<compile_context>
chip_gen: v6e
topology: v6e:2x2x1
jax: 0.10.0
libtpu: 0.0.40
codegen_flags: <defaults>
</compile_context>

<pallas_src>
import numpy as np

import jax
import jax.numpy as jnp
from jax.experimental import pallas as pl
from jax.experimental.pallas import tpu as pltpu


_NUM_LAYERS = 5
_UP = 2 ** _NUM_LAYERS          # 32: total spatial upsampling factor


def _round_up(x, m):
    return ((x + m - 1) // m) * m


# -----------------------------------------------------------------------------
# Pallas kernel: the whole 5-layer decoder for a tile of `tm` input pixels.
#
# Row layout (after layer 2):   row  = (q2)*4tm + (q1)*tm + p        q_l = 2*d_li + d_lj
# Lane layout (after layer 5):  lane = c*64 + d3i*32 + d4i*16 + d5i*8 + d3j*4 + d4j*2 + d5j
# Output block: o_ref[g, p, lane] with g = q2*4 + q1.
# -----------------------------------------------------------------------------
def _decoder_kernel(x_ref,
                    w1_ref, b1_ref, w2_ref, b2_ref, w3_ref, b3_ref,
                    w4_ref, b4_ref, w5_ref, b5_ref,
                    o_ref,
                    a1_ref, a2_ref):
    tm = x_ref.shape[0]
    f32 = jnp.float32

    # ---- Layer 1: lanes = (q1, c1); ReLU; scatter the 4 branch slices to row blocks.
    y1 = jnp.dot(x_ref[...], w1_ref[...], preferred_element_type=f32) + b1_ref[...]
    y1 = jnp.maximum(y1, 0.0)                                   # [tm, 4*256]
    c1 = w2_ref.shape[0]                                        # 256
    for q in range(4):                                          # 256-lane aligned slices
        a1_ref[pl.ds(q * tm, tm), :] = y1[:, q * c1:(q + 1) * c1]

    # ---- Layer 2: lanes = (q2, c2); ReLU; scatter to row blocks.
    y2 = jnp.dot(a1_ref[...], w2_ref[...], preferred_element_type=f32) + b2_ref[...]
    y2 = jnp.maximum(y2, 0.0)                                   # [4tm, 4*128]
    c2 = w3_ref.shape[0]                                        # 128
    for q in range(4):                                          # 128-lane aligned slices
        a2_ref[pl.ds(q * 4 * tm, 4 * tm), :] = y2[:, q * c2:(q + 1) * c2]

    # ---- Layer 3: branches stay in lanes: lanes = (q3, c3).
    a3 = jnp.dot(a2_ref[...], w3_ref[...], preferred_element_type=f32) + b3_ref[...]
    a3 = jnp.maximum(a3, 0.0)                                   # [16tm, 256]

    # ---- Layer 4 (block-diagonal over q3): lanes = (q3, q4, c4).
    a4 = jnp.dot(a3, w4_ref[...], preferred_element_type=f32) + b4_ref[...]
    a4 = jnp.maximum(a4, 0.0)                                   # [16tm, 512]

    # ---- Layer 5 (block-diagonal over (q3, q4)): lanes = (c, d3i, d4i, d5i, d3j, d4j, d5j).
    y5 = jnp.dot(a4, w5_ref[...], preferred_element_type=f32) + b5_ref[...]
    sig = pl.reciprocal(1.0 + jnp.exp(-y5), approx=True)        # sigmoid on the EUP

    # Store one (tm, 192) slab per row group g = q2*4 + q1 (row blocks are contiguous).
    for g in range(16):
        o_ref[g, :, :] = sig[g * tm:(g + 1) * tm, :]


# -----------------------------------------------------------------------------
# Weight re-packing (PyTorch ConvTranspose2d layout -> merged / block-diag matmuls)
# -----------------------------------------------------------------------------
def _pack_cols(w):
    """[Cin, Cout, 2, 2] -> [Cin, 4*Cout], column = (2*di + dj)*Cout + c."""
    cin, cout = w.shape[0], w.shape[1]
    return jnp.transpose(w, (0, 2, 3, 1)).reshape(cin, 4 * cout)


def _pack_block_diag_l4(w):
    """[64, 32, 2, 2] -> [256, 512]: block-diag over q3, block = [64, 4*32]."""
    small = _pack_cols(w)                                   # [64, 128]
    return jnp.kron(jnp.eye(4, dtype=w.dtype), small)       # [256, 512]


def _build_l5_mask(cout):
    """Static [16, 64*cout] 0/1 mask: block (q3,q4) x column (c,d3i,d4i,d5i,d3j,d4j,d5j)."""
    n = 64 * cout
    mask = np.zeros((16, n), np.float32)
    for blk in range(16):
        e3i, e3j = (blk >> 3) & 1, (blk >> 2) & 1
        e4i, e4j = (blk >> 1) & 1, blk & 1
        for c in range(cout):
            for d5i in range(2):
                for d5j in range(2):
                    col = (c * 64 + e3i * 32 + e4i * 16 + d5i * 8
                           + e3j * 4 + e4j * 2 + d5j)
                    mask[blk, col] = 1.0
    return mask


def _pack_block_diag_l5(w):
    """[32, Cout, 2, 2] -> [512, 64*Cout]: block-diag over (q3, q4)."""
    cin, cout = w.shape[0], w.shape[1]
    # Per-column value (depends only on (c, d5i, d5j)):   [cin, 64*cout]
    wcol = jnp.broadcast_to(
        w[:, :, None, None, :, None, None, :],
        (cin, cout, 2, 2, 2, 2, 2, 2)).reshape(cin, 64 * cout)
    mask = jnp.asarray(_build_l5_mask(cout), dtype=w.dtype)     # [16, 64*cout]
    return (mask[:, None, :] * wcol[None, :, :]).reshape(16 * cin, 64 * cout)


# -----------------------------------------------------------------------------
# Forward pass (wrapper: layout plumbing around a single pallas_call)
# -----------------------------------------------------------------------------
def simple_decoder2_forward(params, x_nchw, tile_pixels=64):
    B, cin, H, W = x_nchw.shape
    ch = [params["w1"].shape[0]] + [params[f"w{l}"].shape[1] for l in range(1, 6)]
    assert cin == ch[0]
    cout = ch[5]
    n_last = 64 * cout

    # NCHW -> flattened pixel rows [B*H*W, Cin]
    x = jnp.transpose(x_nchw, (0, 2, 3, 1)).reshape(B * H * W, cin)
    m0 = B * H * W

    # Tile size: multiple of 8; keep >= 2 grid steps when possible (v7x: 2 TensorCores).
    tm = max(8, (min(tile_pixels, _round_up(m0, 8)) // 8) * 8)
    if _round_up(m0, tm) // tm < 2 and m0 >= 16:
        tm = max(8, (m0 // 2 // 8) * 8)
    mp = _round_up(m0, tm)
    if mp != m0:
        x = jnp.pad(x, ((0, mp - m0), (0, 0)))
    ntiles = mp // tm

    # Pack weights: branch positions go to the lane axis (one matmul per layer);
    # layers 4/5 follow a lane-packed layer so their packed weights are block-diagonal.
    w1 = _pack_cols(params["w1"])                       # [512, 1024]
    w2 = _pack_cols(params["w2"])                       # [256, 512]
    w3 = _pack_cols(params["w3"])                       # [128, 256]
    w4 = _pack_block_diag_l4(params["w4"])              # [256, 512]
    w5 = _pack_block_diag_l5(params["w5"])              # [512, 192]
    b1 = jnp.tile(params["b1"], 4).reshape(1, -1)
    b2 = jnp.tile(params["b2"], 4).reshape(1, -1)
    b3 = jnp.tile(params["b3"], 4).reshape(1, -1)
    b4 = jnp.tile(params["b4"], 16).reshape(1, -1)
    b5 = jnp.repeat(params["b5"], 64).reshape(1, -1)

    def cspec(shape):
        return pl.BlockSpec(shape, lambda i: (0,) * len(shape))

    out = pl.pallas_call(
        _decoder_kernel,
        out_shape=jax.ShapeDtypeStruct((16, mp, n_last), jnp.float32),
        grid_spec=pltpu.PrefetchScalarGridSpec(
            num_scalar_prefetch=0,
            grid=(ntiles,),
            in_specs=[
                pl.BlockSpec((tm, ch[0]), lambda i: (i, 0)),        # input pixel tile
                cspec((ch[0], 4 * ch[1])), cspec((1, 4 * ch[1])),   # layer 1
                cspec((ch[1], 4 * ch[2])), cspec((1, 4 * ch[2])),   # layer 2
                cspec((ch[2], 4 * ch[3])), cspec((1, 4 * ch[3])),   # layer 3
                cspec((4 * ch[3], 16 * ch[4])), cspec((1, 16 * ch[4])),  # layer 4 (blkdiag)
                cspec((16 * ch[4], n_last)), cspec((1, n_last)),    # layer 5 (blkdiag)
            ],
            out_specs=pl.BlockSpec((16, tm, n_last), lambda i: (0, i, 0)),
            scratch_shapes=[
                pltpu.VMEM((4 * tm, ch[1]), jnp.float32),           # a1 [4tm, 256]
                pltpu.VMEM((16 * tm, ch[2]), jnp.float32),          # a2 [16tm, 128]
            ],
        ),
        compiler_params=pltpu.CompilerParams(
            dimension_semantics=("parallel",),
            vmem_limit_bytes=32 * 1024 * 1024,
        ),
    )(x, w1, b1, w2, b2, w3, b3, w4, b4, w5, b5)

    # ------------------------------------------------------------------
    # Decode (pure layout plumbing, NO gather):
    #   axis0 = (d2i, d2j, d1i, d1j), axis1 = pixel (b, i, j),
    #   axis2 = (c, d3i d4i d5i, d3j d4j d5j)
    # -> single transpose to NCHW.
    # ------------------------------------------------------------------
    y = out[:, :m0, :].reshape(2, 2, 2, 2, B, H, W, cout, 8, 8)
    y = jnp.transpose(y, (4, 7, 5, 2, 0, 8, 6, 3, 1, 9))
    return y.reshape(B, cout, H * _UP, W * _UP)


# -----------------------------------------------------------------------------
# Plain-jnp reference of the PyTorch module (independent of the kernel's layout)
# -----------------------------------------------------------------------------
def _reference_forward(params, x_nchw):
    x = jnp.transpose(x_nchw, (0, 2, 3, 1))

    def convt(h, w, b):
        B, H, W, _ = h.shape
        cout = w.shape[1]
        y = jnp.einsum("bhwc,cokl->bhwklo", h, w) + b
        return jnp.transpose(y, (0, 1, 3, 2, 4, 5)).reshape(B, 2 * H, 2 * W, cout)

    h = jax.nn.relu(convt(x, params["w1"], params["b1"]))
    h = jax.nn.relu(convt(h, params["w2"], params["b2"]))
    h = jax.nn.relu(convt(h, params["w3"], params["b3"]))
    h = jax.nn.relu(convt(h, params["w4"], params["b4"]))
    h = jax.nn.sigmoid(convt(h, params["w5"], params["b5"]))
    return jnp.transpose(h, (0, 3, 1, 2))


# -----------------------------------------------------------------------------
# Deterministic synthetic parameters (PyTorch ConvTranspose2d weight layout)
# -----------------------------------------------------------------------------
def init_params(key, in_channels=512, out_channels=3):
    channels = (in_channels, 256, 128, 64, 32, out_channels)
    keys = jax.random.split(key, 2 * _NUM_LAYERS)
    p = {}
    for l in range(_NUM_LAYERS):
        cin, cout = channels[l], channels[l + 1]
        std = (2.0 / cin) ** 0.5
        p[f"w{l+1}"] = std * jax.random.normal(keys[2 * l], (cin, cout, 2, 2), jnp.float32)
        p[f"b{l+1}"] = 0.5 * jax.random.normal(keys[2 * l + 1], (cout,), jnp.float32)
    return p


# -----------------------------------------------------------------------------
if __name__ == "__main__":
    key = jax.random.PRNGKey(0)
    pkey, xkey = jax.random.split(key)

    params = init_params(pkey, in_channels=512, out_channels=3)
    # Shapes consistent with the module: B=2, Cin=512, H=W=4 -> (2, 3, 128, 128).
    x = jax.random.normal(xkey, (2, 512, 4, 4), jnp.float32)

    fwd = jax.jit(simple_decoder2_forward)
    out = jax.block_until_ready(fwd(params, x))

    assert out.shape == (2, 3, 128, 128), out.shape
    assert bool(jnp.all(jnp.isfinite(out)))

    # Numerical check vs plain-jnp reference.  Both run the MXU at default precision
    # (bf16 passes for f32 inputs), and the kernel uses the EUP approx reciprocal for
    # the sigmoid, so the tolerance is 3e-2; a layout/permutation bug would give O(0.1+).
    ref = _reference_forward(params, x)
    max_err = float(jnp.max(jnp.abs(out - ref)))
    assert max_err < 3e-2, f"max abs error vs reference: {max_err}"

    print("KERNEL_OK")
</pallas_src>

<mosaic_0001>
module attributes {stable_mosaic.version = 11 : i64} {
  func.func @_decoder_kernel(%arg0: i32, %arg1: memref<16x512xf32, #tpu.memory_space<vmem>>, %arg2: memref<512x1024xf32, #tpu.memory_space<vmem>>, %arg3: memref<1x1024xf32, #tpu.memory_space<vmem>>, %arg4: memref<256x512xf32, #tpu.memory_space<vmem>>, %arg5: memref<1x512xf32, #tpu.memory_space<vmem>>, %arg6: memref<128x256xf32, #tpu.memory_space<vmem>>, %arg7: memref<1x256xf32, #tpu.memory_space<vmem>>, %arg8: memref<256x512xf32, #tpu.memory_space<vmem>>, %arg9: memref<1x512xf32, #tpu.memory_space<vmem>>, %arg10: memref<512x192xf32, #tpu.memory_space<vmem>>, %arg11: memref<1x192xf32, #tpu.memory_space<vmem>>, %arg12: memref<16x16x192xf32, #tpu.memory_space<vmem>>, %arg13: memref<64x256xf32, #tpu.memory_space<vmem>>, %arg14: memref<256x128xf32, #tpu.memory_space<vmem>>) attributes {dimension_semantics = [#tpu.dimension_semantics<parallel>], iteration_bounds = array<i64: 2>, scalar_prefetch = 0 : i64, scratch_operands = 2 : i64, tpu.core_type = #tpu.core_type<tc>, window_params = [{transform_indices = @transform_0, window_bounds = array<i64: 16, 512>}, {pipeline_mode = #tpu.pipeline_mode<synchronous>, transform_indices = @transform_1, window_bounds = array<i64: 512, 1024>}, {pipeline_mode = #tpu.pipeline_mode<synchronous>, transform_indices = @transform_2, window_bounds = array<i64: 1, 1024>}, {pipeline_mode = #tpu.pipeline_mode<synchronous>, transform_indices = @transform_3, window_bounds = array<i64: 256, 512>}, {pipeline_mode = #tpu.pipeline_mode<synchronous>, transform_indices = @transform_4, window_bounds = array<i64: 1, 512>}, {pipeline_mode = #tpu.pipeline_mode<synchronous>, transform_indices = @transform_5, window_bounds = array<i64: 128, 256>}, {pipeline_mode = #tpu.pipeline_mode<synchronous>, transform_indices = @transform_6, window_bounds = array<i64: 1, 256>}, {pipeline_mode = #tpu.pipeline_mode<synchronous>, transform_indices = @transform_7, window_bounds = array<i64: 256, 512>}, {pipeline_mode = #tpu.pipeline_mode<synchronous>, transform_indices = @transform_8, window_bounds = array<i64: 1, 512>}, {pipeline_mode = #tpu.pipeline_mode<synchronous>, transform_indices = @transform_9, window_bounds = array<i64: 512, 192>}, {pipeline_mode = #tpu.pipeline_mode<synchronous>, transform_indices = @transform_10, window_bounds = array<i64: 1, 192>}, {transform_indices = @transform_11, window_bounds = array<i64: 16, 16, 192>}]} {
    %c0 = arith.constant 0 : index
    %c0_0 = arith.constant 0 : index
    %0 = vector.load %arg1[%c0, %c0_0] : memref<16x512xf32, #tpu.memory_space<vmem>>, vector<16x512xf32>
    %c0_1 = arith.constant 0 : index
    %c0_2 = arith.constant 0 : index
    %1 = vector.load %arg2[%c0_1, %c0_2] : memref<512x1024xf32, #tpu.memory_space<vmem>>, vector<512x1024xf32>
    %cst = arith.constant dense<0.000000e+00> : vector<16x1024xf32>
    %2 = tpu.matmul %0, %1, %cst {dimension_numbers = #tpu.dot_dimension_numbers<[1], [0], [0], [1], [0, 0, 1, 1], [], []>} : vector<16x512xf32>, vector<512x1024xf32>, vector<16x1024xf32> -> vector<16x1024xf32>
    %c0_3 = arith.constant 0 : index
    %c0_4 = arith.constant 0 : index
    %3 = vector.load %arg3[%c0_3, %c0_4] : memref<1x1024xf32, #tpu.memory_space<vmem>>, vector<1x1024xf32>
    %4 = vector.broadcast %3 : vector<1x1024xf32> to vector<16x1024xf32>
    %5 = arith.addf %2, %4 : vector<16x1024xf32>
    %cst_5 = arith.constant 0.000000e+00 : f32
    %6 = vector.broadcast %cst_5 : f32 to vector<16x1024xf32>
    %7 = arith.maximumf %5, %6 : vector<16x1024xf32>
    %8 = vector.extract_strided_slice %7 {offsets = [0, 0], sizes = [16, 256], strides = [1, 1]} : vector<16x1024xf32> to vector<16x256xf32>
    %c0_6 = arith.constant 0 : index
    %c0_7 = arith.constant 0 : index
    %9 = vector.load %arg13[%c0_6, %c0_7] : memref<64x256xf32, #tpu.memory_space<vmem>>, vector<16x256xf32>
    tpu.vector_store %arg13[%c0_6, %c0_7], %8 {strides = array<i32>} : memref<64x256xf32, #tpu.memory_space<vmem>>, vector<16x256xf32>,
    %10 = vector.extract_strided_slice %7 {offsets = [0, 256], sizes = [16, 256], strides = [1, 1]} : vector<16x1024xf32> to vector<16x256xf32>
    %c16 = arith.constant 16 : index
    %c0_8 = arith.constant 0 : index
    %11 = vector.load %arg13[%c16, %c0_8] : memref<64x256xf32, #tpu.memory_space<vmem>>, vector<16x256xf32>
    tpu.vector_store %arg13[%c16, %c0_8], %10 {strides = array<i32>} : memref<64x256xf32, #tpu.memory_space<vmem>>, vector<16x256xf32>,
    %12 = vector.extract_strided_slice %7 {offsets = [0, 512], sizes = [16, 256], strides = [1, 1]} : vector<16x1024xf32> to vector<16x256xf32>
    %c32 = arith.constant 32 : index
    %c0_9 = arith.constant 0 : index
    %13 = vector.load %arg13[%c32, %c0_9] : memref<64x256xf32, #tpu.memory_space<vmem>>, vector<16x256xf32>
    tpu.vector_store %arg13[%c32, %c0_9], %12 {strides = array<i32>} : memref<64x256xf32, #tpu.memory_space<vmem>>, vector<16x256xf32>,
    %14 = vector.extract_strided_slice %7 {offsets = [0, 768], sizes = [16, 256], strides = [1, 1]} : vector<16x1024xf32> to vector<16x256xf32>
    %c48 = arith.constant 48 : index
    %c0_10 = arith.constant 0 : index
    %15 = vector.load %arg13[%c48, %c0_10] : memref<64x256xf32, #tpu.memory_space<vmem>>, vector<16x256xf32>
    tpu.vector_store %arg13[%c48, %c0_10], %14 {strides = array<i32>} : memref<64x256xf32, #tpu.memory_space<vmem>>, vector<16x256xf32>,
    %c0_11 = arith.constant 0 : index
    %c0_12 = arith.constant 0 : index
    %16 = vector.load %arg13[%c0_11, %c0_12] : memref<64x256xf32, #tpu.memory_space<vmem>>, vector<64x256xf32>
    %c0_13 = arith.constant 0 : index
    %c0_14 = arith.constant 0 : index
    %17 = vector.load %arg4[%c0_13, %c0_14] : memref<256x512xf32, #tpu.memory_space<vmem>>, vector<256x512xf32>
    %cst_15 = arith.constant dense<0.000000e+00> : vector<64x512xf32>
    %18 = tpu.matmul %16, %17, %cst_15 {dimension_numbers = #tpu.dot_dimension_numbers<[1], [0], [0], [1], [0, 0, 1, 1], [], []>} : vector<64x256xf32>, vector<256x512xf32>, vector<64x512xf32> -> vector<64x512xf32>
    %c0_16 = arith.constant 0 : index
    %c0_17 = arith.constant 0 : index
    %19 = vector.load %arg5[%c0_16, %c0_17] : memref<1x512xf32, #tpu.memory_space<vmem>>, vector<1x512xf32>
    %20 = vector.broadcast %19 : vector<1x512xf32> to vector<64x512xf32>
    %21 = arith.addf %18, %20 : vector<64x512xf32>
    %cst_18 = arith.constant 0.000000e+00 : f32
    %22 = vector.broadcast %cst_18 : f32 to vector<64x512xf32>
    %23 = arith.maximumf %21, %22 : vector<64x512xf32>
    %24 = vector.extract_strided_slice %23 {offsets = [0, 0], sizes = [64, 128], strides = [1, 1]} : vector<64x512xf32> to vector<64x128xf32>
    %c0_19 = arith.constant 0 : index
    %c0_20 = arith.constant 0 : index
    %25 = vector.load %arg14[%c0_19, %c0_20] : memref<256x128xf32, #tpu.memory_space<vmem>>, vector<64x128xf32>
    tpu.vector_store %arg14[%c0_19, %c0_20], %24 {strides = array<i32>} : memref<256x128xf32, #tpu.memory_space<vmem>>, vector<64x128xf32>,
    %26 = vector.extract_strided_slice %23 {offsets = [0, 128], sizes = [64, 128], strides = [1, 1]} : vector<64x512xf32> to vector<64x128xf32>
    %c64 = arith.constant 64 : index
    %c0_21 = arith.constant 0 : index
    %27 = vector.load %arg14[%c64, %c0_21] : memref<256x128xf32, #tpu.memory_space<vmem>>, vector<64x128xf32>
    tpu.vector_store %arg14[%c64, %c0_21], %26 {strides = array<i32>} : memref<256x128xf32, #tpu.memory_space<vmem>>, vector<64x128xf32>,
    %28 = vector.extract_strided_slice %23 {offsets = [0, 256], sizes = [64, 128], strides = [1, 1]} : vector<64x512xf32> to vector<64x128xf32>
    %c128 = arith.constant 128 : index
    %c0_22 = arith.constant 0 : index
    %29 = vector.load %arg14[%c128, %c0_22] : memref<256x128xf32, #tpu.memory_space<vmem>>, vector<64x128xf32>
    tpu.vector_store %arg14[%c128, %c0_22], %28 {strides = array<i32>} : memref<256x128xf32, #tpu.memory_space<vmem>>, vector<64x128xf32>,
    %30 = vector.extract_strided_slice %23 {offsets = [0, 384], sizes = [64, 128], strides = [1, 1]} : vector<64x512xf32> to vector<64x128xf32>
    %c192 = arith.constant 192 : index
    %c0_23 = arith.constant 0 : index
    %31 = vector.load %arg14[%c192, %c0_23] : memref<256x128xf32, #tpu.memory_space<vmem>>, vector<64x128xf32>
    tpu.vector_store %arg14[%c192, %c0_23], %30 {strides = array<i32>} : memref<256x128xf32, #tpu.memory_space<vmem>>, vector<64x128xf32>,
    %c0_24 = arith.constant 0 : index
    %c0_25 = arith.constant 0 : index
    %32 = vector.load %arg14[%c0_24, %c0_25] : memref<256x128xf32, #tpu.memory_space<vmem>>, vector<256x128xf32>
    %c0_26 = arith.constant 0 : index
    %c0_27 = arith.constant 0 : index
    %33 = vector.load %arg6[%c0_26, %c0_27] : memref<128x256xf32, #tpu.memory_space<vmem>>, vector<128x256xf32>
    %cst_28 = arith.constant dense<0.000000e+00> : vector<256x256xf32>
    %34 = tpu.matmul %32, %33, %cst_28 {dimension_numbers = #tpu.dot_dimension_numbers<[1], [0], [0], [1], [0, 0, 1, 1], [], []>} : vector<256x128xf32>, vector<128x256xf32>, vector<256x256xf32> -> vector<256x256xf32>
    %c0_29 = arith.constant 0 : index
    %c0_30 = arith.constant 0 : index
    %35 = vector.load %arg7[%c0_29, %c0_30] : memref<1x256xf32, #tpu.memory_space<vmem>>, vector<1x256xf32>
    %36 = vector.broadcast %35 : vector<1x256xf32> to vector<256x256xf32>
    %37 = arith.addf %34, %36 : vector<256x256xf32>
    %cst_31 = arith.constant 0.000000e+00 : f32
    %38 = vector.broadcast %cst_31 : f32 to vector<256x256xf32>
    %39 = arith.maximumf %37, %38 : vector<256x256xf32>
    %c0_32 = arith.constant 0 : index
    %c0_33 = arith.constant 0 : index
    %40 = vector.load %arg8[%c0_32, %c0_33] : memref<256x512xf32, #tpu.memory_space<vmem>>, vector<256x512xf32>
    %cst_34 = arith.constant dense<0.000000e+00> : vector<256x512xf32>
    %41 = tpu.matmul %39, %40, %cst_34 {dimension_numbers = #tpu.dot_dimension_numbers<[1], [0], [0], [1], [0, 0, 1, 1], [], []>} : vector<256x256xf32>, vector<256x512xf32>, vector<256x512xf32> -> vector<256x512xf32>
    %c0_35 = arith.constant 0 : index
    %c0_36 = arith.constant 0 : index
    %42 = vector.load %arg9[%c0_35, %c0_36] : memref<1x512xf32, #tpu.memory_space<vmem>>, vector<1x512xf32>
    %43 = vector.broadcast %42 : vector<1x512xf32> to vector<256x512xf32>
    %44 = arith.addf %41, %43 : vector<256x512xf32>
    %cst_37 = arith.constant 0.000000e+00 : f32
    %45 = vector.broadcast %cst_37 : f32 to vector<256x512xf32>
    %46 = arith.maximumf %44, %45 : vector<256x512xf32>
    %c0_38 = arith.constant 0 : index
    %c0_39 = arith.constant 0 : index
    %47 = vector.load %arg10[%c0_38, %c0_39] : memref<512x192xf32, #tpu.memory_space<vmem>>, vector<512x192xf32>
    %cst_40 = arith.constant dense<0.000000e+00> : vector<256x192xf32>
    %48 = tpu.matmul %46, %47, %cst_40 {dimension_numbers = #tpu.dot_dimension_numbers<[1], [0], [0], [1], [0, 0, 1, 1], [], []>} : vector<256x512xf32>, vector<512x192xf32>, vector<256x192xf32> -> vector<256x192xf32>
    %c0_41 = arith.constant 0 : index
    %c0_42 = arith.constant 0 : index
    %49 = vector.load %arg11[%c0_41, %c0_42] : memref<1x192xf32, #tpu.memory_space<vmem>>, vector<1x192xf32>
    %50 = vector.broadcast %49 : vector<1x192xf32> to vector<256x192xf32>
    %51 = arith.addf %48, %50 : vector<256x192xf32>
    %cst_43 = arith.constant 0.000000e+00 : f32
    %52 = vector.broadcast %cst_43 : f32 to vector<256x192xf32>
    %53 = arith.subf %52, %51 : vector<256x192xf32>
    %54 = math.exp %53 : vector<256x192xf32>
    %cst_44 = arith.constant 1.000000e+00 : f32
    %55 = vector.broadcast %cst_44 : f32 to vector<256x192xf32>
    %56 = arith.addf %55, %54 : vector<256x192xf32>
    %57 = tpu.reciprocal %56 {approx = true} : vector<256x192xf32> -> vector<256x192xf32>
    %58 = vector.extract_strided_slice %57 {offsets = [0, 0], sizes = [16, 192], strides = [1, 1]} : vector<256x192xf32> to vector<16x192xf32>
    %c0_45 = arith.constant 0 : index
    %c0_46 = arith.constant 0 : index
    %c0_47 = arith.constant 0 : index
    %59 = vector.load %arg12[%c0_45, %c0_46, %c0_47] : memref<16x16x192xf32, #tpu.memory_space<vmem>>, vector<1x16x192xf32>
    %60 = vector.shape_cast %59 : vector<1x16x192xf32> to vector<16x192xf32>
    %61 = vector.shape_cast %58 : vector<16x192xf32> to vector<1x16x192xf32>
    tpu.vector_store %arg12[%c0_45, %c0_46, %c0_47], %61 {strides = array<i32>} : memref<16x16x192xf32, #tpu.memory_space<vmem>>, vector<1x16x192xf32>,
    %62 = vector.extract_strided_slice %57 {offsets = [16, 0], sizes = [16, 192], strides = [1, 1]} : vector<256x192xf32> to vector<16x192xf32>
    %c1 = arith.constant 1 : index
    %c0_48 = arith.constant 0 : index
    %c0_49 = arith.constant 0 : index
    %63 = vector.load %arg12[%c1, %c0_48, %c0_49] : memref<16x16x192xf32, #tpu.memory_space<vmem>>, vector<1x16x192xf32>
    %64 = vector.shape_cast %63 : vector<1x16x192xf32> to vector<16x192xf32>
    %65 = vector.shape_cast %62 : vector<16x192xf32> to vector<1x16x192xf32>
    tpu.vector_store %arg12[%c1, %c0_48, %c0_49], %65 {strides = array<i32>} : memref<16x16x192xf32, #tpu.memory_space<vmem>>, vector<1x16x192xf32>,
    %66 = vector.extract_strided_slice %57 {offsets = [32, 0], sizes = [16, 192], strides = [1, 1]} : vector<256x192xf32> to vector<16x192xf32>
    %c2 = arith.constant 2 : index
    %c0_50 = arith.constant 0 : index
    %c0_51 = arith.constant 0 : index
    %67 = vector.load %arg12[%c2, %c0_50, %c0_51] : memref<16x16x192xf32, #tpu.memory_space<vmem>>, vector<1x16x192xf32>
    %68 = vector.shape_cast %67 : vector<1x16x192xf32> to vector<16x192xf32>
    %69 = vector.shape_cast %66 : vector<16x192xf32> to vector<1x16x192xf32>
    tpu.vector_store %arg12[%c2, %c0_50, %c0_51], %69 {strides = array<i32>} : memref<16x16x192xf32, #tpu.memory_space<vmem>>, vector<1x16x192xf32>,
    %70 = vector.extract_strided_slice %57 {offsets = [48, 0], sizes = [16, 192], strides = [1, 1]} : vector<256x192xf32> to vector<16x192xf32>
    %c3 = arith.constant 3 : index
    %c0_52 = arith.constant 0 : index
    %c0_53 = arith.constant 0 : index
    %71 = vector.load %arg12[%c3, %c0_52, %c0_53] : memref<16x16x192xf32, #tpu.memory_space<vmem>>, vector<1x16x192xf32>
    %72 = vector.shape_cast %71 : vector<1x16x192xf32> to vector<16x192xf32>
    %73 = vector.shape_cast %70 : vector<16x192xf32> to vector<1x16x192xf32>
    tpu.vector_store %arg12[%c3, %c0_52, %c0_53], %73 {strides = array<i32>} : memref<16x16x192xf32, #tpu.memory_space<vmem>>, vector<1x16x192xf32>,
    %74 = vector.extract_strided_slice %57 {offsets = [64, 0], sizes = [16, 192], strides = [1, 1]} : vector<256x192xf32> to vector<16x192xf32>
    %c4 = arith.constant 4 : index
    %c0_54 = arith.constant 0 : index
    %c0_55 = arith.constant 0 : index
    %75 = vector.load %arg12[%c4, %c0_54, %c0_55] : memref<16x16x192xf32, #tpu.memory_space<vmem>>, vector<1x16x192xf32>
    %76 = vector.shape_cast %75 : vector<1x16x192xf32> to vector<16x192xf32>
    %77 = vector.shape_cast %74 : vector<16x192xf32> to vector<1x16x192xf32>
    tpu.vector_store %arg12[%c4, %c0_54, %c0_55], %77 {strides = array<i32>} : memref<16x16x192xf32, #tpu.memory_space<vmem>>, vector<1x16x192xf32>,
    %78 = vector.extract_strided_slice %57 {offsets = [80, 0], sizes = [16, 192], strides = [1, 1]} : vector<256x192xf32> to vector<16x192xf32>
    %c5 = arith.constant 5 : index
    %c0_56 = arith.constant 0 : index
    %c0_57 = arith.constant 0 : index
    %79 = vector.load %arg12[%c5, %c0_56, %c0_57] : memref<16x16x192xf32, #tpu.memory_space<vmem>>, vector<1x16x192xf32>
    %80 = vector.shape_cast %79 : vector<1x16x192xf32> to vector<16x192xf32>
    %81 = vector.shape_cast %78 : vector<16x192xf32> to vector<1x16x192xf32>
    tpu.vector_store %arg12[%c5, %c0_56, %c0_57], %81 {strides = array<i32>} : memref<16x16x192xf32, #tpu.memory_space<vmem>>, vector<1x16x192xf32>,
    %82 = vector.extract_strided_slice %57 {offsets = [96, 0], sizes = [16, 192], strides = [1, 1]} : vector<256x192xf32> to vector<16x192xf32>
    %c6 = arith.constant 6 : index
    %c0_58 = arith.constant 0 : index
    %c0_59 = arith.constant 0 : index
    %83 = vector.load %arg12[%c6, %c0_58, %c0_59] : memref<16x16x192xf32, #tpu.memory_space<vmem>>, vector<1x16x192xf32>
    %84 = vector.shape_cast %83 : vector<1x16x192xf32> to vector<16x192xf32>
    %85 = vector.shape_cast %82 : vector<16x192xf32> to vector<1x16x192xf32>
    tpu.vector_store %arg12[%c6, %c0_58, %c0_59], %85 {strides = array<i32>} : memref<16x16x192xf32, #tpu.memory_space<vmem>>, vector<1x16x192xf32>,
    %86 = vector.extract_strided_slice %57 {offsets = [112, 0], sizes = [16, 192], strides = [1, 1]} : vector<256x192xf32> to vector<16x192xf32>
    %c7 = arith.constant 7 : index
    %c0_60 = arith.constant 0 : index
    %c0_61 = arith.constant 0 : index
    %87 = vector.load %arg12[%c7, %c0_60, %c0_61] : memref<16x16x192xf32, #tpu.memory_space<vmem>>, vector<1x16x192xf32>
    %88 = vector.shape_cast %87 : vector<1x16x192xf32> to vector<16x192xf32>
    %89 = vector.shape_cast %86 : vector<16x192xf32> to vector<1x16x192xf32>
    tpu.vector_store %arg12[%c7, %c0_60, %c0_61], %89 {strides = array<i32>} : memref<16x16x192xf32, #tpu.memory_space<vmem>>, vector<1x16x192xf32>,
    %90 = vector.extract_strided_slice %57 {offsets = [128, 0], sizes = [16, 192], strides = [1, 1]} : vector<256x192xf32> to vector<16x192xf32>
    %c8 = arith.constant 8 : index
    %c0_62 = arith.constant 0 : index
    %c0_63 = arith.constant 0 : index
    %91 = vector.load %arg12[%c8, %c0_62, %c0_63] : memref<16x16x192xf32, #tpu.memory_space<vmem>>, vector<1x16x192xf32>
    %92 = vector.shape_cast %91 : vector<1x16x192xf32> to vector<16x192xf32>
    %93 = vector.shape_cast %90 : vector<16x192xf32> to vector<1x16x192xf32>
    tpu.vector_store %arg12[%c8, %c0_62, %c0_63], %93 {strides = array<i32>} : memref<16x16x192xf32, #tpu.memory_space<vmem>>, vector<1x16x192xf32>,
    %94 = vector.extract_strided_slice %57 {offsets = [144, 0], sizes = [16, 192], strides = [1, 1]} : vector<256x192xf32> to vector<16x192xf32>
    %c9 = arith.constant 9 : index
    %c0_64 = arith.constant 0 : index
    %c0_65 = arith.constant 0 : index
    %95 = vector.load %arg12[%c9, %c0_64, %c0_65] : memref<16x16x192xf32, #tpu.memory_space<vmem>>, vector<1x16x192xf32>
    %96 = vector.shape_cast %95 : vector<1x16x192xf32> to vector<16x192xf32>
    %97 = vector.shape_cast %94 : vector<16x192xf32> to vector<1x16x192xf32>
    tpu.vector_store %arg12[%c9, %c0_64, %c0_65], %97 {strides = array<i32>} : memref<16x16x192xf32, #tpu.memory_space<vmem>>, vector<1x16x192xf32>,
    %98 = vector.extract_strided_slice %57 {offsets = [160, 0], sizes = [16, 192], strides = [1, 1]} : vector<256x192xf32> to vector<16x192xf32>
    %c10 = arith.constant 10 : index
    %c0_66 = arith.constant 0 : index
    %c0_67 = arith.constant 0 : index
    %99 = vector.load %arg12[%c10, %c0_66, %c0_67] : memref<16x16x192xf32, #tpu.memory_space<vmem>>, vector<1x16x192xf32>
    %100 = vector.shape_cast %99 : vector<1x16x192xf32> to vector<16x192xf32>
    %101 = vector.shape_cast %98 : vector<16x192xf32> to vector<1x16x192xf32>
    tpu.vector_store %arg12[%c10, %c0_66, %c0_67], %101 {strides = array<i32>} : memref<16x16x192xf32, #tpu.memory_space<vmem>>, vector<1x16x192xf32>,
    %102 = vector.extract_strided_slice %57 {offsets = [176, 0], sizes = [16, 192], strides = [1, 1]} : vector<256x192xf32> to vector<16x192xf32>
    %c11 = arith.constant 11 : index
    %c0_68 = arith.constant 0 : index
    %c0_69 = arith.constant 0 : index
    %103 = vector.load %arg12[%c11, %c0_68, %c0_69] : memref<16x16x192xf32, #tpu.memory_space<vmem>>, vector<1x16x192xf32>
    %104 = vector.shape_cast %103 : vector<1x16x192xf32> to vector<16x192xf32>
    %105 = vector.shape_cast %102 : vector<16x192xf32> to vector<1x16x192xf32>
    tpu.vector_store %arg12[%c11, %c0_68, %c0_69], %105 {strides = array<i32>} : memref<16x16x192xf32, #tpu.memory_space<vmem>>, vector<1x16x192xf32>,
    %106 = vector.extract_strided_slice %57 {offsets = [192, 0], sizes = [16, 192], strides = [1, 1]} : vector<256x192xf32> to vector<16x192xf32>
    %c12 = arith.constant 12 : index
    %c0_70 = arith.constant 0 : index
    %c0_71 = arith.constant 0 : index
    %107 = vector.load %arg12[%c12, %c0_70, %c0_71] : memref<16x16x192xf32, #tpu.memory_space<vmem>>, vector<1x16x192xf32>
    %108 = vector.shape_cast %107 : vector<1x16x192xf32> to vector<16x192xf32>
    %109 = vector.shape_cast %106 : vector<16x192xf32> to vector<1x16x192xf32>
    tpu.vector_store %arg12[%c12, %c0_70, %c0_71], %109 {strides = array<i32>} : memref<16x16x192xf32, #tpu.memory_space<vmem>>, vector<1x16x192xf32>,
    %110 = vector.extract_strided_slice %57 {offsets = [208, 0], sizes = [16, 192], strides = [1, 1]} : vector<256x192xf32> to vector<16x192xf32>
    %c13 = arith.constant 13 : index
    %c0_72 = arith.constant 0 : index
    %c0_73 = arith.constant 0 : index
    %111 = vector.load %arg12[%c13, %c0_72, %c0_73] : memref<16x16x192xf32, #tpu.memory_space<vmem>>, vector<1x16x192xf32>
    %112 = vector.shape_cast %111 : vector<1x16x192xf32> to vector<16x192xf32>
    %113 = vector.shape_cast %110 : vector<16x192xf32> to vector<1x16x192xf32>
    tpu.vector_store %arg12[%c13, %c0_72, %c0_73], %113 {strides = array<i32>} : memref<16x16x192xf32, #tpu.memory_space<vmem>>, vector<1x16x192xf32>,
    %114 = vector.extract_strided_slice %57 {offsets = [224, 0], sizes = [16, 192], strides = [1, 1]} : vector<256x192xf32> to vector<16x192xf32>
    %c14 = arith.constant 14 : index
    %c0_74 = arith.constant 0 : index
    %c0_75 = arith.constant 0 : index
    %115 = vector.load %arg12[%c14, %c0_74, %c0_75] : memref<16x16x192xf32, #tpu.memory_space<vmem>>, vector<1x16x192xf32>
    %116 = vector.shape_cast %115 : vector<1x16x192xf32> to vector<16x192xf32>
    %117 = vector.shape_cast %114 : vector<16x192xf32> to vector<1x16x192xf32>
    tpu.vector_store %arg12[%c14, %c0_74, %c0_75], %117 {strides = array<i32>} : memref<16x16x192xf32, #tpu.memory_space<vmem>>, vector<1x16x192xf32>,
    %118 = vector.extract_strided_slice %57 {offsets = [240, 0], sizes = [16, 192], strides = [1, 1]} : vector<256x192xf32> to vector<16x192xf32>
    %c15 = arith.constant 15 : index
    %c0_76 = arith.constant 0 : index
    %c0_77 = arith.constant 0 : index
    %119 = vector.load %arg12[%c15, %c0_76, %c0_77] : memref<16x16x192xf32, #tpu.memory_space<vmem>>, vector<1x16x192xf32>
    %120 = vector.shape_cast %119 : vector<1x16x192xf32> to vector<16x192xf32>
    %121 = vector.shape_cast %118 : vector<16x192xf32> to vector<1x16x192xf32>
    tpu.vector_store %arg12[%c15, %c0_76, %c0_77], %121 {strides = array<i32>} : memref<16x16x192xf32, #tpu.memory_space<vmem>>, vector<1x16x192xf32>,
    return
  }
  func.func @transform_0(%arg0: i32) -> (i32, i32) {
    %c0_i32 = arith.constant 0 : i32
    %c0_i32_0 = arith.constant 0 : i32
    return %arg0, %c0_i32 : i32, i32
  }
  func.func @transform_1(%arg0: i32) -> (i32, i32) {
    %c0_i32 = arith.constant 0 : i32
    %c0_i32_0 = arith.constant 0 : i32
    %c0_i32_1 = arith.constant 0 : i32
    return %c0_i32, %c0_i32_0 : i32, i32
  }
  func.func @transform_2(%arg0: i32) -> (i32, i32) {
    %c0_i32 = arith.constant 0 : i32
    %c0_i32_0 = arith.constant 0 : i32
    %c0_i32_1 = arith.constant 0 : i32
    return %c0_i32, %c0_i32_0 : i32, i32
  }
  func.func @transform_3(%arg0: i32) -> (i32, i32) {
    %c0_i32 = arith.constant 0 : i32
    %c0_i32_0 = arith.constant 0 : i32
    %c0_i32_1 = arith.constant 0 : i32
    return %c0_i32, %c0_i32_0 : i32, i32
  }
  func.func @transform_4(%arg0: i32) -> (i32, i32) {
    %c0_i32 = arith.constant 0 : i32
    %c0_i32_0 = arith.constant 0 : i32
    %c0_i32_1 = arith.constant 0 : i32
    return %c0_i32, %c0_i32_0 : i32, i32
  }
  func.func @transform_5(%arg0: i32) -> (i32, i32) {
    %c0_i32 = arith.constant 0 : i32
    %c0_i32_0 = arith.constant 0 : i32
    %c0_i32_1 = arith.constant 0 : i32
    return %c0_i32, %c0_i32_0 : i32, i32
  }
  func.func @transform_6(%arg0: i32) -> (i32, i32) {
    %c0_i32 = arith.constant 0 : i32
    %c0_i32_0 = arith.constant 0 : i32
    %c0_i32_1 = arith.constant 0 : i32
    return %c0_i32, %c0_i32_0 : i32, i32
  }
  func.func @transform_7(%arg0: i32) -> (i32, i32) {
    %c0_i32 = arith.constant 0 : i32
    %c0_i32_0 = arith.constant 0 : i32
    %c0_i32_1 = arith.constant 0 : i32
    return %c0_i32, %c0_i32_0 : i32, i32
  }
  func.func @transform_8(%arg0: i32) -> (i32, i32) {
    %c0_i32 = arith.constant 0 : i32
    %c0_i32_0 = arith.constant 0 : i32
    %c0_i32_1 = arith.constant 0 : i32
    return %c0_i32, %c0_i32_0 : i32, i32
  }
  func.func @transform_9(%arg0: i32) -> (i32, i32) {
    %c0_i32 = arith.constant 0 : i32
    %c0_i32_0 = arith.constant 0 : i32
    %c0_i32_1 = arith.constant 0 : i32
    return %c0_i32, %c0_i32_0 : i32, i32
  }
  func.func @transform_10(%arg0: i32) -> (i32, i32) {
    %c0_i32 = arith.constant 0 : i32
    %c0_i32_0 = arith.constant 0 : i32
    %c0_i32_1 = arith.constant 0 : i32
    return %c0_i32, %c0_i32_0 : i32, i32
  }
  func.func @transform_11(%arg0: i32) -> (i32, i32, i32) {
    %c0_i32 = arith.constant 0 : i32
    %c0_i32_0 = arith.constant 0 : i32
    %c0_i32_1 = arith.constant 0 : i32
    return %c0_i32, %arg0, %c0_i32_0 : i32, i32, i32
  }
}

</mosaic_0001>

<bundles_post_ra>
// kernel: tile.34
= control target key start
LH: loop header
LB: loop body
LE: loop exit
PB: predicated region body
PF: predicated region fallthrough
CT: control target
= control target key end

     0   :  { %s7_s8 = smov 3  ;;  %vm9_vm0 = vcmask 523264   ;;  %s34_s9 = smov 64   ;;  %vm16_vm1 = vcmask 1048064   ;;  %s54_s0 = inlined_call_operand.vmem [shape: f32[4,64], index: 0, kind: input, shape index: {}]   ;;  %s55_s1 = inlined_call_operand.vmem [shape: f32[1,256], index: 1, kind: output, shape index: {}]  }
   0x1   :  { %v5_v0 = vld [vmem:[%s54_s0] sm:$0xf]  ;;  %s12_s0 = smov 3 }
   0x2   :  { %6 = vst [vmem:[#allocation1] sm:$0xf] %v5_v0 }
   0x9   :  { %v13_v1 = vld [vmem:[#allocation1 + $0x1] ss:$2 sm:%s12_s0]   ;;  %v8_v2 = vld [vmem:[#allocation1] ss:$2 sm:%s7_s8]  }
   0xa   :  { %14 = vrot.lane.b32.xlu0 %v13_v1, %s34_s9  ;;  %10 = vst.msk [vmem:[#allocation0] ss:$8 sm:$0x3] %vm9_vm0, %v8_v2  }
  0x7c   :  { %v15_v3 = vpop.permute.xlu0 %14  }
  0x7d   :  { %17 = vst.msk [vmem:[#allocation0] ss:$8 sm:$0x3] %vm16_vm1, %v15_v3  }
  0x84   :  { %v22_v4 = vld [vmem:[#allocation0] sm:$0x1]  ;;  %v27_v5 = vld [vmem:[#allocation0 + $0x8] sm:$0x1] }
  0x85   :  { %25 = vst [vmem:[%s55_s1] sm:$0x1] %v22_v4  ;;  %32 = vst [vmem:[%s55_s1 + $0x1] sm:$0x1] %v27_v5 }

// kernel: tile.28
= control target key start
LH: loop header
LB: loop body
LE: loop exit
PB: predicated region body
PF: predicated region fallthrough
CT: control target
= control target key end

     0   :  { %2 = vsyncpa [#allocation1], 0  ;;  %s42_s6 = smov [#allocation0]   ;;  %s59_s0 = inlined_call_operand.hbm [shape: f32[128], index: 0, kind: input, shape index: {}]   ;;  %s60_s1 = inlined_call_operand.vmem [shape: f32[4,128], index: 1, kind: output, shape index: {}]  }
   0x1   :  { %s9_s7 = sshll.u32 %s42_s6, 4  ;;  %s10_s7 = int_to_ptr.vmem [resolvable:$true] %s9_s7 }
   0x2   :  { %s28_s8 = scalar_lea.vmem %s10_s7, 16  ;;  %s32_s9 = scalar_lea.vmem %s10_s7, 32 }
   0x3   :  { %p29_p0 = scmp.ne.s32.totalorder %s10_s7, %s28_s8  ;;  %p33_p1 = scmp.lt.s32.totalorder %s10_s7, %s10_s7 }
   0x4   :  { %p34_p2 = scmp.lt.s32.totalorder %s32_s9, %s28_s8 }
   0x6   :  { %p35_p3 = por %p34_p2, %p33_p1 }
   0x8   :  { %p36_p4 = pnand %p35_p3, %p29_p0 }
   0xa   :  { %39 = shalt.err (!%p36_p4)
}
   0xb   :  { %12 = dma.hbm_to_vmem [thread:$0]  %s59_s0, 16, %s10_s7, [#allocation1]  }
   0xc   :  { %40 = dma.done.wait [#allocation1], 16  }
   0xd   :  { %41 = vsyncadd [#allocation1], 4294967280  ;;  %v16_v0 = vld [vmem:[#allocation0] ss:$0 sm:$0xff] }
   0xe   :  { %17 = vst [vmem:[%s60_s1] sm:$0xf] %v16_v0 }
   0xf   :  { %18 = vsyncpa [#allocation1], 1 }

// kernel: tile.33
= control target key start
LH: loop header
LB: loop body
LE: loop exit
PB: predicated region body
PF: predicated region fallthrough
CT: control target
= control target key end

     0   :  { %2 = vsyncpa [#allocation1], 0  ;;  %s42_s6 = smov [#allocation0]   ;;  %s59_s0 = inlined_call_operand.hbm [shape: f32[64], index: 0, kind: input, shape index: {}]   ;;  %s60_s1 = inlined_call_operand.vmem [shape: f32[4,64], index: 1, kind: output, shape index: {}]  }
   0x1   :  { %s9_s7 = sshll.u32 %s42_s6, 4  ;;  %s10_s7 = int_to_ptr.vmem [resolvable:$true] %s9_s7 }
   0x2   :  { %s28_s8 = scalar_lea.vmem %s10_s7, 16  ;;  %s32_s9 = scalar_lea.vmem %s10_s7, 32 }
   0x3   :  { %p29_p0 = scmp.ne.s32.totalorder %s10_s7, %s28_s8  ;;  %p33_p1 = scmp.lt.s32.totalorder %s10_s7, %s10_s7 }
   0x4   :  { %p34_p2 = scmp.lt.s32.totalorder %s32_s9, %s28_s8 }
   0x6   :  { %p35_p3 = por %p34_p2, %p33_p1 }
   0x8   :  { %p36_p4 = pnand %p35_p3, %p29_p0 }
   0xa   :  { %39 = shalt.err (!%p36_p4)
}
   0xb   :  { %12 = dma.hbm_to_vmem [thread:$0]  %s59_s0, 16, %s10_s7, [#allocation1]  }
   0xc   :  { %40 = dma.done.wait [#allocation1], 16  }
   0xd   :  { %41 = vsyncadd [#allocation1], 4294967280  ;;  %v16_v0 = vld [vmem:[#allocation0] ss:$0 sm:$0xff] }
   0xe   :  { %17 = vst [vmem:[%s60_s1] sm:$0xf] %v16_v0 }
   0xf   :  { %18 = vsyncpa [#allocation1], 1 }

// kernel: tile.38
= control target key start
LH: loop header
LB: loop body
LE: loop exit
PB: predicated region body
PF: predicated region fallthrough
CT: control target
= control target key end

     0   :  { %2 = vsyncpa [#allocation1], 0  ;;  %s45_s6 = smov [#allocation0]   ;;  %s65_s0 = inlined_call_operand.hbm [shape: f32[32], index: 0, kind: input, shape index: {}]   ;;  %s66_s1 = inlined_call_operand.vmem [shape: f32[16,32], index: 1, kind: output, shape index: {}]  }
   0x1   :  { %s9_s7 = sshll.u32 %s45_s6, 4  ;;  %s10_s7 = int_to_ptr.vmem [resolvable:$true] %s9_s7 }
   0x2   :  { %s31_s8 = scalar_lea.vmem %s10_s7, 16  ;;  %s35_s9 = scalar_lea.vmem %s10_s7, 32 }
   0x3   :  { %p32_p0 = scmp.ne.s32.totalorder %s10_s7, %s31_s8  ;;  %p36_p1 = scmp.lt.s32.totalorder %s10_s7, %s10_s7 }
   0x4   :  { %p37_p2 = scmp.lt.s32.totalorder %s35_s9, %s31_s8 }
   0x6   :  { %p38_p3 = por %p37_p2, %p36_p1 }
   0x8   :  { %p39_p4 = pnand %p38_p3, %p32_p0 }
   0xa   :  { %42 = shalt.err (!%p39_p4)
}
   0xb   :  { %12 = dma.hbm_to_vmem [thread:$0]  %s65_s0, 16, %s10_s7, [#allocation1]  }
   0xc   :  { %43 = dma.done.wait [#allocation1], 16  }
   0xd   :  { %44 = vsyncadd [#allocation1], 4294967280  ;;  %v16_v0 = vld [vmem:[#allocation0] ss:$0 sm:$0xff] }
   0xe   :  { %17 = vst [vmem:[%s66_s1] sm:$0xff] %v16_v0  ;;  %21 = vst [vmem:[%s66_s1 + $0x8] sm:$0xff] %v16_v0 }
   0xf   :  { %20 = vsyncpa [#allocation1], 1 }

// kernel: tile.39
= control target key start
LH: loop header
LB: loop body
LE: loop exit
PB: predicated region body
PF: predicated region fallthrough
CT: control target
= control target key end

     0   :  { %s62_s8 = smov 96   ;;  %vm3_vm0 = vcmask 261120   ;;  %s64_s15 = smov 64   ;;  %vm9_vm1 = vcmask 1048320   ;;  %vm15_vm2 = vcmask 785920   ;;  %vm21_vm3 = vcmask 523520   ;;  %s99_s0 = inlined_call_operand.vmem [shape: f32[16,32], index: 0, kind: input, shape index: {}]   ;;  %s100_s1 = inlined_call_operand.vmem [shape: f32[1,512], index: 1, kind: output, shape index: {}]  }
   0x1   :  { %v53_v0 = vld [vmem:[%s99_s0 + $0x3] ss:$4 sm:$0xf]   ;;  %v54_v1 = vld [vmem:[%s99_s0 + $0x2] ss:$4 sm:$0xf]  }
   0x2   :  { %7 = vrot.lane.b32.xlu0 %v53_v0, %s62_s8  ;;  %v55_v2 = vld [vmem:[%s99_s0 + $0x1] ss:$4 sm:$0xf]   ;;  %v2_v3 = vld [vmem:[%s99_s0] ss:$4 sm:$0xf]  }
   0x3   :  { %s63_s0 = smov 32   ;;  %4 = vst.msk [vmem:[#allocation0] ss:$8 sm:$0xf] %vm3_vm0, %v2_v3  }
   0x4   :  { %19 = vrot.lane.b32.xlu1 %v55_v2, %s63_s0 }
   0x6   :  { %13 = vrot.lane.b32.xlu0 %v54_v1, %s64_s15 }
  0x74   :  { %v8_v4 = vpop.permute.xlu0 %7  }
  0x75   :  { %10 = vst.msk [vmem:[#allocation0] ss:$8 sm:$0xf] %vm9_vm1, %v8_v4  }
  0x76   :  { %v20_v5 = vpop.permute.xlu1 %19  }
  0x78   :  { %v14_v6 = vpop.permute.xlu0 %13  }
  0x79   :  { %16 = vst.msk [vmem:[#allocation0] ss:$8 sm:$0xf] %vm15_vm2, %v14_v6  }
  0x7a   :  { %22 = vst.msk [vmem:[#allocation0] ss:$8 sm:$0xf] %vm21_vm3, %v20_v5  }
  0x81   :  { %v27_v7 = vld [vmem:[#allocation0] sm:$0x1]  ;;  %v32_v8 = vld [vmem:[#allocation0 + $0x8] sm:$0x1]  ;;  %v38_v9 = vld [vmem:[#allocation0 + $0x10] sm:$0x1] }
  0x82   :  { %30 = vst [vmem:[%s100_s1] sm:$0x1] %v27_v7  ;;  %56 = vst [vmem:[%s100_s1 + $0x1] sm:$0x1] %v32_v8  ;;  %v45_v10 = vld [vmem:[#allocation0 + $0x18] sm:$0x1] }
  0x83   :  { %57 = vst [vmem:[%s100_s1 + $0x2] sm:$0x1] %v38_v9  ;;  %58 = vst [vmem:[%s100_s1 + $0x3] sm:$0x1] %v45_v10 }

// kernel: simple_decoder2_forward.1
= control target key start
LH: loop header
LB: loop body
LE: loop exit
PB: predicated region body
PF: predicated region fallthrough
CT: control target
= control target key end

     0   :  { %s4985_s17 = smov 0   ;;  %s4987_s18 = smov 0   ;;  %s8670_s0 = inlined_call_operand.vmem [shape: f32[32,512], index: 0, kind: input, shape index: {}]   ;;  %s8671_s1 = inlined_call_operand.vmem [shape: f32[512,1024], index: 1, kind: input, shape index: {}]   ;;  %s8672_s2 = inlined_call_operand.vmem [shape: f32[1,1024], index: 2, kind: input, shape index: {}]   ;;  %s8673_s3 = inlined_call_operand.vmem [shape: f32[256,512], index: 3, kind: input, shape index: {}]   ;;  %s8674_s4 = inlined_call_operand.vmem [shape: f32[1,512], index: 4, kind: input, shape index: {}]   ;;  %s8675_s5 = inlined_call_operand.vmem [shape: f32[128,256], index: 5, kind: input, shape index: {}]   ;;  %s8676_s6 = inlined_call_operand.vmem [shape: f32[1,256], index: 6, kind: input, shape index: {}]   ;;  %s8677_s7 = inlined_call_operand.vmem [shape: f32[256,512], index: 7, kind: input, shape index: {}]   ;;  %s8678_s8 = inlined_call_operand.vmem [shape: f32[1,512], index: 8, kind: input, shape index: {}]   ;;  %s8679_s9 = inlined_call_operand.vmem [shape: f32[512,192], index: 9, kind: input, shape index: {}]   ;;  %s8680_s10 = inlined_call_operand.vmem [shape: f32[1,192], index: 10, kind: input, shape index: {}]   ;;  %s8681_s11 = inlined_call_operand.vmem [shape: f32[16,32,192], index: 11, kind: output, shape index: {}]  }
   0x1   :  { %s4989_s19 = smov 0  }
   0x2 LB: > { %s4998_s20 = sadd.s32 4294967295, %s4922_s19   ;;  %s5000_s21 = sadd.s32 1, %s4922_s19   ;;  %s4922_s19 = sphi %s4989_s19, %s8686_s19   ;;  %s4918_s18 = sphi %s4987_s18, %s8685_s18   ;;  %s4914_s17 = sphi %s4985_s17, %s8684_s17  }
   0x3   : > { %s261_s22 = ssub.s32 %s4922_s19, %s5000_s21  ;;  %s264_s23 = sadd.s32 1, %s4918_s18 }
   0x4   : > { %p262_p0 = scmp.eq.s32.totalorder %s261_s22, 0  ;;  %p274_p1 = scmp.ne.s32.totalorder %s4918_s18, %s4914_s17 }
   0x5   : > { %p275_p2 = scmp.eq.s32.totalorder %s4998_s20, 1  ;;  %p4504_p3 = scmp.ge.s32.totalorder %s4922_s19, 1 }
   0x6   : > { %s5008_s24 = scalar_select %p262_p0, %s4918_s18, %s264_s23  }
   0x7   : > { %p5010_p4 = por %p275_p2, %p274_p1  ;;  %p339_p5 = scmp.lt.s32.totalorder %s4922_s19, 3 }
   0x9   : > { %p340_p6 = pnand %p4504_p3, %p339_p5 }
   0xa   : > { %s4506_s13 = sshll.u32 (!%p340_p6), %s4998_s20, 1  ;;  %s376_s19 = sand.u32 (!%p340_p6), 1, %s4914_s17  }
   0xb   : > { %343 = sbr.rel (%p340_p6) target bundleno = 1432 (0x598), region = 64  ;;  %p5317_p7 = scmp.lt.s32.totalorder (!%p340_p6), %s4506_s13, 3 }
   0xc   : > { %s4505_s22 = sshll.u32 (!%p340_p6), %s376_s19, 9 }
   0xd   : > { %s8372_s17 = scalar_lea.vmem (!%p340_p6), [#allocation4], %s4505_s22 }
  0x10   : > { %v516_v0 = vld [vmem:[%s8671_s1 + $0x3c8] sm:$0xff]  ;;  %v515_v2 = vld [vmem:[%s8671_s1 + $0x3c0] sm:$0xff]  ;;  %s8688_s13 = smov (!%p5317_p7, %s4506_s13), 3  ;;  %vm4217_vm0 = vcmask 523264   ;;  %s4577_s23 = sshll.u32 (%p5010_p4), %s4998_s20, 5 }
  0x11   : > { %v772_v1 = vld [vmem:[%s8671_s1 + $0xbc8] sm:$0xff]  ;;  %949 = vmatprep.subr.mxu0 %v516_v0  ;;  %v771_v3 = vld [vmem:[%s8671_s1 + $0xbc0] sm:$0xff]  ;;  %s4575_s30 = sshll.u32 %s8688_s13, 5 }
  0x12   : > { %1026 = vmatprep.subr.mxu1 %v772_v1  ;;  %v508_v4 = vld [vmem:[%s8671_s1 + $0x388] sm:$0xff]  ;;  %950 = vmatpush1.msra.mxu0 %v515_v2  ;;  %v507_v6 = vld [vmem:[%s8671_s1 + $0x380] sm:$0xff]  ;;  %s5397_s15 = scalar_lea.vmem %s8670_s0, %s4575_s30  ;;  %s8533_s30 = scalar_lea.vmem (%p5010_p4), %s8681_s11, %s4577_s23 }
  0x13   : > { %v764_v5 = vld [vmem:[%s8671_s1 + $0xb88] sm:$0xff]  ;;  %1027 = vmatpush1.msra.mxu1 %v771_v3  ;;  %v763_v7 = vld [vmem:[%s8671_s1 + $0xb80] sm:$0xff]  ;;  %951 = vmatprep.subr.mxu0 %v508_v4 }
  0x14   : > { %v500_v8 = vld [vmem:[%s8671_s1 + $0x348] sm:$0xff]  ;;  %1028 = vmatprep.subr.mxu1 %v764_v5  ;;  %v499_v10 = vld [vmem:[%s8671_s1 + $0x340] sm:$0xff]  ;;  %952 = vmatpush1.msra.mxu0 %v507_v6 }
  0x15   : > { %v756_v9 = vld [vmem:[%s8671_s1 + $0xb48] sm:$0xff]  ;;  %v755_v11 = vld [vmem:[%s8671_s1 + $0xb40] sm:$0xff]  ;;  %1029 = vmatpush1.msra.mxu1 %v763_v7  ;;  %953 = vmatprep.subr.mxu0 %v500_v8 }
  0x16   : > { %v492_v12 = vld [vmem:[%s8671_s1 + $0x308] sm:$0xff]  ;;  %1030 = vmatprep.subr.mxu1 %v756_v9  ;;  %v491_v14 = vld [vmem:[%s8671_s1 + $0x300] sm:$0xff]  ;;  %954 = vmatpush1.msra.mxu0 %v499_v10 }
  0x17   : > { %v748_v13 = vld [vmem:[%s8671_s1 + $0xb08] sm:$0xff]  ;;  %v747_v15 = vld [vmem:[%s8671_s1 + $0xb00] sm:$0xff]  ;;  %1031 = vmatpush1.msra.mxu1 %v755_v11  ;;  %955 = vmatprep.subr.mxu0 %v492_v12 }
  0x18   : > { %v484_v16 = vld [vmem:[%s8671_s1 + $0x2c8] sm:$0xff]  ;;  %1032 = vmatprep.subr.mxu1 %v748_v13  ;;  %v483_v18 = vld [vmem:[%s8671_s1 + $0x2c0] sm:$0xff]  ;;  %956 = vmatpush1.msra.mxu0 %v491_v14 }
  0x19   : > { %v740_v17 = vld [vmem:[%s8671_s1 + $0xac8] sm:$0xff]  ;;  %v739_v19 = vld [vmem:[%s8671_s1 + $0xac0] sm:$0xff]  ;;  %1033 = vmatpush1.msra.mxu1 %v747_v15  ;;  %957 = vmatprep.subr.mxu0 %v484_v16 }
  0x1a   : > { %v476_v20 = vld [vmem:[%s8671_s1 + $0x288] sm:$0xff]  ;;  %1034 = vmatprep.subr.mxu1 %v740_v17  ;;  %v475_v22 = vld [vmem:[%s8671_s1 + $0x280] sm:$0xff]  ;;  %958 = vmatpush1.msra.mxu0 %v483_v18 }
  0x1b   : > { %v732_v21 = vld [vmem:[%s8671_s1 + $0xa88] sm:$0xff]  ;;  %v731_v23 = vld [vmem:[%s8671_s1 + $0xa80] sm:$0xff]  ;;  %1035 = vmatpush1.msra.mxu1 %v739_v19  ;;  %959 = vmatprep.subr.mxu0 %v476_v20 }
  0x1c   : > { %v468_v24 = vld [vmem:[%s8671_s1 + $0x248] sm:$0xff]  ;;  %1036 = vmatprep.subr.mxu1 %v732_v21  ;;  %v467_v26 = vld [vmem:[%s8671_s1 + $0x240] sm:$0xff]  ;;  %960 = vmatpush1.msra.mxu0 %v475_v22 }
  0x1d   : > { %v724_v25 = vld [vmem:[%s8671_s1 + $0xa48] sm:$0xff]  ;;  %v723_v27 = vld [vmem:[%s8671_s1 + $0xa40] sm:$0xff]  ;;  %1037 = vmatpush1.msra.mxu1 %v731_v23  ;;  %961 = vmatprep.subr.mxu0 %v468_v24 }
  0x1e   : > { %v460_v28 = vld [vmem:[%s8671_s1 + $0x208] sm:$0xff]  ;;  %1038 = vmatprep.subr.mxu1 %v724_v25  ;;  %v459_v30 = vld [vmem:[%s8671_s1 + $0x200] sm:$0xff]  ;;  %962 = vmatpush1.msra.mxu0 %v467_v26 }
  0x1f   : > { %v716_v29 = vld [vmem:[%s8671_s1 + $0xa08] sm:$0xff]  ;;  %v715_v31 = vld [vmem:[%s8671_s1 + $0xa00] sm:$0xff]  ;;  %1039 = vmatpush1.msra.mxu1 %v723_v27  ;;  %963 = vmatprep.subr.mxu0 %v460_v28 }
  0x20   : > { %v452_v32 = vld [vmem:[%s8671_s1 + $0x1c8] sm:$0xff]  ;;  %1040 = vmatprep.subr.mxu1 %v716_v29  ;;  %v451_v34 = vld [vmem:[%s8671_s1 + $0x1c0] sm:$0xff]  ;;  %964 = vmatpush1.msra.mxu0 %v459_v30 }
  0x21   : > { %v708_v33 = vld [vmem:[%s8671_s1 + $0x9c8] sm:$0xff]  ;;  %v707_v35 = vld [vmem:[%s8671_s1 + $0x9c0] sm:$0xff]  ;;  %1041 = vmatpush1.msra.mxu1 %v715_v31  ;;  %965 = vmatprep.subr.mxu0 %v452_v32 }
  0x22   : > { %v444_v36 = vld [vmem:[%s8671_s1 + $0x188] sm:$0xff]  ;;  %1042 = vmatprep.subr.mxu1 %v708_v33  ;;  %v443_v38 = vld [vmem:[%s8671_s1 + $0x180] sm:$0xff]  ;;  %966 = vmatpush1.msra.mxu0 %v451_v34 }
  0x23   : > { %v700_v37 = vld [vmem:[%s8671_s1 + $0x988] sm:$0xff]  ;;  %v699_v39 = vld [vmem:[%s8671_s1 + $0x980] sm:$0xff]  ;;  %1043 = vmatpush1.msra.mxu1 %v707_v35  ;;  %967 = vmatprep.subr.mxu0 %v444_v36 }
  0x24   : > { %v436_v40 = vld [vmem:[%s8671_s1 + $0x148] sm:$0xff]  ;;  %1044 = vmatprep.subr.mxu1 %v700_v37  ;;  %v435_v42 = vld [vmem:[%s8671_s1 + $0x140] sm:$0xff]  ;;  %968 = vmatpush1.msra.mxu0 %v443_v38 }
  0x25   : > { %v692_v41 = vld [vmem:[%s8671_s1 + $0x948] sm:$0xff]  ;;  %v691_v43 = vld [vmem:[%s8671_s1 + $0x940] sm:$0xff]  ;;  %1045 = vmatpush1.msra.mxu1 %v699_v39  ;;  %969 = vmatprep.subr.mxu0 %v436_v40 }
  0x26   : > { %v428_v44 = vld [vmem:[%s8671_s1 + $0x108] sm:$0xff]  ;;  %1046 = vmatprep.subr.mxu1 %v692_v41  ;;  %v427_v46 = vld [vmem:[%s8671_s1 + $0x100] sm:$0xff]  ;;  %970 = vmatpush1.msra.mxu0 %v435_v42 }
  0x27   : > { %v684_v45 = vld [vmem:[%s8671_s1 + $0x908] sm:$0xff]  ;;  %v683_v47 = vld [vmem:[%s8671_s1 + $0x900] sm:$0xff]  ;;  %1047 = vmatpush1.msra.mxu1 %v691_v43  ;;  %971 = vmatprep.subr.mxu0 %v428_v44 }
  0x28   : > { %v420_v48 = vld [vmem:[%s8671_s1 + $0xc8] sm:$0xff]  ;;  %1048 = vmatprep.subr.mxu1 %v684_v45  ;;  %v419_v50 = vld [vmem:[%s8671_s1 + $0xc0] sm:$0xff]  ;;  %972 = vmatpush1.msra.mxu0 %v427_v46 }
  0x29   : > { %v676_v49 = vld [vmem:[%s8671_s1 + $0x8c8] sm:$0xff]  ;;  %v675_v51 = vld [vmem:[%s8671_s1 + $0x8c0] sm:$0xff]  ;;  %1049 = vmatpush1.msra.mxu1 %v683_v47  ;;  %973 = vmatprep.subr.mxu0 %v420_v48 }
  0x2a   : > { %v412_v52 = vld [vmem:[%s8671_s1 + $0x88] sm:$0xff]  ;;  %1050 = vmatprep.subr.mxu1 %v676_v49  ;;  %v411_v54 = vld [vmem:[%s8671_s1 + $0x80] sm:$0xff]  ;;  %974 = vmatpush1.msra.mxu0 %v419_v50 }
  0x2b   : > { %v668_v53 = vld [vmem:[%s8671_s1 + $0x888] sm:$0xff]  ;;  %v667_v55 = vld [vmem:[%s8671_s1 + $0x880] sm:$0xff]  ;;  %1051 = vmatpush1.msra.mxu1 %v675_v51  ;;  %975 = vmatprep.subr.mxu0 %v412_v52 }
  0x2c   : > { %v404_v56 = vld [vmem:[%s8671_s1 + $0x48] sm:$0xff]  ;;  %1052 = vmatprep.subr.mxu1 %v668_v53  ;;  %v403_v58 = vld [vmem:[%s8671_s1 + $0x40] sm:$0xff]  ;;  %976 = vmatpush1.msra.mxu0 %v411_v54 }
  0x2d   : > { %v660_v57 = vld [vmem:[%s8671_s1 + $0x848] sm:$0xff]  ;;  %v659_v59 = vld [vmem:[%s8671_s1 + $0x840] sm:$0xff]  ;;  %1053 = vmatpush1.msra.mxu1 %v667_v55  ;;  %977 = vmatprep.subr.mxu0 %v404_v56 }
  0x2e   : > { %v396_v60 = vld [vmem:[%s8671_s1 + $0x8] sm:$0xff]  ;;  %1054 = vmatprep.subr.mxu1 %v660_v57  ;;  %v395_v62 = vld [vmem:[%s8671_s1] sm:$0xff]  ;;  %978 = vmatpush1.msra.mxu0 %v403_v58 }
  0x2f   : > { %v652_v61 = vld [vmem:[%s8671_s1 + $0x808] sm:$0xff]  ;;  %v651_v63 = vld [vmem:[%s8671_s1 + $0x800] sm:$0xff]  ;;  %1055 = vmatpush1.msra.mxu1 %v659_v59  ;;  %979 = vmatprep.subr.mxu0 %v396_v60 }
  0x30   : > { %v644_v0 = vld [vmem:[%s8671_s1 + $0x7c8] sm:$0xff]  ;;  %1056 = vmatprep.subr.mxu1 %v652_v61  ;;  %v643_v2 = vld [vmem:[%s8671_s1 + $0x7c0] sm:$0xff]  ;;  %980 = vmatpush1.msra.mxu0 %v395_v62 }
  0x31   : > { %v900_v1 = vld [vmem:[%s8671_s1 + $0xfc8] sm:$0xff]  ;;  %v899_v3 = vld [vmem:[%s8671_s1 + $0xfc0] sm:$0xff]  ;;  %1057 = vmatpush1.msra.mxu1 %v651_v63  ;;  %981 = vmatprep.subr.mxu0 %v644_v0 }
  0x32   : > { %v636_v4 = vld [vmem:[%s8671_s1 + $0x788] sm:$0xff]  ;;  %1058 = vmatprep.subr.mxu1 %v900_v1  ;;  %v635_v6 = vld [vmem:[%s8671_s1 + $0x780] sm:$0xff]  ;;  %982 = vmatpush2.msra.mxu0 %v643_v2  ;;  %v5424_v2 = vld [vmem:[%s5397_s15 + $0x18] sm:$0xff] }
  0x33   : > { %v892_v5 = vld [vmem:[%s8671_s1 + $0xf88] sm:$0xff]  ;;  %v891_v7 = vld [vmem:[%s8671_s1 + $0xf80] sm:$0xff]  ;;  %1059 = vmatpush2.msra.mxu1 %v899_v3  ;;  %983 = vmatprep.subr.mxu0 %v636_v4  ;;  %v518_v3 = vld [vmem:[%s8671_s1 + $0x3d8] sm:$0xff] }
  0x34   : > { %v628_v8 = vld [vmem:[%s8671_s1 + $0x748] sm:$0xff]  ;;  %1060 = vmatprep.subr.mxu1 %v892_v5  ;;  %v627_v10 = vld [vmem:[%s8671_s1 + $0x740] sm:$0xff]  ;;  %984 = vmatpush2.msra.mxu0 %v635_v6  ;;  %v774_v4 = vld [vmem:[%s8671_s1 + $0xbd8] sm:$0xff] }
  0x35   : > { %v884_v9 = vld [vmem:[%s8671_s1 + $0xf48] sm:$0xff]  ;;  %v883_v11 = vld [vmem:[%s8671_s1 + $0xf40] sm:$0xff]  ;;  %1061 = vmatpush2.msra.mxu1 %v891_v7  ;;  %985 = vmatprep.subr.mxu0 %v628_v8  ;;  %v5434_v5 = vld [vmem:[%s5397_s15 + $0x10] sm:$0xff] }
  0x36   : > { %v620_v12 = vld [vmem:[%s8671_s1 + $0x708] sm:$0xff]  ;;  %1062 = vmatprep.subr.mxu1 %v884_v9  ;;  %v619_v14 = vld [vmem:[%s8671_s1 + $0x700] sm:$0xff]  ;;  %986 = vmatpush2.msra.mxu0 %v627_v10  ;;  %v517_v6 = vld [vmem:[%s8671_s1 + $0x3d0] sm:$0xff] }
  0x37   : > { %v876_v13 = vld [vmem:[%s8671_s1 + $0xf08] sm:$0xff]  ;;  %v875_v15 = vld [vmem:[%s8671_s1 + $0xf00] sm:$0xff]  ;;  %1063 = vmatpush2.msra.mxu1 %v883_v11  ;;  %987 = vmatprep.subr.mxu0 %v620_v12  ;;  %v773_v7 = vld [vmem:[%s8671_s1 + $0xbd0] sm:$0xff] }
  0x38   : > { %v612_v16 = vld [vmem:[%s8671_s1 + $0x6c8] sm:$0xff]  ;;  %1064 = vmatprep.subr.mxu1 %v876_v13  ;;  %v611_v18 = vld [vmem:[%s8671_s1 + $0x6c0] sm:$0xff]  ;;  %988 = vmatpush2.msra.mxu0 %v619_v14  ;;  %v510_v8 = vld [vmem:[%s8671_s1 + $0x398] sm:$0xff] }
  0x39   : > { %v868_v17 = vld [vmem:[%s8671_s1 + $0xec8] sm:$0xff]  ;;  %v867_v19 = vld [vmem:[%s8671_s1 + $0xec0] sm:$0xff]  ;;  %1065 = vmatpush2.msra.mxu1 %v875_v15  ;;  %989 = vmatprep.subr.mxu0 %v612_v16  ;;  %v766_v9 = vld [vmem:[%s8671_s1 + $0xb98] sm:$0xff] }
  0x3a   : > { %v604_v20 = vld [vmem:[%s8671_s1 + $0x688] sm:$0xff]  ;;  %1066 = vmatprep.subr.mxu1 %v868_v17  ;;  %v603_v22 = vld [vmem:[%s8671_s1 + $0x680] sm:$0xff]  ;;  %990 = vmatpush2.msra.mxu0 %v611_v18  ;;  %v509_v10 = vld [vmem:[%s8671_s1 + $0x390] sm:$0xff] }
  0x3b   : > { %v860_v21 = vld [vmem:[%s8671_s1 + $0xe88] sm:$0xff]  ;;  %v859_v23 = vld [vmem:[%s8671_s1 + $0xe80] sm:$0xff]  ;;  %1067 = vmatpush2.msra.mxu1 %v867_v19  ;;  %991 = vmatprep.subr.mxu0 %v604_v20  ;;  %v765_v11 = vld [vmem:[%s8671_s1 + $0xb90] sm:$0xff] }
  0x3c   : > { %v596_v24 = vld [vmem:[%s8671_s1 + $0x648] sm:$0xff]  ;;  %1068 = vmatprep.subr.mxu1 %v860_v21  ;;  %v595_v26 = vld [vmem:[%s8671_s1 + $0x640] sm:$0xff]  ;;  %992 = vmatpush2.msra.mxu0 %v603_v22  ;;  %v502_v12 = vld [vmem:[%s8671_s1 + $0x358] sm:$0xff] }
  0x3d   : > { %v852_v25 = vld [vmem:[%s8671_s1 + $0xe48] sm:$0xff]  ;;  %v851_v27 = vld [vmem:[%s8671_s1 + $0xe40] sm:$0xff]  ;;  %1069 = vmatpush2.msra.mxu1 %v859_v23  ;;  %993 = vmatprep.subr.mxu0 %v596_v24  ;;  %v758_v13 = vld [vmem:[%s8671_s1 + $0xb58] sm:$0xff] }
  0x3e   : > { %v588_v28 = vld [vmem:[%s8671_s1 + $0x608] sm:$0xff]  ;;  %1070 = vmatprep.subr.mxu1 %v852_v25  ;;  %v587_v30 = vld [vmem:[%s8671_s1 + $0x600] sm:$0xff]  ;;  %994 = vmatpush2.msra.mxu0 %v595_v26  ;;  %v501_v14 = vld [vmem:[%s8671_s1 + $0x350] sm:$0xff] }
  0x3f   : > { %v844_v29 = vld [vmem:[%s8671_s1 + $0xe08] sm:$0xff]  ;;  %v843_v31 = vld [vmem:[%s8671_s1 + $0xe00] sm:$0xff]  ;;  %1071 = vmatpush2.msra.mxu1 %v851_v27  ;;  %995 = vmatprep.subr.mxu0 %v588_v28  ;;  %v757_v15 = vld [vmem:[%s8671_s1 + $0xb50] sm:$0xff] }
  0x40   : > { %v580_v32 = vld [vmem:[%s8671_s1 + $0x5c8] sm:$0xff]  ;;  %1072 = vmatprep.subr.mxu1 %v844_v29  ;;  %v579_v34 = vld [vmem:[%s8671_s1 + $0x5c0] sm:$0xff]  ;;  %996 = vmatpush2.msra.mxu0 %v587_v30  ;;  %v494_v16 = vld [vmem:[%s8671_s1 + $0x318] sm:$0xff] }
  0x41   : > { %v836_v33 = vld [vmem:[%s8671_s1 + $0xdc8] sm:$0xff]  ;;  %v835_v35 = vld [vmem:[%s8671_s1 + $0xdc0] sm:$0xff]  ;;  %1073 = vmatpush2.msra.mxu1 %v843_v31  ;;  %997 = vmatprep.subr.mxu0 %v580_v32  ;;  %v750_v17 = vld [vmem:[%s8671_s1 + $0xb18] sm:$0xff] }
  0x42   : > { %v572_v36 = vld [vmem:[%s8671_s1 + $0x588] sm:$0xff]  ;;  %1074 = vmatprep.subr.mxu1 %v836_v33  ;;  %v571_v38 = vld [vmem:[%s8671_s1 + $0x580] sm:$0xff]  ;;  %998 = vmatpush2.msra.mxu0 %v579_v34  ;;  %v493_v18 = vld [vmem:[%s8671_s1 + $0x310] sm:$0xff] }
  0x43   : > { %v828_v37 = vld [vmem:[%s8671_s1 + $0xd88] sm:$0xff]  ;;  %v827_v39 = vld [vmem:[%s8671_s1 + $0xd80] sm:$0xff]  ;;  %1075 = vmatpush2.msra.mxu1 %v835_v35  ;;  %999 = vmatprep.subr.mxu0 %v572_v36  ;;  %v749_v19 = vld [vmem:[%s8671_s1 + $0xb10] sm:$0xff] }
  0x44   : > { %v564_v40 = vld [vmem:[%s8671_s1 + $0x548] sm:$0xff]  ;;  %1076 = vmatprep.subr.mxu1 %v828_v37  ;;  %v563_v42 = vld [vmem:[%s8671_s1 + $0x540] sm:$0xff]  ;;  %1000 = vmatpush2.msra.mxu0 %v571_v38  ;;  %v486_v20 = vld [vmem:[%s8671_s1 + $0x2d8] sm:$0xff] }
  0x45   : > { %v820_v41 = vld [vmem:[%s8671_s1 + $0xd48] sm:$0xff]  ;;  %v819_v43 = vld [vmem:[%s8671_s1 + $0xd40] sm:$0xff]  ;;  %1077 = vmatpush2.msra.mxu1 %v827_v39  ;;  %1001 = vmatprep.subr.mxu0 %v564_v40  ;;  %v742_v21 = vld [vmem:[%s8671_s1 + $0xad8] sm:$0xff] }
  0x46   : > { %v556_v44 = vld [vmem:[%s8671_s1 + $0x508] sm:$0xff]  ;;  %1078 = vmatprep.subr.mxu1 %v820_v41  ;;  %v555_v46 = vld [vmem:[%s8671_s1 + $0x500] sm:$0xff]  ;;  %1002 = vmatpush2.msra.mxu0 %v563_v42  ;;  %v485_v22 = vld [vmem:[%s8671_s1 + $0x2d0] sm:$0xff] }
  0x47   : > { %v812_v45 = vld [vmem:[%s8671_s1 + $0xd08] sm:$0xff]  ;;  %v811_v47 = vld [vmem:[%s8671_s1 + $0xd00] sm:$0xff]  ;;  %1079 = vmatpush2.msra.mxu1 %v819_v43  ;;  %1003 = vmatprep.subr.mxu0 %v556_v44  ;;  %v741_v23 = vld [vmem:[%s8671_s1 + $0xad0] sm:$0xff] }
  0x48   : > { %v548_v48 = vld [vmem:[%s8671_s1 + $0x4c8] sm:$0xff]  ;;  %1080 = vmatprep.subr.mxu1 %v812_v45  ;;  %v547_v50 = vld [vmem:[%s8671_s1 + $0x4c0] sm:$0xff]  ;;  %1004 = vmatpush2.msra.mxu0 %v555_v46  ;;  %v478_v24 = vld [vmem:[%s8671_s1 + $0x298] sm:$0xff] }
  0x49   : > { %v804_v49 = vld [vmem:[%s8671_s1 + $0xcc8] sm:$0xff]  ;;  %v803_v51 = vld [vmem:[%s8671_s1 + $0xcc0] sm:$0xff]  ;;  %1081 = vmatpush2.msra.mxu1 %v811_v47  ;;  %1005 = vmatprep.subr.mxu0 %v548_v48  ;;  %v734_v25 = vld [vmem:[%s8671_s1 + $0xa98] sm:$0xff] }
  0x4a   : > { %v540_v52 = vld [vmem:[%s8671_s1 + $0x488] sm:$0xff]  ;;  %1082 = vmatprep.subr.mxu1 %v804_v49  ;;  %v539_v54 = vld [vmem:[%s8671_s1 + $0x480] sm:$0xff]  ;;  %1006 = vmatpush2.msra.mxu0 %v547_v50  ;;  %v477_v26 = vld [vmem:[%s8671_s1 + $0x290] sm:$0xff] }
  0x4b   : > { %v796_v53 = vld [vmem:[%s8671_s1 + $0xc88] sm:$0xff]  ;;  %v795_v55 = vld [vmem:[%s8671_s1 + $0xc80] sm:$0xff]  ;;  %1083 = vmatpush2.msra.mxu1 %v803_v51  ;;  %1007 = vmatprep.subr.mxu0 %v540_v52  ;;  %v733_v27 = vld [vmem:[%s8671_s1 + $0xa90] sm:$0xff] }
  0x4c   : > { %v532_v56 = vld [vmem:[%s8671_s1 + $0x448] sm:$0xff]  ;;  %1084 = vmatprep.subr.mxu1 %v796_v53  ;;  %v531_v58 = vld [vmem:[%s8671_s1 + $0x440] sm:$0xff]  ;;  %1008 = vmatpush2.msra.mxu0 %v539_v54  ;;  %v470_v28 = vld [vmem:[%s8671_s1 + $0x258] sm:$0xff] }
  0x4d   : > { %v788_v57 = vld [vmem:[%s8671_s1 + $0xc48] sm:$0xff]  ;;  %v787_v59 = vld [vmem:[%s8671_s1 + $0xc40] sm:$0xff]  ;;  %1085 = vmatpush2.msra.mxu1 %v795_v55  ;;  %1009 = vmatprep.subr.mxu0 %v532_v56  ;;  %v726_v29 = vld [vmem:[%s8671_s1 + $0xa58] sm:$0xff] }
  0x4e   : > { %v524_v60 = vld [vmem:[%s8671_s1 + $0x408] sm:$0xff]  ;;  %1086 = vmatprep.subr.mxu1 %v788_v57  ;;  %v523_v62 = vld [vmem:[%s8671_s1 + $0x400] sm:$0xff]  ;;  %1010 = vmatpush2.msra.mxu0 %v531_v58  ;;  %v469_v30 = vld [vmem:[%s8671_s1 + $0x250] sm:$0xff] }
  0x4f   : > { %v780_v61 = vld [vmem:[%s8671_s1 + $0xc08] sm:$0xff]  ;;  %1087 = vmatpush2.msra.mxu1 %v787_v59  ;;  %v779_v0 = vld [vmem:[%s8671_s1 + $0xc00] sm:$0xff]  ;;  %1011 = vmatprep.subr.mxu0 %v524_v60  ;;  %v725_v31 = vld [vmem:[%s8671_s1 + $0xa50] sm:$0xff] }
  0x50   : > { %v5415_v63 = vld [vmem:[%s5397_s15 + $0x8] sm:$0xff]  ;;  %v5421_v1 = vld [vmem:[%s5397_s15] sm:$0xff]  ;;  %1088 = vmatprep.subr.mxu1 %v780_v61  ;;  %1012 = vmatpush2.msra.mxu0 %v523_v62  ;;  %v462_v32 = vld [vmem:[%s8671_s1 + $0x218] sm:$0xff] }
  0x51   : > { %1013 = vmatprep.mubr.f32.mxu0 %v5415_v63  ;;  %1089 = vmatpush2.msra.mxu1 %v779_v0  ;;  %v718_v33 = vld [vmem:[%s8671_s1 + $0xa18] sm:$0xff]  ;;  %v461_v34 = vld [vmem:[%s8671_s1 + $0x210] sm:$0xff] }
  0x52   : > { %1014 = vmatmul.mubr.f32.vlgmr.msra.gmra.mxu0 %v5421_v1  ;;  %1090 = vmatprep.mubr.f32.mxu1 %v5424_v2  ;;  %v717_v35 = vld [vmem:[%s8671_s1 + $0xa10] sm:$0xff]  ;;  %v454_v36 = vld [vmem:[%s8671_s1 + $0x1d8] sm:$0xff] }
  0x53   : > { %1103 = vmatprep.subr.mxu0 %v518_v3  ;;  %1180 = vmatprep.subr.mxu1 %v774_v4  ;;  %v710_v37 = vld [vmem:[%s8671_s1 + $0x9d8] sm:$0xff]  ;;  %v453_v38 = vld [vmem:[%s8671_s1 + $0x1d0] sm:$0xff] }
  0x54   : > { %1091 = vmatmul.mubr.f32.vlgmr.msra.gmra.mxu1 %v5434_v5  ;;  %1104 = vmatpush1.msra.mxu0 %v517_v6  ;;  %v709_v39 = vld [vmem:[%s8671_s1 + $0x9d0] sm:$0xff]  ;;  %v446_v40 = vld [vmem:[%s8671_s1 + $0x198] sm:$0xff] }
  0x55   : > { %1181 = vmatpush1.msra.mxu1 %v773_v7  ;;  %1105 = vmatprep.subr.mxu0 %v510_v8  ;;  %v702_v41 = vld [vmem:[%s8671_s1 + $0x998] sm:$0xff]  ;;  %v445_v42 = vld [vmem:[%s8671_s1 + $0x190] sm:$0xff] }
  0x56   : > { %1182 = vmatprep.subr.mxu1 %v766_v9  ;;  %1106 = vmatpush1.msra.mxu0 %v509_v10  ;;  %v701_v43 = vld [vmem:[%s8671_s1 + $0x990] sm:$0xff]  ;;  %v438_v44 = vld [vmem:[%s8671_s1 + $0x158] sm:$0xff] }
  0x57   : > { %1183 = vmatpush1.msra.mxu1 %v765_v11  ;;  %1107 = vmatprep.subr.mxu0 %v502_v12  ;;  %v694_v45 = vld [vmem:[%s8671_s1 + $0x958] sm:$0xff]  ;;  %v437_v46 = vld [vmem:[%s8671_s1 + $0x150] sm:$0xff] }
  0x58   : > { %1184 = vmatprep.subr.mxu1 %v758_v13  ;;  %1108 = vmatpush1.msra.mxu0 %v501_v14  ;;  %v693_v47 = vld [vmem:[%s8671_s1 + $0x950] sm:$0xff]  ;;  %v430_v48 = vld [vmem:[%s8671_s1 + $0x118] sm:$0xff] }
  0x59   : > { %1185 = vmatpush1.msra.mxu1 %v757_v15  ;;  %1109 = vmatprep.subr.mxu0 %v494_v16  ;;  %v686_v49 = vld [vmem:[%s8671_s1 + $0x918] sm:$0xff]  ;;  %v429_v50 = vld [vmem:[%s8671_s1 + $0x110] sm:$0xff] }
  0x5a   : > { %1186 = vmatprep.subr.mxu1 %v750_v17  ;;  %1110 = vmatpush1.msra.mxu0 %v493_v18  ;;  %v685_v51 = vld [vmem:[%s8671_s1 + $0x910] sm:$0xff]  ;;  %v422_v52 = vld [vmem:[%s8671_s1 + $0xd8] sm:$0xff] }
  0x5b   : > { %1187 = vmatpush1.msra.mxu1 %v749_v19  ;;  %1111 = vmatprep.subr.mxu0 %v486_v20  ;;  %v678_v53 = vld [vmem:[%s8671_s1 + $0x8d8] sm:$0xff]  ;;  %v421_v54 = vld [vmem:[%s8671_s1 + $0xd0] sm:$0xff] }
  0x5c   : > { %1188 = vmatprep.subr.mxu1 %v742_v21  ;;  %1112 = vmatpush1.msra.mxu0 %v485_v22  ;;  %v677_v55 = vld [vmem:[%s8671_s1 + $0x8d0] sm:$0xff]  ;;  %v414_v56 = vld [vmem:[%s8671_s1 + $0x98] sm:$0xff] }
  0x5d   : > { %1189 = vmatpush1.msra.mxu1 %v741_v23  ;;  %1113 = vmatprep.subr.mxu0 %v478_v24  ;;  %v670_v57 = vld [vmem:[%s8671_s1 + $0x898] sm:$0xff]  ;;  %v413_v58 = vld [vmem:[%s8671_s1 + $0x90] sm:$0xff] }
  0x5e   : > { %1190 = vmatprep.subr.mxu1 %v734_v25  ;;  %1114 = vmatpush1.msra.mxu0 %v477_v26  ;;  %v669_v59 = vld [vmem:[%s8671_s1 + $0x890] sm:$0xff]  ;;  %v406_v60 = vld [vmem:[%s8671_s1 + $0x58] sm:$0xff] }
  0x5f   : > { %1191 = vmatpush1.msra.mxu1 %v733_v27  ;;  %1115 = vmatprep.subr.mxu0 %v470_v28  ;;  %v662_v61 = vld [vmem:[%s8671_s1 + $0x858] sm:$0xff]  ;;  %v405_v62 = vld [vmem:[%s8671_s1 + $0x50] sm:$0xff] }
  0x60   : > { %1192 = vmatprep.subr.mxu1 %v726_v29  ;;  %1116 = vmatpush1.msra.mxu0 %v469_v30  ;;  %v661_v0 = vld [vmem:[%s8671_s1 + $0x850] sm:$0xff]  ;;  %v398_v3 = vld [vmem:[%s8671_s1 + $0x18] sm:$0xff] }
  0x61   : > { %1193 = vmatpush1.msra.mxu1 %v725_v31  ;;  %1117 = vmatprep.subr.mxu0 %v462_v32  ;;  %v654_v4 = vld [vmem:[%s8671_s1 + $0x818] sm:$0xff]  ;;  %v397_v6 = vld [vmem:[%s8671_s1 + $0x10] sm:$0xff] }
  0x62   : > { %1194 = vmatprep.subr.mxu1 %v718_v33  ;;  %1118 = vmatpush1.msra.mxu0 %v461_v34  ;;  %v653_v7 = vld [vmem:[%s8671_s1 + $0x810] sm:$0xff]  ;;  %v646_v8 = vld [vmem:[%s8671_s1 + $0x7d8] sm:$0xff] }
  0x63   : > { %1195 = vmatpush1.msra.mxu1 %v717_v35  ;;  %1119 = vmatprep.subr.mxu0 %v454_v36  ;;  %v902_v9 = vld [vmem:[%s8671_s1 + $0xfd8] sm:$0xff]  ;;  %v645_v10 = vld [vmem:[%s8671_s1 + $0x7d0] sm:$0xff] }
  0x64   : > { %1196 = vmatprep.subr.mxu1 %v710_v37  ;;  %1120 = vmatpush1.msra.mxu0 %v453_v38  ;;  %v901_v11 = vld [vmem:[%s8671_s1 + $0xfd0] sm:$0xff]  ;;  %v638_v12 = vld [vmem:[%s8671_s1 + $0x798] sm:$0xff] }
  0x65   : > { %1197 = vmatpush1.msra.mxu1 %v709_v39  ;;  %1121 = vmatprep.subr.mxu0 %v446_v40  ;;  %v894_v13 = vld [vmem:[%s8671_s1 + $0xf98] sm:$0xff]  ;;  %v637_v14 = vld [vmem:[%s8671_s1 + $0x790] sm:$0xff] }
  0x66   : > { %1198 = vmatprep.subr.mxu1 %v702_v41  ;;  %1122 = vmatpush1.msra.mxu0 %v445_v42  ;;  %v893_v15 = vld [vmem:[%s8671_s1 + $0xf90] sm:$0xff]  ;;  %v630_v16 = vld [vmem:[%s8671_s1 + $0x758] sm:$0xff] }
  0x67   : > { %1199 = vmatpush1.msra.mxu1 %v701_v43  ;;  %1123 = vmatprep.subr.mxu0 %v438_v44  ;;  %v886_v17 = vld [vmem:[%s8671_s1 + $0xf58] sm:$0xff]  ;;  %v629_v18 = vld [vmem:[%s8671_s1 + $0x750] sm:$0xff] }
  0x68   : > { %1200 = vmatprep.subr.mxu1 %v694_v45  ;;  %1124 = vmatpush1.msra.mxu0 %v437_v46  ;;  %v885_v19 = vld [vmem:[%s8671_s1 + $0xf50] sm:$0xff]  ;;  %v622_v20 = vld [vmem:[%s8671_s1 + $0x718] sm:$0xff] }
  0x69   : > { %1201 = vmatpush1.msra.mxu1 %v693_v47  ;;  %1125 = vmatprep.subr.mxu0 %v430_v48  ;;  %v878_v21 = vld [vmem:[%s8671_s1 + $0xf18] sm:$0xff]  ;;  %v621_v22 = vld [vmem:[%s8671_s1 + $0x710] sm:$0xff] }
  0x6a   : > { %1202 = vmatprep.subr.mxu1 %v686_v49  ;;  %1126 = vmatpush1.msra.mxu0 %v429_v50  ;;  %v877_v23 = vld [vmem:[%s8671_s1 + $0xf10] sm:$0xff]  ;;  %v614_v24 = vld [vmem:[%s8671_s1 + $0x6d8] sm:$0xff] }
  0x6b   : > { %1203 = vmatpush1.msra.mxu1 %v685_v51  ;;  %1127 = vmatprep.subr.mxu0 %v422_v52  ;;  %v870_v25 = vld [vmem:[%s8671_s1 + $0xed8] sm:$0xff]  ;;  %v613_v26 = vld [vmem:[%s8671_s1 + $0x6d0] sm:$0xff] }
  0x6c   : > { %1204 = vmatprep.subr.mxu1 %v678_v53  ;;  %1128 = vmatpush1.msra.mxu0 %v421_v54  ;;  %v869_v27 = vld [vmem:[%s8671_s1 + $0xed0] sm:$0xff]  ;;  %v606_v28 = vld [vmem:[%s8671_s1 + $0x698] sm:$0xff] }
  0x6d   : > { %1205 = vmatpush1.msra.mxu1 %v677_v55  ;;  %1129 = vmatprep.subr.mxu0 %v414_v56  ;;  %v862_v29 = vld [vmem:[%s8671_s1 + $0xe98] sm:$0xff]  ;;  %v605_v30 = vld [vmem:[%s8671_s1 + $0x690] sm:$0xff] }
  0x6e   : > { %1206 = vmatprep.subr.mxu1 %v670_v57  ;;  %1130 = vmatpush1.msra.mxu0 %v413_v58  ;;  %v861_v31 = vld [vmem:[%s8671_s1 + $0xe90] sm:$0xff]  ;;  %v598_v32 = vld [vmem:[%s8671_s1 + $0x658] sm:$0xff]  ;;  %v5776_v58 = vld [vmem:[%s5397_s15 + $0x28] sm:$0xff] }
  0x6f   : > { %1207 = vmatpush1.msra.mxu1 %v669_v59  ;;  %1131 = vmatprep.subr.mxu0 %v406_v60  ;;  %v854_v33 = vld [vmem:[%s8671_s1 + $0xe58] sm:$0xff]  ;;  %v597_v34 = vld [vmem:[%s8671_s1 + $0x650] sm:$0xff] }
  0x70   : > { %1208 = vmatprep.subr.mxu1 %v662_v61  ;;  %1132 = vmatpush1.msra.mxu0 %v405_v62  ;;  %v853_v35 = vld [vmem:[%s8671_s1 + $0xe50] sm:$0xff]  ;;  %v590_v36 = vld [vmem:[%s8671_s1 + $0x618] sm:$0xff]  ;;  %v5785_v61 = vld [vmem:[%s5397_s15 + $0x20] sm:$0xff] }
  0x71   : > { %1209 = vmatpush1.msra.mxu1 %v661_v0  ;;  %1133 = vmatprep.subr.mxu0 %v398_v3  ;;  %v846_v37 = vld [vmem:[%s8671_s1 + $0xe18] sm:$0xff]  ;;  %v589_v38 = vld [vmem:[%s8671_s1 + $0x610] sm:$0xff] }
  0x72   : > { %1210 = vmatprep.subr.mxu1 %v654_v4  ;;  %1134 = vmatpush1.msra.mxu0 %v397_v6  ;;  %v845_v39 = vld [vmem:[%s8671_s1 + $0xe10] sm:$0xff]  ;;  %v582_v40 = vld [vmem:[%s8671_s1 + $0x5d8] sm:$0xff] }
  0x73   : > { %1211 = vmatpush1.msra.mxu1 %v653_v7  ;;  %1135 = vmatprep.subr.mxu0 %v646_v8  ;;  %v838_v41 = vld [vmem:[%s8671_s1 + $0xdd8] sm:$0xff]  ;;  %v581_v42 = vld [vmem:[%s8671_s1 + $0x5d0] sm:$0xff] }
  0x74   : > { %1212 = vmatprep.subr.mxu1 %v902_v9  ;;  %1136 = vmatpush2.msra.mxu0 %v645_v10  ;;  %v837_v43 = vld [vmem:[%s8671_s1 + $0xdd0] sm:$0xff]  ;;  %v574_v44 = vld [vmem:[%s8671_s1 + $0x598] sm:$0xff] }
  0x75   : > { %1213 = vmatpush2.msra.mxu1 %v901_v11  ;;  %1137 = vmatprep.subr.mxu0 %v638_v12  ;;  %v830_v45 = vld [vmem:[%s8671_s1 + $0xd98] sm:$0xff]  ;;  %v573_v46 = vld [vmem:[%s8671_s1 + $0x590] sm:$0xff] }
  0x76   : > { %1214 = vmatprep.subr.mxu1 %v894_v13  ;;  %1138 = vmatpush2.msra.mxu0 %v637_v14  ;;  %v829_v47 = vld [vmem:[%s8671_s1 + $0xd90] sm:$0xff]  ;;  %v566_v48 = vld [vmem:[%s8671_s1 + $0x558] sm:$0xff] }
  0x77   : > { %1215 = vmatpush2.msra.mxu1 %v893_v15  ;;  %1139 = vmatprep.subr.mxu0 %v630_v16  ;;  %v822_v49 = vld [vmem:[%s8671_s1 + $0xd58] sm:$0xff]  ;;  %v565_v50 = vld [vmem:[%s8671_s1 + $0x550] sm:$0xff]  ;;  %v520_v16 = vld [vmem:[%s8671_s1 + $0x3e8] sm:$0xff] }
  0x78   : > { %1216 = vmatprep.subr.mxu1 %v886_v17  ;;  %1140 = vmatpush2.msra.mxu0 %v629_v18  ;;  %v821_v51 = vld [vmem:[%s8671_s1 + $0xd50] sm:$0xff]  ;;  %v558_v52 = vld [vmem:[%s8671_s1 + $0x518] sm:$0xff]  ;;  %v776_v17 = vld [vmem:[%s8671_s1 + $0xbe8] sm:$0xff] }
  0x79   : > { %1217 = vmatpush2.msra.mxu1 %v885_v19  ;;  %1141 = vmatprep.subr.mxu0 %v622_v20  ;;  %v814_v53 = vld [vmem:[%s8671_s1 + $0xd18] sm:$0xff]  ;;  %v557_v54 = vld [vmem:[%s8671_s1 + $0x510] sm:$0xff]  ;;  %v519_v18 = vld [vmem:[%s8671_s1 + $0x3e0] sm:$0xff] }
  0x7a   : > { %1218 = vmatprep.subr.mxu1 %v878_v21  ;;  %1142 = vmatpush2.msra.mxu0 %v621_v22  ;;  %v813_v55 = vld [vmem:[%s8671_s1 + $0xd10] sm:$0xff]  ;;  %v550_v56 = vld [vmem:[%s8671_s1 + $0x4d8] sm:$0xff]  ;;  %v775_v19 = vld [vmem:[%s8671_s1 + $0xbe0] sm:$0xff] }
  0x7b   : > { %1219 = vmatpush2.msra.mxu1 %v877_v23  ;;  %1143 = vmatprep.subr.mxu0 %v614_v24  ;;  %v806_v57 = vld [vmem:[%s8671_s1 + $0xcd8] sm:$0xff]  ;;  %v549_v59 = vld [vmem:[%s8671_s1 + $0x4d0] sm:$0xff]  ;;  %v768_v20 = vld [vmem:[%s8671_s1 + $0xba8] sm:$0xff] }
  0x7c   : > { %1220 = vmatprep.subr.mxu1 %v870_v25  ;;  %1144 = vmatpush2.msra.mxu0 %v613_v26  ;;  %v805_v60 = vld [vmem:[%s8671_s1 + $0xcd0] sm:$0xff]  ;;  %v542_v62 = vld [vmem:[%s8671_s1 + $0x498] sm:$0xff]  ;;  %v504_v21 = vld [vmem:[%s8671_s1 + $0x368] sm:$0xff] }
  0x7d   : > { %1221 = vmatpush2.msra.mxu1 %v869_v27  ;;  %1145 = vmatprep.subr.mxu0 %v606_v28  ;;  %v798_v0 = vld [vmem:[%s8671_s1 + $0xc98] sm:$0xff]  ;;  %v541_v4 = vld [vmem:[%s8671_s1 + $0x490] sm:$0xff]  ;;  %v760_v22 = vld [vmem:[%s8671_s1 + $0xb68] sm:$0xff] }
  0x7e   : > { %1222 = vmatprep.subr.mxu1 %v862_v29  ;;  %1146 = vmatpush2.msra.mxu0 %v605_v30  ;;  %v5795_v3 = vld [vmem:[%s5397_s15 + $0x38] sm:$0xff]  ;;  %v797_v6 = vld [vmem:[%s8671_s1 + $0xc90] sm:$0xff]  ;;  %v759_v23 = vld [vmem:[%s8671_s1 + $0xb60] sm:$0xff] }
  0x7f   : > { %1223 = vmatpush2.msra.mxu1 %v861_v31  ;;  %1147 = vmatprep.subr.mxu0 %v598_v32  ;;  %v534_v7 = vld [vmem:[%s8671_s1 + $0x458] sm:$0xff]  ;;  %v5808_v8 = vld [vmem:[%s5397_s15 + $0x30] sm:$0xff]  ;;  %v496_v24 = vld [vmem:[%s8671_s1 + $0x328] sm:$0xff] }
  0x80   : > { %1224 = vmatprep.subr.mxu1 %v854_v33  ;;  %1148 = vmatpush2.msra.mxu0 %v597_v34  ;;  %v790_v9 = vld [vmem:[%s8671_s1 + $0xc58] sm:$0xff]  ;;  %v533_v10 = vld [vmem:[%s8671_s1 + $0x450] sm:$0xff]  ;;  %v752_v25 = vld [vmem:[%s8671_s1 + $0xb28] sm:$0xff] }
  0x81   : > { %1225 = vmatpush2.msra.mxu1 %v853_v35  ;;  %1149 = vmatprep.subr.mxu0 %v590_v36  ;;  %v789_v11 = vld [vmem:[%s8671_s1 + $0xc50] sm:$0xff]  ;;  %v526_v12 = vld [vmem:[%s8671_s1 + $0x418] sm:$0xff]  ;;  %v495_v26 = vld [vmem:[%s8671_s1 + $0x320] sm:$0xff] }
  0x82   : > { %1226 = vmatprep.subr.mxu1 %v846_v37  ;;  %1150 = vmatpush2.msra.mxu0 %v589_v38  ;;  %v782_v13 = vld [vmem:[%s8671_s1 + $0xc18] sm:$0xff]  ;;  %v525_v14 = vld [vmem:[%s8671_s1 + $0x410] sm:$0xff]  ;;  %v751_v27 = vld [vmem:[%s8671_s1 + $0xb20] sm:$0xff] }
  0x83   : > { %1227 = vmatpush2.msra.mxu1 %v845_v39  ;;  %1151 = vmatprep.subr.mxu0 %v582_v40  ;;  %v781_v15 = vld [vmem:[%s8671_s1 + $0xc10] sm:$0xff]  ;;  %v488_v28 = vld [vmem:[%s8671_s1 + $0x2e8] sm:$0xff]  ;;  %v487_v30 = vld [vmem:[%s8671_s1 + $0x2e0] sm:$0xff] }
  0x84   : > { %1228 = vmatprep.subr.mxu1 %v838_v41  ;;  %1152 = vmatpush2.msra.mxu0 %v581_v42  ;;  %v744_v29 = vld [vmem:[%s8671_s1 + $0xae8] sm:$0xff]  ;;  %v743_v31 = vld [vmem:[%s8671_s1 + $0xae0] sm:$0xff] }
  0x85   : > { %1229 = vmatpush2.msra.mxu1 %v837_v43  ;;  %1153 = vmatprep.subr.mxu0 %v574_v44  ;;  %v480_v32 = vld [vmem:[%s8671_s1 + $0x2a8] sm:$0xff]  ;;  %v479_v34 = vld [vmem:[%s8671_s1 + $0x2a0] sm:$0xff] }
  0x86   : > { %1230 = vmatprep.subr.mxu1 %v830_v45  ;;  %1154 = vmatpush2.msra.mxu0 %v573_v46  ;;  %v736_v33 = vld [vmem:[%s8671_s1 + $0xaa8] sm:$0xff]  ;;  %v735_v35 = vld [vmem:[%s8671_s1 + $0xaa0] sm:$0xff] }
  0x87   : > { %1231 = vmatpush2.msra.mxu1 %v829_v47  ;;  %1155 = vmatprep.subr.mxu0 %v566_v48  ;;  %v472_v36 = vld [vmem:[%s8671_s1 + $0x268] sm:$0xff]  ;;  %v471_v38 = vld [vmem:[%s8671_s1 + $0x260] sm:$0xff] }
  0x88   : > { %1232 = vmatprep.subr.mxu1 %v822_v49  ;;  %1156 = vmatpush2.msra.mxu0 %v565_v50  ;;  %v728_v37 = vld [vmem:[%s8671_s1 + $0xa68] sm:$0xff]  ;;  %v727_v39 = vld [vmem:[%s8671_s1 + $0xa60] sm:$0xff] }
  0x89   : > { %1233 = vmatpush2.msra.mxu1 %v821_v51  ;;  %1157 = vmatprep.subr.mxu0 %v558_v52  ;;  %v464_v40 = vld [vmem:[%s8671_s1 + $0x228] sm:$0xff]  ;;  %v463_v42 = vld [vmem:[%s8671_s1 + $0x220] sm:$0xff] }
  0x8a   : > { %1234 = vmatprep.subr.mxu1 %v814_v53  ;;  %1158 = vmatpush2.msra.mxu0 %v557_v54  ;;  %v720_v41 = vld [vmem:[%s8671_s1 + $0xa28] sm:$0xff]  ;;  %v719_v43 = vld [vmem:[%s8671_s1 + $0xa20] sm:$0xff] }
  0x8b   : > { %1235 = vmatpush2.msra.mxu1 %v813_v55  ;;  %1159 = vmatprep.subr.mxu0 %v550_v56  ;;  %v456_v44 = vld [vmem:[%s8671_s1 + $0x1e8] sm:$0xff]  ;;  %v455_v46 = vld [vmem:[%s8671_s1 + $0x1e0] sm:$0xff] }
  0x8c   : > { %1236 = vmatprep.subr.mxu1 %v806_v57  ;;  %1019 = vmatprep.mubr.f32.mxu0 %v5776_v58  ;;  %v712_v45 = vld [vmem:[%s8671_s1 + $0x9e8] sm:$0xff]  ;;  %v711_v47 = vld [vmem:[%s8671_s1 + $0x9e0] sm:$0xff] }
  0x8d   : > { %1160 = vmatpush2.msra.mxu0 %v549_v59  ;;  %1237 = vmatpush2.msra.mxu1 %v805_v60  ;;  %v448_v48 = vld [vmem:[%s8671_s1 + $0x1a8] sm:$0xff]  ;;  %v447_v50 = vld [vmem:[%s8671_s1 + $0x1a0] sm:$0xff] }
  0x8e   : > { %1020 = vmatmul.mubr.f32.gmra.mxu0 %v5785_v61  ;;  %1161 = vmatprep.subr.mxu0 %v542_v62  ;;  %v704_v49 = vld [vmem:[%s8671_s1 + $0x9a8] sm:$0xff]  ;;  %v703_v51 = vld [vmem:[%s8671_s1 + $0x9a0] sm:$0xff] }
  0x8f   : > { %1238 = vmatprep.subr.mxu1 %v798_v0  ;;  %1096 = vmatprep.mubr.f32.mxu1 %v5795_v3  ;;  %v440_v52 = vld [vmem:[%s8671_s1 + $0x168] sm:$0xff]  ;;  %v439_v54 = vld [vmem:[%s8671_s1 + $0x160] sm:$0xff] }
  0x90   : > { %1162 = vmatpush2.msra.mxu0 %v541_v4  ;;  %1239 = vmatpush2.msra.mxu1 %v797_v6  ;;  %v696_v53 = vld [vmem:[%s8671_s1 + $0x968] sm:$0xff]  ;;  %v695_v55 = vld [vmem:[%s8671_s1 + $0x960] sm:$0xff] }
  0x91   : > { %1163 = vmatprep.subr.mxu0 %v534_v7  ;;  %1097 = vmatmul.mubr.f32.gmra.mxu1 %v5808_v8  ;;  %v432_v56 = vld [vmem:[%s8671_s1 + $0x128] sm:$0xff]  ;;  %v431_v59 = vld [vmem:[%s8671_s1 + $0x120] sm:$0xff] }
  0x92   : > { %1240 = vmatprep.subr.mxu1 %v790_v9  ;;  %1164 = vmatpush2.msra.mxu0 %v533_v10  ;;  %v688_v57 = vld [vmem:[%s8671_s1 + $0x928] sm:$0xff]  ;;  %v687_v60 = vld [vmem:[%s8671_s1 + $0x920] sm:$0xff] }
  0x93   : > { %1241 = vmatpush2.msra.mxu1 %v789_v11  ;;  %1165 = vmatprep.subr.mxu0 %v526_v12  ;;  %v424_v62 = vld [vmem:[%s8671_s1 + $0xe8] sm:$0xff]  ;;  %v423_v4 = vld [vmem:[%s8671_s1 + $0xe0] sm:$0xff] }
  0x94   : > { %1242 = vmatprep.subr.mxu1 %v782_v13  ;;  %1166 = vmatpush2.msra.mxu0 %v525_v14  ;;  %v680_v0 = vld [vmem:[%s8671_s1 + $0x8e8] sm:$0xff]  ;;  %v679_v6 = vld [vmem:[%s8671_s1 + $0x8e0] sm:$0xff] }
  0x95   : > { %1167 = vmatprep.mubr.f32.mxu0 %v5415_v63  ;;  %1243 = vmatpush2.msra.mxu1 %v781_v15  ;;  %v512_v63 = vld [vmem:[%s8671_s1 + $0x3a8] sm:$0xff]  ;;  %v415_v10 = vld [vmem:[%s8671_s1 + $0xa0] sm:$0xff] }
  0x96   : > { %1168 = vmatmul.mubr.f32.vlgmr.msra.gmra.mxu0 %v5421_v1  ;;  %1244 = vmatprep.mubr.f32.mxu1 %v5424_v2  ;;  %v511_v1 = vld [vmem:[%s8671_s1 + $0x3a0] sm:$0xff]  ;;  %v416_v7 = vld [vmem:[%s8671_s1 + $0xa8] sm:$0xff] }
  0x97   : > { %1257 = vmatprep.subr.mxu0 %v520_v16  ;;  %1334 = vmatprep.subr.mxu1 %v776_v17  ;;  %v767_v2 = vld [vmem:[%s8671_s1 + $0xba0] sm:$0xff]  ;;  %v672_v9 = vld [vmem:[%s8671_s1 + $0x8a8] sm:$0xff] }
  0x98   : > { %1245 = vmatmul.mubr.f32.vlgmr.msra.gmra.mxu1 %v5434_v5  ;;  %1258 = vmatpush1.msra.mxu0 %v519_v18  ;;  %v503_v5 = vld [vmem:[%s8671_s1 + $0x360] sm:$0xff]  ;;  %v408_v12 = vld [vmem:[%s8671_s1 + $0x68] sm:$0xff] }
  0x99   : > { %1335 = vmatpush1.msra.mxu1 %v775_v19  ;;  %1259 = vmatprep.subr.mxu0 %v512_v63  ;;  %v671_v11 = vld [vmem:[%s8671_s1 + $0x8a0] sm:$0xff]  ;;  %v664_v13 = vld [vmem:[%s8671_s1 + $0x868] sm:$0xff] }
  0x9a   : > { %1336 = vmatprep.subr.mxu1 %v768_v20  ;;  %1260 = vmatpush1.msra.mxu0 %v511_v1  ;;  %v407_v14 = vld [vmem:[%s8671_s1 + $0x60] sm:$0xff]  ;;  %v400_v16 = vld [vmem:[%s8671_s1 + $0x28] sm:$0xff] }
  0x9b   : > { %1337 = vmatpush1.msra.mxu1 %v767_v2  ;;  %1261 = vmatprep.subr.mxu0 %v504_v21  ;;  %v663_v15 = vld [vmem:[%s8671_s1 + $0x860] sm:$0xff]  ;;  %v656_v17 = vld [vmem:[%s8671_s1 + $0x828] sm:$0xff] }
  0x9c   : > { %1338 = vmatprep.subr.mxu1 %v760_v22  ;;  %1262 = vmatpush1.msra.mxu0 %v503_v5  ;;  %v399_v18 = vld [vmem:[%s8671_s1 + $0x20] sm:$0xff]  ;;  %v648_v63 = vld [vmem:[%s8671_s1 + $0x7e8] sm:$0xff] }
  0x9d   : > { %1339 = vmatpush1.msra.mxu1 %v759_v23  ;;  %1263 = vmatprep.subr.mxu0 %v496_v24  ;;  %v655_v19 = vld [vmem:[%s8671_s1 + $0x820] sm:$0xff]  ;;  %v904_v20 = vld [vmem:[%s8671_s1 + $0xfe8] sm:$0xff] }
  0x9e   : > { %1340 = vmatprep.subr.mxu1 %v752_v25  ;;  %1264 = vmatpush1.msra.mxu0 %v495_v26  ;;  %v647_v1 = vld [vmem:[%s8671_s1 + $0x7e0] sm:$0xff]  ;;  %v640_v21 = vld [vmem:[%s8671_s1 + $0x7a8] sm:$0xff] }
  0x9f   : > { %1341 = vmatpush1.msra.mxu1 %v751_v27  ;;  %1265 = vmatprep.subr.mxu0 %v488_v28  ;;  %v903_v2 = vld [vmem:[%s8671_s1 + $0xfe0] sm:$0xff]  ;;  %v896_v22 = vld [vmem:[%s8671_s1 + $0xfa8] sm:$0xff] }
  0xa0   : > { %1342 = vmatprep.subr.mxu1 %v744_v29  ;;  %1266 = vmatpush1.msra.mxu0 %v487_v30  ;;  %v639_v5 = vld [vmem:[%s8671_s1 + $0x7a0] sm:$0xff]  ;;  %v632_v24 = vld [vmem:[%s8671_s1 + $0x768] sm:$0xff] }
  0xa1   : > { %1343 = vmatpush1.msra.mxu1 %v743_v31  ;;  %1267 = vmatprep.subr.mxu0 %v480_v32  ;;  %v895_v23 = vld [vmem:[%s8671_s1 + $0xfa0] sm:$0xff]  ;;  %v888_v25 = vld [vmem:[%s8671_s1 + $0xf68] sm:$0xff] }
  0xa2   : > { %1344 = vmatprep.subr.mxu1 %v736_v33  ;;  %1268 = vmatpush1.msra.mxu0 %v479_v34  ;;  %v631_v26 = vld [vmem:[%s8671_s1 + $0x760] sm:$0xff]  ;;  %v624_v28 = vld [vmem:[%s8671_s1 + $0x728] sm:$0xff] }
  0xa3   : > { %1345 = vmatpush1.msra.mxu1 %v735_v35  ;;  %1269 = vmatprep.subr.mxu0 %v472_v36  ;;  %v887_v27 = vld [vmem:[%s8671_s1 + $0xf60] sm:$0xff]  ;;  %v880_v29 = vld [vmem:[%s8671_s1 + $0xf28] sm:$0xff] }
  0xa4   : > { %1346 = vmatprep.subr.mxu1 %v728_v37  ;;  %1270 = vmatpush1.msra.mxu0 %v471_v38  ;;  %v623_v30 = vld [vmem:[%s8671_s1 + $0x720] sm:$0xff]  ;;  %v616_v32 = vld [vmem:[%s8671_s1 + $0x6e8] sm:$0xff] }
  0xa5   : > { %1347 = vmatpush1.msra.mxu1 %v727_v39  ;;  %1271 = vmatprep.subr.mxu0 %v464_v40  ;;  %v879_v31 = vld [vmem:[%s8671_s1 + $0xf20] sm:$0xff]  ;;  %v872_v33 = vld [vmem:[%s8671_s1 + $0xee8] sm:$0xff] }
  0xa6   : > { %1348 = vmatprep.subr.mxu1 %v720_v41  ;;  %1272 = vmatpush1.msra.mxu0 %v463_v42  ;;  %v615_v34 = vld [vmem:[%s8671_s1 + $0x6e0] sm:$0xff]  ;;  %v608_v36 = vld [vmem:[%s8671_s1 + $0x6a8] sm:$0xff] }
  0xa7   : > { %1349 = vmatpush1.msra.mxu1 %v719_v43  ;;  %1273 = vmatprep.subr.mxu0 %v456_v44  ;;  %v871_v35 = vld [vmem:[%s8671_s1 + $0xee0] sm:$0xff]  ;;  %v864_v37 = vld [vmem:[%s8671_s1 + $0xea8] sm:$0xff] }
  0xa8   : > { %1350 = vmatprep.subr.mxu1 %v712_v45  ;;  %1274 = vmatpush1.msra.mxu0 %v455_v46  ;;  %v607_v38 = vld [vmem:[%s8671_s1 + $0x6a0] sm:$0xff]  ;;  %v600_v40 = vld [vmem:[%s8671_s1 + $0x668] sm:$0xff] }
  0xa9   : > { %1351 = vmatpush1.msra.mxu1 %v711_v47  ;;  %1275 = vmatprep.subr.mxu0 %v448_v48  ;;  %v863_v39 = vld [vmem:[%s8671_s1 + $0xea0] sm:$0xff]  ;;  %v856_v41 = vld [vmem:[%s8671_s1 + $0xe68] sm:$0xff] }
  0xaa   : > { %1352 = vmatprep.subr.mxu1 %v704_v49  ;;  %1276 = vmatpush1.msra.mxu0 %v447_v50  ;;  %v599_v42 = vld [vmem:[%s8671_s1 + $0x660] sm:$0xff]  ;;  %v592_v44 = vld [vmem:[%s8671_s1 + $0x628] sm:$0xff] }
  0xab   : > { %1353 = vmatpush1.msra.mxu1 %v703_v51  ;;  %1277 = vmatprep.subr.mxu0 %v440_v52  ;;  %v855_v43 = vld [vmem:[%s8671_s1 + $0xe60] sm:$0xff]  ;;  %v848_v45 = vld [vmem:[%s8671_s1 + $0xe28] sm:$0xff] }
  0xac   : > { %1354 = vmatprep.subr.mxu1 %v696_v53  ;;  %1278 = vmatpush1.msra.mxu0 %v439_v54  ;;  %v591_v46 = vld [vmem:[%s8671_s1 + $0x620] sm:$0xff]  ;;  %v584_v48 = vld [vmem:[%s8671_s1 + $0x5e8] sm:$0xff] }
  0xad   : > { %1355 = vmatpush1.msra.mxu1 %v695_v55  ;;  %1279 = vmatprep.subr.mxu0 %v432_v56  ;;  %v847_v47 = vld [vmem:[%s8671_s1 + $0xe20] sm:$0xff]  ;;  %v840_v49 = vld [vmem:[%s8671_s1 + $0xde8] sm:$0xff] }
  0xae   : > { %1356 = vmatprep.subr.mxu1 %v688_v57  ;;  %1280 = vmatpush1.msra.mxu0 %v431_v59  ;;  %v583_v50 = vld [vmem:[%s8671_s1 + $0x5e0] sm:$0xff]  ;;  %v576_v52 = vld [vmem:[%s8671_s1 + $0x5a8] sm:$0xff] }
  0xaf   : > { %1357 = vmatpush1.msra.mxu1 %v687_v60  ;;  %1281 = vmatprep.subr.mxu0 %v424_v62  ;;  %v839_v51 = vld [vmem:[%s8671_s1 + $0xde0] sm:$0xff]  ;;  %v832_v53 = vld [vmem:[%s8671_s1 + $0xda8] sm:$0xff] }
  0xb0   : > { %1358 = vmatprep.subr.mxu1 %v680_v0  ;;  %1282 = vmatpush1.msra.mxu0 %v423_v4  ;;  %v575_v54 = vld [vmem:[%s8671_s1 + $0x5a0] sm:$0xff]  ;;  %v568_v56 = vld [vmem:[%s8671_s1 + $0x568] sm:$0xff] }
  0xb1   : > { %1359 = vmatpush1.msra.mxu1 %v679_v6  ;;  %1283 = vmatprep.subr.mxu0 %v416_v7  ;;  %v831_v55 = vld [vmem:[%s8671_s1 + $0xda0] sm:$0xff]  ;;  %v824_v57 = vld [vmem:[%s8671_s1 + $0xd68] sm:$0xff] }
  0xb2   : > { %1360 = vmatprep.subr.mxu1 %v672_v9  ;;  %1284 = vmatpush1.msra.mxu0 %v415_v10  ;;  %v567_v59 = vld [vmem:[%s8671_s1 + $0x560] sm:$0xff]  ;;  %v560_v62 = vld [vmem:[%s8671_s1 + $0x528] sm:$0xff] }
  0xb3   : > { %1361 = vmatpush1.msra.mxu1 %v671_v11  ;;  %1285 = vmatprep.subr.mxu0 %v408_v12  ;;  %v823_v60 = vld [vmem:[%s8671_s1 + $0xd60] sm:$0xff]  ;;  %v816_v0 = vld [vmem:[%s8671_s1 + $0xd28] sm:$0xff] }
  0xb4   : > { %1362 = vmatprep.subr.mxu1 %v664_v13  ;;  %1286 = vmatpush1.msra.mxu0 %v407_v14  ;;  %v559_v4 = vld [vmem:[%s8671_s1 + $0x520] sm:$0xff]  ;;  %v552_v7 = vld [vmem:[%s8671_s1 + $0x4e8] sm:$0xff] }
  0xb5   : > { %1363 = vmatpush1.msra.mxu1 %v663_v15  ;;  %1287 = vmatprep.subr.mxu0 %v400_v16  ;;  %v815_v6 = vld [vmem:[%s8671_s1 + $0xd20] sm:$0xff]  ;;  %v808_v9 = vld [vmem:[%s8671_s1 + $0xce8] sm:$0xff] }
  0xb6   : > { %1364 = vmatprep.subr.mxu1 %v656_v17  ;;  %1288 = vmatpush1.msra.mxu0 %v399_v18  ;;  %v551_v10 = vld [vmem:[%s8671_s1 + $0x4e0] sm:$0xff]  ;;  %v544_v12 = vld [vmem:[%s8671_s1 + $0x4a8] sm:$0xff] }
  0xb7   : > { %1365 = vmatpush1.msra.mxu1 %v655_v19  ;;  %1289 = vmatprep.subr.mxu0 %v648_v63  ;;  %v807_v11 = vld [vmem:[%s8671_s1 + $0xce0] sm:$0xff]  ;;  %v800_v13 = vld [vmem:[%s8671_s1 + $0xca8] sm:$0xff] }
  0xb8   : > { %1366 = vmatprep.subr.mxu1 %v904_v20  ;;  %1290 = vmatpush2.msra.mxu0 %v647_v1  ;;  %v543_v14 = vld [vmem:[%s8671_s1 + $0x4a0] sm:$0xff]  ;;  %v536_v16 = vld [vmem:[%s8671_s1 + $0x468] sm:$0xff] }
  0xb9   : > { %1367 = vmatpush2.msra.mxu1 %v903_v2  ;;  %1291 = vmatprep.subr.mxu0 %v640_v21  ;;  %v799_v15 = vld [vmem:[%s8671_s1 + $0xca0] sm:$0xff]  ;;  %v792_v17 = vld [vmem:[%s8671_s1 + $0xc68] sm:$0xff]  ;;  %v522_v21 = vld [vmem:[%s8671_s1 + $0x3f8] sm:$0xff] }
  0xba   : > { %1368 = vmatprep.subr.mxu1 %v896_v22  ;;  %1292 = vmatpush2.msra.mxu0 %v639_v5  ;;  %v535_v18 = vld [vmem:[%s8671_s1 + $0x460] sm:$0xff]  ;;  %v528_v63 = vld [vmem:[%s8671_s1 + $0x428] sm:$0xff]  ;;  %v778_v5 = vld [vmem:[%s8671_s1 + $0xbf8] sm:$0xff] }
  0xbb   : > { %1369 = vmatpush2.msra.mxu1 %v895_v23  ;;  %1293 = vmatprep.subr.mxu0 %v632_v24  ;;  %v791_v19 = vld [vmem:[%s8671_s1 + $0xc60] sm:$0xff]  ;;  %v784_v20 = vld [vmem:[%s8671_s1 + $0xc28] sm:$0xff]  ;;  %v521_v24 = vld [vmem:[%s8671_s1 + $0x3f0] sm:$0xff] }
  0xbc   : > { %1370 = vmatprep.subr.mxu1 %v888_v25  ;;  %1294 = vmatpush2.msra.mxu0 %v631_v26  ;;  %v527_v1 = vld [vmem:[%s8671_s1 + $0x420] sm:$0xff]  ;;  %v6229_v22 = vld [vmem:[%s5397_s15 + $0x8] sm:$0xff]  ;;  %v777_v25 = vld [vmem:[%s8671_s1 + $0xbf0] sm:$0xff] }
  0xbd   : > { %1371 = vmatpush2.msra.mxu1 %v887_v27  ;;  %1295 = vmatprep.subr.mxu0 %v624_v28  ;;  %v783_v2 = vld [vmem:[%s8671_s1 + $0xc20] sm:$0xff]  ;;  %v6246_v26 = vld [vmem:[%s5397_s15 + $0x18] sm:$0xff] }
  0xbe   : > { %1372 = vmatprep.subr.mxu1 %v880_v29  ;;  %1296 = vmatpush2.msra.mxu0 %v623_v30  ;;  %v6236_v23 = vld [vmem:[%s5397_s15] sm:$0xff]  ;;  %v514_v27 = vld [vmem:[%s8671_s1 + $0x3b8] sm:$0xff]  ;;  %v6256_v29 = vld [vmem:[%s5397_s15 + $0x10] sm:$0xff] }
  0xbf   : > { %1373 = vmatpush2.msra.mxu1 %v879_v31  ;;  %1297 = vmatprep.subr.mxu0 %v616_v32  ;;  %v770_v28 = vld [vmem:[%s8671_s1 + $0xbb8] sm:$0xff]  ;;  %v513_v30 = vld [vmem:[%s8671_s1 + $0x3b0] sm:$0xff] }
  0xc0   : > { %1374 = vmatprep.subr.mxu1 %v872_v33  ;;  %1298 = vmatpush2.msra.mxu0 %v615_v34  ;;  %v769_v31 = vld [vmem:[%s8671_s1 + $0xbb0] sm:$0xff]  ;;  %v506_v32 = vld [vmem:[%s8671_s1 + $0x378] sm:$0xff] }
  0xc1   : > { %1375 = vmatpush2.msra.mxu1 %v871_v35  ;;  %1299 = vmatprep.subr.mxu0 %v608_v36  ;;  %v762_v33 = vld [vmem:[%s8671_s1 + $0xb78] sm:$0xff]  ;;  %v505_v34 = vld [vmem:[%s8671_s1 + $0x370] sm:$0xff] }
  0xc2   : > { %1376 = vmatprep.subr.mxu1 %v864_v37  ;;  %1300 = vmatpush2.msra.mxu0 %v607_v38  ;;  %v761_v35 = vld [vmem:[%s8671_s1 + $0xb70] sm:$0xff]  ;;  %v498_v36 = vld [vmem:[%s8671_s1 + $0x338] sm:$0xff] }
  0xc3   : > { %1377 = vmatpush2.msra.mxu1 %v863_v39  ;;  %1301 = vmatprep.subr.mxu0 %v600_v40  ;;  %v754_v37 = vld [vmem:[%s8671_s1 + $0xb38] sm:$0xff]  ;;  %v497_v38 = vld [vmem:[%s8671_s1 + $0x330] sm:$0xff] }
  0xc4   : > { %1378 = vmatprep.subr.mxu1 %v856_v41  ;;  %1302 = vmatpush2.msra.mxu0 %v599_v42  ;;  %v753_v39 = vld [vmem:[%s8671_s1 + $0xb30] sm:$0xff]  ;;  %v490_v40 = vld [vmem:[%s8671_s1 + $0x2f8] sm:$0xff] }
  0xc5   : > { %1379 = vmatpush2.msra.mxu1 %v855_v43  ;;  %1303 = vmatprep.subr.mxu0 %v592_v44  ;;  %v746_v41 = vld [vmem:[%s8671_s1 + $0xaf8] sm:$0xff]  ;;  %v489_v42 = vld [vmem:[%s8671_s1 + $0x2f0] sm:$0xff] }
  0xc6   : > { %1380 = vmatprep.subr.mxu1 %v848_v45  ;;  %1173 = vmatprep.mubr.f32.mxu0 %v5776_v58  ;;  %v745_v43 = vld [vmem:[%s8671_s1 + $0xaf0] sm:$0xff]  ;;  %v482_v44 = vld [vmem:[%s8671_s1 + $0x2b8] sm:$0xff] }
  0xc7   : > { %1304 = vmatpush2.msra.mxu0 %v591_v46  ;;  %1381 = vmatpush2.msra.mxu1 %v847_v47  ;;  %v738_v45 = vld [vmem:[%s8671_s1 + $0xab8] sm:$0xff]  ;;  %v909_v46 = vlaneseq  ;;  %v481_v47 = vld [vmem:[%s8671_s1 + $0x2b0] sm:$0xff] }
  0xc8   : > { %1174 = vmatmul.mubr.f32.gmra.mxu0 %v5785_v61  ;;  %1305 = vmatprep.subr.mxu0 %v584_v48  ;;  %v737_v48 = vld [vmem:[%s8671_s1 + $0xab0] sm:$0xff] }
  0xc9   : > { %1382 = vmatprep.subr.mxu1 %v840_v49  ;;  %1250 = vmatprep.mubr.f32.mxu1 %v5795_v3  ;;  %v474_v49 = vld [vmem:[%s8671_s1 + $0x278] sm:$0xff] }
  0xca   : > { %1306 = vmatpush2.msra.mxu0 %v583_v50  ;;  %1383 = vmatpush2.msra.mxu1 %v839_v51  ;;  %v730_v50 = vld [vmem:[%s8671_s1 + $0xa78] sm:$0xff]  ;;  %v473_v51 = vld [vmem:[%s8671_s1 + $0x270] sm:$0xff] }
  0xcb   : > { %1307 = vmatprep.subr.mxu0 %v576_v52  ;;  %1251 = vmatmul.mubr.f32.gmra.mxu1 %v5808_v8  ;;  %v729_v52 = vld [vmem:[%s8671_s1 + $0xa70] sm:$0xff] }
  0xcc   : > { %1384 = vmatprep.subr.mxu1 %v832_v53  ;;  %1308 = vmatpush2.msra.mxu0 %v575_v54  ;;  %v466_v53 = vld [vmem:[%s8671_s1 + $0x238] sm:$0xff] }
  0xcd   : > { %1385 = vmatpush2.msra.mxu1 %v831_v55  ;;  %1309 = vmatprep.subr.mxu0 %v568_v56  ;;  %v722_v54 = vld [vmem:[%s8671_s1 + $0xa38] sm:$0xff]  ;;  %v6331_v55 = vshrl.u32 %v909_v46, 7  ;;  %v465_v56 = vld [vmem:[%s8671_s1 + $0x230] sm:$0xff] }
  0xce   : > { %1386 = vmatprep.subr.mxu1 %v824_v57  ;;  %1310 = vmatpush2.msra.mxu0 %v567_v59  ;;  %v721_v57 = vld [vmem:[%s8671_s1 + $0xa30] sm:$0xff]  ;;  %v458_v59 = vld [vmem:[%s8671_s1 + $0x1f8] sm:$0xff] }
  0xcf   : > { %1387 = vmatpush2.msra.mxu1 %v823_v60  ;;  %1311 = vmatprep.subr.mxu0 %v560_v62  ;;  %v714_v60 = vld [vmem:[%s8671_s1 + $0x9f8] sm:$0xff]  ;;  %v6346_v62 = vsub.s32 3, %v6331_v55 }
  0xd0   : > { %1388 = vmatprep.subr.mxu1 %v816_v0  ;;  %1312 = vmatpush2.msra.mxu0 %v559_v4  ;;  %v457_v0 = vld [vmem:[%s8671_s1 + $0x1f0] sm:$0xff]  ;;  %v890_v46 = vld [vmem:[%s8671_s1 + $0xf78] sm:$0xff] }
  0xd1   : > { %1389 = vmatpush2.msra.mxu1 %v815_v6  ;;  %1313 = vmatprep.subr.mxu0 %v552_v7  ;;  %v713_v4 = vld [vmem:[%s8671_s1 + $0x9f0] sm:$0xff]  ;;  %v1741_v6 = vld [vmem:[%s8674_s4] sm:$0xf]  ;;  %v450_v7 = vld [vmem:[%s8671_s1 + $0x1b8] sm:$0xff] }
  0xd2   : > { %1390 = vmatprep.subr.mxu1 %v808_v9  ;;  %1314 = vmatpush2.msra.mxu0 %v551_v10  ;;  %v706_v9 = vld [vmem:[%s8671_s1 + $0x9b8] sm:$0xff]  ;;  %v6364_v10 = vrot.slane %v1741_v6, %v6346_v62 }
  0xd3   : > { %1391 = vmatpush2.msra.mxu1 %v807_v11  ;;  %1315 = vmatprep.subr.mxu0 %v544_v12  ;;  %v449_v11 = vld [vmem:[%s8671_s1 + $0x1b0] sm:$0xff]  ;;  %v602_v6 = vld [vmem:[%s8671_s1 + $0x678] sm:$0xff] }
  0xd4   : > { %1392 = vmatprep.subr.mxu1 %v800_v13  ;;  %1316 = vmatpush2.msra.mxu0 %v543_v14  ;;  %v705_v12 = vld [vmem:[%s8671_s1 + $0x9b0] sm:$0xff]  ;;  %v442_v13 = vld [vmem:[%s8671_s1 + $0x178] sm:$0xff] }
  0xd5   : > { %1393 = vmatpush2.msra.mxu1 %v799_v15  ;;  %1317 = vmatprep.subr.mxu0 %v536_v16  ;;  %v698_v14 = vld [vmem:[%s8671_s1 + $0x978] sm:$0xff]  ;;  %v441_v15 = vld [vmem:[%s8671_s1 + $0x170] sm:$0xff] }
  0xd6   : > { %1394 = vmatprep.subr.mxu1 %v792_v17  ;;  %1318 = vmatpush2.msra.mxu0 %v535_v18  ;;  %v697_v16 = vld [vmem:[%s8671_s1 + $0x970] sm:$0xff]  ;;  %v434_v17 = vld [vmem:[%s8671_s1 + $0x138] sm:$0xff] }
  0xd7   : > { %1395 = vmatpush2.msra.mxu1 %v791_v19  ;;  %1319 = vmatprep.subr.mxu0 %v528_v63  ;;  %v690_v18 = vld [vmem:[%s8671_s1 + $0x938] sm:$0xff]  ;;  %v433_v19 = vld [vmem:[%s8671_s1 + $0x130] sm:$0xff] }
  0xd8   : > { %1396 = vmatprep.subr.mxu1 %v784_v20  ;;  %1320 = vmatpush2.msra.mxu0 %v527_v1  ;;  %v689_v63 = vld [vmem:[%s8671_s1 + $0x930] sm:$0xff]  ;;  %v426_v20 = vld [vmem:[%s8671_s1 + $0xf8] sm:$0xff] }
  0xd9   : > { %1321 = vmatprep.mubr.f32.mxu0 %v6229_v22  ;;  %1397 = vmatpush2.msra.mxu1 %v783_v2  ;;  %v682_v1 = vld [vmem:[%s8671_s1 + $0x8f8] sm:$0xff]  ;;  %v425_v2 = vld [vmem:[%s8671_s1 + $0xf0] sm:$0xff] }
  0xda   : > { %1322 = vmatmul.mubr.f32.vlgmr.msra.gmra.mxu0 %v6236_v23  ;;  %1398 = vmatprep.mubr.f32.mxu1 %v6246_v26 }
  0xdb   : > { %1411 = vmatprep.subr.mxu0 %v522_v21  ;;  %1488 = vmatprep.subr.mxu1 %v778_v5  ;;  %v681_v21 = vld [vmem:[%s8671_s1 + $0x8f0] sm:$0xff]  ;;  %v418_v5 = vld [vmem:[%s8671_s1 + $0xb8] sm:$0xff] }
  0xdc   : > { %1399 = vmatmul.mubr.f32.vlgmr.msra.gmra.mxu1 %v6256_v29  ;;  %1412 = vmatpush1.msra.mxu0 %v521_v24  ;;  %v674_v24 = vld [vmem:[%s8671_s1 + $0x8b8] sm:$0xff] }
  0xdd   : > { %1489 = vmatpush1.msra.mxu1 %v777_v25  ;;  %1413 = vmatprep.subr.mxu0 %v514_v27  ;;  %v417_v25 = vld [vmem:[%s8671_s1 + $0xb0] sm:$0xff] }
  0xde   : > { %1490 = vmatprep.subr.mxu1 %v770_v28  ;;  %1414 = vmatpush1.msra.mxu0 %v513_v30  ;;  %v673_v27 = vld [vmem:[%s8671_s1 + $0x8b0] sm:$0xff]  ;;  %v410_v28 = vld [vmem:[%s8671_s1 + $0x78] sm:$0xff] }
  0xdf   : > { %1491 = vmatpush1.msra.mxu1 %v769_v31  ;;  %1415 = vmatprep.subr.mxu0 %v506_v32  ;;  %v666_v30 = vld [vmem:[%s8671_s1 + $0x878] sm:$0xff]  ;;  %v409_v31 = vld [vmem:[%s8671_s1 + $0x70] sm:$0xff] }
  0xe0   : > { %1492 = vmatprep.subr.mxu1 %v762_v33  ;;  %1416 = vmatpush1.msra.mxu0 %v505_v34  ;;  %v665_v32 = vld [vmem:[%s8671_s1 + $0x870] sm:$0xff]  ;;  %v402_v33 = vld [vmem:[%s8671_s1 + $0x38] sm:$0xff] }
  0xe1   : > { %1493 = vmatpush1.msra.mxu1 %v761_v35  ;;  %1417 = vmatprep.subr.mxu0 %v498_v36  ;;  %v658_v34 = vld [vmem:[%s8671_s1 + $0x838] sm:$0xff]  ;;  %v401_v35 = vld [vmem:[%s8671_s1 + $0x30] sm:$0xff] }
  0xe2   : > { %1494 = vmatprep.subr.mxu1 %v754_v37  ;;  %1418 = vmatpush1.msra.mxu0 %v497_v38  ;;  %v657_v36 = vld [vmem:[%s8671_s1 + $0x830] sm:$0xff]  ;;  %v650_v37 = vld [vmem:[%s8671_s1 + $0x7f8] sm:$0xff] }
  0xe3   : > { %1495 = vmatpush1.msra.mxu1 %v753_v39  ;;  %1419 = vmatprep.subr.mxu0 %v490_v40  ;;  %v906_v38 = vld [vmem:[%s8671_s1 + $0xff8] sm:$0xff]  ;;  %v649_v39 = vld [vmem:[%s8671_s1 + $0x7f0] sm:$0xff] }
  0xe4   : > { %1496 = vmatprep.subr.mxu1 %v746_v41  ;;  %1420 = vmatpush1.msra.mxu0 %v489_v42  ;;  %v905_v40 = vld [vmem:[%s8671_s1 + $0xff0] sm:$0xff]  ;;  %v642_v41 = vld [vmem:[%s8671_s1 + $0x7b8] sm:$0xff] }
  0xe5   : > { %1497 = vmatpush1.msra.mxu1 %v745_v43  ;;  %1421 = vmatprep.subr.mxu0 %v482_v44  ;;  %v898_v42 = vld [vmem:[%s8671_s1 + $0xfb8] sm:$0xff]  ;;  %v641_v43 = vld [vmem:[%s8671_s1 + $0x7b0] sm:$0xff] }
  0xe6   : > { %1498 = vmatprep.subr.mxu1 %v738_v45  ;;  %1422 = vmatpush1.msra.mxu0 %v481_v47  ;;  %v897_v44 = vld [vmem:[%s8671_s1 + $0xfb0] sm:$0xff]  ;;  %v634_v45 = vld [vmem:[%s8671_s1 + $0x778] sm:$0xff] }
  0xe7   : > { %1499 = vmatpush1.msra.mxu1 %v737_v48  ;;  %1423 = vmatprep.subr.mxu0 %v474_v49  ;;  %v633_v47 = vld [vmem:[%s8671_s1 + $0x770] sm:$0xff]  ;;  %v626_v49 = vld [vmem:[%s8671_s1 + $0x738] sm:$0xff] }
  0xe8   : > { %1500 = vmatprep.subr.mxu1 %v730_v50  ;;  %1424 = vmatpush1.msra.mxu0 %v473_v51  ;;  %v889_v48 = vld [vmem:[%s8671_s1 + $0xf70] sm:$0xff]  ;;  %v882_v50 = vld [vmem:[%s8671_s1 + $0xf38] sm:$0xff] }
  0xe9   : > { %1501 = vmatpush1.msra.mxu1 %v729_v52  ;;  %1425 = vmatprep.subr.mxu0 %v466_v53  ;;  %v625_v51 = vld [vmem:[%s8671_s1 + $0x730] sm:$0xff]  ;;  %v618_v53 = vld [vmem:[%s8671_s1 + $0x6f8] sm:$0xff] }
  0xea   : > { %1502 = vmatprep.subr.mxu1 %v722_v54  ;;  %1426 = vmatpush1.msra.mxu0 %v465_v56  ;;  %v881_v52 = vld [vmem:[%s8671_s1 + $0xf30] sm:$0xff]  ;;  %v874_v54 = vld [vmem:[%s8671_s1 + $0xef8] sm:$0xff] }
  0xeb   : > { %1503 = vmatpush1.msra.mxu1 %v721_v57  ;;  %1427 = vmatprep.subr.mxu0 %v458_v59  ;;  %v617_v56 = vld [vmem:[%s8671_s1 + $0x6f0] sm:$0xff]  ;;  %v610_v59 = vld [vmem:[%s8671_s1 + $0x6b8] sm:$0xff] }
  0xec   : > { %1504 = vmatprep.subr.mxu1 %v714_v60  ;;  %1428 = vmatpush1.msra.mxu0 %v457_v0  ;;  %v873_v57 = vld [vmem:[%s8671_s1 + $0xef0] sm:$0xff]  ;;  %v866_v60 = vld [vmem:[%s8671_s1 + $0xeb8] sm:$0xff] }
  0xed   : > { %1505 = vmatpush1.msra.mxu1 %v713_v4  ;;  %1429 = vmatprep.subr.mxu0 %v450_v7  ;;  %v609_v0 = vld [vmem:[%s8671_s1 + $0x6b0] sm:$0xff]  ;;  %v858_v7 = vld [vmem:[%s8671_s1 + $0xe78] sm:$0xff] }
  0xee   : > { %1506 = vmatprep.subr.mxu1 %v706_v9  ;;  %1430 = vmatpush1.msra.mxu0 %v449_v11  ;;  %v865_v4 = vld [vmem:[%s8671_s1 + $0xeb0] sm:$0xff] }
  0xef   : > { %1507 = vmatpush1.msra.mxu1 %v705_v12  ;;  %1431 = vmatprep.subr.mxu0 %v442_v13  ;;  %v601_v9 = vld [vmem:[%s8671_s1 + $0x670] sm:$0xff]  ;;  %v594_v12 = vld [vmem:[%s8671_s1 + $0x638] sm:$0xff] }
  0xf0   : > { %1508 = vmatprep.subr.mxu1 %v698_v14  ;;  %1432 = vmatpush1.msra.mxu0 %v441_v15  ;;  %v857_v11 = vld [vmem:[%s8671_s1 + $0xe70] sm:$0xff]  ;;  %v850_v13 = vld [vmem:[%s8671_s1 + $0xe38] sm:$0xff] }
  0xf1   : > { %1509 = vmatpush1.msra.mxu1 %v697_v16  ;;  %1433 = vmatprep.subr.mxu0 %v434_v17  ;;  %v593_v14 = vld [vmem:[%s8671_s1 + $0x630] sm:$0xff]  ;;  %v586_v16 = vld [vmem:[%s8671_s1 + $0x5f8] sm:$0xff] }
  0xf2   : > { %1510 = vmatprep.subr.mxu1 %v690_v18  ;;  %1434 = vmatpush1.msra.mxu0 %v433_v19  ;;  %v849_v15 = vld [vmem:[%s8671_s1 + $0xe30] sm:$0xff]  ;;  %v842_v17 = vld [vmem:[%s8671_s1 + $0xdf8] sm:$0xff] }
  0xf3   : > { %1511 = vmatpush1.msra.mxu1 %v689_v63  ;;  %1435 = vmatprep.subr.mxu0 %v426_v20  ;;  %v585_v18 = vld [vmem:[%s8671_s1 + $0x5f0] sm:$0xff]  ;;  %v834_v19 = vld [vmem:[%s8671_s1 + $0xdb8] sm:$0xff] }
  0xf4   : > { %1512 = vmatprep.subr.mxu1 %v682_v1  ;;  %1436 = vmatpush1.msra.mxu0 %v425_v2  ;;  %v577_v63 = vld [vmem:[%s8671_s1 + $0x5b0] sm:$0xff]  ;;  %v570_v20 = vld [vmem:[%s8671_s1 + $0x578] sm:$0xff] }
  0xf5   : > { %1513 = vmatpush1.msra.mxu1 %v681_v21  ;;  %1437 = vmatprep.subr.mxu0 %v418_v5  ;;  %v826_v1 = vld [vmem:[%s8671_s1 + $0xd78] sm:$0xff]  ;;  %v825_v2 = vld [vmem:[%s8671_s1 + $0xd70] sm:$0xff] }
  0xf6   : > { %1514 = vmatprep.subr.mxu1 %v674_v24  ;;  %1438 = vmatpush1.msra.mxu0 %v417_v25  ;;  %v562_v21 = vld [vmem:[%s8671_s1 + $0x538] sm:$0xff]  ;;  %v561_v24 = vld [vmem:[%s8671_s1 + $0x530] sm:$0xff] }
  0xf7   : > { %1515 = vmatpush1.msra.mxu1 %v673_v27  ;;  %1439 = vmatprep.subr.mxu0 %v410_v28  ;;  %v818_v5 = vld [vmem:[%s8671_s1 + $0xd38] sm:$0xff]  ;;  %v817_v25 = vld [vmem:[%s8671_s1 + $0xd30] sm:$0xff] }
  0xf8   : > { %1516 = vmatprep.subr.mxu1 %v666_v30  ;;  %1440 = vmatpush1.msra.mxu0 %v409_v31  ;;  %v554_v27 = vld [vmem:[%s8671_s1 + $0x4f8] sm:$0xff]  ;;  %v553_v30 = vld [vmem:[%s8671_s1 + $0x4f0] sm:$0xff] }
  0xf9   : > { %1517 = vmatpush1.msra.mxu1 %v665_v32  ;;  %1441 = vmatprep.subr.mxu0 %v402_v33  ;;  %v810_v28 = vld [vmem:[%s8671_s1 + $0xcf8] sm:$0xff]  ;;  %v809_v31 = vld [vmem:[%s8671_s1 + $0xcf0] sm:$0xff] }
  0xfa   : > { %1518 = vmatprep.subr.mxu1 %v658_v34  ;;  %1442 = vmatpush1.msra.mxu0 %v401_v35  ;;  %v546_v32 = vld [vmem:[%s8671_s1 + $0x4b8] sm:$0xff]  ;;  %v545_v34 = vld [vmem:[%s8671_s1 + $0x4b0] sm:$0xff] }
  0xfb   : > { %1519 = vmatpush1.msra.mxu1 %v657_v36  ;;  %1443 = vmatprep.subr.mxu0 %v650_v37  ;;  %v802_v33 = vld [vmem:[%s8671_s1 + $0xcb8] sm:$0xff]  ;;  %v801_v35 = vld [vmem:[%s8671_s1 + $0xcb0] sm:$0xff] }
  0xfc   : > { %1520 = vmatprep.subr.mxu1 %v906_v38  ;;  %1444 = vmatpush2.msra.mxu0 %v649_v39  ;;  %v538_v36 = vld [vmem:[%s8671_s1 + $0x478] sm:$0xff]  ;;  %v6623_v38 = vsub.s32 1, %v6331_v55  ;;  %v537_v39 = vld [vmem:[%s8671_s1 + $0x470] sm:$0xff] }
  0xfd   : > { %1521 = vmatpush2.msra.mxu1 %v905_v40  ;;  %1445 = vmatprep.subr.mxu0 %v642_v41  ;;  %v794_v37 = vld [vmem:[%s8671_s1 + $0xc78] sm:$0xff]  ;;  %v793_v40 = vld [vmem:[%s8671_s1 + $0xc70] sm:$0xff]  ;;  %v6634_v41 = vld [vmem:[%s8672_s2] sm:$0xff] }
  0xfe   : > { %1522 = vmatprep.subr.mxu1 %v898_v42  ;;  %1446 = vmatpush2.msra.mxu0 %v641_v43  ;;  %v530_v43 = vld [vmem:[%s8671_s1 + $0x438] sm:$0xff] }
  0xff   : > { %1523 = vmatpush2.msra.mxu1 %v897_v44  ;;  %1447 = vmatprep.subr.mxu0 %v634_v45  ;;  %v786_v44 = vld [vmem:[%s8671_s1 + $0xc38] sm:$0xff]  ;;  %v529_v45 = vld [vmem:[%s8671_s1 + $0x430] sm:$0xff] }
 0x100   : > { %1524 = vmatprep.subr.mxu1 %v890_v46  ;;  %1448 = vmatpush2.msra.mxu0 %v633_v47  ;;  %v785_v46 = vld [vmem:[%s8671_s1 + $0xc30] sm:$0xff]  ;;  %v6652_v47 = vrot.slane %v6634_v41, %v6623_v38 }
 0x101   : > { %1525 = vmatpush2.msra.mxu1 %v889_v48  ;;  %1449 = vmatprep.subr.mxu0 %v626_v49 }
 0x102   : > { %1526 = vmatprep.subr.mxu1 %v882_v50  ;;  %1450 = vmatpush2.msra.mxu0 %v625_v51  ;;  %v1674_v50 = vld [vmem:[%s8673_s3 + $0x1e8] sm:$0xff]  ;;  %v1676_v51 = vld [vmem:[%s8673_s3 + $0x1f8] sm:$0xff] }
 0x103   : > { %1527 = vmatpush2.msra.mxu1 %v881_v52  ;;  %1451 = vmatprep.subr.mxu0 %v618_v53  ;;  %v1673_v52 = vld [vmem:[%s8673_s3 + $0x1e0] sm:$0xff]  ;;  %v1675_v53 = vld [vmem:[%s8673_s3 + $0x1f0] sm:$0xff] }
 0x104   : > { %1528 = vmatprep.subr.mxu1 %v874_v54  ;;  %1452 = vmatpush2.msra.mxu0 %v617_v56  ;;  %v1672_v54 = vld [vmem:[%s8673_s3 + $0x1d8] sm:$0xff] }
 0x105   : > { %1529 = vmatpush2.msra.mxu1 %v873_v57  ;;  %1453 = vmatprep.subr.mxu0 %v610_v59  ;;  %v4895_v59 = vld [vmem:[%s5397_s15 + $0x28] sm:$0xff] }
 0x106   : > { %1530 = vmatprep.subr.mxu1 %v866_v60  ;;  %1454 = vmatpush2.msra.mxu0 %v609_v0  ;;  %v4896_v60 = vld [vmem:[%s5397_s15 + $0x38] sm:$0xff]  ;;  %v1666_v0 = vld [vmem:[%s8673_s3 + $0x1a8] sm:$0xff] }
 0x107   : > { %1531 = vmatpush2.msra.mxu1 %v865_v4  ;;  %1455 = vmatprep.subr.mxu0 %v602_v6  ;;  %v1668_v4 = vld [vmem:[%s8673_s3 + $0x1b8] sm:$0xff]  ;;  %v1665_v6 = vld [vmem:[%s8673_s3 + $0x1a0] sm:$0xff] }
 0x108   : > { %1532 = vmatprep.subr.mxu1 %v858_v7  ;;  %1456 = vmatpush2.msra.mxu0 %v601_v9  ;;  %v1667_v7 = vld [vmem:[%s8673_s3 + $0x1b0] sm:$0xff]  ;;  %v4897_v9 = vld [vmem:[%s5397_s15 + $0x20] sm:$0xff] }
 0x109   : > { %1533 = vmatpush2.msra.mxu1 %v857_v11  ;;  %1327 = vmatprep.mubr.f32.mxu0 %v5776_v58  ;;  %v841_v58 = vld [vmem:[%s8671_s1 + $0xdf0] sm:$0xff] }
 0x10a   : > { %1457 = vmatprep.subr.mxu0 %v594_v12  ;;  %1534 = vmatprep.subr.mxu1 %v850_v13  ;;  %v4898_v11 = vld [vmem:[%s5397_s15 + $0x30] sm:$0xff]  ;;  %v1662_v12 = vld [vmem:[%s8673_s3 + $0x188] sm:$0xff]  ;;  %v1664_v13 = vld [vmem:[%s8673_s3 + $0x198] sm:$0xff] }
 0x10b   : > { %1328 = vmatmul.mubr.f32.gmra.mxu0 %v5785_v61  ;;  %1535 = vmatpush2.msra.mxu1 %v849_v15  ;;  %v578_v61 = vld [vmem:[%s8671_s1 + $0x5b8] sm:$0xff]  ;;  %v1663_v15 = vld [vmem:[%s8673_s3 + $0x190] sm:$0xff] }
 0x10c   : > { %1458 = vmatpush2.msra.mxu0 %v593_v14  ;;  %1404 = vmatprep.mubr.f32.mxu1 %v5795_v3  ;;  %v833_v3 = vld [vmem:[%s8671_s1 + $0xdb0] sm:$0xff]  ;;  %v1661_v14 = vld [vmem:[%s8673_s3 + $0x180] sm:$0xff] }
 0x10d   : > { %1459 = vmatprep.subr.mxu0 %v586_v16  ;;  %1536 = vmatprep.subr.mxu1 %v842_v17  ;;  %v1658_v17 = vld [vmem:[%s8673_s3 + $0x168] sm:$0xff] }
 0x10e   : > { %1405 = vmatmul.mubr.f32.gmra.mxu1 %v5808_v8  ;;  %1460 = vmatpush2.msra.mxu0 %v585_v18  ;;  %v569_v8 = vld [vmem:[%s8671_s1 + $0x570] sm:$0xff]  ;;  %v1660_v18 = vld [vmem:[%s8673_s3 + $0x178] sm:$0xff] }
 0x10f   : > { %1537 = vmatpush2.msra.mxu1 %v841_v58  ;;  %1461 = vmatprep.subr.mxu0 %v578_v61  ;;  %v1657_v58 = vld [vmem:[%s8673_s3 + $0x160] sm:$0xff]  ;;  %v1659_v61 = vld [vmem:[%s8673_s3 + $0x170] sm:$0xff] }
 0x110   : > { %1538 = vmatprep.subr.mxu1 %v834_v19  ;;  %1462 = vmatpush2.msra.mxu0 %v577_v63  ;;  %v1654_v19 = vld [vmem:[%s8673_s3 + $0x148] sm:$0xff]  ;;  %v1656_v63 = vld [vmem:[%s8673_s3 + $0x158] sm:$0xff] }
 0x111   : > { %1539 = vmatpush2.msra.mxu1 %v833_v3  ;;  %1463 = vmatprep.subr.mxu0 %v570_v20  ;;  %v1653_v3 = vld [vmem:[%s8673_s3 + $0x140] sm:$0xff]  ;;  %v1655_v20 = vld [vmem:[%s8673_s3 + $0x150] sm:$0xff] }
 0x112   : > { %1540 = vmatprep.subr.mxu1 %v826_v1  ;;  %1464 = vmatpush2.msra.mxu0 %v569_v8  ;;  %v6636_v42 = vpop.f32.mrf.mxu0  ;;  %v1650_v1 = vld [vmem:[%s8673_s3 + $0x128] sm:$0xff]  ;;  %v1652_v8 = vld [vmem:[%s8673_s3 + $0x138] sm:$0xff] }
 0x113   : > { %1541 = vmatpush2.msra.mxu1 %v825_v2  ;;  %1465 = vmatprep.subr.mxu0 %v562_v21  ;;  %v1649_v2 = vld [vmem:[%s8673_s3 + $0x120] sm:$0xff]  ;;  %v1651_v21 = vld [vmem:[%s8673_s3 + $0x130] sm:$0xff] }
 0x114   : > { %1542 = vmatprep.subr.mxu1 %v818_v5  ;;  %1466 = vmatpush2.msra.mxu0 %v561_v24  ;;  %v6654_v48 = vpop.f32.mrf.mxu1  ;;  %v1017_v49 = vpop.f32.mrf.mxu0  ;;  %v1646_v5 = vld [vmem:[%s8673_s3 + $0x108] sm:$0xff]  ;;  %v1648_v24 = vld [vmem:[%s8673_s3 + $0x118] sm:$0xff] }
 0x115   : > { %1543 = vmatpush2.msra.mxu1 %v817_v25  ;;  %1467 = vmatprep.subr.mxu0 %v554_v27  ;;  %v1645_v25 = vld [vmem:[%s8673_s3 + $0x100] sm:$0xff]  ;;  %v1647_v27 = vld [vmem:[%s8673_s3 + $0x110] sm:$0xff] }
 0x116   : > { %1544 = vmatprep.subr.mxu1 %v810_v28  ;;  %1468 = vmatpush2.msra.mxu0 %v553_v30  ;;  %v1094_v56 = vpop.f32.mrf.mxu1  ;;  %v1642_v28 = vld [vmem:[%s8673_s3 + $0xe8] sm:$0xff]  ;;  %v1644_v30 = vld [vmem:[%s8673_s3 + $0xf8] sm:$0xff] }
 0x117   : > { %1545 = vmatpush2.msra.mxu1 %v809_v31  ;;  %1469 = vmatprep.subr.mxu0 %v546_v32  ;;  %v1641_v31 = vld [vmem:[%s8673_s3 + $0xe0] sm:$0xff]  ;;  %v1643_v32 = vld [vmem:[%s8673_s3 + $0xf0] sm:$0xff] }
 0x118   : > { %1546 = vmatprep.subr.mxu1 %v802_v33  ;;  %1470 = vmatpush2.msra.mxu0 %v545_v34  ;;  %v1638_v33 = vld [vmem:[%s8673_s3 + $0xc8] sm:$0xff]  ;;  %v1640_v34 = vld [vmem:[%s8673_s3 + $0xd8] sm:$0xff] }
 0x119   : > { %1547 = vmatpush2.msra.mxu1 %v801_v35  ;;  %1471 = vmatprep.subr.mxu0 %v538_v36  ;;  %v1637_v35 = vld [vmem:[%s8673_s3 + $0xc0] sm:$0xff]  ;;  %v1639_v36 = vld [vmem:[%s8673_s3 + $0xd0] sm:$0xff] }
 0x11a   : > { %1548 = vmatprep.subr.mxu1 %v794_v37  ;;  %1472 = vmatpush2.msra.mxu0 %v537_v39  ;;  %v1634_v37 = vld [vmem:[%s8673_s3 + $0xa8] sm:$0xff]  ;;  %v1636_v39 = vld [vmem:[%s8673_s3 + $0xb8] sm:$0xff] }
 0x11b   : > { %1549 = vmatpush2.msra.mxu1 %v793_v40  ;;  %1473 = vmatprep.subr.mxu0 %v530_v43  ;;  %v1633_v40 = vld [vmem:[%s8673_s3 + $0xa0] sm:$0xff]  ;;  %v1635_v43 = vld [vmem:[%s8673_s3 + $0xb0] sm:$0xff] }
 0x11c   : > { %1550 = vmatprep.subr.mxu1 %v786_v44  ;;  %1474 = vmatpush2.msra.mxu0 %v529_v45  ;;  %v1630_v44 = vld [vmem:[%s8673_s3 + $0x88] sm:$0xff]  ;;  %v1632_v45 = vld [vmem:[%s8673_s3 + $0x98] sm:$0xff] }
 0x11d   : > { %1475 = vmatprep.mubr.f32.mxu0 %v6229_v22  ;;  %1551 = vmatpush2.msra.mxu1 %v785_v46  ;;  %v1018_v22 = vadd.f32 %v1017_v49, %v6652_v47  ;;  %v1629_v46 = vld [vmem:[%s8673_s3 + $0x80] sm:$0xff]  ;;  %v1631_v49 = vld [vmem:[%s8673_s3 + $0x90] sm:$0xff] }
 0x11e   : > { %1552 = vmatprep.mubr.f32.mxu1 %v6246_v26  ;;  %1476 = vmatmul.mubr.f32.vlgmr.msra.gmra.mxu0 %v6236_v23  ;;  %v1670_v26 = vld [vmem:[%s8673_s3 + $0x1c8] sm:$0xff]  ;;  %v1669_v23 = vld [vmem:[%s8673_s3 + $0x1c0] sm:$0xff] }
 0x11f   : > { %1553 = vmatmul.mubr.f32.vlgmr.msra.gmra.mxu1 %v6256_v29  ;;  %1763 = vmatprep.subr.mxu0 %v1674_v50  ;;  %v1671_v29 = vld [vmem:[%s8673_s3 + $0x1d0] sm:$0xff]  ;;  %v1095_v57 = vadd.f32 %v1094_v56, %v1018_v22  ;;  %v1626_v50 = vld [vmem:[%s8673_s3 + $0x68] sm:$0xff] }
 0x120   : > { %1876 = vmatprep.subr.mxu1 %v1676_v51  ;;  %1764 = vmatpush1.msra.mxu0 %v1673_v52  ;;  %v1628_v51 = vld [vmem:[%s8673_s3 + $0x78] sm:$0xff]  ;;  %v1625_v52 = vld [vmem:[%s8673_s3 + $0x60] sm:$0xff]  ;;  %v1622_v22 = vld [vmem:[%s8673_s3 + $0x48] sm:$0xff] }
 0x121   : > { %1877 = vmatpush1.msra.mxu1 %v1675_v53  ;;  %1765 = vmatprep.subr.mxu0 %v1670_v26  ;;  %v1566_v16 = vmax.f32 %v1095_v57, 0.0  ;;  %v1627_v53 = vld [vmem:[%s8673_s3 + $0x70] sm:$0xff]  ;;  %v1624_v26 = vld [vmem:[%s8673_s3 + $0x58] sm:$0xff]  ;;  %v1617_v57 = vld [vmem:[%s8673_s3 + $0x20] sm:$0xff] }
 0x122   : > { %1878 = vmatprep.subr.mxu1 %v1672_v54  ;;  %1481 = vmatprep.mubr.f32.mxu0 %v4895_v59  ;;  %v1621_v54 = vld [vmem:[%s8673_s3 + $0x40] sm:$0xff]  ;;  %v1623_v56 = vld [vmem:[%s8673_s3 + $0x50] sm:$0xff] }
 0x123   : > { %1558 = vmatprep.mubr.f32.mxu1 %v4896_v60  ;;  %1766 = vmatpush1.msra.mxu0 %v1669_v23  ;;  %v1618_v23 = vld [vmem:[%s8673_s3 + $0x28] sm:$0xff]  ;;  %v1619_v59 = vld [vmem:[%s8673_s3 + $0x30] sm:$0xff] }
 0x124   : > { %1879 = vmatpush1.msra.mxu1 %v1671_v29  ;;  %1482 = vmatmul.mubr.f32.gmra.mxu0 %v4897_v9  ;;  %v1620_v29 = vld [vmem:[%s8673_s3 + $0x38] sm:$0xff]  ;;  %v1614_v60 = vld [vmem:[%s8673_s3 + $0x8] sm:$0xff] }
 0x125   : > { %1559 = vmatmul.mubr.f32.gmra.mxu1 %v4898_v11  ;;  %1767 = vmatprep.subr.mxu0 %v1666_v0  ;;  %v1616_v0 = vld [vmem:[%s8673_s3 + $0x18] sm:$0xff]  ;;  %v1737_v11 = vld [vmem:[%s8673_s3 + $0x3e0] sm:$0xff] }
 0x126   : > { %1880 = vmatprep.subr.mxu1 %v1668_v4  ;;  %1768 = vmatpush1.msra.mxu0 %v1665_v6  ;;  %v1613_v4 = vld [vmem:[%s8673_s3] sm:$0xff]  ;;  %v1615_v6 = vld [vmem:[%s8673_s3 + $0x10] sm:$0xff]  ;;  %v1740_v9 = vld [vmem:[%s8673_s3 + $0x3f8] sm:$0xff] }
 0x127   : > { %1881 = vmatpush1.msra.mxu1 %v1667_v7  ;;  %1769 = vmatprep.subr.mxu0 %v1662_v12  ;;  %v1738_v7 = vld [vmem:[%s8673_s3 + $0x3e8] sm:$0xff]  ;;  %v1739_v12 = vld [vmem:[%s8673_s3 + $0x3f0] sm:$0xff] }
 0x128   : > { %1882 = vmatprep.subr.mxu1 %v1664_v13  ;;  %1770 = vmatpush1.msra.mxu0 %v1661_v14  ;;  %v1734_v13 = vld [vmem:[%s8673_s3 + $0x3c8] sm:$0xff]  ;;  %v1736_v14 = vld [vmem:[%s8673_s3 + $0x3d8] sm:$0xff] }
 0x129   : > { %1883 = vmatpush1.msra.mxu1 %v1663_v15  ;;  %1771 = vmatprep.subr.mxu0 %v1658_v17  ;;  %v1733_v15 = vld [vmem:[%s8673_s3 + $0x3c0] sm:$0xff]  ;;  %v1730_v17 = vld [vmem:[%s8673_s3 + $0x3a8] sm:$0xff] }
 0x12a   : > { %1884 = vmatprep.subr.mxu1 %v1660_v18  ;;  %1772 = vmatpush1.msra.mxu0 %v1657_v58  ;;  %v1732_v18 = vld [vmem:[%s8673_s3 + $0x3b8] sm:$0xff]  ;;  %v1729_v58 = vld [vmem:[%s8673_s3 + $0x3a0] sm:$0xff] }
 0x12b   : > { %1827 = vmatprep.mubr.f32.mxu0 %v1566_v16  ;;  %1885 = vmatpush1.msra.mxu1 %v1659_v61  ;;  %v1731_v61 = vld [vmem:[%s8673_s3 + $0x3b0] sm:$0xff] }
 0x12c   : > { %1940 = vmatprep.mubr.f32.mxu1 %v1566_v16  ;;  %1773 = vmatprep.subr.mxu0 %v1654_v19  ;;  %v1735_v16 = vld [vmem:[%s8673_s3 + $0x3d0] sm:$0xff]  ;;  %v1726_v19 = vld [vmem:[%s8673_s3 + $0x388] sm:$0xff] }
 0x12d   : > { %1886 = vmatprep.subr.mxu1 %v1656_v63  ;;  %1774 = vmatpush1.msra.mxu0 %v1653_v3  ;;  %v1728_v63 = vld [vmem:[%s8673_s3 + $0x398] sm:$0xff]  ;;  %v1725_v3 = vld [vmem:[%s8673_s3 + $0x380] sm:$0xff] }
 0x12e   : > { %1887 = vmatpush1.msra.mxu1 %v1655_v20  ;;  %1775 = vmatprep.subr.mxu0 %v1650_v1  ;;  %v1727_v20 = vld [vmem:[%s8673_s3 + $0x390] sm:$0xff]  ;;  %v1722_v1 = vld [vmem:[%s8673_s3 + $0x368] sm:$0xff] }
 0x12f   : > { %1888 = vmatprep.subr.mxu1 %v1652_v8  ;;  %1776 = vmatpush1.msra.mxu0 %v1649_v2  ;;  %v1724_v8 = vld [vmem:[%s8673_s3 + $0x378] sm:$0xff]  ;;  %v1721_v2 = vld [vmem:[%s8673_s3 + $0x360] sm:$0xff] }
 0x130   : > { %1889 = vmatpush1.msra.mxu1 %v1651_v21  ;;  %1777 = vmatprep.subr.mxu0 %v1646_v5  ;;  %v1723_v21 = vld [vmem:[%s8673_s3 + $0x370] sm:$0xff]  ;;  %v1718_v5 = vld [vmem:[%s8673_s3 + $0x348] sm:$0xff] }
 0x131   : > { %1890 = vmatprep.subr.mxu1 %v1648_v24  ;;  %1778 = vmatpush1.msra.mxu0 %v1645_v25  ;;  %v1720_v24 = vld [vmem:[%s8673_s3 + $0x358] sm:$0xff]  ;;  %v1717_v25 = vld [vmem:[%s8673_s3 + $0x340] sm:$0xff] }
 0x132   : > { %1891 = vmatpush1.msra.mxu1 %v1647_v27  ;;  %1779 = vmatprep.subr.mxu0 %v1642_v28  ;;  %v1719_v27 = vld [vmem:[%s8673_s3 + $0x350] sm:$0xff]  ;;  %v1714_v28 = vld [vmem:[%s8673_s3 + $0x328] sm:$0xff] }
 0x133   : > { %1892 = vmatprep.subr.mxu1 %v1644_v30  ;;  %1780 = vmatpush1.msra.mxu0 %v1641_v31  ;;  %v1716_v30 = vld [vmem:[%s8673_s3 + $0x338] sm:$0xff]  ;;  %v1713_v31 = vld [vmem:[%s8673_s3 + $0x320] sm:$0xff] }
 0x134   : > { %1893 = vmatpush1.msra.mxu1 %v1643_v32  ;;  %1781 = vmatprep.subr.mxu0 %v1638_v33  ;;  %v1715_v32 = vld [vmem:[%s8673_s3 + $0x330] sm:$0xff]  ;;  %v1710_v33 = vld [vmem:[%s8673_s3 + $0x308] sm:$0xff] }
 0x135   : > { %1894 = vmatprep.subr.mxu1 %v1640_v34  ;;  %1782 = vmatpush1.msra.mxu0 %v1637_v35  ;;  %v1712_v34 = vld [vmem:[%s8673_s3 + $0x318] sm:$0xff]  ;;  %v1709_v35 = vld [vmem:[%s8673_s3 + $0x300] sm:$0xff] }
 0x136   : > { %1895 = vmatpush1.msra.mxu1 %v1639_v36  ;;  %1783 = vmatprep.subr.mxu0 %v1634_v37  ;;  %v1711_v36 = vld [vmem:[%s8673_s3 + $0x310] sm:$0xff]  ;;  %v1706_v37 = vld [vmem:[%s8673_s3 + $0x2e8] sm:$0xff] }
 0x137   : > { %1896 = vmatprep.subr.mxu1 %v1636_v39  ;;  %1784 = vmatpush1.msra.mxu0 %v1633_v40  ;;  %v1708_v39 = vld [vmem:[%s8673_s3 + $0x2f8] sm:$0xff] }
 0x138   : > { %1897 = vmatpush1.msra.mxu1 %v1635_v43  ;;  %1785 = vmatprep.subr.mxu0 %v1630_v44  ;;  %v6960_v43 = vsub.s32 0, %v6331_v55  ;;  %v1705_v44 = vld [vmem:[%s8673_s3 + $0x2e0] sm:$0xff] }
 0x139   : > { %1898 = vmatprep.subr.mxu1 %v1632_v45  ;;  %1786 = vmatpush1.msra.mxu0 %v1629_v46  ;;  %v1707_v45 = vld [vmem:[%s8673_s3 + $0x2f0] sm:$0xff]  ;;  %v1702_v46 = vld [vmem:[%s8673_s3 + $0x2c8] sm:$0xff] }
 0x13a   : > { %1899 = vmatpush1.msra.mxu1 %v1631_v49  ;;  %1787 = vmatprep.subr.mxu0 %v1626_v50  ;;  %v1704_v49 = vld [vmem:[%s8673_s3 + $0x2d8] sm:$0xff] }
 0x13b   : > { %1900 = vmatprep.subr.mxu1 %v1628_v51  ;;  %1788 = vmatpush1.msra.mxu0 %v1625_v52  ;;  %v1701_v51 = vld [vmem:[%s8673_s3 + $0x2c0] sm:$0xff]  ;;  %v1703_v52 = vld [vmem:[%s8673_s3 + $0x2d0] sm:$0xff] }
 0x13c   : > { %1901 = vmatpush1.msra.mxu1 %v1627_v53  ;;  %1789 = vmatprep.subr.mxu0 %v1622_v22  ;;  %v1698_v53 = vld [vmem:[%s8673_s3 + $0x2a8] sm:$0xff]  ;;  %v1700_v22 = vld [vmem:[%s8673_s3 + $0x2b8] sm:$0xff] }
 0x13d   : > { %1902 = vmatprep.subr.mxu1 %v1624_v26  ;;  %1790 = vmatpush1.msra.mxu0 %v1621_v54  ;;  %v912_v54 = vrot.slane %v6634_v41, %v6960_v43 }
 0x13e   : > { %1903 = vmatpush1.msra.mxu1 %v1623_v56  ;;  %1791 = vmatprep.subr.mxu0 %v1618_v23  ;;  %v1697_v56 = vld [vmem:[%s8673_s3 + $0x2a0] sm:$0xff]  ;;  %v1699_v23 = vld [vmem:[%s8673_s3 + $0x2b0] sm:$0xff] }
 0x13f   : > { %1904 = vmatprep.subr.mxu1 %v1620_v29  ;;  %1792 = vmatpush1.msra.mxu0 %v1617_v57  ;;  %v1694_v57 = vld [vmem:[%s8673_s3 + $0x288] sm:$0xff] }
 0x140   : > { %1905 = vmatpush1.msra.mxu1 %v1619_v59  ;;  %1793 = vmatprep.subr.mxu0 %v1614_v60  ;;  %v1696_v59 = vld [vmem:[%s8673_s3 + $0x298] sm:$0xff] }
 0x141   : > { %1906 = vmatprep.subr.mxu1 %v1616_v0  ;;  %1794 = vmatpush1.msra.mxu0 %v1613_v4  ;;  %v1693_v0 = vld [vmem:[%s8673_s3 + $0x280] sm:$0xff]  ;;  %v1695_v4 = vld [vmem:[%s8673_s3 + $0x290] sm:$0xff] }
 0x142   : > { %1907 = vmatpush1.msra.mxu1 %v1615_v6  ;;  %1795 = vmatprep.subr.mxu0 %v1738_v7  ;;  %v1690_v6 = vld [vmem:[%s8673_s3 + $0x268] sm:$0xff]  ;;  %v1692_v7 = vld [vmem:[%s8673_s3 + $0x278] sm:$0xff] }
 0x143   : > { %1908 = vmatprep.subr.mxu1 %v1740_v9  ;;  %1796 = vmatpush2.msra.mxu0 %v1737_v11  ;;  %v7017_v11 = vrot.slane %v6634_v41, %v6346_v62 }
 0x144   : > { %1909 = vmatpush2.msra.mxu1 %v1739_v12  ;;  %1797 = vmatprep.subr.mxu0 %v1734_v13  ;;  %v1016_v12 = vadd.f32 %v6636_v42, %v912_v54  ;;  %v1689_v13 = vld [vmem:[%s8673_s3 + $0x260] sm:$0xff]  ;;  %v1686_v42 = vld [vmem:[%s8673_s3 + $0x248] sm:$0xff] }
 0x145   : > { %1910 = vmatprep.subr.mxu1 %v1736_v14  ;;  %1798 = vmatpush2.msra.mxu0 %v1733_v15  ;;  %v1691_v14 = vld [vmem:[%s8673_s3 + $0x270] sm:$0xff]  ;;  %v7027_v15 = vsub.s32 2, %v6331_v55 }
 0x146   : > { %1911 = vmatpush2.msra.mxu1 %v1735_v16  ;;  %1799 = vmatprep.subr.mxu0 %v1730_v17  ;;  %v1688_v17 = vld [vmem:[%s8673_s3 + $0x258] sm:$0xff] }
 0x147   : > { %1912 = vmatprep.subr.mxu1 %v1732_v18  ;;  %1800 = vmatpush2.msra.mxu0 %v1729_v58  ;;  %v1685_v58 = vld [vmem:[%s8673_s3 + $0x240] sm:$0xff] }
 0x148   : > { %1913 = vmatpush2.msra.mxu1 %v1731_v61  ;;  %1801 = vmatprep.subr.mxu0 %v1726_v19  ;;  %v1687_v61 = vld [vmem:[%s8673_s3 + $0x250] sm:$0xff]  ;;  %v1682_v19 = vld [vmem:[%s8673_s3 + $0x228] sm:$0xff] }
 0x149   : > { %1914 = vmatprep.subr.mxu1 %v1728_v63  ;;  %1802 = vmatpush2.msra.mxu0 %v1725_v3  ;;  %v1684_v63 = vld [vmem:[%s8673_s3 + $0x238] sm:$0xff] }
 0x14a   : > { %1915 = vmatpush2.msra.mxu1 %v1727_v20  ;;  %1803 = vmatprep.subr.mxu0 %v1722_v1  ;;  %v1093_v1 = vadd.f32 %v6654_v48, %v1016_v12  ;;  %v1678_v48 = vld [vmem:[%s8673_s3 + $0x208] sm:$0xff]  ;;  %v2092_v12 = vld [vmem:[%s8675_s5 + $0x38] sm:$0xff] }
 0x14b   : > { %1916 = vmatprep.subr.mxu1 %v1724_v8  ;;  %1804 = vmatpush2.msra.mxu0 %v1721_v2  ;;  %v1681_v8 = vld [vmem:[%s8673_s3 + $0x220] sm:$0xff]  ;;  %v1683_v2 = vld [vmem:[%s8673_s3 + $0x230] sm:$0xff] }
 0x14c   : > { %1917 = vmatpush2.msra.mxu1 %v1723_v21  ;;  %1805 = vmatprep.subr.mxu0 %v1718_v5  ;;  %v7057_v21 = vrot.slane %v6634_v41, %v7027_v15 }
 0x14d   : > { %1918 = vmatprep.subr.mxu1 %v1720_v24  ;;  %1806 = vmatpush2.msra.mxu0 %v1717_v25  ;;  %v1680_v24 = vld [vmem:[%s8673_s3 + $0x218] sm:$0xff] }
 0x14e   : > { %1919 = vmatpush2.msra.mxu1 %v1719_v27  ;;  %1807 = vmatprep.subr.mxu0 %v1714_v28  ;;  %v1021_v40 = vpop.f32.mrf.mxu0  ;;  %v1677_v27 = vld [vmem:[%s8673_s3 + $0x200] sm:$0xff]  ;;  %v1679_v28 = vld [vmem:[%s8673_s3 + $0x210] sm:$0xff] }
 0x14f   : > { %1920 = vmatprep.subr.mxu1 %v1716_v30  ;;  %1808 = vmatpush2.msra.mxu0 %v1713_v31  ;;  %v1022_v18 = vadd.f32 %v1021_v40, %v912_v54  ;;  %v2115_v40 = vld [vmem:[%s8675_s5 + $0xf0] sm:$0xff]  ;;  %v2104_v54 = vld [vmem:[%s8675_s5 + $0x98] sm:$0xff] }
 0x150   : > { %1921 = vmatpush2.msra.mxu1 %v1715_v32  ;;  %1809 = vmatprep.subr.mxu0 %v1710_v33  ;;  %v1023_v26 = vpop.f32.mrf.mxu0  ;;  %v1565_v32 = vmax.f32 %v1093_v1, 0.0  ;;  %v931_v1 = vsub.s32 5, %v6331_v55 }
 0x151   : > { %1922 = vmatprep.subr.mxu1 %v1712_v34  ;;  %1810 = vmatpush2.msra.mxu0 %v1709_v35  ;;  %v6974_v50 = vpop.f32.mrf.mxu1  ;;  %v1024_v9 = vadd.f32 %v1023_v26, %v6652_v47  ;;  %v2105_v26 = vld [vmem:[%s8675_s5 + $0xa0] sm:$0xff] }
 0x152   : > { %1923 = vmatpush2.msra.mxu1 %v1711_v36  ;;  %1811 = vmatprep.subr.mxu0 %v1706_v37  ;;  %v1099_v25 = vadd.f32 %v6974_v50, %v1022_v18  ;;  %v2110_v50 = vld [vmem:[%s8675_s5 + $0xc8] sm:$0xff] }
 0x153   : > { %1924 = vmatprep.subr.mxu1 %v1708_v39  ;;  %1812 = vmatpush2.msra.mxu0 %v1705_v44  ;;  %v1100_v29 = vpop.f32.mrf.mxu1  ;;  %v2116_v39 = vld [vmem:[%s8675_s5 + $0xf8] sm:$0xff]  ;;  %v2114_v44 = vld [vmem:[%s8675_s5 + $0xe8] sm:$0xff] }
 0x154   : > { %1925 = vmatpush2.msra.mxu1 %v1707_v45  ;;  %1813 = vmatprep.subr.mxu0 %v1702_v46  ;;  %v1101_v3 = vadd.f32 %v1100_v29, %v1024_v9  ;;  %v1573_v34 = vmax.f32 %v1099_v25, 0.0  ;;  %v2113_v45 = vld [vmem:[%s8675_s5 + $0xe0] sm:$0xff]  ;;  %v2112_v46 = vld [vmem:[%s8675_s5 + $0xd8] sm:$0xff] }
 0x155   : > { %1926 = vmatprep.subr.mxu1 %v1704_v49  ;;  %1814 = vmatpush2.msra.mxu0 %v1701_v51  ;;  %v2111_v49 = vld [vmem:[%s8675_s5 + $0xd0] sm:$0xff]  ;;  %v2109_v51 = vld [vmem:[%s8675_s5 + $0xc0] sm:$0xff] }
 0x156   : > { %1927 = vmatpush2.msra.mxu1 %v1703_v52  ;;  %v1169_v60 = vpop.f32.mrf.mxu0  ;;  %1815 = vmatprep.subr.mxu0 %v1698_v53  ;;  %v1574_v30 = vmax.f32 %v1101_v3, 0.0  ;;  %v2108_v52 = vld [vmem:[%s8675_s5 + $0xb8] sm:$0xff]  ;;  %v2107_v53 = vld [vmem:[%s8675_s5 + $0xb0] sm:$0xff]  ;;  %v2101_v29 = vld [vmem:[%s8675_s5 + $0x80] sm:$0xff] }
 0x157   : > { %1928 = vmatprep.subr.mxu1 %v1700_v22  ;;  %1816 = vmatpush2.msra.mxu0 %v1697_v56  ;;  %v1170_v33 = vadd.f32 %v1169_v60, %v7057_v21  ;;  %v2106_v22 = vld [vmem:[%s8675_s5 + $0xa8] sm:$0xff]  ;;  %v2103_v56 = vld [vmem:[%s8675_s5 + $0x90] sm:$0xff]  ;;  %v2093_v9 = vld [vmem:[%s8675_s5 + $0x40] sm:$0xff] }
 0x158   : > { %1929 = vmatpush2.msra.mxu1 %v1699_v23  ;;  %1817 = vmatprep.subr.mxu0 %v1694_v57  ;;  %v1246_v47 = vpop.f32.mrf.mxu1  ;;  %v1171_v16 = vpop.f32.mrf.mxu0  ;;  %v2102_v23 = vld [vmem:[%s8675_s5 + $0x88] sm:$0xff]  ;;  %v2100_v57 = vld [vmem:[%s8675_s5 + $0x78] sm:$0xff] }
 0x159   : > { %1930 = vmatprep.subr.mxu1 %v1696_v59  ;;  %1818 = vmatpush2.msra.mxu0 %v1693_v0  ;;  %v1172_v20 = vadd.f32 %v1171_v16, %v7017_v11  ;;  %v1247_v36 = vadd.f32 %v1246_v47, %v1170_v33  ;;  %v2099_v59 = vld [vmem:[%s8675_s5 + $0x70] sm:$0xff]  ;;  %v2098_v60 = vld [vmem:[%s8675_s5 + $0x68] sm:$0xff]  ;;  %v2097_v0 = vld [vmem:[%s8675_s5 + $0x60] sm:$0xff] }
 0x15a   : > { %1931 = vmatpush2.msra.mxu1 %v1695_v4  ;;  %1819 = vmatprep.subr.mxu0 %v1690_v6  ;;  %v1248_v5 = vpop.f32.mrf.mxu1  ;;  %v2096_v4 = vld [vmem:[%s8675_s5 + $0x58] sm:$0xff]  ;;  %v2095_v6 = vld [vmem:[%s8675_s5 + $0x50] sm:$0xff] }
 0x15b   : > { %1932 = vmatprep.subr.mxu1 %v1692_v7  ;;  %1820 = vmatpush2.msra.mxu0 %v1689_v13  ;;  %v1249_v31 = vadd.f32 %v1248_v5, %v1172_v20  ;;  %v1567_v37 = vmax.f32 %v1247_v36, 0.0  ;;  %v2094_v7 = vld [vmem:[%s8675_s5 + $0x48] sm:$0xff]  ;;  %v2091_v13 = vld [vmem:[%s8675_s5 + $0x30] sm:$0xff]  ;;  %v927_v20 = vsub.s32 4, %v6331_v55  ;;  %v2088_v33 = vld [vmem:[%s8675_s5 + $0x18] sm:$0xff] }
 0x15c   : > { %1933 = vmatpush2.msra.mxu1 %v1691_v14  ;;  %1821 = vmatprep.subr.mxu0 %v1686_v42  ;;  %v2090_v14 = vld [vmem:[%s8675_s5 + $0x28] sm:$0xff]  ;;  %v2085_v36 = vld [vmem:[%s8675_s5] sm:$0xff] }
 0x15d   : > { %1934 = vmatprep.subr.mxu1 %v1688_v17  ;;  %1822 = vmatpush2.msra.mxu0 %v1685_v58  ;;  %v1568_v35 = vmax.f32 %v1249_v31, 0.0 }
 0x15e   : > { %1935 = vmatpush2.msra.mxu1 %v1687_v61  ;;  %1823 = vmatprep.subr.mxu0 %v1682_v19 }
 0x15f   : > { %1936 = vmatprep.subr.mxu1 %v1684_v63  ;;  %1824 = vmatpush2.msra.mxu0 %v1681_v8  ;;  %v928_v8 = vrot.slane %v6634_v41, %v927_v20 }
 0x160   : > { %1937 = vmatpush2.msra.mxu1 %v1683_v2  ;;  %1825 = vmatprep.subr.mxu0 %v1678_v48  ;;  %v932_v2 = vrot.slane %v6634_v41, %v931_v1 }
 0x161   : > { %1938 = vmatprep.subr.mxu1 %v1680_v24  ;;  %1826 = vmatpush2.msra.mxu0 %v1677_v27 }
 0x162   : > { %1939 = vmatpush2.msra.mxu1 %v1679_v28  ;;  %1828 = vmatmul.mubr.f32.vlgmr.msra.gmra.mxu0 %v1565_v32 }
 0x163   : > { %1941 = vmatmul.mubr.f32.vlgmr.msra.gmra.mxu1 %v1565_v32  ;;  %1833 = vmatprep.mubr.f32.mxu0 %v1574_v30  ;;  %v2089_v32 = vld [vmem:[%s8675_s5 + $0x20] sm:$0xff] }
 0x164   : > { %1946 = vmatprep.mubr.f32.mxu1 %v1574_v30  ;;  %2129 = vmatprep.subr.mxu0 %v2116_v39 }
 0x165   : > { %4578 = vmatprep.subr.mxu1 %v2116_v39  ;;  %2130 = vmatpush1.msra.mxu0 %v2115_v40 }
 0x166   : > { %1834 = vmatmul.mubr.f32.gmra.mxu0 %v1573_v34  ;;  %4594 = vmatpush1.msra.mxu1 %v2115_v40 }
 0x167   : > { %1947 = vmatmul.mubr.f32.gmra.mxu1 %v1573_v34  ;;  %1839 = vmatprep.mubr.f32.mxu0 %v1568_v35  ;;  %v2087_v34 = vld [vmem:[%s8675_s5 + $0x10] sm:$0xff] }
 0x168   : > { %1952 = vmatprep.mubr.f32.mxu1 %v1568_v35  ;;  %2131 = vmatprep.subr.mxu0 %v2114_v44  ;;  %v2086_v35 = vld [vmem:[%s8675_s5 + $0x8] sm:$0xff] }
 0x169   : > { %4579 = vmatprep.subr.mxu1 %v2114_v44  ;;  %2132 = vmatpush1.msra.mxu0 %v2113_v45 }
 0x16a   : > { %1840 = vmatmul.mubr.f32.gmra.mxu0 %v1567_v37  ;;  %4595 = vmatpush1.msra.mxu1 %v2113_v45 }
 0x16b   : > { %1953 = vmatmul.mubr.f32.gmra.mxu1 %v1567_v37  ;;  %2133 = vmatprep.subr.mxu0 %v2112_v46 }
 0x16c   : > { %4580 = vmatprep.subr.mxu1 %v2112_v46  ;;  %2134 = vmatpush1.msra.mxu0 %v2111_v49 }
 0x16d   : > { %4596 = vmatpush1.msra.mxu1 %v2111_v49  ;;  %2135 = vmatprep.subr.mxu0 %v2110_v50 }
 0x16e   : > { %4581 = vmatprep.subr.mxu1 %v2110_v50  ;;  %2136 = vmatpush1.msra.mxu0 %v2109_v51 }
 0x16f   : > { %4597 = vmatpush1.msra.mxu1 %v2109_v51  ;;  %2137 = vmatprep.subr.mxu0 %v2108_v52 }
 0x170   : > { %4582 = vmatprep.subr.mxu1 %v2108_v52  ;;  %2138 = vmatpush1.msra.mxu0 %v2107_v53 }
 0x171   : > { %4598 = vmatpush1.msra.mxu1 %v2107_v53  ;;  %2139 = vmatprep.subr.mxu0 %v2106_v22  ;;  %v935_v53 = vsub.s32 6, %v6331_v55 }
 0x172   : > { %4583 = vmatprep.subr.mxu1 %v2106_v22  ;;  %2140 = vmatpush1.msra.mxu0 %v2105_v26  ;;  %v939_v22 = vsub.s32 7, %v6331_v55 }
 0x173   : > { %4599 = vmatpush1.msra.mxu1 %v2105_v26  ;;  %2141 = vmatprep.subr.mxu0 %v2104_v54  ;;  %v936_v26 = vrot.slane %v6634_v41, %v935_v53  ;;  %v2505_v53 = vld [vmem:[%s8677_s7 + $0x1b8] sm:$0xff] }
 0x174   : > { %4584 = vmatprep.subr.mxu1 %v2104_v54  ;;  %2142 = vmatpush1.msra.mxu0 %v2103_v56  ;;  %v940_v54 = vrot.slane %v6634_v41, %v939_v22  ;;  %v2502_v22 = vld [vmem:[%s8677_s7 + $0x1a0] sm:$0xff] }
 0x175   : > { %4600 = vmatpush1.msra.mxu1 %v2103_v56  ;;  %2143 = vmatprep.subr.mxu0 %v2102_v23 }
 0x176   : > { %4585 = vmatprep.subr.mxu1 %v2102_v23  ;;  %2144 = vmatpush1.msra.mxu0 %v2101_v29 }
 0x177   : > { %4601 = vmatpush1.msra.mxu1 %v2101_v29  ;;  %2145 = vmatprep.subr.mxu0 %v2100_v57 }
 0x178   : > { %4586 = vmatprep.subr.mxu1 %v2100_v57  ;;  %2146 = vmatpush1.msra.mxu0 %v2099_v59 }
 0x179   : > { %4602 = vmatpush1.msra.mxu1 %v2099_v59  ;;  %2147 = vmatprep.subr.mxu0 %v2098_v60 }
 0x17a   : > { %4587 = vmatprep.subr.mxu1 %v2098_v60  ;;  %2148 = vmatpush1.msra.mxu0 %v2097_v0 }
 0x17b   : > { %4603 = vmatpush1.msra.mxu1 %v2097_v0  ;;  %2149 = vmatprep.subr.mxu0 %v2096_v4 }
 0x17c   : > { %4588 = vmatprep.subr.mxu1 %v2096_v4  ;;  %2150 = vmatpush1.msra.mxu0 %v2095_v6 }
 0x17d   : > { %4604 = vmatpush1.msra.mxu1 %v2095_v6  ;;  %2151 = vmatprep.subr.mxu0 %v2094_v7 }
 0x17e   : > { %4589 = vmatprep.subr.mxu1 %v2094_v7  ;;  %2152 = vmatpush1.msra.mxu0 %v2093_v9 }
 0x17f   : > { %4605 = vmatpush1.msra.mxu1 %v2093_v9  ;;  %2153 = vmatprep.subr.mxu0 %v2092_v12 }
 0x180   : > { %4590 = vmatprep.subr.mxu1 %v2092_v12  ;;  %2154 = vmatpush1.msra.mxu0 %v2091_v13 }
 0x181   : > { %4606 = vmatpush1.msra.mxu1 %v2091_v13  ;;  %2155 = vmatprep.subr.mxu0 %v2090_v14 }
 0x182   : > { %4591 = vmatprep.subr.mxu1 %v2090_v14  ;;  %2156 = vmatpush1.msra.mxu0 %v2089_v32 }
 0x183   : > { %4607 = vmatpush1.msra.mxu1 %v2089_v32  ;;  %2157 = vmatprep.subr.mxu0 %v2088_v33 }
 0x184   : > { %4592 = vmatprep.subr.mxu1 %v2088_v33  ;;  %2158 = vmatpush1.msra.mxu0 %v2087_v34 }
 0x185   : > { %4608 = vmatpush1.msra.mxu1 %v2087_v34  ;;  %2159 = vmatprep.subr.mxu0 %v2086_v35 }
 0x186   : > { %4593 = vmatprep.subr.mxu1 %v2086_v35  ;;  %2160 = vmatpush1.msra.mxu0 %v2085_v36 }
 0x187   : > { %4609 = vmatpush1.msra.mxu1 %v2085_v36 }
 0x188   : > { %v1175_v47 = vpop.f32.mrf.mxu0 }
 0x189   : > { %v1176_v16 = vadd.f32 %v1175_v47, %v7057_v21 }
 0x18a   : > { %v1177_v42 = vpop.f32.mrf.mxu0 }
 0x18b   : > { %v1178_v17 = vadd.f32 %v1177_v42, %v7017_v11  ;;  %v1252_v18 = vpop.f32.mrf.mxu1 }
 0x18c   : > { %v1253_v58 = vadd.f32 %v1252_v18, %v1176_v16  ;;  %v4924_v18 = vmov 0.0  }
 0x18d   : > { %v1254_v61 = vpop.f32.mrf.mxu1 }
 0x18e   : > { %v1255_v19 = vadd.f32 %v1254_v61, %v1178_v17  ;;  %v1575_v63 = vmax.f32 %v1253_v58, 0.0  ;;  %v7184_v58 = vld [vmem:[%s8674_s4] sm:$0xf] }
 0x18f   : > { %v7188_v61 = vrot.slane %v7184_v58, %v6960_v43 }
 0x190   : > { %v1576_v3 = vmax.f32 %v1255_v19, 0.0  ;;  %v7192_v19 = vrot.slane %v7184_v58, %v7027_v15 }
 0x192   : > { %1845 = vmatprep.mubr.f32.mxu0 %v1576_v3  ;;  %1958 = vmatprep.mubr.f32.mxu1 %v1576_v3 }
 0x193   : > { %1846 = vmatmul.mubr.f32.gmra.mxu0 %v1575_v63  ;;  %1959 = vmatmul.mubr.f32.gmra.mxu1 %v1575_v63 }
 0x19a   : > { %v1323_v21 = vpop.f32.mrf.mxu0 }
 0x19b   : > { %v1324_v11 = vadd.f32 %v1323_v21, %v928_v8 }
 0x19c   : > { %v1400_v5 = vpop.f32.mrf.mxu1  ;;  %v1325_v48 = vpop.f32.mrf.mxu0 }
 0x19d   : > { %v1326_v24 = vadd.f32 %v1325_v48, %v932_v2  ;;  %v1401_v25 = vadd.f32 %v1400_v5, %v1324_v11 }
 0x19e   : > { %v1402_v27 = vpop.f32.mrf.mxu1 }
 0x19f   : > { %v1403_v28 = vadd.f32 %v1402_v27, %v1326_v24  ;;  %v1569_v31 = vmax.f32 %v1401_v25, 0.0 }
 0x1a1   : > { %v1570_v30 = vmax.f32 %v1403_v28, 0.0 }
 0x1a3   : > { %1851 = vmatprep.mubr.f32.mxu0 %v1570_v30  ;;  %1964 = vmatprep.mubr.f32.mxu1 %v1570_v30 }
 0x1a4   : > { %1852 = vmatmul.mubr.f32.gmra.mxu0 %v1569_v31  ;;  %1965 = vmatmul.mubr.f32.gmra.mxu1 %v1569_v31 }
 0x1cb   : > { %v1329_v37 = vpop.f32.mrf.mxu0 }
 0x1cc   : > { %v1330_v39 = vadd.f32 %v1329_v37, %v928_v8 }
 0x1cd   : > { %v1331_v40 = vpop.f32.mrf.mxu0 }
 0x1ce   : > { %v1332_v44 = vadd.f32 %v1331_v40, %v932_v2  ;;  %v1406_v45 = vpop.f32.mrf.mxu1  ;;  %v2513_v40 = vld [vmem:[%s8677_s7 + $0x1f8] sm:$0xff] }
 0x1cf   : > { %v1407_v46 = vadd.f32 %v1406_v45, %v1330_v39  ;;  %v2511_v39 = vld [vmem:[%s8677_s7 + $0x1e8] sm:$0xff]  ;;  %2857 = vmatprep.subr.mxu0 %v2513_v40  ;;  %v2512_v45 = vld [vmem:[%s8677_s7 + $0x1f0] sm:$0xff] }
 0x1d0   : > { %v1408_v49 = vpop.f32.mrf.mxu1  ;;  %2600 = vmatprep.subr.mxu1 %v2511_v39  ;;  %v2464_v39 = vld [vmem:[%s8677_s7 + $0x70] sm:$0xff]  ;;  %v2459_v40 = vld [vmem:[%s8677_s7 + $0x48] sm:$0xff] }
 0x1d1   : > { %v1409_v50 = vadd.f32 %v1408_v49, %v1332_v44  ;;  %v1577_v51 = vmax.f32 %v1407_v46, 0.0  ;;  %v2510_v44 = vld [vmem:[%s8677_s7 + $0x1e0] sm:$0xff]  ;;  %v2507_v46 = vld [vmem:[%s8677_s7 + $0x1c8] sm:$0xff]  ;;  %v2509_v49 = vld [vmem:[%s8677_s7 + $0x1d8] sm:$0xff] }
 0x1d3   : > { %v1578_v52 = vmax.f32 %v1409_v50, 0.0  ;;  %v2506_v50 = vld [vmem:[%s8677_s7 + $0x1c0] sm:$0xff] }
 0x1d5   : > { %1857 = vmatprep.mubr.f32.mxu0 %v1578_v52  ;;  %1970 = vmatprep.mubr.f32.mxu1 %v1578_v52  ;;  %v2503_v52 = vld [vmem:[%s8677_s7 + $0x1a8] sm:$0xff] }
 0x1d6   : > { %1858 = vmatmul.mubr.f32.gmra.mxu0 %v1577_v51  ;;  %1971 = vmatmul.mubr.f32.gmra.mxu1 %v1577_v51  ;;  %v2508_v51 = vld [vmem:[%s8677_s7 + $0x1d0] sm:$0xff] }
 0x1de   : > { %v1477_v56 = vpop.f32.mrf.mxu0 }
 0x1df   : > { %v1554_v23 = vpop.f32.mrf.mxu1  ;;  %v1478_v29 = vadd.f32 %v1477_v56, %v936_v26  ;;  %v2501_v56 = vld [vmem:[%s8677_s7 + $0x198] sm:$0xff] }
 0x1e0   : > { %v1479_v57 = vpop.f32.mrf.mxu0 }
 0x1e1   : > { %v1556_v59 = vpop.f32.mrf.mxu1  ;;  %v1480_v60 = vadd.f32 %v1479_v57, %v940_v54  ;;  %v1555_v0 = vadd.f32 %v1554_v23, %v1478_v29  ;;  %v2498_v23 = vld [vmem:[%s8677_s7 + $0x180] sm:$0xff]  ;;  %v2500_v29 = vld [vmem:[%s8677_s7 + $0x190] sm:$0xff]  ;;  %v2495_v57 = vld [vmem:[%s8677_s7 + $0x168] sm:$0xff] }
 0x1e3   : > { %v1557_v4 = vadd.f32 %v1556_v59, %v1480_v60  ;;  %v1571_v13 = vmax.f32 %v1555_v0, 0.0  ;;  %v2497_v59 = vld [vmem:[%s8677_s7 + $0x178] sm:$0xff]  ;;  %v2494_v60 = vld [vmem:[%s8677_s7 + $0x160] sm:$0xff]  ;;  %v2496_v0 = vld [vmem:[%s8677_s7 + $0x170] sm:$0xff] }
 0x1e4   : > { %v1483_v6 = vpop.f32.mrf.mxu0 }
 0x1e5   : > { %v1560_v7 = vpop.f32.mrf.mxu1  ;;  %v1572_v9 = vmax.f32 %v1557_v4, 0.0  ;;  %v1484_v12 = vadd.f32 %v1483_v6, %v936_v26  ;;  %v2504_v26 = vld [vmem:[%s8677_s7 + $0x1b0] sm:$0xff]  ;;  %v2491_v4 = vld [vmem:[%s8677_s7 + $0x148] sm:$0xff]  ;;  %v2493_v6 = vld [vmem:[%s8677_s7 + $0x158] sm:$0xff] }
 0x1e6   : > { %v1485_v14 = vpop.f32.mrf.mxu0 }
 0x1e7   : > { %v1486_v47 = vadd.f32 %v1485_v14, %v940_v54  ;;  %1863 = vmatprep.mubr.f32.mxu0 %v1572_v9  ;;  %1976 = vmatprep.mubr.f32.mxu1 %v1572_v9  ;;  %v1561_v55 = vadd.f32 %v1560_v7, %v1484_v12  ;;  %v1562_v16 = vpop.f32.mrf.mxu1  ;;  %v2499_v54 = vld [vmem:[%s8677_s7 + $0x188] sm:$0xff]  ;;  %v2490_v7 = vld [vmem:[%s8677_s7 + $0x140] sm:$0xff]  ;;  %v2492_v9 = vld [vmem:[%s8677_s7 + $0x150] sm:$0xff] }
 0x1e8   : > { %1864 = vmatmul.mubr.f32.gmra.mxu0 %v1571_v13  ;;  %1977 = vmatmul.mubr.f32.gmra.mxu1 %v1571_v13  ;;  %v2487_v12 = vld [vmem:[%s8677_s7 + $0x128] sm:$0xff]  ;;  %v2489_v13 = vld [vmem:[%s8677_s7 + $0x138] sm:$0xff]  ;;  %v2486_v14 = vld [vmem:[%s8677_s7 + $0x120] sm:$0xff] }
 0x1e9   : > { %v1563_v41 = vadd.f32 %v1562_v16, %v1486_v47  ;;  %v1579_v17 = vmax.f32 %v1561_v55, 0.0  ;;  %v2488_v47 = vld [vmem:[%s8677_s7 + $0x130] sm:$0xff]  ;;  %v2483_v55 = vld [vmem:[%s8677_s7 + $0x108] sm:$0xff]  ;;  %v2485_v16 = vld [vmem:[%s8677_s7 + $0x118] sm:$0xff] }
 0x1eb   : > { %v1580_v42 = vmax.f32 %v1563_v41, 0.0  ;;  %v2482_v41 = vld [vmem:[%s8677_s7 + $0x100] sm:$0xff] }
 0x1ed   : > { %1869 = vmatprep.mubr.f32.mxu0 %v1580_v42  ;;  %1982 = vmatprep.mubr.f32.mxu1 %v1580_v42  ;;  %v2484_v42 = vld [vmem:[%s8677_s7 + $0x110] sm:$0xff] }
 0x1ee   : > { %1870 = vmatmul.mubr.f32.gmra.mxu0 %v1579_v17  ;;  %1983 = vmatmul.mubr.f32.gmra.mxu1 %v1579_v17  ;;  %v2479_v17 = vld [vmem:[%s8677_s7 + $0xe8] sm:$0xff] }
 0x1ef   : > { %2193 = vmatprep.mubr.f32.mxu0 %v4924_v18  ;;  %2289 = vmatprep.mubr.f32.mxu1 %v4924_v18 }
 0x222   : > { %v1829_v63 = vpop.f32.mrf.mxu0 }
 0x223   : > { %v1942_v3 = vpop.f32.mrf.mxu1  ;;  %v1830_v20 = vadd.f32 %v1829_v63, %v7188_v61  ;;  %v2481_v63 = vld [vmem:[%s8677_s7 + $0xf8] sm:$0xff] }
 0x224   : > { %v1943_v1 = vadd.f32 %v1942_v3, %v7192_v19  ;;  %v7196_v8 = vpop.f32.mrf.mxu0  ;;  %v2478_v3 = vld [vmem:[%s8677_s7 + $0xe0] sm:$0xff] }
 0x225   : > { %v7198_v2 = vpop.f32.mrf.mxu1  ;;  %v1989_v21 = vmax.f32 %v1830_v20, 0.0  ;;  %v2480_v20 = vld [vmem:[%s8677_s7 + $0xf0] sm:$0xff] }
 0x226   : > { %v1991_v11 = vmax.f32 %v1943_v1, 0.0  ;;  %v1835_v5 = vpop.f32.mrf.mxu0  ;;  %v2475_v1 = vld [vmem:[%s8677_s7 + $0xc8] sm:$0xff] }
 0x227   : > { %v1948_v48 = vpop.f32.mrf.mxu1  ;;  %v1836_v24 = vadd.f32 %v1835_v5, %v7188_v61  ;;  %2194 = vmatmul.mubr.f32.vlgmr.msra.gmra.mxu0 %v1989_v21  ;;  %v2477_v21 = vld [vmem:[%s8677_s7 + $0xd8] sm:$0xff]  ;;  %v2476_v5 = vld [vmem:[%s8677_s7 + $0xd0] sm:$0xff] }
 0x228   : > { %v1949_v25 = vadd.f32 %v1948_v48, %v7192_v19  ;;  %2290 = vmatmul.mubr.f32.vlgmr.msra.gmra.mxu1 %v1991_v11  ;;  %v7202_v27 = vpop.f32.mrf.mxu0  ;;  %2199 = vmatprep.mubr.f32.mxu0 %v4924_v18  ;;  %v2474_v11 = vld [vmem:[%s8677_s7 + $0xc0] sm:$0xff]  ;;  %v2471_v48 = vld [vmem:[%s8677_s7 + $0xa8] sm:$0xff] }
 0x229   : > { %v7204_v28 = vpop.f32.mrf.mxu1  ;;  %2295 = vmatprep.mubr.f32.mxu1 %v4924_v18  ;;  %v1993_v30 = vmax.f32 %v1836_v24, 0.0  ;;  %2601 = vmatpush1.msra.mxu1 %v2510_v44  ;;  %v2473_v24 = vld [vmem:[%s8677_s7 + $0xb8] sm:$0xff] }
 0x22a   : > { %v1995_v31 = vmax.f32 %v1949_v25, 0.0  ;;  %v1841_v32 = vpop.f32.mrf.mxu0  ;;  %2858 = vmatpush1.msra.mxu0 %v2512_v45  ;;  %2602 = vmatprep.subr.mxu1 %v2507_v46  ;;  %v2470_v25 = vld [vmem:[%s8677_s7 + $0xa0] sm:$0xff]  ;;  %v2461_v44 = vld [vmem:[%s8677_s7 + $0x58] sm:$0xff]  ;;  %v2460_v46 = vld [vmem:[%s8677_s7 + $0x50] sm:$0xff] }
 0x22b   : > { %v1954_v33 = vpop.f32.mrf.mxu1  ;;  %2200 = vmatmul.mubr.f32.gmra.mxu0 %v1993_v30  ;;  %v1842_v34 = vadd.f32 %v1841_v32, %v7188_v61  ;;  %2859 = vmatprep.subr.mxu0 %v2509_v49  ;;  %v2472_v30 = vld [vmem:[%s8677_s7 + $0xb0] sm:$0xff]  ;;  %v2469_v32 = vld [vmem:[%s8677_s7 + $0x98] sm:$0xff]  ;;  %v2458_v45 = vld [vmem:[%s8677_s7 + $0x40] sm:$0xff] }
 0x22c   : > { %2296 = vmatmul.mubr.f32.gmra.mxu1 %v1995_v31  ;;  %v1955_v35 = vadd.f32 %v1954_v33, %v7192_v19  ;;  %2205 = vmatprep.mubr.f32.mxu0 %v4924_v18  ;;  %v2467_v31 = vld [vmem:[%s8677_s7 + $0x88] sm:$0xff]  ;;  %v2466_v33 = vld [vmem:[%s8677_s7 + $0x80] sm:$0xff] }
 0x22d   : > { %2301 = vmatprep.mubr.f32.mxu1 %v4924_v18  ;;  %v1997_v36 = vmax.f32 %v1842_v34, 0.0  ;;  %2603 = vmatpush1.msra.mxu1 %v2506_v50  ;;  %v2468_v34 = vld [vmem:[%s8677_s7 + $0x90] sm:$0xff]  ;;  %v2455_v49 = vld [vmem:[%s8677_s7 + $0x28] sm:$0xff]  ;;  %v2457_v50 = vld [vmem:[%s8677_s7 + $0x38] sm:$0xff] }
 0x22e   : > { %v1999_v37 = vmax.f32 %v1955_v35, 0.0  ;;  %2860 = vmatpush1.msra.mxu0 %v2508_v51  ;;  %2604 = vmatprep.subr.mxu1 %v2503_v52  ;;  %v2463_v35 = vld [vmem:[%s8677_s7 + $0x68] sm:$0xff]  ;;  %v2454_v51 = vld [vmem:[%s8677_s7 + $0x20] sm:$0xff]  ;;  %v2456_v52 = vld [vmem:[%s8677_s7 + $0x30] sm:$0xff] }
 0x22f   : > { %2206 = vmatmul.mubr.f32.gmra.mxu0 %v1997_v36  ;;  %2861 = vmatprep.subr.mxu0 %v2505_v53  ;;  %v2465_v36 = vld [vmem:[%s8677_s7 + $0x78] sm:$0xff]  ;;  %v2451_v53 = vld [vmem:[%s8677_s7 + $0x8] sm:$0xff] }
 0x230   : > { %2302 = vmatmul.mubr.f32.gmra.mxu1 %v1999_v37  ;;  %2211 = vmatprep.mubr.f32.mxu0 %v4924_v18  ;;  %v2462_v37 = vld [vmem:[%s8677_s7 + $0x60] sm:$0xff] }
 0x231   : > { %2307 = vmatprep.mubr.f32.mxu1 %v4924_v18  ;;  %2605 = vmatpush1.msra.mxu1 %v2502_v22  ;;  %v2453_v22 = vld [vmem:[%s8677_s7 + $0x18] sm:$0xff] }
 0x232   : > { %2862 = vmatpush1.msra.mxu0 %v2504_v26  ;;  %2606 = vmatprep.subr.mxu1 %v2499_v54  ;;  %v2450_v26 = vld [vmem:[%s8677_s7] sm:$0xff]  ;;  %v2452_v54 = vld [vmem:[%s8677_s7 + $0x10] sm:$0xff] }
 0x233   : > { %2863 = vmatprep.subr.mxu0 %v2501_v56  ;;  %2607 = vmatpush1.msra.mxu1 %v2498_v23  ;;  %v2575_v56 = vld [vmem:[%s8677_s7 + $0x3e8] sm:$0xff]  ;;  %v2577_v23 = vld [vmem:[%s8677_s7 + $0x3f8] sm:$0xff] }
 0x234   : > { %2864 = vmatpush1.msra.mxu0 %v2500_v29  ;;  %2608 = vmatprep.subr.mxu1 %v2495_v57  ;;  %v2574_v29 = vld [vmem:[%s8677_s7 + $0x3e0] sm:$0xff]  ;;  %v2576_v57 = vld [vmem:[%s8677_s7 + $0x3f0] sm:$0xff] }
 0x235   : > { %2865 = vmatprep.subr.mxu0 %v2497_v59  ;;  %2609 = vmatpush1.msra.mxu1 %v2494_v60  ;;  %v2571_v59 = vld [vmem:[%s8677_s7 + $0x3c8] sm:$0xff]  ;;  %v2573_v60 = vld [vmem:[%s8677_s7 + $0x3d8] sm:$0xff] }
 0x236   : > { %2866 = vmatpush1.msra.mxu0 %v2496_v0  ;;  %2610 = vmatprep.subr.mxu1 %v2491_v4  ;;  %v2570_v0 = vld [vmem:[%s8677_s7 + $0x3c0] sm:$0xff]  ;;  %v2572_v4 = vld [vmem:[%s8677_s7 + $0x3d0] sm:$0xff] }
 0x237   : > { %2867 = vmatprep.subr.mxu0 %v2493_v6  ;;  %2611 = vmatpush1.msra.mxu1 %v2490_v7  ;;  %v7430_v6 = vpop.f32.mrf.mxu0  ;;  %v7432_v7 = vpop.f32.mrf.mxu1 }
 0x238   : > { %2868 = vmatpush1.msra.mxu0 %v2492_v9  ;;  %2612 = vmatprep.subr.mxu1 %v2487_v12  ;;  %v2567_v9 = vld [vmem:[%s8677_s7 + $0x3a8] sm:$0xff]  ;;  %v2569_v12 = vld [vmem:[%s8677_s7 + $0x3b8] sm:$0xff] }
 0x239   : > { %2869 = vmatprep.subr.mxu0 %v2489_v13  ;;  %2613 = vmatpush1.msra.mxu1 %v2486_v14  ;;  %v2566_v13 = vld [vmem:[%s8677_s7 + $0x3a0] sm:$0xff]  ;;  %v2568_v14 = vld [vmem:[%s8677_s7 + $0x3b0] sm:$0xff] }
 0x23a   : > { %2870 = vmatpush1.msra.mxu0 %v2488_v47  ;;  %2614 = vmatprep.subr.mxu1 %v2483_v55 }
 0x23b   : > { %2871 = vmatprep.subr.mxu0 %v2485_v16  ;;  %2615 = vmatpush1.msra.mxu1 %v2482_v41  ;;  %v2563_v16 = vld [vmem:[%s8677_s7 + $0x388] sm:$0xff]  ;;  %v2565_v41 = vld [vmem:[%s8677_s7 + $0x398] sm:$0xff] }
 0x23c   : > { %2872 = vmatpush1.msra.mxu0 %v2484_v42  ;;  %2616 = vmatprep.subr.mxu1 %v2479_v17 }
 0x23d   : > { %2873 = vmatprep.subr.mxu0 %v2481_v63  ;;  %2617 = vmatpush1.msra.mxu1 %v2478_v3  ;;  %v2562_v63 = vld [vmem:[%s8677_s7 + $0x380] sm:$0xff]  ;;  %v2564_v3 = vld [vmem:[%s8677_s7 + $0x390] sm:$0xff] }
 0x23e   : > { %2874 = vmatpush1.msra.mxu0 %v2480_v20  ;;  %2618 = vmatprep.subr.mxu1 %v2475_v1 }
 0x23f   : > { %2875 = vmatprep.subr.mxu0 %v2477_v21  ;;  %2619 = vmatpush1.msra.mxu1 %v2474_v11  ;;  %v2559_v21 = vld [vmem:[%s8677_s7 + $0x368] sm:$0xff]  ;;  %v2561_v11 = vld [vmem:[%s8677_s7 + $0x378] sm:$0xff] }
 0x240   : > { %2876 = vmatpush1.msra.mxu0 %v2476_v5  ;;  %2620 = vmatprep.subr.mxu1 %v2471_v48  ;;  %v2558_v5 = vld [vmem:[%s8677_s7 + $0x360] sm:$0xff]  ;;  %v2560_v48 = vld [vmem:[%s8677_s7 + $0x370] sm:$0xff] }
 0x241   : > { %2877 = vmatprep.subr.mxu0 %v2473_v24  ;;  %2621 = vmatpush1.msra.mxu1 %v2470_v25  ;;  %v2555_v24 = vld [vmem:[%s8677_s7 + $0x348] sm:$0xff]  ;;  %v2557_v25 = vld [vmem:[%s8677_s7 + $0x358] sm:$0xff] }
 0x242   : > { %2878 = vmatpush1.msra.mxu0 %v2472_v30  ;;  %2622 = vmatprep.subr.mxu1 %v2467_v31  ;;  %v2554_v30 = vld [vmem:[%s8677_s7 + $0x340] sm:$0xff]  ;;  %v2556_v31 = vld [vmem:[%s8677_s7 + $0x350] sm:$0xff] }
 0x243   : > { %2879 = vmatprep.subr.mxu0 %v2469_v32  ;;  %2623 = vmatpush1.msra.mxu1 %v2466_v33  ;;  %v2551_v32 = vld [vmem:[%s8677_s7 + $0x328] sm:$0xff]  ;;  %v2553_v33 = vld [vmem:[%s8677_s7 + $0x338] sm:$0xff] }
 0x244   : > { %2880 = vmatpush1.msra.mxu0 %v2468_v34  ;;  %2624 = vmatprep.subr.mxu1 %v2463_v35  ;;  %v2550_v34 = vld [vmem:[%s8677_s7 + $0x320] sm:$0xff]  ;;  %v2552_v35 = vld [vmem:[%s8677_s7 + $0x330] sm:$0xff] }
 0x245   : > { %2881 = vmatprep.subr.mxu0 %v2465_v36  ;;  %2625 = vmatpush1.msra.mxu1 %v2462_v37  ;;  %v2547_v36 = vld [vmem:[%s8677_s7 + $0x308] sm:$0xff]  ;;  %v2549_v37 = vld [vmem:[%s8677_s7 + $0x318] sm:$0xff] }
 0x246   : > { %2882 = vmatpush1.msra.mxu0 %v2464_v39  ;;  %2626 = vmatprep.subr.mxu1 %v2459_v40  ;;  %v2546_v39 = vld [vmem:[%s8677_s7 + $0x300] sm:$0xff]  ;;  %v2548_v40 = vld [vmem:[%s8677_s7 + $0x310] sm:$0xff] }
 0x247   : > { %2883 = vmatprep.subr.mxu0 %v2461_v44  ;;  %2627 = vmatpush1.msra.mxu1 %v2458_v45  ;;  %v2543_v44 = vld [vmem:[%s8677_s7 + $0x2e8] sm:$0xff]  ;;  %v2545_v45 = vld [vmem:[%s8677_s7 + $0x2f8] sm:$0xff] }
 0x248   : > { %2884 = vmatpush1.msra.mxu0 %v2460_v46  ;;  %2628 = vmatprep.subr.mxu1 %v2455_v49  ;;  %v2542_v46 = vld [vmem:[%s8677_s7 + $0x2e0] sm:$0xff]  ;;  %v2544_v49 = vld [vmem:[%s8677_s7 + $0x2f0] sm:$0xff] }
 0x249   : > { %2885 = vmatprep.subr.mxu0 %v2457_v50  ;;  %2629 = vmatpush1.msra.mxu1 %v2454_v51 }
 0x24a   : > { %2886 = vmatpush1.msra.mxu0 %v2456_v52  ;;  %2630 = vmatprep.subr.mxu1 %v2451_v53  ;;  %v2539_v52 = vld [vmem:[%s8677_s7 + $0x2c8] sm:$0xff]  ;;  %v2541_v53 = vld [vmem:[%s8677_s7 + $0x2d8] sm:$0xff] }
 0x24b   : > { %2887 = vmatprep.subr.mxu0 %v2453_v22  ;;  %2631 = vmatpush1.msra.mxu1 %v2450_v26  ;;  %v2538_v22 = vld [vmem:[%s8677_s7 + $0x2c0] sm:$0xff]  ;;  %v2540_v26 = vld [vmem:[%s8677_s7 + $0x2d0] sm:$0xff] }
 0x24c   : > { %2888 = vmatpush1.msra.mxu0 %v2452_v54  ;;  %2632 = vmatprep.subr.mxu1 %v2575_v56 }
 0x24d   : > { %2889 = vmatprep.subr.mxu0 %v2577_v23  ;;  %2633 = vmatpush2.msra.mxu1 %v2574_v29  ;;  %v2535_v23 = vld [vmem:[%s8677_s7 + $0x2a8] sm:$0xff]  ;;  %v2537_v29 = vld [vmem:[%s8677_s7 + $0x2b8] sm:$0xff] }
 0x24e   : > { %2890 = vmatpush2.msra.mxu0 %v2576_v57  ;;  %2634 = vmatprep.subr.mxu1 %v2571_v59 }
 0x24f   : > { %2891 = vmatprep.subr.mxu0 %v2573_v60  ;;  %2635 = vmatpush2.msra.mxu1 %v2570_v0  ;;  %v2534_v60 = vld [vmem:[%s8677_s7 + $0x2a0] sm:$0xff]  ;;  %v2536_v0 = vld [vmem:[%s8677_s7 + $0x2b0] sm:$0xff] }
 0x250   : > { %2892 = vmatpush2.msra.mxu0 %v2572_v4  ;;  %2636 = vmatprep.subr.mxu1 %v2567_v9 }
 0x251   : > { %2893 = vmatprep.subr.mxu0 %v2569_v12  ;;  %2637 = vmatpush2.msra.mxu1 %v2566_v13  ;;  %v2531_v12 = vld [vmem:[%s8677_s7 + $0x288] sm:$0xff]  ;;  %v2533_v13 = vld [vmem:[%s8677_s7 + $0x298] sm:$0xff] }
 0x252   : > { %2894 = vmatpush2.msra.mxu0 %v2568_v14  ;;  %2638 = vmatprep.subr.mxu1 %v2563_v16  ;;  %v2530_v14 = vld [vmem:[%s8677_s7 + $0x280] sm:$0xff]  ;;  %v2529_v16 = vld [vmem:[%s8677_s7 + $0x278] sm:$0xff] }
 0x253   : > { %v1847_v47 = vpop.f32.mrf.mxu0  ;;  %v1960_v55 = vpop.f32.mrf.mxu1  ;;  %2895 = vmatprep.subr.mxu0 %v2565_v41  ;;  %2639 = vmatpush2.msra.mxu1 %v2562_v63  ;;  %v2526_v41 = vld [vmem:[%s8677_s7 + $0x260] sm:$0xff]  ;;  %v2525_v63 = vld [vmem:[%s8677_s7 + $0x258] sm:$0xff] }
 0x254   : > { %v1848_v42 = vadd.f32 %v1847_v47, %v7188_v61  ;;  %v1961_v17 = vadd.f32 %v1960_v55, %v7192_v19  ;;  %2896 = vmatpush2.msra.mxu0 %v2564_v3  ;;  %2640 = vmatprep.subr.mxu1 %v2559_v21  ;;  %v2532_v47 = vld [vmem:[%s8677_s7 + $0x290] sm:$0xff]  ;;  %v2527_v55 = vld [vmem:[%s8677_s7 + $0x268] sm:$0xff]  ;;  %v2522_v3 = vld [vmem:[%s8677_s7 + $0x240] sm:$0xff] }
 0x255   : > { %2897 = vmatprep.subr.mxu0 %v2561_v11  ;;  %2641 = vmatpush2.msra.mxu1 %v2558_v5  ;;  %v7522_v50 = vpop.f32.mrf.mxu0  ;;  %v7524_v51 = vpop.f32.mrf.mxu1  ;;  %v2521_v21 = vld [vmem:[%s8677_s7 + $0x238] sm:$0xff]  ;;  %v2518_v11 = vld [vmem:[%s8677_s7 + $0x220] sm:$0xff]  ;;  %v2520_v5 = vld [vmem:[%s8677_s7 + $0x230] sm:$0xff] }
 0x256   : > { %v2001_v20 = vmax.f32 %v1848_v42, 0.0  ;;  %v2003_v1 = vmax.f32 %v1961_v17, 0.0  ;;  %2898 = vmatpush2.msra.mxu0 %v2560_v48  ;;  %2642 = vmatprep.subr.mxu1 %v2555_v24  ;;  %v2528_v42 = vld [vmem:[%s8677_s7 + $0x270] sm:$0xff]  ;;  %v2523_v17 = vld [vmem:[%s8677_s7 + $0x248] sm:$0xff]  ;;  %v2517_v24 = vld [vmem:[%s8677_s7 + $0x218] sm:$0xff] }
 0x257   : > { %2899 = vmatprep.subr.mxu0 %v2557_v25  ;;  %2643 = vmatpush2.msra.mxu1 %v2554_v30  ;;  %v2515_v48 = vld [vmem:[%s8677_s7 + $0x208] sm:$0xff]  ;;  %v2514_v25 = vld [vmem:[%s8677_s7 + $0x200] sm:$0xff]  ;;  %v2516_v30 = vld [vmem:[%s8677_s7 + $0x210] sm:$0xff] }
 0x258   : > { %2212 = vmatmul.mubr.f32.gmra.mxu0 %v2001_v20  ;;  %2308 = vmatmul.mubr.f32.gmra.mxu1 %v2003_v1  ;;  %v2524_v20 = vld [vmem:[%s8677_s7 + $0x250] sm:$0xff]  ;;  %v2519_v1 = vld [vmem:[%s8677_s7 + $0x228] sm:$0xff] }
 0x259   : > { %2217 = vmatprep.mubr.f32.mxu0 %v4924_v18  ;;  %2313 = vmatprep.mubr.f32.mxu1 %v4924_v18 }
 0x25a   : > { %2900 = vmatpush2.msra.mxu0 %v2556_v31  ;;  %2644 = vmatprep.subr.mxu1 %v2551_v32 }
 0x25b   : > { %2901 = vmatprep.subr.mxu0 %v2553_v33  ;;  %2645 = vmatpush2.msra.mxu1 %v2550_v34 }
 0x25c   : > { %2902 = vmatpush2.msra.mxu0 %v2552_v35  ;;  %2646 = vmatprep.subr.mxu1 %v2547_v36 }
 0x25d   : > { %2903 = vmatprep.subr.mxu0 %v2549_v37  ;;  %2647 = vmatpush2.msra.mxu1 %v2546_v39 }
 0x25e   : > { %2904 = vmatpush2.msra.mxu0 %v2548_v40  ;;  %2648 = vmatprep.subr.mxu1 %v2543_v44 }
 0x25f   : > { %2905 = vmatprep.subr.mxu0 %v2545_v45  ;;  %2649 = vmatpush2.msra.mxu1 %v2542_v46 }
 0x260   : > { %2906 = vmatpush2.msra.mxu0 %v2544_v49  ;;  %2650 = vmatprep.subr.mxu1 %v2539_v52 }
 0x261   : > { %2907 = vmatprep.subr.mxu0 %v2541_v53  ;;  %2651 = vmatpush2.msra.mxu1 %v2538_v22 }
 0x262   : > { %2908 = vmatpush2.msra.mxu0 %v2540_v26  ;;  %2652 = vmatprep.subr.mxu1 %v2535_v23 }
 0x263   : > { %2909 = vmatprep.subr.mxu0 %v2537_v29  ;;  %2653 = vmatpush2.msra.mxu1 %v2534_v60 }
 0x264   : > { %v1853_v54 = vpop.f32.mrf.mxu0  ;;  %v1966_v56 = vpop.f32.mrf.mxu1  ;;  %2910 = vmatpush2.msra.mxu0 %v2536_v0  ;;  %2654 = vmatprep.subr.mxu1 %v2531_v12  ;;  %v1945_v0 = vadd.f32 %v7198_v2, %v6364_v10 }
 0x265   : > { %v1854_v57 = vadd.f32 %v1853_v54, %v7188_v61  ;;  %v1967_v59 = vadd.f32 %v1966_v56, %v7192_v19  ;;  %2911 = vmatprep.subr.mxu0 %v2533_v13  ;;  %2655 = vmatpush2.msra.mxu1 %v2530_v14  ;;  %v7630_v56 = vrot.slane %v7184_v58, %v6623_v38 }
 0x266   : > { %2912 = vmatpush2.msra.mxu0 %v2532_v47  ;;  %2656 = vmatprep.subr.mxu1 %v2527_v55  ;;  %v7614_v31 = vpop.f32.mrf.mxu0  ;;  %v7616_v32 = vpop.f32.mrf.mxu1  ;;  %v1992_v12 = vmax.f32 %v1945_v0, 0.0  ;;  %v1957_v14 = vadd.f32 %v7432_v7, %v6364_v10  ;;  %v1963_v55 = vadd.f32 %v7524_v51, %v6364_v10 }
 0x267   : > { %v2005_v4 = vmax.f32 %v1854_v57, 0.0  ;;  %v2007_v9 = vmax.f32 %v1967_v59, 0.0  ;;  %2913 = vmatprep.subr.mxu0 %v2529_v16  ;;  %2657 = vmatpush2.msra.mxu1 %v2526_v41  ;;  %v1832_v60 = vadd.f32 %v7196_v8, %v7630_v56  ;;  %v1844_v13 = vadd.f32 %v7430_v6, %v7630_v56 }
 0x268   : > { %2914 = vmatpush2.msra.mxu0 %v2528_v42  ;;  %2658 = vmatprep.subr.mxu1 %v2523_v17  ;;  %v1850_v47 = vadd.f32 %v7522_v50, %v7630_v56  ;;  %v2004_v7 = vmax.f32 %v1963_v55, 0.0  ;;  %v1856_v16 = vadd.f32 %v7614_v31, %v7630_v56  ;;  %v1969_v41 = vadd.f32 %v7616_v32, %v6364_v10  ;;  %v2117_v32 = vld [vmem:[%s8676_s6] sm:$0x3]  ;;  %v3267_v55 = vld [vmem:[%s8679_s9 + $0xc8] sm:$0xff] }
 0x269   : > { %2218 = vmatmul.mubr.f32.gmra.mxu0 %v2005_v4  ;;  %2314 = vmatmul.mubr.f32.gmra.mxu1 %v2007_v9  ;;  %v1990_v9 = vmax.f32 %v1832_v60, 0.0 }
 0x26a   : > { %2223 = vmatprep.mubr.f32.mxu0 %v4924_v18  ;;  %2319 = vmatprep.mubr.f32.mxu1 %v4924_v18  ;;  %v2002_v6 = vmax.f32 %v1850_v47, 0.0  ;;  %v2006_v50 = vmax.f32 %v1856_v16, 0.0  ;;  %v2008_v51 = vmax.f32 %v1969_v41, 0.0  ;;  %v3332_v47 = vld [vmem:[%s8679_s9 + $0x2d0] sm:$0xff]  ;;  %v3330_v16 = vld [vmem:[%s8679_s9 + $0x2c0] sm:$0xff]  ;;  %v3265_v41 = vld [vmem:[%s8679_s9 + $0xb8] sm:$0xff] }
 0x26b   : > { %2915 = vmatprep.subr.mxu0 %v2525_v63  ;;  %2659 = vmatpush2.msra.mxu1 %v2522_v3 }
 0x26c   : > { %2916 = vmatpush2.msra.mxu0 %v2524_v20  ;;  %2660 = vmatprep.subr.mxu1 %v2519_v1 }
 0x26d   : > { %2917 = vmatprep.subr.mxu0 %v2521_v21  ;;  %2661 = vmatpush2.msra.mxu1 %v2518_v11 }
 0x26e   : > { %2918 = vmatpush2.msra.mxu0 %v2520_v5  ;;  %2662 = vmatprep.subr.mxu1 %v2515_v48 }
 0x26f   : > { %2919 = vmatprep.subr.mxu0 %v2517_v24  ;;  %2663 = vmatpush2.msra.mxu1 %v2514_v25 }
 0x270   : > { %2920 = vmatpush2.msra.mxu0 %v2516_v30 }
 0x296   : > { %v1859_v33 = vpop.f32.mrf.mxu0  ;;  %v1972_v34 = vpop.f32.mrf.mxu1 }
 0x297   : > { %v1860_v35 = vadd.f32 %v1859_v33, %v7188_v61  ;;  %v1973_v36 = vadd.f32 %v1972_v34, %v7192_v19  ;;  %v7684_v33 = vrot.slane %v2117_v32, %v6960_v43  ;;  %v7687_v34 = vrot.slane %v2117_v32, %v6623_v38 }
 0x298   : > { %v1861_v40 = vpop.f32.mrf.mxu0  ;;  %v1974_v44 = vpop.f32.mrf.mxu1 }
 0x299   : > { %v2009_v37 = vmax.f32 %v1860_v35, 0.0  ;;  %v2011_v39 = vmax.f32 %v1973_v36, 0.0  ;;  %v1862_v42 = vadd.f32 %v1861_v40, %v7630_v56  ;;  %v1975_v17 = vadd.f32 %v1974_v44, %v6364_v10 }
 0x29b   : > { %2224 = vmatmul.mubr.f32.gmra.mxu0 %v2009_v37  ;;  %2320 = vmatmul.mubr.f32.gmra.mxu1 %v2011_v39  ;;  %v2010_v63 = vmax.f32 %v1862_v42, 0.0  ;;  %v2012_v3 = vmax.f32 %v1975_v17, 0.0  ;;  %v3264_v42 = vld [vmem:[%s8679_s9 + $0xb0] sm:$0xff] }
 0x29c   : > { %2229 = vmatprep.mubr.f32.mxu0 %v4924_v18  ;;  %2325 = vmatprep.mubr.f32.mxu1 %v4924_v18  ;;  %v3328_v17 = vld [vmem:[%s8679_s9 + $0x2b0] sm:$0xff] }
 0x2a8   : > { %v1865_v45 = vpop.f32.mrf.mxu0  ;;  %v1978_v46 = vpop.f32.mrf.mxu1 }
 0x2a9   : > { %v1866_v49 = vadd.f32 %v1865_v45, %v7188_v61  ;;  %v1979_v52 = vadd.f32 %v1978_v46, %v7192_v19 }
 0x2aa   : > { %v7624_v53 = vpop.f32.mrf.mxu0  ;;  %v7626_v22 = vpop.f32.mrf.mxu1 }
 0x2ab   : > { %v2013_v26 = vmax.f32 %v1866_v49, 0.0  ;;  %v2015_v54 = vmax.f32 %v1979_v52, 0.0  ;;  %v1868_v20 = vadd.f32 %v7624_v53, %v7630_v56  ;;  %v1981_v1 = vadd.f32 %v7626_v22, %v6364_v10 }
 0x2ad   : > { %2230 = vmatmul.mubr.f32.gmra.mxu0 %v2013_v26  ;;  %2326 = vmatmul.mubr.f32.gmra.mxu1 %v2015_v54  ;;  %v2014_v5 = vmax.f32 %v1868_v20, 0.0  ;;  %v2016_v48 = vmax.f32 %v1981_v1, 0.0  ;;  %v3262_v20 = vld [vmem:[%s8679_s9 + $0xa0] sm:$0xff] }
 0x2ae   : > { %v1871_v23 = vpop.f32.mrf.mxu0  ;;  %v1984_v29 = vpop.f32.mrf.mxu1  ;;  %2235 = vmatprep.mubr.f32.mxu0 %v4924_v18  ;;  %2331 = vmatprep.mubr.f32.mxu1 %v4924_v18  ;;  %v3326_v1 = vld [vmem:[%s8679_s9 + $0x2a0] sm:$0xff] }
 0x2af   : > { %v1872_v57 = vadd.f32 %v1871_v23, %v7188_v61  ;;  %v1985_v59 = vadd.f32 %v1984_v29, %v7192_v19  ;;  %v1838_v61 = vadd.f32 %v7202_v27, %v7630_v56  ;;  %v1951_v19 = vadd.f32 %v7204_v28, %v6364_v10 }
 0x2b0   : > { %v1998_v27 = vmax.f32 %v1844_v13, 0.0  ;;  %v2000_v28 = vmax.f32 %v1957_v14, 0.0  ;;  %v1873_v21 = vpop.f32.mrf.mxu0  ;;  %v1986_v11 = vpop.f32.mrf.mxu1  ;;  %v3334_v13 = vld [vmem:[%s8679_s9 + $0x2e0] sm:$0xff]  ;;  %v3269_v14 = vld [vmem:[%s8679_s9 + $0xd8] sm:$0xff] }
 0x2b1   : > { %v2017_v58 = vmax.f32 %v1872_v57, 0.0  ;;  %v2019_v4 = vmax.f32 %v1985_v59, 0.0  ;;  %v1994_v8 = vmax.f32 %v1838_v61, 0.0  ;;  %v1996_v2 = vmax.f32 %v1951_v19, 0.0  ;;  %v3336_v61 = vld [vmem:[%s8679_s9 + $0x2f0] sm:$0xff]  ;;  %v3271_v19 = vld [vmem:[%s8679_s9 + $0xe8] sm:$0xff] }
 0x2b2   : > { %v1874_v24 = vadd.f32 %v1873_v21, %v7630_v56  ;;  %v1987_v25 = vadd.f32 %v1986_v11, %v6364_v10 }
 0x2b3   : > { %2236 = vmatmul.mubr.f32.gmra.mxu0 %v2017_v58  ;;  %2332 = vmatmul.mubr.f32.gmra.mxu1 %v2019_v4  ;;  %v3273_v4 = vld [vmem:[%s8679_s9 + $0xf8] sm:$0xff] }
 0x2b4   : > { %2241 = vmatprep.mubr.f32.mxu0 %v4924_v18  ;;  %2337 = vmatprep.mubr.f32.mxu1 %v4924_v18  ;;  %v2018_v30 = vmax.f32 %v1874_v24, 0.0  ;;  %v2020_v31 = vmax.f32 %v1987_v25, 0.0  ;;  %v3325_v24 = vld [vmem:[%s8679_s9 + $0x298] sm:$0xff]  ;;  %v3260_v25 = vld [vmem:[%s8679_s9 + $0x90] sm:$0xff] }
 0x2b5   : > { %3382 = vmatprep.subr.mxu1 %v3273_v4  ;;  %v3247_v4 = vld [vmem:[%s8679_s9 + $0x28] sm:$0xff] }
 0x2b7   : > { %2242 = vmatmul.mubr.f32.gmra.mxu0 %v1990_v9  ;;  %2338 = vmatmul.mubr.f32.gmra.mxu1 %v1992_v12  ;;  %v3337_v9 = vld [vmem:[%s8679_s9 + $0x2f8] sm:$0xff]  ;;  %v3272_v12 = vld [vmem:[%s8679_s9 + $0xf0] sm:$0xff] }
 0x2b8   : > { %2247 = vmatprep.mubr.f32.mxu0 %v4924_v18  ;;  %2343 = vmatprep.mubr.f32.mxu1 %v4924_v18 }
 0x2b9   : > { %3639 = vmatprep.subr.mxu0 %v3337_v9  ;;  %v3311_v9 = vld [vmem:[%s8679_s9 + $0x228] sm:$0xff] }
 0x2bb   : > { %2248 = vmatmul.mubr.f32.gmra.mxu0 %v1994_v8  ;;  %2344 = vmatmul.mubr.f32.gmra.mxu1 %v1996_v2  ;;  %v3335_v8 = vld [vmem:[%s8679_s9 + $0x2e8] sm:$0xff]  ;;  %v3270_v2 = vld [vmem:[%s8679_s9 + $0xe0] sm:$0xff] }
 0x2bc   : > { %2253 = vmatprep.mubr.f32.mxu0 %v4924_v18  ;;  %2349 = vmatprep.mubr.f32.mxu1 %v4924_v18 }
 0x2bf   : > { %2254 = vmatmul.mubr.f32.gmra.mxu0 %v1998_v27  ;;  %2350 = vmatmul.mubr.f32.gmra.mxu1 %v2000_v28  ;;  %v3333_v27 = vld [vmem:[%s8679_s9 + $0x2d8] sm:$0xff]  ;;  %v3268_v28 = vld [vmem:[%s8679_s9 + $0xd0] sm:$0xff] }
 0x2c0   : > { %2259 = vmatprep.mubr.f32.mxu0 %v4924_v18  ;;  %2355 = vmatprep.mubr.f32.mxu1 %v4924_v18 }
 0x2c3   : > { %2260 = vmatmul.mubr.f32.gmra.mxu0 %v2002_v6  ;;  %2356 = vmatmul.mubr.f32.gmra.mxu1 %v2004_v7  ;;  %v3331_v6 = vld [vmem:[%s8679_s9 + $0x2c8] sm:$0xff]  ;;  %v3266_v7 = vld [vmem:[%s8679_s9 + $0xc0] sm:$0xff] }
 0x2c4   : > { %2265 = vmatprep.mubr.f32.mxu0 %v4924_v18  ;;  %2361 = vmatprep.mubr.f32.mxu1 %v4924_v18 }
 0x2c7   : > { %2266 = vmatmul.mubr.f32.gmra.mxu0 %v2006_v50  ;;  %2362 = vmatmul.mubr.f32.gmra.mxu1 %v2008_v51  ;;  %v3329_v50 = vld [vmem:[%s8679_s9 + $0x2b8] sm:$0xff] }
 0x2c8   : > { %2271 = vmatprep.mubr.f32.mxu0 %v4924_v18  ;;  %2367 = vmatprep.mubr.f32.mxu1 %v4924_v18 }
 0x2cb   : > { %2272 = vmatmul.mubr.f32.gmra.mxu0 %v2010_v63  ;;  %2368 = vmatmul.mubr.f32.gmra.mxu1 %v2012_v3  ;;  %v3263_v63 = vld [vmem:[%s8679_s9 + $0xa8] sm:$0xff] }
 0x2cc   : > { %2277 = vmatprep.mubr.f32.mxu0 %v4924_v18  ;;  %2373 = vmatprep.mubr.f32.mxu1 %v4924_v18  ;;  %v3327_v3 = vld [vmem:[%s8679_s9 + $0x2a8] sm:$0xff] }
 0x2cf   : > { %2278 = vmatmul.mubr.f32.gmra.mxu0 %v2014_v5  ;;  %2374 = vmatmul.mubr.f32.gmra.mxu1 %v2016_v48  ;;  %v3261_v48 = vld [vmem:[%s8679_s9 + $0x98] sm:$0xff] }
 0x2d0   : > { %2283 = vmatprep.mubr.f32.mxu0 %v4924_v18  ;;  %2379 = vmatprep.mubr.f32.mxu1 %v4924_v18 }
 0x2d3   : > { %2284 = vmatmul.mubr.f32.gmra.mxu0 %v2018_v30  ;;  %2380 = vmatmul.mubr.f32.gmra.mxu1 %v2020_v31  ;;  %v3324_v30 = vld [vmem:[%s8679_s9 + $0x290] sm:$0xff] }
 0x2e7   : > { %v2195_v10 = vpop.f32.mrf.mxu0 }
 0x2e8   : > { %v2196_v35 = vadd.f32 %v2195_v10, %v7684_v33  ;;  %v3259_v10 = vld [vmem:[%s8679_s9 + $0x88] sm:$0xff] }
 0x2e9   : > { %v2197_v36 = vpop.f32.mrf.mxu0 }
 0x2ea   : > { %v2198_v18 = vadd.f32 %v2197_v36, %v7687_v34  ;;  %v2386_v40 = vmax.f32 %v2196_v35, 0.0  ;;  %v3323_v35 = vld [vmem:[%s8679_s9 + $0x288] sm:$0xff]  ;;  %v3258_v36 = vld [vmem:[%s8679_s9 + $0x80] sm:$0xff] }
 0x2eb   : > { %v2201_v37 = vpop.f32.mrf.mxu0 }
 0x2ec   : > { %v2387_v39 = vmax.f32 %v2198_v18, 0.0  ;;  %v2202_v44 = vadd.f32 %v2201_v37, %v7684_v33  ;;  %v3322_v18 = vld [vmem:[%s8679_s9 + $0x280] sm:$0xff]  ;;  %v3257_v37 = vld [vmem:[%s8679_s9 + $0x78] sm:$0xff] }
 0x2ed   : > { %v2203_v45 = vpop.f32.mrf.mxu0 }
 0x2ee   : > { %v2204_v46 = vadd.f32 %v2203_v45, %v7687_v34  ;;  %2664 = vmatprep.mubr.f32.mxu1 %v2387_v39  ;;  %2921 = vmatprep.mubr.f32.mxu0 %v2387_v39  ;;  %v2388_v53 = vmax.f32 %v2202_v44, 0.0  ;;  %v3321_v39 = vld [vmem:[%s8679_s9 + $0x278] sm:$0xff]  ;;  %v3320_v44 = vld [vmem:[%s8679_s9 + $0x270] sm:$0xff]  ;;  %v3255_v45 = vld [vmem:[%s8679_s9 + $0x68] sm:$0xff] }
 0x2ef   : > { %2665 = vmatmul.mubr.f32.vlgmr.msra.gmra.mxu1 %v2386_v40  ;;  %2922 = vmatmul.mubr.f32.vlgmr.msra.gmra.mxu0 %v2386_v40  ;;  %v2207_v49 = vpop.f32.mrf.mxu0  ;;  %v3256_v40 = vld [vmem:[%s8679_s9 + $0x70] sm:$0xff] }
 0x2f0   : > { %v2389_v52 = vmax.f32 %v2204_v46, 0.0  ;;  %v2208_v22 = vadd.f32 %v2207_v49, %v7684_v33  ;;  %3383 = vmatpush1.msra.mxu1 %v3272_v12  ;;  %3640 = vmatpush1.msra.mxu0 %v3336_v61  ;;  %v3319_v46 = vld [vmem:[%s8679_s9 + $0x268] sm:$0xff]  ;;  %v3254_v49 = vld [vmem:[%s8679_s9 + $0x60] sm:$0xff] }
 0x2f1   : > { %v2209_v26 = vpop.f32.mrf.mxu0  ;;  %3384 = vmatprep.subr.mxu1 %v3271_v19  ;;  %3641 = vmatprep.subr.mxu0 %v3335_v8  ;;  %v3246_v12 = vld [vmem:[%s8679_s9 + $0x20] sm:$0xff]  ;;  %v3245_v19 = vld [vmem:[%s8679_s9 + $0x18] sm:$0xff] }
 0x2f2   : > { %2670 = vmatprep.mubr.f32.mxu1 %v2389_v52  ;;  %2927 = vmatprep.mubr.f32.mxu0 %v2389_v52  ;;  %v2210_v54 = vadd.f32 %v2209_v26, %v7687_v34  ;;  %v2390_v23 = vmax.f32 %v2208_v22, 0.0  ;;  %v3318_v52 = vld [vmem:[%s8679_s9 + $0x260] sm:$0xff]  ;;  %v3317_v22 = vld [vmem:[%s8679_s9 + $0x258] sm:$0xff]  ;;  %v3252_v26 = vld [vmem:[%s8679_s9 + $0x50] sm:$0xff] }
 0x2f3   : > { %2671 = vmatmul.mubr.f32.gmra.mxu1 %v2388_v53  ;;  %2928 = vmatmul.mubr.f32.gmra.mxu0 %v2388_v53  ;;  %v3253_v53 = vld [vmem:[%s8679_s9 + $0x58] sm:$0xff]  ;;  %v3310_v61 = vld [vmem:[%s8679_s9 + $0x220] sm:$0xff] }
 0x2f4   : > { %v2391_v56 = vmax.f32 %v2210_v54, 0.0  ;;  %3385 = vmatpush1.msra.mxu1 %v3270_v2  ;;  %3642 = vmatpush1.msra.mxu0 %v3334_v13  ;;  %v3316_v54 = vld [vmem:[%s8679_s9 + $0x250] sm:$0xff]  ;;  %v3309_v8 = vld [vmem:[%s8679_s9 + $0x218] sm:$0xff] }
 0x2f5   : > { %3386 = vmatprep.subr.mxu1 %v3269_v14  ;;  %3643 = vmatprep.subr.mxu0 %v3333_v27  ;;  %v3244_v2 = vld [vmem:[%s8679_s9 + $0x10] sm:$0xff]  ;;  %v3243_v14 = vld [vmem:[%s8679_s9 + $0x8] sm:$0xff] }
 0x2f6   : > { %2676 = vmatprep.mubr.f32.mxu1 %v2391_v56  ;;  %2933 = vmatprep.mubr.f32.mxu0 %v2391_v56  ;;  %v3251_v56 = vld [vmem:[%s8679_s9 + $0x48] sm:$0xff]  ;;  %v3308_v13 = vld [vmem:[%s8679_s9 + $0x210] sm:$0xff] }
 0x2f7   : > { %2677 = vmatmul.mubr.f32.gmra.mxu1 %v2390_v23  ;;  %2934 = vmatmul.mubr.f32.gmra.mxu0 %v2390_v23  ;;  %v3315_v23 = vld [vmem:[%s8679_s9 + $0x248] sm:$0xff] }
 0x2f8   : > { %3387 = vmatpush1.msra.mxu1 %v3268_v28  ;;  %3644 = vmatpush1.msra.mxu0 %v3332_v47  ;;  %v3307_v27 = vld [vmem:[%s8679_s9 + $0x208] sm:$0xff]  ;;  %v3242_v28 = vld [vmem:[%s8679_s9] sm:$0xff] }
 0x2f9   : > { %3388 = vmatprep.subr.mxu1 %v3267_v55  ;;  %3645 = vmatprep.subr.mxu0 %v3331_v6  ;;  %v3306_v47 = vld [vmem:[%s8679_s9 + $0x200] sm:$0xff]  ;;  %v3305_v55 = vld [vmem:[%s8679_s9 + $0x1f8] sm:$0xff] }
 0x2fa   : > { %3389 = vmatpush1.msra.mxu1 %v3266_v7  ;;  %3646 = vmatpush1.msra.mxu0 %v3330_v16  ;;  %v3369_v6 = vld [vmem:[%s8679_s9 + $0x3f8] sm:$0xff]  ;;  %v3304_v7 = vld [vmem:[%s8679_s9 + $0x1f0] sm:$0xff] }
 0x2fb   : > { %3390 = vmatprep.subr.mxu1 %v3265_v41  ;;  %3647 = vmatprep.subr.mxu0 %v3329_v50  ;;  %v3368_v16 = vld [vmem:[%s8679_s9 + $0x3f0] sm:$0xff]  ;;  %v3303_v41 = vld [vmem:[%s8679_s9 + $0x1e8] sm:$0xff] }
 0x2fc   : > { %3391 = vmatpush1.msra.mxu1 %v3264_v42  ;;  %3648 = vmatpush1.msra.mxu0 %v3328_v17  ;;  %v3367_v50 = vld [vmem:[%s8679_s9 + $0x3e8] sm:$0xff]  ;;  %v3366_v42 = vld [vmem:[%s8679_s9 + $0x3e0] sm:$0xff]  ;;  %v3301_v17 = vld [vmem:[%s8679_s9 + $0x1d8] sm:$0xff] }
 0x2fd   : > { %3392 = vmatprep.subr.mxu1 %v3263_v63  ;;  %3649 = vmatprep.subr.mxu0 %v3327_v3  ;;  %v3365_v63 = vld [vmem:[%s8679_s9 + $0x3d8] sm:$0xff]  ;;  %v3300_v3 = vld [vmem:[%s8679_s9 + $0x1d0] sm:$0xff] }
 0x2fe   : > { %3393 = vmatpush1.msra.mxu1 %v3262_v20  ;;  %3650 = vmatpush1.msra.mxu0 %v3326_v1  ;;  %v3364_v20 = vld [vmem:[%s8679_s9 + $0x3d0] sm:$0xff]  ;;  %v3299_v1 = vld [vmem:[%s8679_s9 + $0x1c8] sm:$0xff] }
 0x2ff   : > { %3394 = vmatprep.subr.mxu1 %v3261_v48  ;;  %3651 = vmatprep.subr.mxu0 %v3325_v24  ;;  %v3297_v48 = vld [vmem:[%s8679_s9 + $0x1b8] sm:$0xff] }
 0x300   : > { %3395 = vmatpush1.msra.mxu1 %v3260_v25  ;;  %3652 = vmatpush1.msra.mxu0 %v3324_v30  ;;  %v3361_v24 = vld [vmem:[%s8679_s9 + $0x3b8] sm:$0xff]  ;;  %v3296_v25 = vld [vmem:[%s8679_s9 + $0x1b0] sm:$0xff] }
 0x301   : > { %3396 = vmatprep.subr.mxu1 %v3259_v10  ;;  %3653 = vmatprep.subr.mxu0 %v3323_v35  ;;  %v3360_v30 = vld [vmem:[%s8679_s9 + $0x3b0] sm:$0xff]  ;;  %v3294_v10 = vld [vmem:[%s8679_s9 + $0x1a0] sm:$0xff] }
 0x302   : > { %3397 = vmatpush1.msra.mxu1 %v3258_v36  ;;  %3654 = vmatpush1.msra.mxu0 %v3322_v18  ;;  %v3358_v35 = vld [vmem:[%s8679_s9 + $0x3a0] sm:$0xff]  ;;  %v3293_v36 = vld [vmem:[%s8679_s9 + $0x198] sm:$0xff] }
 0x303   : > { %3398 = vmatprep.subr.mxu1 %v3257_v37  ;;  %3655 = vmatprep.subr.mxu0 %v3321_v39  ;;  %v3357_v18 = vld [vmem:[%s8679_s9 + $0x398] sm:$0xff]  ;;  %v3292_v37 = vld [vmem:[%s8679_s9 + $0x190] sm:$0xff] }
 0x304   : > { %3399 = vmatpush1.msra.mxu1 %v3256_v40  ;;  %3656 = vmatpush1.msra.mxu0 %v3320_v44  ;;  %v3356_v39 = vld [vmem:[%s8679_s9 + $0x390] sm:$0xff]  ;;  %v3291_v40 = vld [vmem:[%s8679_s9 + $0x188] sm:$0xff] }
 0x305   : > { %3400 = vmatprep.subr.mxu1 %v3255_v45  ;;  %3657 = vmatprep.subr.mxu0 %v3319_v46  ;;  %v3355_v44 = vld [vmem:[%s8679_s9 + $0x388] sm:$0xff]  ;;  %v3290_v45 = vld [vmem:[%s8679_s9 + $0x180] sm:$0xff] }
 0x306   : > { %3401 = vmatpush1.msra.mxu1 %v3254_v49  ;;  %3658 = vmatpush1.msra.mxu0 %v3318_v52  ;;  %v3354_v46 = vld [vmem:[%s8679_s9 + $0x380] sm:$0xff]  ;;  %v3289_v49 = vld [vmem:[%s8679_s9 + $0x178] sm:$0xff] }
 0x307   : > { %3402 = vmatprep.subr.mxu1 %v3253_v53  ;;  %3659 = vmatprep.subr.mxu0 %v3317_v22  ;;  %v3353_v52 = vld [vmem:[%s8679_s9 + $0x378] sm:$0xff]  ;;  %v3288_v53 = vld [vmem:[%s8679_s9 + $0x170] sm:$0xff] }
 0x308   : > { %3403 = vmatpush1.msra.mxu1 %v3252_v26  ;;  %3660 = vmatpush1.msra.mxu0 %v3316_v54  ;;  %v3352_v22 = vld [vmem:[%s8679_s9 + $0x370] sm:$0xff]  ;;  %v3287_v26 = vld [vmem:[%s8679_s9 + $0x168] sm:$0xff] }
 0x309   : > { %3404 = vmatprep.subr.mxu1 %v3251_v56  ;;  %3661 = vmatprep.subr.mxu0 %v3315_v23  ;;  %v3351_v54 = vld [vmem:[%s8679_s9 + $0x368] sm:$0xff]  ;;  %v3286_v56 = vld [vmem:[%s8679_s9 + $0x160] sm:$0xff] }
 0x30a   : > { %v3350_v23 = vld [vmem:[%s8679_s9 + $0x360] sm:$0xff] }
 0x318   : > { %v2213_v29 = vpop.f32.mrf.mxu0 }
 0x319   : > { %v2214_v57 = vadd.f32 %v2213_v29, %v7684_v33  ;;  %v3250_v29 = vld [vmem:[%s8679_s9 + $0x40] sm:$0xff] }
 0x31a   : > { %v2215_v59 = vpop.f32.mrf.mxu0  ;;  %3405 = vmatpush1.msra.mxu1 %v3250_v29  ;;  %v3285_v29 = vld [vmem:[%s8679_s9 + $0x158] sm:$0xff] }
 0x31b   : > { %v2216_v60 = vadd.f32 %v2215_v59, %v7687_v34  ;;  %v2392_v0 = vmax.f32 %v2214_v57, 0.0  ;;  %v3314_v57 = vld [vmem:[%s8679_s9 + $0x240] sm:$0xff]  ;;  %v3249_v59 = vld [vmem:[%s8679_s9 + $0x38] sm:$0xff] }
 0x31c   : > { %3662 = vmatpush1.msra.mxu0 %v3314_v57  ;;  %3406 = vmatprep.subr.mxu1 %v3249_v59  ;;  %v3349_v57 = vld [vmem:[%s8679_s9 + $0x358] sm:$0xff]  ;;  %v8017_v59 = vpop.f32.mrf.mxu1 }
 0x31d   : > { %v2393_v58 = vmax.f32 %v2216_v60, 0.0  ;;  %v3313_v60 = vld [vmem:[%s8679_s9 + $0x238] sm:$0xff] }
 0x31e   : > { %3663 = vmatprep.subr.mxu0 %v3313_v60  ;;  %v3284_v60 = vld [vmem:[%s8679_s9 + $0x150] sm:$0xff] }
 0x31f   : > { %2682 = vmatprep.mubr.f32.mxu1 %v2393_v58  ;;  %2939 = vmatprep.mubr.f32.mxu0 %v2393_v58  ;;  %v3312_v58 = vld [vmem:[%s8679_s9 + $0x230] sm:$0xff] }
 0x320   : > { %2683 = vmatmul.mubr.f32.gmra.mxu1 %v2392_v0  ;;  %2940 = vmatmul.mubr.f32.gmra.mxu0 %v2392_v0  ;;  %v3248_v0 = vld [vmem:[%s8679_s9 + $0x30] sm:$0xff] }
 0x321   : > { %3407 = vmatpush1.msra.mxu1 %v3248_v0  ;;  %3664 = vmatpush1.msra.mxu0 %v3312_v58  ;;  %v3348_v0 = vld [vmem:[%s8679_s9 + $0x350] sm:$0xff]  ;;  %v3283_v58 = vld [vmem:[%s8679_s9 + $0x148] sm:$0xff] }
 0x322   : > { %3408 = vmatprep.subr.mxu1 %v3247_v4  ;;  %3665 = vmatprep.subr.mxu0 %v3311_v9  ;;  %v3347_v4 = vld [vmem:[%s8679_s9 + $0x348] sm:$0xff]  ;;  %v3282_v9 = vld [vmem:[%s8679_s9 + $0x140] sm:$0xff] }
 0x323   : > { %3409 = vmatpush1.msra.mxu1 %v3246_v12  ;;  %3666 = vmatpush1.msra.mxu0 %v3310_v61  ;;  %v3346_v12 = vld [vmem:[%s8679_s9 + $0x340] sm:$0xff]  ;;  %v3281_v61 = vld [vmem:[%s8679_s9 + $0x138] sm:$0xff] }
 0x324   : > { %3410 = vmatprep.subr.mxu1 %v3245_v19  ;;  %3667 = vmatprep.subr.mxu0 %v3309_v8  ;;  %v3345_v19 = vld [vmem:[%s8679_s9 + $0x338] sm:$0xff]  ;;  %v8043_v8 = vpop.f32.mrf.mxu1 }
 0x325   : > { %3411 = vmatpush1.msra.mxu1 %v3244_v2  ;;  %3668 = vmatpush1.msra.mxu0 %v3308_v13  ;;  %v3280_v2 = vld [vmem:[%s8679_s9 + $0x130] sm:$0xff] }
 0x326   : > { %3412 = vmatprep.subr.mxu1 %v3243_v14  ;;  %3669 = vmatprep.subr.mxu0 %v3307_v27  ;;  %v3344_v13 = vld [vmem:[%s8679_s9 + $0x330] sm:$0xff]  ;;  %v3279_v27 = vld [vmem:[%s8679_s9 + $0x128] sm:$0xff] }
 0x327   : > { %3413 = vmatpush1.msra.mxu1 %v3242_v28  ;;  %3670 = vmatpush1.msra.mxu0 %v3306_v47  ;;  %v3343_v28 = vld [vmem:[%s8679_s9 + $0x328] sm:$0xff] }
 0x328   : > { %3414 = vmatprep.subr.mxu1 %v3305_v55  ;;  %3671 = vmatprep.subr.mxu0 %v3369_v6  ;;  %v3278_v55 = vld [vmem:[%s8679_s9 + $0x120] sm:$0xff] }
 0x329   : > { %v2219_v51 = vpop.f32.mrf.mxu0  ;;  %3415 = vmatpush2.msra.mxu1 %v3304_v7  ;;  %3672 = vmatpush2.msra.mxu0 %v3368_v16  ;;  %v3342_v6 = vld [vmem:[%s8679_s9 + $0x320] sm:$0xff]  ;;  %v3277_v16 = vld [vmem:[%s8679_s9 + $0x118] sm:$0xff] }
 0x32a   : > { %v2220_v21 = vadd.f32 %v2219_v51, %v7684_v33  ;;  %v3302_v51 = vld [vmem:[%s8679_s9 + $0x1e0] sm:$0xff]  ;;  %3416 = vmatprep.subr.mxu1 %v3303_v41  ;;  %3673 = vmatprep.subr.mxu0 %v3367_v50  ;;  %v3341_v41 = vld [vmem:[%s8679_s9 + $0x318] sm:$0xff]  ;;  %v8070_v50 = vpop.f32.mrf.mxu1 }
 0x32b   : > { %v2221_v11 = vpop.f32.mrf.mxu0  ;;  %3417 = vmatpush2.msra.mxu1 %v3302_v51  ;;  %3674 = vmatpush2.msra.mxu0 %v3366_v42  ;;  %v3276_v42 = vld [vmem:[%s8679_s9 + $0x110] sm:$0xff] }
 0x32c   : > { %v2222_v5 = vadd.f32 %v2221_v11, %v7687_v34  ;;  %v2394_v32 = vmax.f32 %v2220_v21, 0.0  ;;  %v3363_v21 = vld [vmem:[%s8679_s9 + $0x3c8] sm:$0xff]  ;;  %3418 = vmatprep.subr.mxu1 %v3301_v17  ;;  %3675 = vmatprep.subr.mxu0 %v3365_v63  ;;  %v3298_v11 = vld [vmem:[%s8679_s9 + $0x1c0] sm:$0xff]  ;;  %v3340_v17 = vld [vmem:[%s8679_s9 + $0x310] sm:$0xff] }
 0x32d   : > { %3419 = vmatpush2.msra.mxu1 %v3300_v3  ;;  %3676 = vmatpush2.msra.mxu0 %v3364_v20  ;;  %v3275_v20 = vld [vmem:[%s8679_s9 + $0x108] sm:$0xff] }
 0x32e   : > { %v2395_v31 = vmax.f32 %v2222_v5, 0.0  ;;  %v3362_v5 = vld [vmem:[%s8679_s9 + $0x3c0] sm:$0xff]  ;;  %3420 = vmatprep.subr.mxu1 %v3299_v1  ;;  %3677 = vmatprep.subr.mxu0 %v3363_v21  ;;  %v3339_v1 = vld [vmem:[%s8679_s9 + $0x308] sm:$0xff]  ;;  %v8085_v21 = vpop.f32.mrf.mxu1 }
 0x32f   : > { %3421 = vmatpush2.msra.mxu1 %v3298_v11  ;;  %3678 = vmatpush2.msra.mxu0 %v3362_v5  ;;  %v3274_v11 = vld [vmem:[%s8679_s9 + $0x100] sm:$0xff] }
 0x330   : > { %2688 = vmatprep.mubr.f32.mxu1 %v2395_v31  ;;  %2945 = vmatprep.mubr.f32.mxu0 %v2395_v31  ;;  %v3295_v31 = vld [vmem:[%s8679_s9 + $0x1a8] sm:$0xff]  ;;  %v3338_v5 = vld [vmem:[%s8679_s9 + $0x300] sm:$0xff] }
 0x331   : > { %2689 = vmatmul.mubr.f32.gmra.mxu1 %v2394_v32  ;;  %2946 = vmatmul.mubr.f32.gmra.mxu0 %v2394_v32  ;;  %v3359_v32 = vld [vmem:[%s8679_s9 + $0x3a8] sm:$0xff] }
 0x332   : > { %3422 = vmatprep.subr.mxu1 %v3297_v48  ;;  %3679 = vmatprep.subr.mxu0 %v3361_v24  ;;  %v8093_v48 = vpop.f32.mrf.mxu1 }
 0x333   : > { %3423 = vmatpush2.msra.mxu1 %v3296_v25  ;;  %3680 = vmatpush2.msra.mxu0 %v3360_v30 }
 0x334   : > { %3424 = vmatprep.subr.mxu1 %v3295_v31  ;;  %3681 = vmatprep.subr.mxu0 %v3359_v32  ;;  %v8095_v24 = vpop.f32.mrf.mxu1 }
 0x335   : > { %3425 = vmatpush2.msra.mxu1 %v3294_v10  ;;  %3682 = vmatpush2.msra.mxu0 %v3358_v35 }
 0x336   : > { %3426 = vmatprep.subr.mxu1 %v3293_v36  ;;  %3683 = vmatprep.subr.mxu0 %v3357_v18  ;;  %v8097_v25 = vpop.f32.mrf.mxu1 }
 0x337   : > { %3427 = vmatpush2.msra.mxu1 %v3292_v37  ;;  %3684 = vmatpush2.msra.mxu0 %v3356_v39 }
 0x338   : > { %3428 = vmatprep.subr.mxu1 %v3291_v40  ;;  %3685 = vmatprep.subr.mxu0 %v3355_v44  ;;  %v8099_v30 = vpop.f32.mrf.mxu1 }
 0x339   : > { %3429 = vmatpush2.msra.mxu1 %v3290_v45  ;;  %3686 = vmatpush2.msra.mxu0 %v3354_v46 }
 0x33a   : > { %3430 = vmatprep.subr.mxu1 %v3289_v49  ;;  %3687 = vmatprep.subr.mxu0 %v3353_v52  ;;  %v8101_v32 = vpop.f32.mrf.mxu1 }
 0x33b   : > { %3431 = vmatpush2.msra.mxu1 %v3288_v53  ;;  %3688 = vmatpush2.msra.mxu0 %v3352_v22 }
 0x33c   : > { %3432 = vmatprep.subr.mxu1 %v3287_v26  ;;  %3689 = vmatprep.subr.mxu0 %v3351_v54  ;;  %v8105_v37 = vpop.f32.mrf.mxu1 }
 0x33d   : > { %3433 = vmatpush2.msra.mxu1 %v3286_v56  ;;  %3690 = vmatpush2.msra.mxu0 %v3350_v23 }
 0x33e   : > { %3434 = vmatprep.subr.mxu1 %v3285_v29  ;;  %3691 = vmatprep.subr.mxu0 %v3349_v57 }
 0x33f   : > { %3435 = vmatpush2.msra.mxu1 %v3284_v60  ;;  %3692 = vmatpush2.msra.mxu0 %v3348_v0 }
 0x340   : > { %3436 = vmatprep.subr.mxu1 %v3283_v58  ;;  %3693 = vmatprep.subr.mxu0 %v3347_v4 }
 0x341   : > { %3437 = vmatpush2.msra.mxu1 %v3282_v9  ;;  %3694 = vmatpush2.msra.mxu0 %v3346_v12 }
 0x342   : > { %3438 = vmatprep.subr.mxu1 %v3281_v61  ;;  %3695 = vmatprep.subr.mxu0 %v3345_v19 }
 0x343   : > { %3439 = vmatpush2.msra.mxu1 %v3280_v2  ;;  %3696 = vmatpush2.msra.mxu0 %v3344_v13 }
 0x344   : > { %3440 = vmatprep.subr.mxu1 %v3279_v27  ;;  %3697 = vmatprep.subr.mxu0 %v3343_v28 }
 0x345   : > { %3441 = vmatpush2.msra.mxu1 %v3278_v55  ;;  %3698 = vmatpush2.msra.mxu0 %v3342_v6 }
 0x346   : > { %3442 = vmatprep.subr.mxu1 %v3277_v16  ;;  %3699 = vmatprep.subr.mxu0 %v3341_v41 }
 0x347   : > { %3443 = vmatpush2.msra.mxu1 %v3276_v42  ;;  %3700 = vmatpush2.msra.mxu0 %v3340_v17 }
 0x348   : > { %3444 = vmatprep.subr.mxu1 %v3275_v20  ;;  %3701 = vmatprep.subr.mxu0 %v3339_v1 }
 0x349   : > { %3445 = vmatpush2.msra.mxu1 %v3274_v11  ;;  %3702 = vmatpush2.msra.mxu0 %v3338_v5 }
 0x35b   : > { %v2225_v14 = vpop.f32.mrf.mxu0  ;;  %v8107_v44 = vpop.f32.mrf.mxu1 }
 0x35c   : > { %v2226_v47 = vadd.f32 %v2225_v14, %v7684_v33 }
 0x35d   : > { %v2227_v7 = vpop.f32.mrf.mxu0  ;;  %v8111_v22 = vpop.f32.mrf.mxu1 }
 0x35e   : > { %v2228_v51 = vadd.f32 %v2227_v7, %v7687_v34  ;;  %v2396_v63 = vmax.f32 %v2226_v47, 0.0 }
 0x360   : > { %v2397_v3 = vmax.f32 %v2228_v51, 0.0 }
 0x362   : > { %2694 = vmatprep.mubr.f32.mxu1 %v2397_v3  ;;  %2951 = vmatprep.mubr.f32.mxu0 %v2397_v3 }
 0x363   : > { %2695 = vmatmul.mubr.f32.gmra.mxu1 %v2396_v63  ;;  %2952 = vmatmul.mubr.f32.gmra.mxu0 %v2396_v63 }
 0x36d   : > { %v2231_v31 = vpop.f32.mrf.mxu0  ;;  %v8115_v29 = vpop.f32.mrf.mxu1 }
 0x36e   : > { %v2232_v10 = vadd.f32 %v2231_v31, %v7684_v33 }
 0x36f   : > { %v2233_v35 = vpop.f32.mrf.mxu0  ;;  %v8119_v12 = vpop.f32.mrf.mxu1 }
 0x370   : > { %v2234_v36 = vadd.f32 %v2233_v35, %v7687_v34  ;;  %v2398_v39 = vmax.f32 %v2232_v10, 0.0 }
 0x372   : > { %v2399_v18 = vmax.f32 %v2234_v36, 0.0 }
 0x373   : > { %v2237_v40 = vpop.f32.mrf.mxu0  ;;  %v8123_v28 = vpop.f32.mrf.mxu1 }
 0x374   : > { %2700 = vmatprep.mubr.f32.mxu1 %v2399_v18  ;;  %2957 = vmatprep.mubr.f32.mxu0 %v2399_v18  ;;  %v2238_v45 = vadd.f32 %v2237_v40, %v7684_v33 }
 0x375   : > { %v2239_v46 = vpop.f32.mrf.mxu0  ;;  %2701 = vmatmul.mubr.f32.gmra.mxu1 %v2398_v39  ;;  %2958 = vmatmul.mubr.f32.gmra.mxu0 %v2398_v39  ;;  %v8127_v51 = vpop.f32.mrf.mxu1 }
 0x376   : > { %v2240_v49 = vadd.f32 %v2239_v46, %v7687_v34  ;;  %v2400_v26 = vmax.f32 %v2238_v45, 0.0 }
 0x377   : > { %v2243_v52 = vpop.f32.mrf.mxu0  ;;  %v8131_v11 = vpop.f32.mrf.mxu1 }
 0x378   : > { %v2401_v53 = vmax.f32 %v2240_v49, 0.0  ;;  %v2244_v54 = vadd.f32 %v2243_v52, %v7684_v33 }
 0x379   : > { %v2245_v56 = vpop.f32.mrf.mxu0  ;;  %v8135_v39 = vpop.f32.mrf.mxu1 }
 0x37a   : > { %v2246_v23 = vadd.f32 %v2245_v56, %v7687_v34  ;;  %2706 = vmatprep.mubr.f32.mxu1 %v2401_v53  ;;  %2963 = vmatprep.mubr.f32.mxu0 %v2401_v53  ;;  %v2402_v0 = vmax.f32 %v2244_v54, 0.0 }
 0x37b   : > { %v2249_v57 = vpop.f32.mrf.mxu0  ;;  %2707 = vmatmul.mubr.f32.gmra.mxu1 %v2400_v26  ;;  %2964 = vmatmul.mubr.f32.gmra.mxu0 %v2400_v26  ;;  %v8139_v26 = vpop.f32.mrf.mxu1 }
 0x37c   : > { %v2403_v60 = vmax.f32 %v2246_v23, 0.0  ;;  %v2250_v58 = vadd.f32 %v2249_v57, %v7684_v33 }
 0x37d   : > { %v2251_v4 = vpop.f32.mrf.mxu0 }
 0x37e   : > { %v2252_v9 = vadd.f32 %v2251_v4, %v7687_v34  ;;  %2712 = vmatprep.mubr.f32.mxu1 %v2403_v60  ;;  %2969 = vmatprep.mubr.f32.mxu0 %v2403_v60  ;;  %v2404_v2 = vmax.f32 %v2250_v58, 0.0  ;;  %v8145_v4 = vpop.f32.mrf.mxu1 }
 0x37f   : > { %v2255_v61 = vpop.f32.mrf.mxu0  ;;  %2713 = vmatmul.mubr.f32.gmra.mxu1 %v2402_v0  ;;  %2970 = vmatmul.mubr.f32.gmra.mxu0 %v2402_v0  ;;  %v2294_v0 = vadd.f32 %v8043_v8, %v7687_v34 }
 0x380   : > { %v2405_v19 = vmax.f32 %v2252_v9, 0.0  ;;  %v2256_v13 = vadd.f32 %v2255_v61, %v7684_v33  ;;  %v2292_v61 = vadd.f32 %v8017_v59, %v7684_v33  ;;  %v8151_v8 = vpop.f32.mrf.mxu1  ;;  %v2306_v59 = vadd.f32 %v8095_v24, %v7687_v34 }
 0x381   : > { %v2257_v14 = vpop.f32.mrf.mxu0  ;;  %v2310_v24 = vadd.f32 %v8097_v25, %v7684_v33 }
 0x382   : > { %v2258_v27 = vadd.f32 %v2257_v14, %v7687_v34  ;;  %2718 = vmatprep.mubr.f32.mxu1 %v2405_v19  ;;  %2975 = vmatprep.mubr.f32.mxu0 %v2405_v19  ;;  %v2406_v6 = vmax.f32 %v2256_v13, 0.0  ;;  %v2300_v13 = vadd.f32 %v8085_v21, %v7687_v34  ;;  %v2418_v14 = vmax.f32 %v2292_v61, 0.0 }
 0x383   : > { %v2261_v47 = vpop.f32.mrf.mxu0  ;;  %2719 = vmatmul.mubr.f32.gmra.mxu1 %v2404_v2  ;;  %2976 = vmatmul.mubr.f32.gmra.mxu0 %v2404_v2  ;;  %v2419_v2 = vmax.f32 %v2294_v0, 0.0 }
 0x384   : > { %v2407_v55 = vmax.f32 %v2258_v27, 0.0  ;;  %v2262_v7 = vadd.f32 %v2261_v47, %v7684_v33  ;;  %v2298_v27 = vadd.f32 %v8070_v50, %v7684_v33  ;;  %v2421_v47 = vmax.f32 %v2300_v13, 0.0 }
 0x385   : > { %v2263_v16 = vpop.f32.mrf.mxu0 }
 0x386   : > { %v2264_v41 = vadd.f32 %v2263_v16, %v7687_v34  ;;  %2724 = vmatprep.mubr.f32.mxu1 %v2407_v55  ;;  %2981 = vmatprep.mubr.f32.mxu0 %v2407_v55  ;;  %v2408_v63 = vmax.f32 %v2262_v7, 0.0  ;;  %v8157_v55 = vpop.f32.mrf.mxu1  ;;  %v2420_v21 = vmax.f32 %v2298_v27, 0.0  ;;  %v2423_v7 = vmax.f32 %v2306_v59, 0.0 }
 0x387   : > { %v2267_v42 = vpop.f32.mrf.mxu0  ;;  %2725 = vmatmul.mubr.f32.gmra.mxu1 %v2406_v6  ;;  %2982 = vmatmul.mubr.f32.gmra.mxu0 %v2406_v6  ;;  %v2304_v6 = vadd.f32 %v8093_v48, %v7684_v33  ;;  %v2312_v16 = vadd.f32 %v8099_v30, %v7687_v34  ;;  %v2424_v48 = vmax.f32 %v2310_v24, 0.0  ;;  %v2316_v30 = vadd.f32 %v8101_v32, %v7684_v33 }
 0x388   : > { %v2409_v17 = vmax.f32 %v2264_v41, 0.0  ;;  %v2268_v3 = vadd.f32 %v2267_v42, %v7684_v33  ;;  %v8163_v41 = vpop.f32.mrf.mxu1 }
 0x389   : > { %v2269_v20 = vpop.f32.mrf.mxu0  ;;  %v2422_v50 = vmax.f32 %v2304_v6, 0.0  ;;  %v2425_v42 = vmax.f32 %v2312_v16, 0.0  ;;  %v2426_v25 = vmax.f32 %v2316_v30, 0.0 }
 0x38a   : > { %v2270_v1 = vadd.f32 %v2269_v20, %v7687_v34  ;;  %2730 = vmatprep.mubr.f32.mxu1 %v2409_v17  ;;  %2987 = vmatprep.mubr.f32.mxu0 %v2409_v17  ;;  %v2410_v10 = vmax.f32 %v2268_v3, 0.0  ;;  %v2318_v17 = vadd.f32 %v8105_v37, %v7687_v34  ;;  %v2324_v20 = vadd.f32 %v8111_v22, %v7687_v34 }
 0x38b   : > { %v2273_v5 = vpop.f32.mrf.mxu0  ;;  %2731 = vmatmul.mubr.f32.gmra.mxu1 %v2408_v63  ;;  %2988 = vmatmul.mubr.f32.gmra.mxu0 %v2408_v63  ;;  %v2359_v63 = vpop.f32.mrf.mxu1  ;;  %v2322_v37 = vadd.f32 %v8107_v44, %v7684_v33  ;;  %v2328_v22 = vadd.f32 %v8115_v29, %v7684_v33 }
 0x38c   : > { %v2411_v31 = vmax.f32 %v2270_v1, 0.0  ;;  %v2274_v35 = vadd.f32 %v2273_v5, %v7684_v33  ;;  %v2427_v3 = vmax.f32 %v2318_v17, 0.0  ;;  %v2429_v5 = vmax.f32 %v2324_v20, 0.0 }
 0x38d   : > { %v2275_v36 = vpop.f32.mrf.mxu0  ;;  %v8173_v1 = vpop.f32.mrf.mxu1  ;;  %v2428_v32 = vmax.f32 %v2322_v37, 0.0  ;;  %v2430_v44 = vmax.f32 %v2328_v22, 0.0  ;;  %v2360_v0 = vadd.f32 %v2359_v63, %v7687_v34 }
 0x38e   : > { %v2276_v18 = vadd.f32 %v2275_v36, %v7687_v34  ;;  %2736 = vmatprep.mubr.f32.mxu1 %v2411_v31  ;;  %2993 = vmatprep.mubr.f32.mxu0 %v2411_v31  ;;  %v2412_v46 = vmax.f32 %v2274_v35, 0.0  ;;  %v2330_v31 = vadd.f32 %v8119_v12, %v7687_v34  ;;  %v2336_v36 = vadd.f32 %v8127_v51, %v7687_v34 }
 0x38f   : > { %v2279_v40 = vpop.f32.mrf.mxu0  ;;  %2737 = vmatmul.mubr.f32.gmra.mxu1 %v2410_v10  ;;  %2994 = vmatmul.mubr.f32.gmra.mxu0 %v2410_v10  ;;  %v2365_v10 = vpop.f32.mrf.mxu1  ;;  %v2334_v12 = vadd.f32 %v8123_v28, %v7684_v33  ;;  %v2340_v51 = vadd.f32 %v8131_v11, %v7684_v33  ;;  %v2364_v13 = vadd.f32 %v8173_v1, %v7684_v33 }
 0x390   : > { %v2413_v45 = vmax.f32 %v2276_v18, 0.0  ;;  %v2280_v49 = vadd.f32 %v2279_v40, %v7684_v33  ;;  %v2431_v35 = vmax.f32 %v2330_v31, 0.0  ;;  %v2433_v40 = vmax.f32 %v2336_v36, 0.0 }
 0x391   : > { %v2281_v52 = vpop.f32.mrf.mxu0  ;;  %v2369_v18 = vpop.f32.mrf.mxu1  ;;  %v2432_v29 = vmax.f32 %v2334_v12, 0.0  ;;  %v2434_v28 = vmax.f32 %v2340_v51, 0.0  ;;  %v2366_v61 = vadd.f32 %v2365_v10, %v7687_v34  ;;  %v2442_v59 = vmax.f32 %v2364_v13, 0.0 }
 0x392   : > { %v2282_v53 = vadd.f32 %v2281_v52, %v7687_v34  ;;  %2742 = vmatprep.mubr.f32.mxu1 %v2413_v45  ;;  %2999 = vmatprep.mubr.f32.mxu0 %v2413_v45  ;;  %v2414_v23 = vmax.f32 %v2280_v49, 0.0  ;;  %v2342_v45 = vadd.f32 %v8135_v39, %v7687_v34  ;;  %v2348_v52 = vadd.f32 %v8145_v4, %v7687_v34 }
 0x393   : > { %v2285_v54 = vpop.f32.mrf.mxu0  ;;  %2743 = vmatmul.mubr.f32.gmra.mxu1 %v2412_v46  ;;  %3000 = vmatmul.mubr.f32.gmra.mxu0 %v2412_v46  ;;  %v2371_v46 = vpop.f32.mrf.mxu1  ;;  %v2346_v39 = vadd.f32 %v8139_v26, %v7684_v33  ;;  %v2358_v4 = vadd.f32 %v8163_v41, %v7684_v33  ;;  %v2443_v27 = vmax.f32 %v2366_v61, 0.0  ;;  %v2578_v41 = vld [vmem:[%s8678_s8] sm:$0xf] }
 0x394   : > { %v2415_v56 = vmax.f32 %v2282_v53, 0.0  ;;  %v2286_v57 = vadd.f32 %v2285_v54, %v7684_v33  ;;  %v2435_v49 = vmax.f32 %v2342_v45, 0.0  ;;  %v2437_v54 = vmax.f32 %v2348_v52, 0.0 }
 0x395   : > { %v2287_v60 = vpop.f32.mrf.mxu0  ;;  %v2375_v53 = vpop.f32.mrf.mxu1  ;;  %v2436_v11 = vmax.f32 %v2346_v39, 0.0  ;;  %v8211_v63 = vrot.slane %v2578_v41, %v6346_v62  ;;  %v8218_v20 = vrot.slane %v2578_v41, %v7027_v15  ;;  %v8222_v37 = vrot.slane %v2578_v41, %v6960_v43 }
 0x396   : > { %v2288_v58 = vadd.f32 %v2287_v60, %v7687_v34  ;;  %2748 = vmatprep.mubr.f32.mxu1 %v2415_v56  ;;  %3005 = vmatprep.mubr.f32.mxu0 %v2415_v56  ;;  %v2416_v19 = vmax.f32 %v2286_v57, 0.0  ;;  %v2354_v56 = vadd.f32 %v8157_v55, %v7687_v34  ;;  %v2352_v57 = vadd.f32 %v8151_v8, %v7684_v33 }
 0x397   : > { %2749 = vmatmul.mubr.f32.gmra.mxu1 %v2414_v23  ;;  %3006 = vmatmul.mubr.f32.gmra.mxu0 %v2414_v23  ;;  %v2377_v23 = vpop.f32.mrf.mxu1  ;;  %v2370_v55 = vadd.f32 %v2369_v18, %v7684_v33  ;;  %v2376_v24 = vadd.f32 %v2375_v53, %v7684_v33 }
 0x398   : > { %v2417_v9 = vmax.f32 %v2288_v58, 0.0  ;;  %v2439_v60 = vmax.f32 %v2354_v56, 0.0  ;;  %v2438_v26 = vmax.f32 %v2352_v57, 0.0  ;;  %v2378_v16 = vadd.f32 %v2377_v23, %v7687_v34 }
 0x399   : > { %v2381_v58 = vpop.f32.mrf.mxu1  ;;  %v2446_v1 = vmax.f32 %v2376_v24, 0.0 }
 0x39a   : > { %2754 = vmatprep.mubr.f32.mxu1 %v2417_v9  ;;  %3011 = vmatprep.mubr.f32.mxu0 %v2417_v9  ;;  %v2441_v9 = vmax.f32 %v2360_v0, 0.0 }
 0x39b   : > { %2755 = vmatmul.mubr.f32.gmra.mxu1 %v2416_v19  ;;  %3012 = vmatmul.mubr.f32.gmra.mxu0 %v2416_v19  ;;  %v2383_v19 = vpop.f32.mrf.mxu1 }
 0x39c   : > { %2760 = vmatprep.mubr.f32.mxu1 %v2419_v2  ;;  %3017 = vmatprep.mubr.f32.mxu0 %v2419_v2  ;;  %v2440_v2 = vmax.f32 %v2358_v4, 0.0  ;;  %v2384_v30 = vadd.f32 %v2383_v19, %v7687_v34 }
 0x39e   : > { %v2449_v31 = vmax.f32 %v2384_v30, 0.0 }
 0x39f   : > { %2761 = vmatmul.mubr.f32.gmra.mxu1 %v2418_v14  ;;  %3018 = vmatmul.mubr.f32.gmra.mxu0 %v2418_v14 }
 0x3a0   : > { %2766 = vmatprep.mubr.f32.mxu1 %v2421_v47  ;;  %3023 = vmatprep.mubr.f32.mxu0 %v2421_v47  ;;  %v2372_v47 = vadd.f32 %v2371_v46, %v7687_v34 }
 0x3a3   : > { %2767 = vmatmul.mubr.f32.gmra.mxu1 %v2420_v21  ;;  %3024 = vmatmul.mubr.f32.gmra.mxu0 %v2420_v21 }
 0x3a4   : > { %2772 = vmatprep.mubr.f32.mxu1 %v2423_v7  ;;  %3029 = vmatprep.mubr.f32.mxu0 %v2423_v7  ;;  %v2445_v7 = vmax.f32 %v2372_v47, 0.0 }
 0x3a7   : > { %2773 = vmatmul.mubr.f32.gmra.mxu1 %v2422_v50  ;;  %3030 = vmatmul.mubr.f32.gmra.mxu0 %v2422_v50  ;;  %v2444_v50 = vmax.f32 %v2370_v55, 0.0 }
 0x3a8   : > { %2778 = vmatprep.mubr.f32.mxu1 %v2425_v42  ;;  %3035 = vmatprep.mubr.f32.mxu0 %v2425_v42 }
 0x3ab   : > { %2779 = vmatmul.mubr.f32.gmra.mxu1 %v2424_v48  ;;  %3036 = vmatmul.mubr.f32.gmra.mxu0 %v2424_v48  ;;  %v2447_v48 = vmax.f32 %v2378_v16, 0.0 }
 0x3ac   : > { %2784 = vmatprep.mubr.f32.mxu1 %v2427_v3  ;;  %3041 = vmatprep.mubr.f32.mxu0 %v2427_v3  ;;  %v8215_v3 = vrot.slane %v2578_v41, %v6623_v38 }
 0x3af   : > { %2785 = vmatmul.mubr.f32.gmra.mxu1 %v2426_v25  ;;  %3042 = vmatmul.mubr.f32.gmra.mxu0 %v2426_v25  ;;  %v2666_v8 = vpop.f32.mrf.mxu1  ;;  %v2923_v14 = vpop.f32.mrf.mxu0  ;;  %v2382_v25 = vadd.f32 %v2381_v58, %v7684_v33 }
 0x3b0   : > { %2790 = vmatprep.mubr.f32.mxu1 %v2429_v5  ;;  %3047 = vmatprep.mubr.f32.mxu0 %v2429_v5  ;;  %v2924_v33 = vadd.f32 %v2923_v14, %v8218_v20 }
 0x3b1   : > { %v2668_v21 = vpop.f32.mrf.mxu1  ;;  %v2925_v6 = vpop.f32.mrf.mxu0  ;;  %v2448_v15 = vmax.f32 %v2382_v25, 0.0 }
 0x3b2   : > { %v2669_v34 = vadd.f32 %v2668_v21, %v8215_v3  ;;  %v2926_v10 = vadd.f32 %v2925_v6, %v8211_v63 }
 0x3b3   : > { %2791 = vmatmul.mubr.f32.gmra.mxu1 %v2428_v32  ;;  %3048 = vmatmul.mubr.f32.gmra.mxu0 %v2428_v32  ;;  %v2672_v42 = vpop.f32.mrf.mxu1  ;;  %v2929_v17 = vpop.f32.mrf.mxu0 }
 0x3b4   : > { %2796 = vmatprep.mubr.f32.mxu1 %v2431_v35  ;;  %3053 = vmatprep.mubr.f32.mxu0 %v2431_v35  ;;  %v2667_v35 = vadd.f32 %v2666_v8, %v8222_v37  ;;  %v3115_v36 = vmax.f32 %v2669_v34, 0.0  ;;  %v3117_v18 = vmax.f32 %v2926_v10, 0.0  ;;  %v2673_v51 = vadd.f32 %v2672_v42, %v8222_v37 }
 0x3b5   : > { %v2674_v62 = vpop.f32.mrf.mxu1  ;;  %v2931_v5 = vpop.f32.mrf.mxu0 }
 0x3b6   : > { %v2932_v12 = vadd.f32 %v2931_v5, %v8211_v63  ;;  %v3114_v46 = vmax.f32 %v2667_v35, 0.0  ;;  %v3118_v23 = vmax.f32 %v2673_v51, 0.0 }
 0x3b7   : > { %2797 = vmatmul.mubr.f32.gmra.mxu1 %v2430_v44  ;;  %3054 = vmatmul.mubr.f32.gmra.mxu0 %v2430_v44  ;;  %v2678_v32 = vpop.f32.mrf.mxu1  ;;  %v2935_v22 = vpop.f32.mrf.mxu0  ;;  %v2675_v44 = vadd.f32 %v2674_v62, %v8215_v3 }
 0x3b8   : > { %2802 = vmatprep.mubr.f32.mxu1 %v2433_v40  ;;  %3059 = vmatprep.mubr.f32.mxu0 %v2433_v40  ;;  %v3121_v53 = vmax.f32 %v2932_v12, 0.0  ;;  %v2679_v57 = vadd.f32 %v2678_v32, %v8222_v37 }
 0x3b9   : > { %v2680_v40 = vpop.f32.mrf.mxu1  ;;  %v2937_v45 = vpop.f32.mrf.mxu0  ;;  %v3119_v52 = vmax.f32 %v2675_v44, 0.0 }
 0x3ba   : > { %v2938_v39 = vadd.f32 %v2937_v45, %v8211_v63  ;;  %v3122_v13 = vmax.f32 %v2679_v57, 0.0 }
 0x3bb   : > { %2803 = vmatmul.mubr.f32.gmra.mxu1 %v2432_v29  ;;  %3060 = vmatmul.mubr.f32.gmra.mxu0 %v2432_v29  ;;  %v3116_v29 = vmax.f32 %v2924_v33, 0.0 }
 0x3bc   : > { %2808 = vmatprep.mubr.f32.mxu1 %v2435_v49  ;;  %3065 = vmatprep.mubr.f32.mxu0 %v2435_v49  ;;  %v2930_v49 = vadd.f32 %v2929_v17, %v8218_v20  ;;  %v3125_v58 = vmax.f32 %v2938_v39, 0.0 }
 0x3bf   : > { %2809 = vmatmul.mubr.f32.gmra.mxu1 %v2434_v28  ;;  %3066 = vmatmul.mubr.f32.gmra.mxu0 %v2434_v28  ;;  %v2681_v28 = vadd.f32 %v2680_v40, %v8215_v3 }
 0x3c0   : > { %2814 = vmatprep.mubr.f32.mxu1 %v2437_v54  ;;  %3071 = vmatprep.mubr.f32.mxu0 %v2437_v54 }
 0x3c1   : > { %v3123_v0 = vmax.f32 %v2681_v28, 0.0 }
 0x3c3   : > { %2815 = vmatmul.mubr.f32.gmra.mxu1 %v2436_v11  ;;  %3072 = vmatmul.mubr.f32.gmra.mxu0 %v2436_v11  ;;  %v3120_v11 = vmax.f32 %v2930_v49, 0.0 }
 0x3c4   : > { %2820 = vmatprep.mubr.f32.mxu1 %v2439_v60  ;;  %3077 = vmatprep.mubr.f32.mxu0 %v2439_v60  ;;  %v2936_v60 = vadd.f32 %v2935_v22, %v8218_v20 }
 0x3c6   : > { %v3124_v8 = vmax.f32 %v2936_v60, 0.0 }
 0x3c7   : > { %2821 = vmatmul.mubr.f32.gmra.mxu1 %v2438_v26  ;;  %3078 = vmatmul.mubr.f32.gmra.mxu0 %v2438_v26 }
 0x3c8   : > { %2826 = vmatprep.mubr.f32.mxu1 %v2441_v9  ;;  %3083 = vmatprep.mubr.f32.mxu0 %v2441_v9 }
 0x3cb   : > { %2827 = vmatmul.mubr.f32.gmra.mxu1 %v2440_v2  ;;  %3084 = vmatmul.mubr.f32.gmra.mxu0 %v2440_v2 }
 0x3cc   : > { %2832 = vmatprep.mubr.f32.mxu1 %v2443_v27  ;;  %3089 = vmatprep.mubr.f32.mxu0 %v2443_v27 }
 0x3cf   : > { %2833 = vmatmul.mubr.f32.gmra.mxu1 %v2442_v59  ;;  %3090 = vmatmul.mubr.f32.gmra.mxu0 %v2442_v59 }
 0x3d0   : > { %2838 = vmatprep.mubr.f32.mxu1 %v2445_v7  ;;  %3095 = vmatprep.mubr.f32.mxu0 %v2445_v7 }
 0x3d3   : > { %2839 = vmatmul.mubr.f32.gmra.mxu1 %v2444_v50  ;;  %3096 = vmatmul.mubr.f32.gmra.mxu0 %v2444_v50 }
 0x3d4   : > { %2844 = vmatprep.mubr.f32.mxu1 %v2447_v48  ;;  %3101 = vmatprep.mubr.f32.mxu0 %v2447_v48 }
 0x3d7   : > { %2845 = vmatmul.mubr.f32.gmra.mxu1 %v2446_v1  ;;  %3102 = vmatmul.mubr.f32.gmra.mxu0 %v2446_v1 }
 0x3d8   : > { %2850 = vmatprep.mubr.f32.mxu1 %v2449_v31  ;;  %3107 = vmatprep.mubr.f32.mxu0 %v2449_v31 }
 0x3db   : > { %2851 = vmatmul.mubr.f32.gmra.mxu1 %v2448_v15  ;;  %3108 = vmatmul.mubr.f32.gmra.mxu0 %v2448_v15 }
 0x3dc   : > { %3446 = vmatprep.mubr.f32.mxu1 %v3115_v36  ;;  %3703 = vmatprep.mubr.f32.mxu0 %v3117_v18 }
 0x3df   : > { %3447 = vmatmul.mubr.f32.vlgmr.msra.gmra.mxu1 %v3114_v46  ;;  %3704 = vmatmul.mubr.f32.vlgmr.msra.gmra.mxu0 %v3116_v29 }
 0x3e0   : > { %3452 = vmatprep.mubr.f32.mxu1 %v3119_v52  ;;  %3709 = vmatprep.mubr.f32.mxu0 %v3121_v53  ;;  %v2684_v54 = vpop.f32.mrf.mxu1  ;;  %v2941_v56 = vpop.f32.mrf.mxu0 }
 0x3e1   : > { %v2685_v26 = vadd.f32 %v2684_v54, %v8222_v37  ;;  %v2942_v19 = vadd.f32 %v2941_v56, %v8218_v20 }
 0x3e2   : > { %v2686_v4 = vpop.f32.mrf.mxu1  ;;  %v2943_v9 = vpop.f32.mrf.mxu0 }
 0x3e3   : > { %3453 = vmatmul.mubr.f32.gmra.mxu1 %v3118_v23  ;;  %3710 = vmatmul.mubr.f32.gmra.mxu0 %v3120_v11  ;;  %v2687_v61 = vadd.f32 %v2686_v4, %v8215_v3  ;;  %v2944_v2 = vadd.f32 %v2943_v9, %v8211_v63  ;;  %v3126_v47 = vmax.f32 %v2685_v26, 0.0  ;;  %v3128_v59 = vmax.f32 %v2942_v19, 0.0 }
 0x3e4   : > { %3458 = vmatprep.mubr.f32.mxu1 %v3123_v0  ;;  %3715 = vmatprep.mubr.f32.mxu0 %v3125_v58 }
 0x3e5   : > { %v3127_v14 = vmax.f32 %v2687_v61, 0.0  ;;  %v3129_v27 = vmax.f32 %v2944_v2, 0.0 }
 0x3e7   : > { %3459 = vmatmul.mubr.f32.gmra.mxu1 %v3122_v13  ;;  %3716 = vmatmul.mubr.f32.gmra.mxu0 %v3124_v8 }
 0x3e8   : > { %3464 = vmatprep.mubr.f32.mxu1 %v3127_v14  ;;  %3721 = vmatprep.mubr.f32.mxu0 %v3129_v27 }
 0x3eb   : > { %3465 = vmatmul.mubr.f32.gmra.mxu1 %v3126_v47  ;;  %3722 = vmatmul.mubr.f32.gmra.mxu0 %v3128_v59 }
 0x3f1   : > { %v2690_v55 = vpop.f32.mrf.mxu1  ;;  %v2947_v21 = vpop.f32.mrf.mxu0 }
 0x3f2   : > { %v2691_v6 = vadd.f32 %v2690_v55, %v8222_v37  ;;  %v2948_v7 = vadd.f32 %v2947_v21, %v8218_v20 }
 0x3f3   : > { %v2692_v16 = vpop.f32.mrf.mxu1  ;;  %v2949_v41 = vpop.f32.mrf.mxu0 }
 0x3f4   : > { %v2693_v50 = vadd.f32 %v2692_v16, %v8215_v3  ;;  %v2950_v24 = vadd.f32 %v2949_v41, %v8211_v63  ;;  %v3130_v48 = vmax.f32 %v2691_v6, 0.0  ;;  %v3132_v30 = vmax.f32 %v2948_v7, 0.0 }
 0x3f6   : > { %v3131_v42 = vmax.f32 %v2693_v50, 0.0  ;;  %v3133_v17 = vmax.f32 %v2950_v24, 0.0 }
 0x3f8   : > { %3470 = vmatprep.mubr.f32.mxu1 %v3131_v42  ;;  %3727 = vmatprep.mubr.f32.mxu0 %v3133_v17 }
 0x3f9   : > { %3471 = vmatmul.mubr.f32.gmra.mxu1 %v3130_v48  ;;  %3728 = vmatmul.mubr.f32.gmra.mxu0 %v3132_v30 }
 0x423   : > { %v2696_v1 = vpop.f32.mrf.mxu1  ;;  %v2953_v25 = vpop.f32.mrf.mxu0 }
 0x424   : > { %v2697_v62 = vadd.f32 %v2696_v1, %v8222_v37  ;;  %v2954_v5 = vadd.f32 %v2953_v25, %v8218_v20 }
 0x425   : > { %v2698_v31 = vpop.f32.mrf.mxu1  ;;  %v2955_v34 = vpop.f32.mrf.mxu0 }
 0x426   : > { %v2699_v10 = vadd.f32 %v2698_v31, %v8215_v3  ;;  %v2956_v32 = vadd.f32 %v2955_v34, %v8211_v63  ;;  %v3134_v22 = vmax.f32 %v2697_v62, 0.0  ;;  %v3136_v15 = vmax.f32 %v2954_v5, 0.0 }
 0x428   : > { %v3135_v35 = vmax.f32 %v2699_v10, 0.0  ;;  %v3137_v33 = vmax.f32 %v2956_v32, 0.0 }
 0x42a   : > { %3476 = vmatprep.mubr.f32.mxu1 %v3135_v35  ;;  %3733 = vmatprep.mubr.f32.mxu0 %v3137_v33 }
 0x42b   : > { %3477 = vmatmul.mubr.f32.gmra.mxu1 %v3134_v22  ;;  %3734 = vmatmul.mubr.f32.gmra.mxu0 %v3136_v15 }
 0x435   : > { %v2702_v36 = vpop.f32.mrf.mxu1  ;;  %v2959_v18 = vpop.f32.mrf.mxu0 }
 0x436   : > { %v2703_v44 = vadd.f32 %v2702_v36, %v8222_v37  ;;  %v2960_v12 = vadd.f32 %v2959_v18, %v8218_v20 }
 0x437   : > { %v2704_v40 = vpop.f32.mrf.mxu1  ;;  %v2961_v45 = vpop.f32.mrf.mxu0 }
 0x438   : > { %v2705_v46 = vadd.f32 %v2704_v40, %v8215_v3  ;;  %v2962_v29 = vadd.f32 %v2961_v45, %v8211_v63  ;;  %v3138_v52 = vmax.f32 %v2703_v44, 0.0  ;;  %v3140_v53 = vmax.f32 %v2960_v12, 0.0 }
 0x43a   : > { %v3139_v51 = vmax.f32 %v2705_v46, 0.0  ;;  %v3141_v49 = vmax.f32 %v2962_v29, 0.0 }
 0x43b   : > { %v2708_v28 = vpop.f32.mrf.mxu1  ;;  %v2965_v39 = vpop.f32.mrf.mxu0 }
 0x43c   : > { %3482 = vmatprep.mubr.f32.mxu1 %v3139_v51  ;;  %3739 = vmatprep.mubr.f32.mxu0 %v3141_v49  ;;  %v2709_v54 = vadd.f32 %v2708_v28, %v8222_v37  ;;  %v2966_v56 = vadd.f32 %v2965_v39, %v8218_v20 }
 0x43d   : > { %v2710_v23 = vpop.f32.mrf.mxu1  ;;  %v2967_v11 = vpop.f32.mrf.mxu0  ;;  %3483 = vmatmul.mubr.f32.gmra.mxu1 %v3138_v52  ;;  %3740 = vmatmul.mubr.f32.gmra.mxu0 %v3140_v53 }
 0x43e   : > { %v2711_v57 = vadd.f32 %v2710_v23, %v8215_v3  ;;  %v2968_v60 = vadd.f32 %v2967_v11, %v8211_v63  ;;  %v3142_v9 = vmax.f32 %v2709_v54, 0.0  ;;  %v3144_v61 = vmax.f32 %v2966_v56, 0.0 }
 0x43f   : > { %v2714_v0 = vpop.f32.mrf.mxu1  ;;  %v2971_v58 = vpop.f32.mrf.mxu0 }
 0x440   : > { %v3143_v26 = vmax.f32 %v2711_v57, 0.0  ;;  %v3145_v4 = vmax.f32 %v2968_v60, 0.0  ;;  %v2715_v19 = vadd.f32 %v2714_v0, %v8222_v37  ;;  %v2972_v2 = vadd.f32 %v2971_v58, %v8218_v20 }
 0x441   : > { %v2716_v13 = vpop.f32.mrf.mxu1  ;;  %v2973_v8 = vpop.f32.mrf.mxu0 }
 0x442   : > { %v2717_v14 = vadd.f32 %v2716_v13, %v8215_v3  ;;  %v2974_v27 = vadd.f32 %v2973_v8, %v8211_v63  ;;  %3488 = vmatprep.mubr.f32.mxu1 %v3143_v26  ;;  %3745 = vmatprep.mubr.f32.mxu0 %v3145_v4  ;;  %v3146_v6 = vmax.f32 %v2715_v19, 0.0  ;;  %v3148_v7 = vmax.f32 %v2972_v2, 0.0 }
 0x443   : > { %v2720_v47 = vpop.f32.mrf.mxu1  ;;  %v2977_v59 = vpop.f32.mrf.mxu0  ;;  %3489 = vmatmul.mubr.f32.gmra.mxu1 %v3142_v9  ;;  %3746 = vmatmul.mubr.f32.gmra.mxu0 %v3144_v61 }
 0x444   : > { %v3147_v55 = vmax.f32 %v2717_v14, 0.0  ;;  %v3149_v21 = vmax.f32 %v2974_v27, 0.0  ;;  %v2721_v16 = vadd.f32 %v2720_v47, %v8222_v37  ;;  %v2978_v41 = vadd.f32 %v2977_v59, %v8218_v20 }
 0x445   : > { %v2722_v50 = vpop.f32.mrf.mxu1  ;;  %v2979_v24 = vpop.f32.mrf.mxu0 }
 0x446   : > { %v2723_v42 = vadd.f32 %v2722_v50, %v8215_v3  ;;  %v2980_v17 = vadd.f32 %v2979_v24, %v8211_v63  ;;  %3494 = vmatprep.mubr.f32.mxu1 %v3147_v55  ;;  %3751 = vmatprep.mubr.f32.mxu0 %v3149_v21  ;;  %v3150_v62 = vmax.f32 %v2721_v16, 0.0  ;;  %v3152_v5 = vmax.f32 %v2978_v41, 0.0 }
 0x447   : > { %v2726_v48 = vpop.f32.mrf.mxu1  ;;  %v2983_v30 = vpop.f32.mrf.mxu0  ;;  %3495 = vmatmul.mubr.f32.gmra.mxu1 %v3146_v6  ;;  %3752 = vmatmul.mubr.f32.gmra.mxu0 %v3148_v7 }
 0x448   : > { %v3151_v1 = vmax.f32 %v2723_v42, 0.0  ;;  %v3153_v25 = vmax.f32 %v2980_v17, 0.0  ;;  %v2727_v31 = vadd.f32 %v2726_v48, %v8222_v37  ;;  %v2984_v34 = vadd.f32 %v2983_v30, %v8218_v20 }
 0x449   : > { %v2728_v10 = vpop.f32.mrf.mxu1  ;;  %v2985_v32 = vpop.f32.mrf.mxu0 }
 0x44a   : > { %v2729_v22 = vadd.f32 %v2728_v10, %v8215_v3  ;;  %v2986_v15 = vadd.f32 %v2985_v32, %v8211_v63  ;;  %3500 = vmatprep.mubr.f32.mxu1 %v3151_v1  ;;  %3757 = vmatprep.mubr.f32.mxu0 %v3153_v25  ;;  %v3154_v44 = vmax.f32 %v2727_v31, 0.0  ;;  %v3156_v12 = vmax.f32 %v2984_v34, 0.0 }
 0x44b   : > { %v2732_v35 = vpop.f32.mrf.mxu1  ;;  %v2989_v33 = vpop.f32.mrf.mxu0  ;;  %3501 = vmatmul.mubr.f32.gmra.mxu1 %v3150_v62  ;;  %3758 = vmatmul.mubr.f32.gmra.mxu0 %v3152_v5 }
 0x44c   : > { %v3155_v36 = vmax.f32 %v2729_v22, 0.0  ;;  %v3157_v18 = vmax.f32 %v2986_v15, 0.0  ;;  %v2733_v40 = vadd.f32 %v2732_v35, %v8222_v37  ;;  %v2990_v45 = vadd.f32 %v2989_v33, %v8218_v20 }
 0x44d   : > { %v2734_v46 = vpop.f32.mrf.mxu1  ;;  %v2991_v29 = vpop.f32.mrf.mxu0 }
 0x44e   : > { %v2735_v51 = vadd.f32 %v2734_v46, %v8215_v3  ;;  %v2992_v49 = vadd.f32 %v2991_v29, %v8211_v63  ;;  %3506 = vmatprep.mubr.f32.mxu1 %v3155_v36  ;;  %3763 = vmatprep.mubr.f32.mxu0 %v3157_v18  ;;  %v3158_v54 = vmax.f32 %v2733_v40, 0.0  ;;  %v3160_v56 = vmax.f32 %v2990_v45, 0.0 }
 0x44f   : > { %v2738_v52 = vpop.f32.mrf.mxu1  ;;  %v2995_v53 = vpop.f32.mrf.mxu0  ;;  %3507 = vmatmul.mubr.f32.gmra.mxu1 %v3154_v44  ;;  %3764 = vmatmul.mubr.f32.gmra.mxu0 %v3156_v12 }
 0x450   : > { %v3159_v28 = vmax.f32 %v2735_v51, 0.0  ;;  %v3161_v39 = vmax.f32 %v2992_v49, 0.0  ;;  %v2739_v23 = vadd.f32 %v2738_v52, %v8222_v37  ;;  %v2996_v11 = vadd.f32 %v2995_v53, %v8218_v20 }
 0x451   : > { %v2740_v57 = vpop.f32.mrf.mxu1  ;;  %v2997_v60 = vpop.f32.mrf.mxu0 }
 0x452   : > { %v2741_v0 = vadd.f32 %v2740_v57, %v8215_v3  ;;  %v2998_v58 = vadd.f32 %v2997_v60, %v8211_v63  ;;  %3512 = vmatprep.mubr.f32.mxu1 %v3159_v28  ;;  %3769 = vmatprep.mubr.f32.mxu0 %v3161_v39  ;;  %v3162_v19 = vmax.f32 %v2739_v23, 0.0  ;;  %v3164_v2 = vmax.f32 %v2996_v11, 0.0 }
 0x453   : > { %v2744_v26 = vpop.f32.mrf.mxu1  ;;  %v3001_v4 = vpop.f32.mrf.mxu0  ;;  %3513 = vmatmul.mubr.f32.gmra.mxu1 %v3158_v54  ;;  %3770 = vmatmul.mubr.f32.gmra.mxu0 %v3160_v56 }
 0x454   : > { %v3163_v9 = vmax.f32 %v2741_v0, 0.0  ;;  %v3165_v61 = vmax.f32 %v2998_v58, 0.0  ;;  %v2745_v13 = vadd.f32 %v2744_v26, %v8222_v37  ;;  %v3002_v8 = vadd.f32 %v3001_v4, %v8218_v20 }
 0x455   : > { %v2746_v14 = vpop.f32.mrf.mxu1  ;;  %v3003_v27 = vpop.f32.mrf.mxu0 }
 0x456   : > { %v2747_v47 = vadd.f32 %v2746_v14, %v8215_v3  ;;  %v3004_v59 = vadd.f32 %v3003_v27, %v8211_v63  ;;  %3518 = vmatprep.mubr.f32.mxu1 %v3163_v9  ;;  %3775 = vmatprep.mubr.f32.mxu0 %v3165_v61  ;;  %v3166_v16 = vmax.f32 %v2745_v13, 0.0  ;;  %v3168_v41 = vmax.f32 %v3002_v8, 0.0 }
 0x457   : > { %v2750_v55 = vpop.f32.mrf.mxu1  ;;  %v3007_v21 = vpop.f32.mrf.mxu0  ;;  %3519 = vmatmul.mubr.f32.gmra.mxu1 %v3162_v19  ;;  %3776 = vmatmul.mubr.f32.gmra.mxu0 %v3164_v2 }
 0x458   : > { %v3167_v6 = vmax.f32 %v2747_v47, 0.0  ;;  %v3169_v7 = vmax.f32 %v3004_v59, 0.0  ;;  %v2751_v50 = vadd.f32 %v2750_v55, %v8222_v37  ;;  %v3008_v24 = vadd.f32 %v3007_v21, %v8218_v20 }
 0x459   : > { %v2752_v42 = vpop.f32.mrf.mxu1  ;;  %v3009_v17 = vpop.f32.mrf.mxu0 }
 0x45a   : > { %v2753_v48 = vadd.f32 %v2752_v42, %v8215_v3  ;;  %v3010_v30 = vadd.f32 %v3009_v17, %v8211_v63  ;;  %3524 = vmatprep.mubr.f32.mxu1 %v3167_v6  ;;  %3781 = vmatprep.mubr.f32.mxu0 %v3169_v7  ;;  %v3170_v31 = vmax.f32 %v2751_v50, 0.0  ;;  %v3172_v34 = vmax.f32 %v3008_v24, 0.0 }
 0x45b   : > { %v2756_v1 = vpop.f32.mrf.mxu1  ;;  %v3013_v25 = vpop.f32.mrf.mxu0  ;;  %3525 = vmatmul.mubr.f32.gmra.mxu1 %v3166_v16  ;;  %3782 = vmatmul.mubr.f32.gmra.mxu0 %v3168_v41 }
 0x45c   : > { %v3171_v62 = vmax.f32 %v2753_v48, 0.0  ;;  %v3173_v5 = vmax.f32 %v3010_v30, 0.0  ;;  %v2757_v10 = vadd.f32 %v2756_v1, %v8222_v37  ;;  %v3014_v32 = vadd.f32 %v3013_v25, %v8218_v20 }
 0x45d   : > { %v2758_v22 = vpop.f32.mrf.mxu1  ;;  %v3015_v15 = vpop.f32.mrf.mxu0 }
 0x45e   : > { %v2759_v35 = vadd.f32 %v2758_v22, %v8215_v3  ;;  %v3016_v33 = vadd.f32 %v3015_v15, %v8211_v63  ;;  %3530 = vmatprep.mubr.f32.mxu1 %v3171_v62  ;;  %3787 = vmatprep.mubr.f32.mxu0 %v3173_v5  ;;  %v3174_v40 = vmax.f32 %v2757_v10, 0.0  ;;  %v3176_v45 = vmax.f32 %v3014_v32, 0.0 }
 0x45f   : > { %v2762_v36 = vpop.f32.mrf.mxu1  ;;  %v3019_v18 = vpop.f32.mrf.mxu0  ;;  %3531 = vmatmul.mubr.f32.gmra.mxu1 %v3170_v31  ;;  %3788 = vmatmul.mubr.f32.gmra.mxu0 %v3172_v34 }
 0x460   : > { %v3175_v44 = vmax.f32 %v2759_v35, 0.0  ;;  %v3177_v12 = vmax.f32 %v3016_v33, 0.0  ;;  %v2763_v46 = vadd.f32 %v2762_v36, %v8222_v37  ;;  %v3020_v29 = vadd.f32 %v3019_v18, %v8218_v20 }
 0x461   : > { %v2764_v51 = vpop.f32.mrf.mxu1  ;;  %v3021_v49 = vpop.f32.mrf.mxu0 }
 0x462   : > { %v2765_v52 = vadd.f32 %v2764_v51, %v8215_v3  ;;  %v3022_v53 = vadd.f32 %v3021_v49, %v8211_v63  ;;  %3536 = vmatprep.mubr.f32.mxu1 %v3175_v44  ;;  %3793 = vmatprep.mubr.f32.mxu0 %v3177_v12  ;;  %v3178_v23 = vmax.f32 %v2763_v46, 0.0  ;;  %v3180_v11 = vmax.f32 %v3020_v29, 0.0 }
 0x463   : > { %v2768_v28 = vpop.f32.mrf.mxu1  ;;  %v3025_v39 = vpop.f32.mrf.mxu0  ;;  %3537 = vmatmul.mubr.f32.gmra.mxu1 %v3174_v40  ;;  %3794 = vmatmul.mubr.f32.gmra.mxu0 %v3176_v45 }
 0x464   : > { %v3179_v54 = vmax.f32 %v2765_v52, 0.0  ;;  %v3181_v56 = vmax.f32 %v3022_v53, 0.0  ;;  %v2769_v57 = vadd.f32 %v2768_v28, %v8222_v37  ;;  %v3026_v60 = vadd.f32 %v3025_v39, %v8218_v20 }
 0x465   : > { %v2770_v0 = vpop.f32.mrf.mxu1  ;;  %v3027_v58 = vpop.f32.mrf.mxu0 }
 0x466   : > { %v2771_v26 = vadd.f32 %v2770_v0, %v8215_v3  ;;  %v3028_v4 = vadd.f32 %v3027_v58, %v8211_v63  ;;  %3542 = vmatprep.mubr.f32.mxu1 %v3179_v54  ;;  %3799 = vmatprep.mubr.f32.mxu0 %v3181_v56  ;;  %v3182_v13 = vmax.f32 %v2769_v57, 0.0  ;;  %v3184_v8 = vmax.f32 %v3026_v60, 0.0 }
 0x467   : > { %v2774_v9 = vpop.f32.mrf.mxu1  ;;  %v3031_v61 = vpop.f32.mrf.mxu0  ;;  %3543 = vmatmul.mubr.f32.gmra.mxu1 %v3178_v23  ;;  %3800 = vmatmul.mubr.f32.gmra.mxu0 %v3180_v11 }
 0x468   : > { %v3183_v19 = vmax.f32 %v2771_v26, 0.0  ;;  %v3185_v2 = vmax.f32 %v3028_v4, 0.0  ;;  %v2775_v14 = vadd.f32 %v2774_v9, %v8222_v37  ;;  %v3032_v27 = vadd.f32 %v3031_v61, %v8218_v20 }
 0x469   : > { %v2776_v47 = vpop.f32.mrf.mxu1  ;;  %v3033_v59 = vpop.f32.mrf.mxu0 }
 0x46a   : > { %v2777_v55 = vadd.f32 %v2776_v47, %v8215_v3  ;;  %v3034_v21 = vadd.f32 %v3033_v59, %v8211_v63  ;;  %3548 = vmatprep.mubr.f32.mxu1 %v3183_v19  ;;  %3805 = vmatprep.mubr.f32.mxu0 %v3185_v2  ;;  %v3186_v50 = vmax.f32 %v2775_v14, 0.0  ;;  %v3188_v24 = vmax.f32 %v3032_v27, 0.0 }
 0x46b   : > { %v2780_v6 = vpop.f32.mrf.mxu1  ;;  %v3037_v7 = vpop.f32.mrf.mxu0  ;;  %3549 = vmatmul.mubr.f32.gmra.mxu1 %v3182_v13  ;;  %3806 = vmatmul.mubr.f32.gmra.mxu0 %v3184_v8 }
 0x46c   : > { %v3187_v16 = vmax.f32 %v2777_v55, 0.0  ;;  %v3189_v41 = vmax.f32 %v3034_v21, 0.0  ;;  %v2781_v42 = vadd.f32 %v2780_v6, %v8222_v37  ;;  %v3038_v17 = vadd.f32 %v3037_v7, %v8218_v20 }
 0x46d   : > { %v2782_v48 = vpop.f32.mrf.mxu1  ;;  %v3039_v30 = vpop.f32.mrf.mxu0 }
 0x46e   : > { %v2783_v1 = vadd.f32 %v2782_v48, %v8215_v3  ;;  %v3040_v25 = vadd.f32 %v3039_v30, %v8211_v63  ;;  %3554 = vmatprep.mubr.f32.mxu1 %v3187_v16  ;;  %3811 = vmatprep.mubr.f32.mxu0 %v3189_v41  ;;  %v3190_v10 = vmax.f32 %v2781_v42, 0.0  ;;  %v3192_v32 = vmax.f32 %v3038_v17, 0.0 }
 0x46f   : > { %v2786_v62 = vpop.f32.mrf.mxu1  ;;  %v3043_v5 = vpop.f32.mrf.mxu0  ;;  %3555 = vmatmul.mubr.f32.gmra.mxu1 %v3186_v50  ;;  %3812 = vmatmul.mubr.f32.gmra.mxu0 %v3188_v24 }
 0x470   : > { %v3191_v31 = vmax.f32 %v2783_v1, 0.0  ;;  %v3193_v34 = vmax.f32 %v3040_v25, 0.0  ;;  %v2787_v22 = vadd.f32 %v2786_v62, %v8222_v37  ;;  %v3044_v15 = vadd.f32 %v3043_v5, %v8218_v20 }
 0x471   : > { %v2788_v35 = vpop.f32.mrf.mxu1  ;;  %v3045_v33 = vpop.f32.mrf.mxu0 }
 0x472   : > { %v2789_v36 = vadd.f32 %v2788_v35, %v8215_v3  ;;  %v3046_v18 = vadd.f32 %v3045_v33, %v8211_v63  ;;  %3560 = vmatprep.mubr.f32.mxu1 %v3191_v31  ;;  %3817 = vmatprep.mubr.f32.mxu0 %v3193_v34  ;;  %v3194_v46 = vmax.f32 %v2787_v22, 0.0  ;;  %v3196_v29 = vmax.f32 %v3044_v15, 0.0 }
 0x473   : > { %v2792_v44 = vpop.f32.mrf.mxu1  ;;  %v3049_v12 = vpop.f32.mrf.mxu0  ;;  %3561 = vmatmul.mubr.f32.gmra.mxu1 %v3190_v10  ;;  %3818 = vmatmul.mubr.f32.gmra.mxu0 %v3192_v32 }
 0x474   : > { %v3195_v40 = vmax.f32 %v2789_v36, 0.0  ;;  %v3197_v45 = vmax.f32 %v3046_v18, 0.0  ;;  %v2793_v51 = vadd.f32 %v2792_v44, %v8222_v37  ;;  %v3050_v49 = vadd.f32 %v3049_v12, %v8218_v20 }
 0x475   : > { %v2794_v52 = vpop.f32.mrf.mxu1  ;;  %v3051_v53 = vpop.f32.mrf.mxu0 }
 0x476   : > { %v2795_v28 = vadd.f32 %v2794_v52, %v8215_v3  ;;  %v3052_v39 = vadd.f32 %v3051_v53, %v8211_v63  ;;  %3566 = vmatprep.mubr.f32.mxu1 %v3195_v40  ;;  %3823 = vmatprep.mubr.f32.mxu0 %v3197_v45  ;;  %v3198_v57 = vmax.f32 %v2793_v51, 0.0  ;;  %v3200_v60 = vmax.f32 %v3050_v49, 0.0 }
 0x477   : > { %v2798_v54 = vpop.f32.mrf.mxu1  ;;  %v3055_v56 = vpop.f32.mrf.mxu0  ;;  %3567 = vmatmul.mubr.f32.gmra.mxu1 %v3194_v46  ;;  %3824 = vmatmul.mubr.f32.gmra.mxu0 %v3196_v29 }
 0x478   : > { %v3199_v23 = vmax.f32 %v2795_v28, 0.0  ;;  %v3201_v11 = vmax.f32 %v3052_v39, 0.0  ;;  %v2799_v0 = vadd.f32 %v2798_v54, %v8222_v37  ;;  %v3056_v58 = vadd.f32 %v3055_v56, %v8218_v20 }
 0x479   : > { %v2800_v26 = vpop.f32.mrf.mxu1  ;;  %v3057_v4 = vpop.f32.mrf.mxu0 }
 0x47a   : > { %v2801_v9 = vadd.f32 %v2800_v26, %v8215_v3  ;;  %v3058_v61 = vadd.f32 %v3057_v4, %v8211_v63  ;;  %3572 = vmatprep.mubr.f32.mxu1 %v3199_v23  ;;  %3829 = vmatprep.mubr.f32.mxu0 %v3201_v11  ;;  %v3202_v14 = vmax.f32 %v2799_v0, 0.0  ;;  %v3204_v27 = vmax.f32 %v3056_v58, 0.0 }
 0x47b   : > { %v2804_v19 = vpop.f32.mrf.mxu1  ;;  %v3061_v2 = vpop.f32.mrf.mxu0  ;;  %3573 = vmatmul.mubr.f32.gmra.mxu1 %v3198_v57  ;;  %3830 = vmatmul.mubr.f32.gmra.mxu0 %v3200_v60 }
 0x47c   : > { %v3203_v13 = vmax.f32 %v2801_v9, 0.0  ;;  %v3205_v8 = vmax.f32 %v3058_v61, 0.0  ;;  %v2805_v47 = vadd.f32 %v2804_v19, %v8222_v37  ;;  %v3062_v59 = vadd.f32 %v3061_v2, %v8218_v20 }
 0x47d   : > { %v2806_v55 = vpop.f32.mrf.mxu1  ;;  %v3063_v21 = vpop.f32.mrf.mxu0 }
 0x47e   : > { %v2807_v6 = vadd.f32 %v2806_v55, %v8215_v3  ;;  %v3064_v7 = vadd.f32 %v3063_v21, %v8211_v63  ;;  %3578 = vmatprep.mubr.f32.mxu1 %v3203_v13  ;;  %3835 = vmatprep.mubr.f32.mxu0 %v3205_v8  ;;  %v3206_v42 = vmax.f32 %v2805_v47, 0.0  ;;  %v3208_v17 = vmax.f32 %v3062_v59, 0.0 }
 0x47f   : > { %v2810_v16 = vpop.f32.mrf.mxu1  ;;  %v3067_v41 = vpop.f32.mrf.mxu0  ;;  %3579 = vmatmul.mubr.f32.gmra.mxu1 %v3202_v14  ;;  %3836 = vmatmul.mubr.f32.gmra.mxu0 %v3204_v27 }
 0x480   : > { %v3207_v50 = vmax.f32 %v2807_v6, 0.0  ;;  %v3209_v24 = vmax.f32 %v3064_v7, 0.0  ;;  %v2811_v48 = vadd.f32 %v2810_v16, %v8222_v37  ;;  %v3068_v30 = vadd.f32 %v3067_v41, %v8218_v20 }
 0x481   : > { %v2812_v1 = vpop.f32.mrf.mxu1  ;;  %v3069_v25 = vpop.f32.mrf.mxu0 }
 0x482   : > { %v2813_v62 = vadd.f32 %v2812_v1, %v8215_v3  ;;  %v3070_v5 = vadd.f32 %v3069_v25, %v8211_v63  ;;  %3584 = vmatprep.mubr.f32.mxu1 %v3207_v50  ;;  %3841 = vmatprep.mubr.f32.mxu0 %v3209_v24  ;;  %v3210_v22 = vmax.f32 %v2811_v48, 0.0  ;;  %v3212_v15 = vmax.f32 %v3068_v30, 0.0 }
 0x483   : > { %v2816_v31 = vpop.f32.mrf.mxu1  ;;  %v3073_v34 = vpop.f32.mrf.mxu0  ;;  %3585 = vmatmul.mubr.f32.gmra.mxu1 %v3206_v42  ;;  %3842 = vmatmul.mubr.f32.gmra.mxu0 %v3208_v17 }
 0x484   : > { %v3211_v10 = vmax.f32 %v2813_v62, 0.0  ;;  %v3213_v32 = vmax.f32 %v3070_v5, 0.0  ;;  %v2817_v35 = vadd.f32 %v2816_v31, %v8222_v37  ;;  %v3074_v33 = vadd.f32 %v3073_v34, %v8218_v20 }
 0x485   : > { %v2818_v36 = vpop.f32.mrf.mxu1  ;;  %v3075_v18 = vpop.f32.mrf.mxu0 }
 0x486   : > { %v2819_v44 = vadd.f32 %v2818_v36, %v8215_v3  ;;  %v3076_v12 = vadd.f32 %v3075_v18, %v8211_v63  ;;  %3590 = vmatprep.mubr.f32.mxu1 %v3211_v10  ;;  %3847 = vmatprep.mubr.f32.mxu0 %v3213_v32  ;;  %v3214_v51 = vmax.f32 %v2817_v35, 0.0  ;;  %v3216_v49 = vmax.f32 %v3074_v33, 0.0 }
 0x487   : > { %v2822_v40 = vpop.f32.mrf.mxu1  ;;  %v3079_v45 = vpop.f32.mrf.mxu0  ;;  %3591 = vmatmul.mubr.f32.gmra.mxu1 %v3210_v22  ;;  %3848 = vmatmul.mubr.f32.gmra.mxu0 %v3212_v15 }
 0x488   : > { %v3215_v46 = vmax.f32 %v2819_v44, 0.0  ;;  %v3217_v29 = vmax.f32 %v3076_v12, 0.0  ;;  %v2823_v52 = vadd.f32 %v2822_v40, %v8222_v37  ;;  %v3080_v53 = vadd.f32 %v3079_v45, %v8218_v20  ;;  %v3370_v40 = vld [vmem:[%s8680_s10] sm:$0x3] }
 0x489   : > { %v2824_v28 = vpop.f32.mrf.mxu1  ;;  %v3081_v39 = vpop.f32.mrf.mxu0 }
 0x48a   : > { %v2825_v54 = vadd.f32 %v2824_v28, %v8215_v3  ;;  %v3082_v56 = vadd.f32 %v3081_v39, %v8211_v63  ;;  %3596 = vmatprep.mubr.f32.mxu1 %v3215_v46  ;;  %3853 = vmatprep.mubr.f32.mxu0 %v3217_v29  ;;  %v3218_v0 = vmax.f32 %v2823_v52, 0.0  ;;  %v3220_v58 = vmax.f32 %v3080_v53, 0.0 }
 0x48b   : > { %v2828_v23 = vpop.f32.mrf.mxu1  ;;  %v3085_v11 = vpop.f32.mrf.mxu0  ;;  %3597 = vmatmul.mubr.f32.gmra.mxu1 %v3214_v51  ;;  %3854 = vmatmul.mubr.f32.gmra.mxu0 %v3216_v49  ;;  %v8352_v53 = vrot.slane %v3370_v40, %v6960_v43 }
 0x48c   : > { %v3219_v57 = vmax.f32 %v2825_v54, 0.0  ;;  %v3221_v60 = vmax.f32 %v3082_v56, 0.0  ;;  %v2829_v26 = vadd.f32 %v2828_v23, %v8222_v37  ;;  %v3086_v4 = vadd.f32 %v3085_v11, %v8218_v20 }
 0x48d   : > { %v2830_v9 = vpop.f32.mrf.mxu1  ;;  %v3087_v61 = vpop.f32.mrf.mxu0 }
 0x48e   : > { %v2831_v19 = vadd.f32 %v2830_v9, %v8215_v3  ;;  %v3088_v2 = vadd.f32 %v3087_v61, %v8211_v63  ;;  %3602 = vmatprep.mubr.f32.mxu1 %v3219_v57  ;;  %3859 = vmatprep.mubr.f32.mxu0 %v3221_v60  ;;  %v3222_v47 = vmax.f32 %v2829_v26, 0.0  ;;  %v3224_v59 = vmax.f32 %v3086_v4, 0.0 }
 0x48f   : > { %v2834_v13 = vpop.f32.mrf.mxu1  ;;  %v3091_v8 = vpop.f32.mrf.mxu0  ;;  %3603 = vmatmul.mubr.f32.gmra.mxu1 %v3218_v0  ;;  %3860 = vmatmul.mubr.f32.gmra.mxu0 %v3220_v58  ;;  %v8359_v0 = vrot.slane %v3370_v40, %v6623_v38 }
 0x490   : > { %v3223_v14 = vmax.f32 %v2831_v19, 0.0  ;;  %v3225_v27 = vmax.f32 %v3088_v2, 0.0  ;;  %v2835_v55 = vadd.f32 %v2834_v13, %v8222_v37  ;;  %v3092_v21 = vadd.f32 %v3091_v8, %v8218_v20 }
 0x491   : > { %v2836_v6 = vpop.f32.mrf.mxu1  ;;  %v3093_v7 = vpop.f32.mrf.mxu0 }
 0x492   : > { %v2837_v16 = vadd.f32 %v2836_v6, %v8215_v3  ;;  %v3094_v41 = vadd.f32 %v3093_v7, %v8211_v63  ;;  %3608 = vmatprep.mubr.f32.mxu1 %v3223_v14  ;;  %3865 = vmatprep.mubr.f32.mxu0 %v3225_v27  ;;  %v3226_v48 = vmax.f32 %v2835_v55, 0.0  ;;  %v3228_v30 = vmax.f32 %v3092_v21, 0.0 }
 0x493   : > { %v2840_v50 = vpop.f32.mrf.mxu1  ;;  %v3097_v24 = vpop.f32.mrf.mxu0  ;;  %3609 = vmatmul.mubr.f32.gmra.mxu1 %v3222_v47  ;;  %3866 = vmatmul.mubr.f32.gmra.mxu0 %v3224_v59 }
 0x494   : > { %v3227_v42 = vmax.f32 %v2837_v16, 0.0  ;;  %v3229_v17 = vmax.f32 %v3094_v41, 0.0  ;;  %v2841_v1 = vadd.f32 %v2840_v50, %v8222_v37  ;;  %v3098_v25 = vadd.f32 %v3097_v24, %v8218_v20 }
 0x495   : > { %v2842_v62 = vpop.f32.mrf.mxu1  ;;  %v3099_v5 = vpop.f32.mrf.mxu0 }
 0x496   : > { %v2843_v31 = vadd.f32 %v2842_v62, %v8215_v3  ;;  %v3100_v34 = vadd.f32 %v3099_v5, %v8211_v63  ;;  %3614 = vmatprep.mubr.f32.mxu1 %v3227_v42  ;;  %3871 = vmatprep.mubr.f32.mxu0 %v3229_v17  ;;  %v3230_v35 = vmax.f32 %v2841_v1, 0.0  ;;  %v3232_v33 = vmax.f32 %v3098_v25, 0.0 }
 0x497   : > { %v2846_v10 = vpop.f32.mrf.mxu1  ;;  %v3103_v32 = vpop.f32.mrf.mxu0  ;;  %3615 = vmatmul.mubr.f32.gmra.mxu1 %v3226_v48  ;;  %3872 = vmatmul.mubr.f32.gmra.mxu0 %v3228_v30 }
 0x498   : > { %v3231_v22 = vmax.f32 %v2843_v31, 0.0  ;;  %v3233_v15 = vmax.f32 %v3100_v34, 0.0  ;;  %v2847_v36 = vadd.f32 %v2846_v10, %v8222_v37  ;;  %v3104_v18 = vadd.f32 %v3103_v32, %v8218_v20 }
 0x499   : > { %v2848_v44 = vpop.f32.mrf.mxu1  ;;  %v3105_v12 = vpop.f32.mrf.mxu0 }
 0x49a   : > { %v2849_v45 = vadd.f32 %v2848_v44, %v8215_v3  ;;  %v3106_v46 = vadd.f32 %v3105_v12, %v8211_v63  ;;  %3620 = vmatprep.mubr.f32.mxu1 %v3231_v22  ;;  %3877 = vmatprep.mubr.f32.mxu0 %v3233_v15  ;;  %v3234_v28 = vmax.f32 %v2847_v36, 0.0  ;;  %v3236_v39 = vmax.f32 %v3104_v18, 0.0 }
 0x49b   : > { %v2852_v29 = vpop.f32.mrf.mxu1  ;;  %v3109_v51 = vpop.f32.mrf.mxu0  ;;  %3621 = vmatmul.mubr.f32.gmra.mxu1 %v3230_v35  ;;  %3878 = vmatmul.mubr.f32.gmra.mxu0 %v3232_v33 }
 0x49c   : > { %v3235_v49 = vmax.f32 %v2849_v45, 0.0  ;;  %v3237_v52 = vmax.f32 %v3106_v46, 0.0  ;;  %v2853_v54 = vadd.f32 %v2852_v29, %v8222_v37  ;;  %v3110_v56 = vadd.f32 %v3109_v51, %v8218_v20 }
 0x49d   : > { %v2854_v23 = vpop.f32.mrf.mxu1  ;;  %v3111_v11 = vpop.f32.mrf.mxu0 }
 0x49e   : > { %v2855_v57 = vadd.f32 %v2854_v23, %v8215_v3  ;;  %v3112_v60 = vadd.f32 %v3111_v11, %v8211_v63  ;;  %3626 = vmatprep.mubr.f32.mxu1 %v3235_v49  ;;  %3883 = vmatprep.mubr.f32.mxu0 %v3237_v52  ;;  %v3238_v20 = vmax.f32 %v2853_v54, 0.0  ;;  %v3240_v9 = vmax.f32 %v3110_v56, 0.0 }
 0x49f   : > { %v3448_v58 = vpop.f32.mrf.mxu1  ;;  %3627 = vmatmul.mubr.f32.gmra.mxu1 %v3234_v28  ;;  %v3705_v43 = vpop.f32.mrf.mxu0  ;;  %3884 = vmatmul.mubr.f32.gmra.mxu0 %v3236_v39 }
 0x4a0   : > { %v3239_v26 = vmax.f32 %v2855_v57, 0.0  ;;  %v3241_v4 = vmax.f32 %v3112_v60, 0.0  ;;  %v3449_v37 = vadd.f32 %v3448_v58, %v8352_v53 }
 0x4a1   : > { %v3450_v61 = vpop.f32.mrf.mxu1  ;;  %v3707_v19 = vpop.f32.mrf.mxu0 }
 0x4a2   : > { %v3706_v3 = vadd.f32 %v3705_v43, %v3449_v37  ;;  %v3451_v63 = vadd.f32 %v3450_v61, %v8359_v0  ;;  %3632 = vmatprep.mubr.f32.mxu1 %v3239_v26  ;;  %3889 = vmatprep.mubr.f32.mxu0 %v3241_v4 }
 0x4a3   : > { %v3454_v2 = vpop.f32.mrf.mxu1  ;;  %3633 = vmatmul.mubr.f32.gmra.mxu1 %v3238_v20  ;;  %v3711_v38 = vpop.f32.mrf.mxu0  ;;  %3890 = vmatmul.mubr.f32.gmra.mxu0 %v3240_v9 }
 0x4a4   : > { %v3896_v13 = vsub.f32 0.0, %v3706_v3  ;;  %v3708_v8 = vadd.f32 %v3707_v19, %v3451_v63  ;;  %v3455_v14 = vadd.f32 %v3454_v2, %v8352_v53 }
 0x4a5   : > { %v3456_v27 = vpop.f32.mrf.mxu1  ;;  %v3713_v47 = vpop.f32.mrf.mxu0 }
 0x4a6   : > { %v3960_v59 = vmul.f32 1.442695, %v3896_v13  ;;  %v3897_v55 = vsub.f32 0.0, %v3708_v8  ;;  %v3712_v21 = vadd.f32 %v3711_v38, %v3455_v14  ;;  %v3457_v6 = vadd.f32 %v3456_v27, %v8359_v0 }
 0x4a7   : > { %v3460_v7 = vpop.f32.mrf.mxu1  ;;  %v3717_v16 = vpop.f32.mrf.mxu0 }
 0x4a8   : > { %4635 = vpow2.f32 %v3960_v59  ;;  %v3962_v41 = vmul.f32 1.442695, %v3897_v55  ;;  %v3898_v50 = vsub.f32 0.0, %v3712_v21  ;;  %v3714_v24 = vadd.f32 %v3713_v47, %v3457_v6 }
 0x4a9   : > { %v3461_v42 = vadd.f32 %v3460_v7, %v8352_v53  ;;  %v3462_v17 = vpop.f32.mrf.mxu1  ;;  %v3719_v48 = vpop.f32.mrf.mxu0 }
 0x4aa   : > { %4637 = vpow2.f32 %v3962_v41  ;;  %v3964_v30 = vmul.f32 1.442695, %v3898_v50  ;;  %v3899_v1 = vsub.f32 0.0, %v3714_v24  ;;  %v3463_v25 = vadd.f32 %v3462_v17, %v8359_v0 }
 0x4ab   : > { %v3718_v62 = vadd.f32 %v3717_v16, %v3461_v42  ;;  %v3466_v5 = vpop.f32.mrf.mxu1  ;;  %v3723_v31 = vpop.f32.mrf.mxu0 }
 0x4ac   : > { %4639 = vpow2.f32 %v3964_v30  ;;  %v3966_v34 = vmul.f32 1.442695, %v3899_v1  ;;  %v3720_v10 = vadd.f32 %v3719_v48, %v3463_v25  ;;  %v3467_v32 = vadd.f32 %v3466_v5, %v8352_v53 }
 0x4ad   : > { %v3900_v22 = vsub.f32 0.0, %v3718_v62  ;;  %v3468_v15 = vpop.f32.mrf.mxu1  ;;  %v3725_v35 = vpop.f32.mrf.mxu0 }
 0x4ae   : > { %4641 = vpow2.f32 %v3966_v34  ;;  %v3901_v33 = vsub.f32 0.0, %v3720_v10  ;;  %v3469_v36 = vadd.f32 %v3468_v15, %v8359_v0  ;;  %v3724_v18 = vadd.f32 %v3723_v31, %v3467_v32 }
 0x4af   : > { %v3968_v44 = vmul.f32 1.442695, %v3900_v22 }
 0x4b0   : > { %v3970_v12 = vmul.f32 1.442695, %v3901_v33  ;;  %v3902_v40 = vsub.f32 0.0, %v3724_v18  ;;  %v3726_v45 = vadd.f32 %v3725_v35, %v3469_v36 }
 0x4b1   : > { %4643 = vpow2.f32 %v3968_v44 }
 0x4b2   : > { %4645 = vpow2.f32 %v3970_v12  ;;  %v3972_v46 = vmul.f32 1.442695, %v3902_v40  ;;  %v3903_v29 = vsub.f32 0.0, %v3726_v45 }
 0x4b4   : > { %4647 = vpow2.f32 %v3972_v46  ;;  %v3974_v51 = vmul.f32 1.442695, %v3903_v29 }
 0x4b5   : > { %v4636_v49 = vpop.eup %4635 }
 0x4b6   : > { %v4088_v52 = vadd.f32 1.0, %v4636_v49  ;;  %4649 = vpow2.f32 %v3974_v51 }
 0x4b7   : > { %v4638_v28 = vpop.eup %4637 }
 0x4b8   : > { %4651 = vrcp.f32 %v4088_v52  ;;  %v4089_v39 = vadd.f32 1.0, %v4638_v28 }
 0x4b9   : > { %v3472_v54 = vpop.f32.mrf.mxu1  ;;  %v3729_v56 = vpop.f32.mrf.mxu0 }
 0x4ba   : > { %v4640_v23 = vpop.eup %4639  ;;  %v3473_v11 = vadd.f32 %v3472_v54, %v8352_v53  ;;  %4653 = vrcp.f32 %v4089_v39 }
 0x4bb   : > { %v4090_v57 = vadd.f32 1.0, %v4640_v23  ;;  %v3474_v60 = vpop.f32.mrf.mxu1  ;;  %v4642_v58 = vpop.eup %4641 }
 0x4bc   : > { %v3730_v43 = vadd.f32 %v3729_v56, %v3473_v11  ;;  %v3475_v26 = vadd.f32 %v3474_v60, %v8359_v0  ;;  %v4091_v4 = vadd.f32 1.0, %v4642_v58  ;;  %v3731_v37 = vpop.f32.mrf.mxu0 }
 0x4bd   : > { %4655 = vrcp.f32 %v4090_v57 }
 0x4be   : > { %v3904_v20 = vsub.f32 0.0, %v3730_v43  ;;  %v3732_v9 = vadd.f32 %v3731_v37, %v3475_v26  ;;  %v4644_v61 = vpop.eup %4643  ;;  %4657 = vrcp.f32 %v4091_v4 }
 0x4bf   : > { %v4646_v19 = vpop.eup %4645  ;;  %v4092_v3 = vadd.f32 1.0, %v4644_v61 }
 0x4c0   : > { %v3976_v63 = vmul.f32 1.442695, %v3904_v20  ;;  %v3905_v2 = vsub.f32 0.0, %v3732_v9  ;;  %v4093_v38 = vadd.f32 1.0, %v4646_v19 }
 0x4c1   : > { %v4648_v13 = vpop.eup %4647  ;;  %4659 = vrcp.f32 %v4092_v3 }
 0x4c2   : > { %v3978_v8 = vmul.f32 1.442695, %v3905_v2  ;;  %4661 = vrcp.f32 %v4093_v38  ;;  %v4094_v14 = vadd.f32 1.0, %v4648_v13 }
 0x4c3   : > { %v4650_v27 = vpop.eup %4649  ;;  %4663 = vpow2.f32 %v3976_v63 }
 0x4c4   : > { %4665 = vrcp.f32 %v4094_v14  ;;  %v4095_v47 = vadd.f32 1.0, %v4650_v27 }
 0x4c5   : > { %v4652_v59 = vpop.eup %4651  ;;  %4667 = vpow2.f32 %v3978_v8 }
 0x4c6   : > { %4216 = vst [vmem:[%s8372_s17] sm:$0xff] %v4652_v59  ;;  %4669 = vrcp.f32 %v4095_v47 }
 0x4c7   : > { %v4654_v55 = vpop.eup %4653 }
 0x4c8   : > { %4218 = vst.msk [vmem:[%s8372_s17 + $0x8] sm:$0xff] %vm4217_vm0, %v4654_v55 }
 0x4ca   : > { %v4656_v21 = vpop.eup %4655 }
 0x4cb   : > { %4219 = vst [vmem:[%s8372_s17 + $0x10] sm:$0xff] %v4656_v21  ;;  %v4658_v6 = vpop.eup %4657 }
 0x4cc   : > { %4220 = vst.msk [vmem:[%s8372_s17 + $0x18] sm:$0xff] %vm4217_vm0, %v4658_v6 }
 0x4ce   : > { %v4660_v7 = vpop.eup %4659 }
 0x4cf   : > { %v4662_v16 = vpop.eup %4661  ;;  %4509 = vst [vmem:[%s8372_s17 + $0x20] sm:$0xff] %v4660_v7 }
 0x4d0   : > { %v4664_v41 = vpop.eup %4663  ;;  %4510 = vst.msk [vmem:[%s8372_s17 + $0x28] sm:$0xff] %vm4217_vm0, %v4662_v16 }
 0x4d1   : > { %v4666_v50 = vpop.eup %4665  ;;  %v4096_v24 = vadd.f32 1.0, %v4664_v41 }
 0x4d2   : > { %v4668_v42 = vpop.eup %4667  ;;  %4511 = vst [vmem:[%s8372_s17 + $0x30] sm:$0xff] %v4666_v50 }
 0x4d3   : > { %v4670_v17 = vpop.eup %4669  ;;  %4671 = vrcp.f32 %v4096_v24  ;;  %v4097_v48 = vadd.f32 1.0, %v4668_v42 }
 0x4d4   : > { %4512 = vst.msk [vmem:[%s8372_s17 + $0x38] sm:$0xff] %vm4217_vm0, %v4670_v17 }
 0x4d5   : > { %4673 = vrcp.f32 %v4097_v48 }
 0x4e0   : > { %v4672_v30 = vpop.eup %4671 }
 0x4e1   : > { %4513 = vst [vmem:[%s8372_s17 + $0x40] sm:$0xff] %v4672_v30 }
 0x4e2   : > { %v4674_v1 = vpop.eup %4673 }
 0x4e3   : > { %4514 = vst.msk [vmem:[%s8372_s17 + $0x48] sm:$0xff] %vm4217_vm0, %v4674_v1 }
 0x4eb   : > { %v3478_v25 = vpop.f32.mrf.mxu1  ;;  %v3735_v62 = vpop.f32.mrf.mxu0 }
 0x4ec   : > { %v3479_v5 = vadd.f32 %v3478_v25, %v8352_v53 }
 0x4ed   : > { %v3480_v31 = vpop.f32.mrf.mxu1  ;;  %v3737_v34 = vpop.f32.mrf.mxu0 }
 0x4ee   : > { %v3481_v10 = vadd.f32 %v3480_v31, %v8359_v0  ;;  %v3736_v32 = vadd.f32 %v3735_v62, %v3479_v5 }
 0x4f0   : > { %v3906_v22 = vsub.f32 0.0, %v3736_v32  ;;  %v3738_v15 = vadd.f32 %v3737_v34, %v3481_v10 }
 0x4f2   : > { %v3980_v35 = vmul.f32 1.442695, %v3906_v22  ;;  %v3907_v33 = vsub.f32 0.0, %v3738_v15 }
 0x4f4   : > { %4675 = vpow2.f32 %v3980_v35  ;;  %v3982_v36 = vmul.f32 1.442695, %v3907_v33 }
 0x4f6   : > { %4677 = vpow2.f32 %v3982_v36 }
 0x4fd   : > { %v3484_v18 = vpop.f32.mrf.mxu1  ;;  %v3741_v44 = vpop.f32.mrf.mxu0 }
 0x4fe   : > { %v3485_v12 = vadd.f32 %v3484_v18, %v8352_v53 }
 0x4ff   : > { %v3486_v40 = vpop.f32.mrf.mxu1  ;;  %v3743_v45 = vpop.f32.mrf.mxu0 }
 0x500   : > { %v3742_v29 = vadd.f32 %v3741_v44, %v3485_v12  ;;  %v3487_v51 = vadd.f32 %v3486_v40, %v8359_v0 }
 0x501   : > { %v4676_v46 = vpop.eup %4675 }
 0x502   : > { %v4098_v49 = vadd.f32 1.0, %v4676_v46  ;;  %v3908_v28 = vsub.f32 0.0, %v3742_v29  ;;  %v3744_v39 = vadd.f32 %v3743_v45, %v3487_v51 }
 0x503   : > { %v4678_v52 = vpop.eup %4677  ;;  %v3490_v56 = vpop.f32.mrf.mxu1 }
 0x504   : > { %4679 = vrcp.f32 %v4098_v49  ;;  %v4099_v54 = vadd.f32 1.0, %v4678_v52  ;;  %v3747_v23 = vpop.f32.mrf.mxu0  ;;  %v3984_v11 = vmul.f32 1.442695, %v3908_v28  ;;  %v3909_v57 = vsub.f32 0.0, %v3744_v39 }
 0x505   : > { %v3491_v60 = vadd.f32 %v3490_v56, %v8352_v53  ;;  %v3492_v58 = vpop.f32.mrf.mxu1 }
 0x506   : > { %4681 = vrcp.f32 %v4099_v54  ;;  %v3749_v43 = vpop.f32.mrf.mxu0  ;;  %v3986_v26 = vmul.f32 1.442695, %v3909_v57  ;;  %v3493_v37 = vadd.f32 %v3492_v58, %v8359_v0 }
 0x507   : > { %4683 = vpow2.f32 %v3984_v11  ;;  %v3748_v4 = vadd.f32 %v3747_v23, %v3491_v60  ;;  %v3496_v20 = vpop.f32.mrf.mxu1 }
 0x508   : > { %v3753_v9 = vpop.f32.mrf.mxu0  ;;  %4685 = vpow2.f32 %v3986_v26  ;;  %v3750_v19 = vadd.f32 %v3749_v43, %v3493_v37  ;;  %v3497_v3 = vadd.f32 %v3496_v20, %v8352_v53 }
 0x509   : > { %v3910_v61 = vsub.f32 0.0, %v3748_v4  ;;  %v3498_v63 = vpop.f32.mrf.mxu1 }
 0x50a   : > { %v3755_v2 = vpop.f32.mrf.mxu0  ;;  %v3911_v13 = vsub.f32 0.0, %v3750_v19  ;;  %v3754_v8 = vadd.f32 %v3753_v9, %v3497_v3  ;;  %v3499_v14 = vadd.f32 %v3498_v63, %v8359_v0 }
 0x50b   : > { %v3988_v38 = vmul.f32 1.442695, %v3910_v61  ;;  %v3502_v27 = vpop.f32.mrf.mxu1 }
 0x50c   : > { %v3759_v47 = vpop.f32.mrf.mxu0  ;;  %v3990_v59 = vmul.f32 1.442695, %v3911_v13  ;;  %v3912_v55 = vsub.f32 0.0, %v3754_v8  ;;  %v3756_v21 = vadd.f32 %v3755_v2, %v3499_v14  ;;  %v3503_v6 = vadd.f32 %v3502_v27, %v8352_v53 }
 0x50d   : > { %4687 = vpow2.f32 %v3988_v38  ;;  %v3504_v7 = vpop.f32.mrf.mxu1 }
 0x50e   : > { %v3761_v16 = vpop.f32.mrf.mxu0  ;;  %4689 = vpow2.f32 %v3990_v59  ;;  %v3992_v41 = vmul.f32 1.442695, %v3912_v55  ;;  %v3913_v50 = vsub.f32 0.0, %v3756_v21  ;;  %v3505_v24 = vadd.f32 %v3504_v7, %v8359_v0 }
 0x50f   : > { %v3760_v42 = vadd.f32 %v3759_v47, %v3503_v6  ;;  %v3508_v17 = vpop.f32.mrf.mxu1 }
 0x510   : > { %v3765_v48 = vpop.f32.mrf.mxu0  ;;  %4691 = vpow2.f32 %v3992_v41  ;;  %v3994_v1 = vmul.f32 1.442695, %v3913_v50  ;;  %v3762_v25 = vadd.f32 %v3761_v16, %v3505_v24  ;;  %v3509_v62 = vadd.f32 %v3508_v17, %v8352_v53 }
 0x511   : > { %v4680_v30 = vpop.eup %4679  ;;  %v3914_v5 = vsub.f32 0.0, %v3760_v42  ;;  %v3510_v31 = vpop.f32.mrf.mxu1 }
 0x512   : > { %4515 = vst [vmem:[%s8372_s17 + $0x50] sm:$0xff] %v4680_v30  ;;  %v3767_v34 = vpop.f32.mrf.mxu0  ;;  %4693 = vpow2.f32 %v3994_v1  ;;  %v3915_v32 = vsub.f32 0.0, %v3762_v25  ;;  %v3766_v22 = vadd.f32 %v3765_v48, %v3509_v62  ;;  %v3511_v15 = vadd.f32 %v3510_v31, %v8359_v0 }
 0x513   : > { %v4682_v10 = vpop.eup %4681  ;;  %v3996_v33 = vmul.f32 1.442695, %v3914_v5  ;;  %v3514_v36 = vpop.f32.mrf.mxu1 }
 0x514   : > { %v4684_v35 = vpop.eup %4683  ;;  %4516 = vst.msk [vmem:[%s8372_s17 + $0x58] sm:$0xff] %vm4217_vm0, %v4682_v10  ;;  %v3771_v18 = vpop.f32.mrf.mxu0  ;;  %v3998_v12 = vmul.f32 1.442695, %v3915_v32  ;;  %v3916_v40 = vsub.f32 0.0, %v3766_v22  ;;  %v3768_v45 = vadd.f32 %v3767_v34, %v3511_v15  ;;  %v3515_v29 = vadd.f32 %v3514_v36, %v8352_v53 }
 0x515   : > { %v4100_v44 = vadd.f32 1.0, %v4684_v35  ;;  %v4686_v46 = vpop.eup %4685  ;;  %4695 = vpow2.f32 %v3996_v33  ;;  %v3516_v51 = vpop.f32.mrf.mxu1 }
 0x516   : > { %v3773_v49 = vpop.f32.mrf.mxu0  ;;  %v4101_v52 = vadd.f32 1.0, %v4686_v46  ;;  %v4000_v28 = vmul.f32 1.442695, %v3916_v40  ;;  %v3917_v39 = vsub.f32 0.0, %v3768_v45  ;;  %v3772_v54 = vadd.f32 %v3771_v18, %v3515_v29 }
 0x517   : > { %4697 = vrcp.f32 %v4100_v44  ;;  %v3517_v56 = vadd.f32 %v3516_v51, %v8359_v0  ;;  %v3520_v23 = vpop.f32.mrf.mxu1 }
 0x518   : > { %4699 = vpow2.f32 %v3998_v12  ;;  %v3777_v11 = vpop.f32.mrf.mxu0  ;;  %v4002_v57 = vmul.f32 1.442695, %v3917_v39  ;;  %v3521_v60 = vadd.f32 %v3520_v23, %v8352_v53  ;;  %v3918_v43 = vsub.f32 0.0, %v3772_v54 }
 0x519   : > { %4701 = vrcp.f32 %v4101_v52  ;;  %v3774_v26 = vadd.f32 %v3773_v49, %v3517_v56  ;;  %v3522_v4 = vpop.f32.mrf.mxu1 }
 0x51a   : > { %v4688_v58 = vpop.eup %4687  ;;  %4703 = vpow2.f32 %v4000_v28  ;;  %v3779_v37 = vpop.f32.mrf.mxu0  ;;  %v3778_v9 = vadd.f32 %v3777_v11, %v3521_v60  ;;  %v3523_v61 = vadd.f32 %v3522_v4, %v8359_v0  ;;  %v4004_v3 = vmul.f32 1.442695, %v3918_v43 }
 0x51b   : > { %v4102_v20 = vadd.f32 1.0, %v4688_v58  ;;  %4705 = vpow2.f32 %v4002_v57  ;;  %v4690_v19 = vpop.eup %4689  ;;  %v3919_v63 = vsub.f32 0.0, %v3774_v26  ;;  %v3526_v2 = vpop.f32.mrf.mxu1 }
 0x51c   : > { %v3783_v38 = vpop.f32.mrf.mxu0  ;;  %v4103_v13 = vadd.f32 1.0, %v4690_v19  ;;  %v3920_v8 = vsub.f32 0.0, %v3778_v9  ;;  %v3780_v14 = vadd.f32 %v3779_v37, %v3523_v61  ;;  %v3527_v59 = vadd.f32 %v3526_v2, %v8352_v53 }
 0x51d   : > { %4707 = vrcp.f32 %v4102_v20  ;;  %v4692_v27 = vpop.eup %4691  ;;  %v4006_v47 = vmul.f32 1.442695, %v3919_v63  ;;  %v3528_v55 = vpop.f32.mrf.mxu1 }
 0x51e   : > { %4709 = vpow2.f32 %v4004_v3  ;;  %v3785_v21 = vpop.f32.mrf.mxu0  ;;  %v4104_v6 = vadd.f32 1.0, %v4692_v27  ;;  %v4008_v7 = vmul.f32 1.442695, %v3920_v8  ;;  %v3921_v16 = vsub.f32 0.0, %v3780_v14 }
 0x51f   : > { %4711 = vrcp.f32 %v4103_v13  ;;  %v4694_v41 = vpop.eup %4693  ;;  %v3784_v50 = vadd.f32 %v3783_v38, %v3527_v59  ;;  %v3529_v24 = vadd.f32 %v3528_v55, %v8359_v0  ;;  %v3532_v42 = vpop.f32.mrf.mxu1 }
 0x520   : > { %4713 = vpow2.f32 %v4006_v47  ;;  %v3789_v17 = vpop.f32.mrf.mxu0  ;;  %v4105_v48 = vadd.f32 1.0, %v4694_v41  ;;  %v4010_v30 = vmul.f32 1.442695, %v3921_v16  ;;  %v3533_v1 = vadd.f32 %v3532_v42, %v8352_v53 }
 0x521   : > { %4715 = vrcp.f32 %v4104_v6  ;;  %v3922_v25 = vsub.f32 0.0, %v3784_v50  ;;  %v3786_v62 = vadd.f32 %v3785_v21, %v3529_v24  ;;  %v3534_v5 = vpop.f32.mrf.mxu1 }
 0x522   : > { %4717 = vpow2.f32 %v4008_v7  ;;  %v3791_v31 = vpop.f32.mrf.mxu0  ;;  %v4696_v34 = vpop.eup %4695  ;;  %v3790_v10 = vadd.f32 %v3789_v17, %v3533_v1  ;;  %v3535_v32 = vadd.f32 %v3534_v5, %v8359_v0 }
 0x523   : > { %4719 = vrcp.f32 %v4105_v48  ;;  %v4106_v15 = vadd.f32 1.0, %v4696_v34  ;;  %v4012_v35 = vmul.f32 1.442695, %v3922_v25  ;;  %v3923_v33 = vsub.f32 0.0, %v3786_v62  ;;  %v3538_v36 = vpop.f32.mrf.mxu1 }
 0x524   : > { %v4698_v22 = vpop.eup %4697  ;;  %4721 = vpow2.f32 %v4010_v30  ;;  %v3795_v18 = vpop.f32.mrf.mxu0  ;;  %v3924_v12 = vsub.f32 0.0, %v3790_v10  ;;  %v3792_v40 = vadd.f32 %v3791_v31, %v3535_v32  ;;  %v3539_v45 = vadd.f32 %v3538_v36, %v8352_v53 }
 0x525   : > { %v4700_v44 = vpop.eup %4699  ;;  %4517 = vst [vmem:[%s8372_s17 + $0x60] sm:$0xff] %v4698_v22  ;;  %4723 = vrcp.f32 %v4106_v15  ;;  %v4014_v51 = vmul.f32 1.442695, %v3923_v33  ;;  %v3540_v49 = vpop.f32.mrf.mxu1 }
 0x526   : > { %v4702_v46 = vpop.eup %4701  ;;  %v4107_v29 = vadd.f32 1.0, %v4700_v44  ;;  %v3797_v52 = vpop.f32.mrf.mxu0  ;;  %4725 = vpow2.f32 %v4012_v35  ;;  %v3925_v39 = vsub.f32 0.0, %v3792_v40  ;;  %v3796_v54 = vadd.f32 %v3795_v18, %v3539_v45 }
 0x527   : > { %v4704_v28 = vpop.eup %4703  ;;  %4518 = vst.msk [vmem:[%s8372_s17 + $0x68] sm:$0xff] %vm4217_vm0, %v4702_v46  ;;  %v4016_v11 = vmul.f32 1.442695, %v3924_v12  ;;  %v3541_v57 = vadd.f32 %v3540_v49, %v8359_v0  ;;  %v3544_v60 = vpop.f32.mrf.mxu1 }
 0x528   : > { %v4706_v56 = vpop.eup %4705  ;;  %4727 = vrcp.f32 %v4107_v29  ;;  %v4108_v23 = vadd.f32 1.0, %v4704_v28  ;;  %v3801_v58 = vpop.f32.mrf.mxu0  ;;  %v4018_v26 = vmul.f32 1.442695, %v3925_v39  ;;  %v3926_v4 = vsub.f32 0.0, %v3796_v54 }
 0x529   : > { %v4109_v43 = vadd.f32 1.0, %v4706_v56  ;;  %4729 = vpow2.f32 %v4014_v51  ;;  %v3798_v20 = vadd.f32 %v3797_v52, %v3541_v57  ;;  %v3545_v9 = vadd.f32 %v3544_v60, %v8352_v53  ;;  %v3546_v61 = vpop.f32.mrf.mxu1 }
 0x52a   : > { %v4708_v37 = vpop.eup %4707  ;;  %4731 = vrcp.f32 %v4108_v23  ;;  %v3803_v19 = vpop.f32.mrf.mxu0  ;;  %v4020_v63 = vmul.f32 1.442695, %v3926_v4  ;;  %v3547_v2 = vadd.f32 %v3546_v61, %v8359_v0 }
 0x52b   : > { %v4710_v3 = vpop.eup %4709  ;;  %4519 = vst [vmem:[%s8372_s17 + $0x70] sm:$0xff] %v4708_v37  ;;  %4733 = vrcp.f32 %v4109_v43  ;;  %v3927_v8 = vsub.f32 0.0, %v3798_v20  ;;  %v3802_v14 = vadd.f32 %v3801_v58, %v3545_v9  ;;  %v3550_v27 = vpop.f32.mrf.mxu1 }
 0x52c   : > { %v4712_v38 = vpop.eup %4711  ;;  %v4110_v13 = vadd.f32 1.0, %v4710_v3  ;;  %4735 = vpow2.f32 %v4016_v11  ;;  %v3807_v47 = vpop.f32.mrf.mxu0  ;;  %v3804_v55 = vadd.f32 %v3803_v19, %v3547_v2  ;;  %v3551_v21 = vadd.f32 %v3550_v27, %v8352_v53 }
 0x52d   : > { %v4714_v59 = vpop.eup %4713  ;;  %4520 = vst.msk [vmem:[%s8372_s17 + $0x78] sm:$0xff] %vm4217_vm0, %v4712_v38  ;;  %4737 = vpow2.f32 %v4018_v26  ;;  %v4022_v16 = vmul.f32 1.442695, %v3927_v8  ;;  %v3928_v41 = vsub.f32 0.0, %v3802_v14  ;;  %v3552_v50 = vpop.f32.mrf.mxu1 }
 0x52e   : > { %v4716_v6 = vpop.eup %4715  ;;  %4739 = vrcp.f32 %v4110_v13  ;;  %v4111_v7 = vadd.f32 1.0, %v4714_v59  ;;  %v3809_v24 = vpop.f32.mrf.mxu0  ;;  %v3929_v17 = vsub.f32 0.0, %v3804_v55  ;;  %v3808_v48 = vadd.f32 %v3807_v47, %v3551_v21 }
 0x52f   : > { %v4718_v42 = vpop.eup %4717  ;;  %4521 = vst [vmem:[%s8372_s17 + $0x80] sm:$0xff] %v4716_v6  ;;  %4741 = vpow2.f32 %v4020_v63  ;;  %v3553_v30 = vadd.f32 %v3552_v50, %v8359_v0  ;;  %v4024_v62 = vmul.f32 1.442695, %v3928_v41  ;;  %v3556_v5 = vpop.f32.mrf.mxu1 }
 0x530   : > { %v4720_v1 = vpop.eup %4719  ;;  %4743 = vrcp.f32 %v4111_v7  ;;  %v4112_v25 = vadd.f32 1.0, %v4718_v42  ;;  %v3813_v31 = vpop.f32.mrf.mxu0  ;;  %v4026_v10 = vmul.f32 1.442695, %v3929_v17  ;;  %v3930_v32 = vsub.f32 0.0, %v3808_v48 }
 0x531   : > { %v4722_v34 = vpop.eup %4721  ;;  %4522 = vst.msk [vmem:[%s8372_s17 + $0x88] sm:$0xff] %vm4217_vm0, %v4720_v1  ;;  %4745 = vpow2.f32 %v4022_v16  ;;  %v3810_v22 = vadd.f32 %v3809_v24, %v3553_v30  ;;  %v3557_v35 = vadd.f32 %v3556_v5, %v8352_v53  ;;  %v3558_v33 = vpop.f32.mrf.mxu1 }
 0x532   : > { %4747 = vrcp.f32 %v4112_v25  ;;  %v4113_v15 = vadd.f32 1.0, %v4722_v34  ;;  %v3815_v36 = vpop.f32.mrf.mxu0  ;;  %v4724_v18 = vpop.eup %4723  ;;  %v4028_v44 = vmul.f32 1.442695, %v3930_v32  ;;  %v3559_v40 = vadd.f32 %v3558_v33, %v8359_v0 }
 0x533   : > { %4749 = vpow2.f32 %v4024_v62  ;;  %v3931_v12 = vsub.f32 0.0, %v3810_v22  ;;  %v4726_v45 = vpop.eup %4725  ;;  %4523 = vst [vmem:[%s8372_s17 + $0x90] sm:$0xff] %v4724_v18  ;;  %v3814_v46 = vadd.f32 %v3813_v31, %v3557_v35  ;;  %v3562_v29 = vpop.f32.mrf.mxu1 }
 0x534   : > { %4751 = vrcp.f32 %v4113_v15  ;;  %v3819_v51 = vpop.f32.mrf.mxu0  ;;  %v4114_v52 = vadd.f32 1.0, %v4726_v45  ;;  %v3816_v39 = vadd.f32 %v3815_v36, %v3559_v40  ;;  %v3563_v23 = vadd.f32 %v3562_v29, %v8352_v53 }
 0x535   : > { %v4728_v49 = vpop.eup %4727  ;;  %4753 = vpow2.f32 %v4026_v10  ;;  %v4030_v28 = vmul.f32 1.442695, %v3931_v12  ;;  %v3932_v56 = vsub.f32 0.0, %v3814_v46  ;;  %v3564_v11 = vpop.f32.mrf.mxu1 }
 0x536   : > { %v4730_v54 = vpop.eup %4729  ;;  %4524 = vst.msk [vmem:[%s8372_s17 + $0x98] sm:$0xff] %vm4217_vm0, %v4728_v49  ;;  %4755 = vpow2.f32 %v4028_v44  ;;  %v3821_v57 = vpop.f32.mrf.mxu0  ;;  %v3933_v43 = vsub.f32 0.0, %v3816_v39  ;;  %v3565_v26 = vadd.f32 %v3564_v11, %v8359_v0  ;;  %v3820_v20 = vadd.f32 %v3819_v51, %v3563_v23 }
 0x537   : > { %v4732_v60 = vpop.eup %4731  ;;  %4757 = vrcp.f32 %v4114_v52  ;;  %v4115_v58 = vadd.f32 1.0, %v4730_v54  ;;  %v4032_v37 = vmul.f32 1.442695, %v3932_v56  ;;  %v3568_v9 = vpop.f32.mrf.mxu1 }
 0x538   : > { %v4734_v4 = vpop.eup %4733  ;;  %4525 = vst [vmem:[%s8372_s17 + $0xa0] sm:$0xff] %v4732_v60  ;;  %4759 = vpow2.f32 %v4030_v28  ;;  %v3825_v61 = vpop.f32.mrf.mxu0  ;;  %v4034_v3 = vmul.f32 1.442695, %v3933_v43  ;;  %v3822_v63 = vadd.f32 %v3821_v57, %v3565_v26  ;;  %v3569_v2 = vadd.f32 %v3568_v9, %v8352_v53 }
 0x539   : > { %v4736_v19 = vpop.eup %4735  ;;  %4526 = vst.msk [vmem:[%s8372_s17 + $0xa8] sm:$0xff] %vm4217_vm0, %v4734_v4  ;;  %4761 = vrcp.f32 %v4115_v58  ;;  %v3934_v8 = vsub.f32 0.0, %v3820_v20  ;;  %v3570_v14 = vpop.f32.mrf.mxu1 }
 0x53a   : > { %v4738_v38 = vpop.eup %4737  ;;  %v4116_v13 = vadd.f32 1.0, %v4736_v19  ;;  %4763 = vpow2.f32 %v4032_v37  ;;  %v3827_v27 = vpop.f32.mrf.mxu0  ;;  %v3935_v55 = vsub.f32 0.0, %v3822_v63  ;;  %v3826_v21 = vadd.f32 %v3825_v61, %v3569_v2 }
 0x53b   : > { %v4740_v47 = vpop.eup %4739  ;;  %v4117_v59 = vadd.f32 1.0, %v4738_v38  ;;  %4765 = vpow2.f32 %v4034_v3  ;;  %v4036_v7 = vmul.f32 1.442695, %v3934_v8  ;;  %v3571_v16 = vadd.f32 %v3570_v14, %v8359_v0  ;;  %v3574_v41 = vpop.f32.mrf.mxu1 }
 0x53c   : > { %v4742_v6 = vpop.eup %4741  ;;  %4527 = vst [vmem:[%s8372_s17 + $0xb0] sm:$0xff] %v4740_v47  ;;  %4767 = vrcp.f32 %v4116_v13  ;;  %v3831_v50 = vpop.f32.mrf.mxu0  ;;  %v4038_v17 = vmul.f32 1.442695, %v3935_v55  ;;  %v3936_v48 = vsub.f32 0.0, %v3826_v21  ;;  %v3575_v25 = vadd.f32 %v3574_v41, %v8352_v53 }
 0x53d   : > { %v4744_v24 = vpop.eup %4743  ;;  %4769 = vrcp.f32 %v4117_v59  ;;  %v4118_v42 = vadd.f32 1.0, %v4742_v6  ;;  %v3828_v1 = vadd.f32 %v3827_v27, %v3571_v16  ;;  %v3576_v62 = vpop.f32.mrf.mxu1 }
 0x53e   : > { %v4746_v30 = vpop.eup %4745  ;;  %4528 = vst.msk [vmem:[%s8372_s17 + $0xb8] sm:$0xff] %vm4217_vm0, %v4744_v24  ;;  %4771 = vpow2.f32 %v4036_v7  ;;  %v3833_v5 = vpop.f32.mrf.mxu0  ;;  %v4040_v10 = vmul.f32 1.442695, %v3936_v48  ;;  %v3577_v32 = vadd.f32 %v3576_v62, %v8359_v0  ;;  %v3832_v35 = vadd.f32 %v3831_v50, %v3575_v25 }
 0x53f   : > { %v4748_v31 = vpop.eup %4747  ;;  %4773 = vrcp.f32 %v4118_v42  ;;  %v4119_v34 = vadd.f32 1.0, %v4746_v30  ;;  %v3937_v15 = vsub.f32 0.0, %v3828_v1  ;;  %v3580_v33 = vpop.f32.mrf.mxu1 }
 0x540   : > { %v4750_v22 = vpop.eup %4749  ;;  %4529 = vst [vmem:[%s8372_s17 + $0xc0] sm:$0xff] %v4748_v31  ;;  %4775 = vpow2.f32 %v4038_v17  ;;  %v3837_v36 = vpop.f32.mrf.mxu0  ;;  %v3834_v12 = vadd.f32 %v3833_v5, %v3577_v32  ;;  %v3581_v40 = vadd.f32 %v3580_v33, %v8352_v53  ;;  %v3938_v29 = vsub.f32 0.0, %v3832_v35 }
 0x541   : > { %v4752_v18 = vpop.eup %4751  ;;  %4777 = vrcp.f32 %v4119_v34  ;;  %v4120_v44 = vadd.f32 1.0, %v4750_v22  ;;  %v4042_v46 = vmul.f32 1.442695, %v3937_v15  ;;  %v3582_v51 = vpop.f32.mrf.mxu1 }
 0x542   : > { %v4754_v45 = vpop.eup %4753  ;;  %4530 = vst.msk [vmem:[%s8372_s17 + $0xc8] sm:$0xff] %vm4217_vm0, %v4752_v18  ;;  %4779 = vpow2.f32 %v4040_v10  ;;  %v3839_v49 = vpop.f32.mrf.mxu0  ;;  %v3939_v39 = vsub.f32 0.0, %v3834_v12  ;;  %v3838_v54 = vadd.f32 %v3837_v36, %v3581_v40  ;;  %v4044_v11 = vmul.f32 1.442695, %v3938_v29 }
 0x543   : > { %v4756_v52 = vpop.eup %4755  ;;  %4781 = vrcp.f32 %v4120_v44  ;;  %v4121_v28 = vadd.f32 1.0, %v4754_v45  ;;  %v3583_v57 = vadd.f32 %v3582_v51, %v8359_v0  ;;  %v3586_v60 = vpop.f32.mrf.mxu1 }
 0x544   : > { %v4758_v56 = vpop.eup %4757  ;;  %v4122_v23 = vadd.f32 1.0, %v4756_v52  ;;  %4783 = vpow2.f32 %v4042_v46  ;;  %v3843_v58 = vpop.f32.mrf.mxu0  ;;  %v4046_v26 = vmul.f32 1.442695, %v3939_v39  ;;  %v3940_v4 = vsub.f32 0.0, %v3838_v54 }
 0x545   : > { %v4760_v43 = vpop.eup %4759  ;;  %4531 = vst [vmem:[%s8372_s17 + $0xd0] sm:$0xff] %v4758_v56  ;;  %4785 = vrcp.f32 %v4121_v28  ;;  %v3587_v37 = vadd.f32 %v3586_v60, %v8352_v53  ;;  %v3840_v61 = vadd.f32 %v3839_v49, %v3583_v57  ;;  %v3588_v19 = vpop.f32.mrf.mxu1 }
 0x546   : > { %v4762_v20 = vpop.eup %4761  ;;  %4787 = vrcp.f32 %v4122_v23  ;;  %v4123_v9 = vadd.f32 1.0, %v4760_v43  ;;  %v3845_v3 = vpop.f32.mrf.mxu0  ;;  %v3589_v38 = vadd.f32 %v3588_v19, %v8359_v0  ;;  %v4048_v14 = vmul.f32 1.442695, %v3940_v4 }
 0x547   : > { %v4764_v63 = vpop.eup %4763  ;;  %4532 = vst.msk [vmem:[%s8372_s17 + $0xd8] sm:$0xff] %vm4217_vm0, %v4762_v20  ;;  %4789 = vpow2.f32 %v4044_v11  ;;  %v3844_v2 = vadd.f32 %v3843_v58, %v3587_v37  ;;  %v3941_v27 = vsub.f32 0.0, %v3840_v61  ;;  %v3592_v47 = vpop.f32.mrf.mxu1 }
 0x548   : > { %v4766_v13 = vpop.eup %4765  ;;  %4791 = vrcp.f32 %v4123_v9  ;;  %v4124_v8 = vadd.f32 1.0, %v4764_v63  ;;  %v3849_v59 = vpop.f32.mrf.mxu0  ;;  %v3846_v7 = vadd.f32 %v3845_v3, %v3589_v38  ;;  %v3593_v50 = vadd.f32 %v3592_v47, %v8352_v53 }
 0x549   : > { %v4768_v55 = vpop.eup %4767  ;;  %v4125_v21 = vadd.f32 1.0, %v4766_v13  ;;  %4793 = vpow2.f32 %v4046_v26  ;;  %v3942_v6 = vsub.f32 0.0, %v3844_v2  ;;  %v4050_v41 = vmul.f32 1.442695, %v3941_v27  ;;  %v3594_v24 = vpop.f32.mrf.mxu1 }
 0x54a   : > { %v4770_v16 = vpop.eup %4769  ;;  %4533 = vst [vmem:[%s8372_s17 + $0xe0] sm:$0xff] %v4768_v55  ;;  %4795 = vrcp.f32 %v4124_v8  ;;  %v3851_v42 = vpop.f32.mrf.mxu0  ;;  %v3943_v30 = vsub.f32 0.0, %v3846_v7  ;;  %v3595_v1 = vadd.f32 %v3594_v24, %v8359_v0  ;;  %v3850_v5 = vadd.f32 %v3849_v59, %v3593_v50 }
 0x54b   : > { %v4772_v17 = vpop.eup %4771  ;;  %4534 = vst.msk [vmem:[%s8372_s17 + $0xe8] sm:$0xff] %vm4217_vm0, %v4770_v16  ;;  %4797 = vrcp.f32 %v4125_v21  ;;  %v4052_v48 = vmul.f32 1.442695, %v3942_v6  ;;  %v3598_v31 = vpop.f32.mrf.mxu1 }
 0x54c   : > { %v4774_v25 = vpop.eup %4773  ;;  %v4126_v62 = vadd.f32 1.0, %v4772_v17  ;;  %4799 = vpow2.f32 %v4048_v14  ;;  %v3855_v34 = vpop.f32.mrf.mxu0  ;;  %v4054_v32 = vmul.f32 1.442695, %v3943_v30  ;;  %v3852_v22 = vadd.f32 %v3851_v42, %v3595_v1 }
 0x54d   : > { %v4776_v10 = vpop.eup %4775  ;;  %4535 = vst [vmem:[%s8372_s17 + $0xf0] sm:$0xff] %v4774_v25  ;;  %4801 = vpow2.f32 %v4050_v41  ;;  %v3599_v15 = vadd.f32 %v3598_v31, %v8352_v53  ;;  %v3944_v36 = vsub.f32 0.0, %v3850_v5  ;;  %v3600_v18 = vpop.f32.mrf.mxu1 }
 0x54e   : > { %v4778_v35 = vpop.eup %4777  ;;  %4803 = vrcp.f32 %v4126_v62  ;;  %v4127_v33 = vadd.f32 1.0, %v4776_v10  ;;  %v3857_v44 = vpop.f32.mrf.mxu0  ;;  %v3945_v40 = vsub.f32 0.0, %v3852_v22  ;;  %v3601_v46 = vadd.f32 %v3600_v18, %v8359_v0 }
 0x54f   : > { %v4780_v12 = vpop.eup %4779  ;;  %4536 = vst.msk [vmem:[%s8372_s17 + $0xf8] sm:$0xff] %vm4217_vm0, %v4778_v35  ;;  %4805 = vpow2.f32 %v4052_v48  ;;  %v3856_v45 = vadd.f32 %v3855_v34, %v3599_v15  ;;  %v4056_v49 = vmul.f32 1.442695, %v3944_v36  ;;  %v3604_v52 = vpop.f32.mrf.mxu1 }
 0x550   : > { %v4782_v29 = vpop.eup %4781  ;;  %4807 = vrcp.f32 %v4127_v33  ;;  %v4128_v51 = vadd.f32 1.0, %v4780_v12  ;;  %v3861_v28 = vpop.f32.mrf.mxu0  ;;  %v4058_v54 = vmul.f32 1.442695, %v3945_v40  ;;  %v3858_v23 = vadd.f32 %v3857_v44, %v3601_v46 }
 0x551   : > { %v4784_v39 = vpop.eup %4783  ;;  %4537 = vst [vmem:[%s8372_s17 + $0x100] sm:$0xff] %v4782_v29  ;;  %4809 = vpow2.f32 %v4054_v32  ;;  %v3946_v56 = vsub.f32 0.0, %v3856_v45  ;;  %v3605_v60 = vadd.f32 %v3604_v52, %v8352_v53  ;;  %v3606_v58 = vpop.f32.mrf.mxu1 }
 0x552   : > { %v4786_v11 = vpop.eup %4785  ;;  %4811 = vrcp.f32 %v4128_v51  ;;  %v4129_v57 = vadd.f32 1.0, %v4784_v39  ;;  %v3863_v43 = vpop.f32.mrf.mxu0  ;;  %v3947_v37 = vsub.f32 0.0, %v3858_v23  ;;  %v3607_v20 = vadd.f32 %v3606_v58, %v8359_v0 }
 0x553   : > { %v4788_v26 = vpop.eup %4787  ;;  %4538 = vst.msk [vmem:[%s8372_s17 + $0x108] sm:$0xff] %vm4217_vm0, %v4786_v11  ;;  %4813 = vpow2.f32 %v4056_v49  ;;  %v4060_v4 = vmul.f32 1.442695, %v3946_v56  ;;  %v3862_v61 = vadd.f32 %v3861_v28, %v3605_v60  ;;  %v3610_v19 = vpop.f32.mrf.mxu1 }
 0x554   : > { %v4790_v9 = vpop.eup %4789  ;;  %4539 = vst [vmem:[%s8372_s17 + $0x110] sm:$0xff] %v4788_v26  ;;  %4815 = vrcp.f32 %v4129_v57  ;;  %v3867_v3 = vpop.f32.mrf.mxu0  ;;  %v4062_v38 = vmul.f32 1.442695, %v3947_v37  ;;  %v3864_v13 = vadd.f32 %v3863_v43, %v3607_v20  ;;  %v3611_v27 = vadd.f32 %v3610_v19, %v8352_v53 }
 0x555   : > { %v4792_v63 = vpop.eup %4791  ;;  %v4130_v2 = vadd.f32 1.0, %v4790_v9  ;;  %4817 = vpow2.f32 %v4058_v54  ;;  %v3948_v14 = vsub.f32 0.0, %v3862_v61  ;;  %v3612_v47 = vpop.f32.mrf.mxu1 }
 0x556   : > { %v4794_v8 = vpop.eup %4793  ;;  %4540 = vst.msk [vmem:[%s8372_s17 + $0x118] sm:$0xff] %vm4217_vm0, %v4792_v63  ;;  %4819 = vpow2.f32 %v4060_v4  ;;  %v3869_v59 = vpop.f32.mrf.mxu0  ;;  %v3949_v6 = vsub.f32 0.0, %v3864_v13  ;;  %v3613_v7 = vadd.f32 %v3612_v47, %v8359_v0  ;;  %v3868_v50 = vadd.f32 %v3867_v3, %v3611_v27 }
 0x557   : > { %v4796_v55 = vpop.eup %4795  ;;  %4821 = vrcp.f32 %v4130_v2  ;;  %v4131_v21 = vadd.f32 1.0, %v4794_v8  ;;  %v4064_v41 = vmul.f32 1.442695, %v3948_v14  ;;  %v3616_v24 = vpop.f32.mrf.mxu1 }
 0x558   : > { %v4798_v16 = vpop.eup %4797  ;;  %4541 = vst [vmem:[%s8372_s17 + $0x120] sm:$0xff] %v4796_v55  ;;  %4823 = vpow2.f32 %v4062_v38  ;;  %v3873_v42 = vpop.f32.mrf.mxu0  ;;  %v4066_v48 = vmul.f32 1.442695, %v3949_v6  ;;  %v3870_v30 = vadd.f32 %v3869_v59, %v3613_v7  ;;  %v3617_v1 = vadd.f32 %v3616_v24, %v8352_v53 }
 0x559   : > { %v4800_v17 = vpop.eup %4799  ;;  %4542 = vst.msk [vmem:[%s8372_s17 + $0x128] sm:$0xff] %vm4217_vm0, %v4798_v16  ;;  %4825 = vrcp.f32 %v4131_v21  ;;  %v3950_v5 = vsub.f32 0.0, %v3868_v50  ;;  %v3618_v31 = vpop.f32.mrf.mxu1 }
 0x55a   : > { %v4802_v25 = vpop.eup %4801  ;;  %v4132_v62 = vadd.f32 1.0, %v4800_v17  ;;  %4827 = vpow2.f32 %v4064_v41  ;;  %v3875_v34 = vpop.f32.mrf.mxu0  ;;  %v3951_v22 = vsub.f32 0.0, %v3870_v30  ;;  %v3874_v15 = vadd.f32 %v3873_v42, %v3617_v1 }
 0x55b   : > { %v4804_v10 = vpop.eup %4803  ;;  %v4133_v32 = vadd.f32 1.0, %v4802_v25  ;;  %4829 = vpow2.f32 %v4066_v48  ;;  %v4068_v33 = vmul.f32 1.442695, %v3950_v5  ;;  %v3619_v36 = vadd.f32 %v3618_v31, %v8359_v0  ;;  %v3622_v18 = vpop.f32.mrf.mxu1 }
 0x55c   : > { %v4806_v35 = vpop.eup %4805  ;;  %4543 = vst [vmem:[%s8372_s17 + $0x130] sm:$0xff] %v4804_v10  ;;  %4831 = vrcp.f32 %v4132_v62  ;;  %v3879_v44 = vpop.f32.mrf.mxu0  ;;  %v4070_v45 = vmul.f32 1.442695, %v3951_v22  ;;  %v3952_v46 = vsub.f32 0.0, %v3874_v15  ;;  %v3623_v49 = vadd.f32 %v3622_v18, %v8352_v53 }
 0x55d   : > { %v4808_v12 = vpop.eup %4807  ;;  %4833 = vrcp.f32 %v4133_v32  ;;  %v4134_v40 = vadd.f32 1.0, %v4806_v35  ;;  %v3876_v51 = vadd.f32 %v3875_v34, %v3619_v36  ;;  %v3624_v52 = vpop.f32.mrf.mxu1 }
 0x55e   : > { %v4810_v29 = vpop.eup %4809  ;;  %4544 = vst.msk [vmem:[%s8372_s17 + $0x138] sm:$0xff] %vm4217_vm0, %v4808_v12  ;;  %4835 = vpow2.f32 %v4068_v33  ;;  %v3881_v28 = vpop.f32.mrf.mxu0  ;;  %v4072_v56 = vmul.f32 1.442695, %v3952_v46  ;;  %v3625_v23 = vadd.f32 %v3624_v52, %v8359_v0  ;;  %v3880_v60 = vadd.f32 %v3879_v44, %v3623_v49 }
 0x55f   : > { %v4812_v39 = vpop.eup %4811  ;;  %4837 = vrcp.f32 %v4134_v40  ;;  %v4135_v54 = vadd.f32 1.0, %v4810_v29  ;;  %v3953_v57 = vsub.f32 0.0, %v3876_v51  ;;  %v3628_v58 = vpop.f32.mrf.mxu1 }
 0x560   : > { %v4814_v11 = vpop.eup %4813  ;;  %4545 = vst [vmem:[%s8372_s17 + $0x140] sm:$0xff] %v4812_v39  ;;  %4839 = vpow2.f32 %v4070_v45  ;;  %v3885_v43 = vpop.f32.mrf.mxu0  ;;  %v3882_v37 = vadd.f32 %v3881_v28, %v3625_v23  ;;  %v3629_v20 = vadd.f32 %v3628_v58, %v8352_v53  ;;  %v3954_v19 = vsub.f32 0.0, %v3880_v60 }
 0x561   : > { %v4816_v26 = vpop.eup %4815  ;;  %4841 = vrcp.f32 %v4135_v54  ;;  %v4136_v4 = vadd.f32 1.0, %v4814_v11  ;;  %v4074_v61 = vmul.f32 1.442695, %v3953_v57  ;;  %v3630_v3 = vpop.f32.mrf.mxu1 }
 0x562   : > { %v4818_v9 = vpop.eup %4817  ;;  %4546 = vst.msk [vmem:[%s8372_s17 + $0x148] sm:$0xff] %vm4217_vm0, %v4816_v26  ;;  %4843 = vpow2.f32 %v4072_v56  ;;  %v3887_v63 = vpop.f32.mrf.mxu0  ;;  %v3955_v13 = vsub.f32 0.0, %v3882_v37  ;;  %v3886_v8 = vadd.f32 %v3885_v43, %v3629_v20  ;;  %v4076_v47 = vmul.f32 1.442695, %v3954_v19 }
 0x563   : > { %v4820_v2 = vpop.eup %4819  ;;  %4845 = vrcp.f32 %v4136_v4  ;;  %v4137_v38 = vadd.f32 1.0, %v4818_v9  ;;  %v3631_v59 = vadd.f32 %v3630_v3, %v8359_v0  ;;  %v3634_v55 = vpop.f32.mrf.mxu1 }
 0x564   : > { %v4822_v14 = vpop.eup %4821  ;;  %v4138_v27 = vadd.f32 1.0, %v4820_v2  ;;  %4847 = vpow2.f32 %v4074_v61  ;;  %v3891_v21 = vpop.f32.mrf.mxu0  ;;  %v4078_v7 = vmul.f32 1.442695, %v3955_v13  ;;  %v3956_v16 = vsub.f32 0.0, %v3886_v8 }
 0x565   : > { %v4824_v6 = vpop.eup %4823  ;;  %4547 = vst [vmem:[%s8372_s17 + $0x150] sm:$0xff] %v4822_v14  ;;  %4849 = vrcp.f32 %v4137_v38  ;;  %v3635_v41 = vadd.f32 %v3634_v55, %v8352_v53  ;;  %v3888_v42 = vadd.f32 %v3887_v63, %v3631_v59  ;;  %v3636_v17 = vpop.f32.mrf.mxu1 }
 0x566   : > { %v4826_v50 = vpop.eup %4825  ;;  %4851 = vrcp.f32 %v4138_v27  ;;  %v4139_v24 = vadd.f32 1.0, %v4824_v6  ;;  %v3637_v1 = vadd.f32 %v3636_v17, %v8359_v0  ;;  %v4080_v5 = vmul.f32 1.442695, %v3956_v16  ;;  %v3893_v53 = vpop.f32.mrf.mxu0  ;;  %v4321_v6 = vld [vmem:[%s8372_s17 + $0x8] sm:$0xff] (%p5010_p4)  ;;  %v4325_v16 = vld [vmem:[%s8372_s17 + $0x18] sm:$0xff] (%p5010_p4)  ;;  %v4335_v17 = vld [vmem:[%s8372_s17 + $0x40] sm:$0xff] (%p5010_p4) }
 0x567   : > { %v4828_v48 = vpop.eup %4827  ;;  %4548 = vst.msk [vmem:[%s8372_s17 + $0x158] sm:$0xff] %vm4217_vm0, %v4826_v50  ;;  %4853 = vpow2.f32 %v4076_v47  ;;  %v3892_v30 = vadd.f32 %v3891_v21, %v3635_v41  ;;  %v3957_v31 = vsub.f32 0.0, %v3888_v42  ;;  %v4319_v21 = vld [vmem:[%s8372_s17] sm:$0xff] (%p5010_p4)  ;;  %v4329_v50 = vld [vmem:[%s8372_s17 + $0x28] sm:$0xff] (%p5010_p4)  ;;  %4322 = vst [vmem:[%s8533_s30 + $0x8] sm:$0xff] (%p5010_p4), %v4321_v6 }
 0x568   : > { %v4830_v25 = vpop.eup %4829  ;;  %4855 = vrcp.f32 %v4139_v24  ;;  %v4140_v62 = vadd.f32 1.0, %v4828_v48  ;;  %v3894_v22 = vadd.f32 %v3893_v53, %v3637_v1  ;;  %v4327_v41 = vld [vmem:[%s8372_s17 + $0x20] sm:$0xff] (%p5010_p4)  ;;  %4320 = vst [vmem:[%s8533_s30] sm:$0xff] (%p5010_p4), %v4319_v21  ;;  %4326 = vst [vmem:[%s8533_s30 + $0x18] sm:$0xff] (%p5010_p4), %v4325_v16  ;;  %v4331_v24 = vld [vmem:[%s8372_s17 + $0x30] sm:$0xff] (%p5010_p4) }
 0x569   : > { %v4832_v34 = vpop.eup %4831  ;;  %v4141_v10 = vadd.f32 1.0, %v4830_v25  ;;  %4857 = vpow2.f32 %v4078_v7  ;;  %v3958_v32 = vsub.f32 0.0, %v3892_v30  ;;  %v4082_v35 = vmul.f32 1.442695, %v3957_v31  ;;  %v4323_v7 = vld [vmem:[%s8372_s17 + $0x10] sm:$0xff] (%p5010_p4)  ;;  %4328 = vst [vmem:[%s8533_s30 + $0x40] sm:$0xff] (%p5010_p4), %v4327_v41 }
 0x56a   : > { %v4834_v15 = vpop.eup %4833  ;;  %4549 = vst [vmem:[%s8372_s17 + $0x160] sm:$0xff] %v4832_v34  ;;  %4859 = vrcp.f32 %v4140_v62  ;;  %v3959_v36 = vsub.f32 0.0, %v3894_v22  ;;  %4324 = vst [vmem:[%s8533_s30 + $0x10] sm:$0xff] (%p5010_p4), %v4323_v7  ;;  %v4333_v42 = vld [vmem:[%s8372_s17 + $0x38] sm:$0xff] (%p5010_p4)  ;;  %v4337_v48 = vld [vmem:[%s8372_s17 + $0x48] sm:$0xff] (%p5010_p4) }
 0x56b   : > { %v4836_v33 = vpop.eup %4835  ;;  %4550 = vst.msk [vmem:[%s8372_s17 + $0x168] sm:$0xff] %vm4217_vm0, %v4834_v15  ;;  %4861 = vrcp.f32 %v4141_v10  ;;  %v4084_v0 = vmul.f32 1.442695, %v3958_v32  ;;  %4330 = vst [vmem:[%s8533_s30 + $0x48] sm:$0xff] (%p5010_p4), %v4329_v50  ;;  %v4339_v30 = vld [vmem:[%s8372_s17 + $0x50] sm:$0xff] (%p5010_p4)  ;;  %v4341_v1 = vld [vmem:[%s8372_s17 + $0x58] sm:$0xff] (%p5010_p4) }
 0x56c   : > { %v4838_v18 = vpop.eup %4837  ;;  %v4142_v44 = vadd.f32 1.0, %v4836_v33  ;;  %4863 = vpow2.f32 %v4080_v5  ;;  %v4086_v40 = vmul.f32 1.442695, %v3959_v36  ;;  %4332 = vst [vmem:[%s8533_s30 + $0x50] sm:$0xff] (%p5010_p4), %v4331_v24  ;;  %4334 = vst [vmem:[%s8533_s30 + $0x58] sm:$0xff] (%p5010_p4), %v4333_v42  ;;  %v4343_v25 = vld [vmem:[%s8372_s17 + $0x60] sm:$0xff] (%p5010_p4) }
 0x56d   : > { %v4840_v12 = vpop.eup %4839  ;;  %4551 = vst [vmem:[%s8372_s17 + $0x170] sm:$0xff] %v4838_v18  ;;  %4865 = vpow2.f32 %v4082_v35  ;;  %4336 = vst [vmem:[%s8533_s30 + $0x80] sm:$0xff] (%p5010_p4), %v4335_v17  ;;  %v4345_v62 = vld [vmem:[%s8372_s17 + $0x68] sm:$0xff] (%p5010_p4)  ;;  %v4347_v5 = vld [vmem:[%s8372_s17 + $0x70] sm:$0xff] (%p5010_p4) }
 0x56e   : > { %v4842_v45 = vpop.eup %4841  ;;  %4867 = vrcp.f32 %v4142_v44  ;;  %v4143_v46 = vadd.f32 1.0, %v4840_v12  ;;  %4338 = vst [vmem:[%s8533_s30 + $0x88] sm:$0xff] (%p5010_p4), %v4337_v48  ;;  %4340 = vst [vmem:[%s8533_s30 + $0x90] sm:$0xff] (%p5010_p4), %v4339_v30  ;;  %v4349_v31 = vld [vmem:[%s8372_s17 + $0x78] sm:$0xff] (%p5010_p4)  ;;  %v4351_v53 = vld [vmem:[%s8372_s17 + $0x80] sm:$0xff] (%p5010_p4) }
 0x56f   : > { %v4844_v29 = vpop.eup %4843  ;;  %4552 = vst.msk [vmem:[%s8372_s17 + $0x178] sm:$0xff] %vm4217_vm0, %v4842_v45  ;;  %4869 = vpow2.f32 %v4084_v0  ;;  %4342 = vst [vmem:[%s8533_s30 + $0x98] sm:$0xff] (%p5010_p4), %v4341_v1  ;;  %v4353_v34 = vld [vmem:[%s8372_s17 + $0x88] sm:$0xff] (%p5010_p4)  ;;  %v4355_v10 = vld [vmem:[%s8372_s17 + $0x90] sm:$0xff] (%p5010_p4) }
 0x570   : > { %v4846_v51 = vpop.eup %4845  ;;  %4871 = vrcp.f32 %v4143_v46  ;;  %v4144_v49 = vadd.f32 1.0, %v4844_v29  ;;  %4344 = vst [vmem:[%s8533_s30 + $0xc0] sm:$0xff] (%p5010_p4), %v4343_v25  ;;  %4346 = vst [vmem:[%s8533_s30 + $0xc8] sm:$0xff] (%p5010_p4), %v4345_v62  ;;  %v4357_v32 = vld [vmem:[%s8372_s17 + $0x98] sm:$0xff] (%p5010_p4)  ;;  %v4359_v22 = vld [vmem:[%s8372_s17 + $0xa0] sm:$0xff] (%p5010_p4) }
 0x571   : > { %v4848_v52 = vpop.eup %4847  ;;  %4553 = vst [vmem:[%s8372_s17 + $0x180] sm:$0xff] %v4846_v51  ;;  %4873 = vpow2.f32 %v4086_v40  ;;  %4348 = vst [vmem:[%s8533_s30 + $0xd0] sm:$0xff] (%p5010_p4), %v4347_v5  ;;  %v4361_v15 = vld [vmem:[%s8372_s17 + $0xa8] sm:$0xff] (%p5010_p4)  ;;  %v4363_v35 = vld [vmem:[%s8372_s17 + $0xb0] sm:$0xff] (%p5010_p4) }
 0x572   : > { %v4850_v28 = vpop.eup %4849  ;;  %4875 = vrcp.f32 %v4144_v49  ;;  %v4145_v39 = vadd.f32 1.0, %v4848_v52  ;;  %4350 = vst [vmem:[%s8533_s30 + $0xd8] sm:$0xff] (%p5010_p4), %v4349_v31  ;;  %4352 = vst [vmem:[%s8533_s30 + $0x100] sm:$0xff] (%p5010_p4), %v4351_v53  ;;  %v4365_v33 = vld [vmem:[%s8372_s17 + $0xb8] sm:$0xff] (%p5010_p4)  ;;  %v4367_v0 = vld [vmem:[%s8372_s17 + $0xc0] sm:$0xff] (%p5010_p4) }
 0x573   : > { %v4852_v54 = vpop.eup %4851  ;;  %4554 = vst.msk [vmem:[%s8372_s17 + $0x188] sm:$0xff] %vm4217_vm0, %v4850_v28  ;;  %4354 = vst [vmem:[%s8533_s30 + $0x108] sm:$0xff] (%p5010_p4), %v4353_v34  ;;  %v4369_v36 = vld [vmem:[%s8372_s17 + $0xc8] sm:$0xff] (%p5010_p4)  ;;  %v4371_v18 = vld [vmem:[%s8372_s17 + $0xd0] sm:$0xff] (%p5010_p4) }
 0x574   : > { %v4854_v56 = vpop.eup %4853  ;;  %4555 = vst [vmem:[%s8372_s17 + $0x190] sm:$0xff] %v4852_v54  ;;  %4877 = vrcp.f32 %v4145_v39  ;;  %4356 = vst [vmem:[%s8533_s30 + $0x110] sm:$0xff] (%p5010_p4), %v4355_v10  ;;  %v4373_v44 = vld [vmem:[%s8372_s17 + $0xd8] sm:$0xff] (%p5010_p4)  ;;  %v4375_v12 = vld [vmem:[%s8372_s17 + $0xe0] sm:$0xff] (%p5010_p4) }
 0x575   : > { %v4856_v23 = vpop.eup %4855  ;;  %v4146_v11 = vadd.f32 1.0, %v4854_v56  ;;  %4358 = vst [vmem:[%s8533_s30 + $0x118] sm:$0xff] (%p5010_p4), %v4357_v32  ;;  %4360 = vst [vmem:[%s8533_s30 + $0x140] sm:$0xff] (%p5010_p4), %v4359_v22  ;;  %v4377_v40 = vld [vmem:[%s8372_s17 + $0xe8] sm:$0xff] (%p5010_p4)  ;;  %v4379_v45 = vld [vmem:[%s8372_s17 + $0xf0] sm:$0xff] (%p5010_p4) }
 0x576   : > { %v4858_v57 = vpop.eup %4857  ;;  %4556 = vst.msk [vmem:[%s8372_s17 + $0x198] sm:$0xff] %vm4217_vm0, %v4856_v23  ;;  %4362 = vst [vmem:[%s8533_s30 + $0x148] sm:$0xff] (%p5010_p4), %v4361_v15  ;;  %v4381_v46 = vld [vmem:[%s8372_s17 + $0xf8] sm:$0xff] (%p5010_p4)  ;;  %v4383_v29 = vld [vmem:[%s8372_s17 + $0x100] sm:$0xff] (%p5010_p4) }
 0x577   : > { %v4860_v60 = vpop.eup %4859  ;;  %4879 = vrcp.f32 %v4146_v11  ;;  %v4147_v58 = vadd.f32 1.0, %v4858_v57  ;;  %4364 = vst [vmem:[%s8533_s30 + $0x150] sm:$0xff] (%p5010_p4), %v4363_v35  ;;  %4366 = vst [vmem:[%s8533_s30 + $0x158] sm:$0xff] (%p5010_p4), %v4365_v33  ;;  %v4385_v51 = vld [vmem:[%s8372_s17 + $0x108] sm:$0xff] (%p5010_p4)  ;;  %v4387_v49 = vld [vmem:[%s8372_s17 + $0x110] sm:$0xff] (%p5010_p4) }
 0x578   : > { %v4862_v43 = vpop.eup %4861  ;;  %4557 = vst [vmem:[%s8372_s17 + $0x1a0] sm:$0xff] %v4860_v60  ;;  %4368 = vst [vmem:[%s8533_s30 + $0x180] sm:$0xff] (%p5010_p4), %v4367_v0  ;;  %v4389_v52 = vld [vmem:[%s8372_s17 + $0x118] sm:$0xff] (%p5010_p4)  ;;  %v4391_v28 = vld [vmem:[%s8372_s17 + $0x120] sm:$0xff] (%p5010_p4) }
 0x579   : > { %v4864_v26 = vpop.eup %4863  ;;  %4558 = vst.msk [vmem:[%s8372_s17 + $0x1a8] sm:$0xff] %vm4217_vm0, %v4862_v43  ;;  %4881 = vrcp.f32 %v4147_v58  ;;  %4370 = vst [vmem:[%s8533_s30 + $0x188] sm:$0xff] (%p5010_p4), %v4369_v36  ;;  %v4393_v39 = vld [vmem:[%s8372_s17 + $0x128] sm:$0xff] (%p5010_p4)  ;;  %v4395_v54 = vld [vmem:[%s8372_s17 + $0x130] sm:$0xff] (%p5010_p4) }
 0x57a   : > { %v4866_v4 = vpop.eup %4865  ;;  %v4148_v37 = vadd.f32 1.0, %v4864_v26  ;;  %4372 = vst [vmem:[%s8533_s30 + $0x190] sm:$0xff] (%p5010_p4), %v4371_v18  ;;  %4374 = vst [vmem:[%s8533_s30 + $0x198] sm:$0xff] (%p5010_p4), %v4373_v44  ;;  %v4397_v56 = vld [vmem:[%s8372_s17 + $0x138] sm:$0xff] (%p5010_p4)  ;;  %v4399_v23 = vld [vmem:[%s8372_s17 + $0x140] sm:$0xff] (%p5010_p4) }
 0x57b   : > { %v4868_v20 = vpop.eup %4867  ;;  %v4149_v9 = vadd.f32 1.0, %v4866_v4  ;;  %4376 = vst [vmem:[%s8533_s30 + $0x1c0] sm:$0xff] (%p5010_p4), %v4375_v12  ;;  %4378 = vst [vmem:[%s8533_s30 + $0x1c8] sm:$0xff] (%p5010_p4), %v4377_v40  ;;  %v4401_v11 = vld [vmem:[%s8372_s17 + $0x148] sm:$0xff] (%p5010_p4)  ;;  %v4403_v57 = vld [vmem:[%s8372_s17 + $0x150] sm:$0xff] (%p5010_p4) }
 0x57c   : > { %v4870_v61 = vpop.eup %4869  ;;  %4559 = vst [vmem:[%s8372_s17 + $0x1b0] sm:$0xff] %v4868_v20  ;;  %4883 = vrcp.f32 %v4148_v37  ;;  %4380 = vst [vmem:[%s8533_s30 + $0x1d0] sm:$0xff] (%p5010_p4), %v4379_v45  ;;  %v4405_v60 = vld [vmem:[%s8372_s17 + $0x158] sm:$0xff] (%p5010_p4)  ;;  %v4407_v58 = vld [vmem:[%s8372_s17 + $0x160] sm:$0xff] (%p5010_p4) }
 0x57d   : > { %v4872_v19 = vpop.eup %4871  ;;  %4885 = vrcp.f32 %v4149_v9  ;;  %v4150_v3 = vadd.f32 1.0, %v4870_v61  ;;  %4382 = vst [vmem:[%s8533_s30 + $0x1d8] sm:$0xff] (%p5010_p4), %v4381_v46  ;;  %4384 = vst [vmem:[%s8533_s30 + $0x200] sm:$0xff] (%p5010_p4), %v4383_v29  ;;  %v4409_v43 = vld [vmem:[%s8372_s17 + $0x168] sm:$0xff] (%p5010_p4)  ;;  %v4411_v26 = vld [vmem:[%s8372_s17 + $0x170] sm:$0xff] (%p5010_p4) }
 0x57e   : > { %v4874_v63 = vpop.eup %4873  ;;  %4560 = vst.msk [vmem:[%s8372_s17 + $0x1b8] sm:$0xff] %vm4217_vm0, %v4872_v19  ;;  %4386 = vst [vmem:[%s8533_s30 + $0x208] sm:$0xff] (%p5010_p4), %v4385_v51  ;;  %v4413_v4 = vld [vmem:[%s8372_s17 + $0x178] sm:$0xff] (%p5010_p4)  ;;  %v4415_v37 = vld [vmem:[%s8372_s17 + $0x180] sm:$0xff] (%p5010_p4) }
 0x57f   : > { %v4876_v2 = vpop.eup %4875  ;;  %4887 = vrcp.f32 %v4150_v3  ;;  %v4151_v38 = vadd.f32 1.0, %v4874_v63  ;;  %4388 = vst [vmem:[%s8533_s30 + $0x210] sm:$0xff] (%p5010_p4), %v4387_v49  ;;  %4390 = vst [vmem:[%s8533_s30 + $0x218] sm:$0xff] (%p5010_p4), %v4389_v52  ;;  %v4417_v20 = vld [vmem:[%s8372_s17 + $0x188] sm:$0xff] (%p5010_p4)  ;;  %v4419_v9 = vld [vmem:[%s8372_s17 + $0x190] sm:$0xff] (%p5010_p4) }
 0x580   : > { %4561 = vst [vmem:[%s8372_s17 + $0x1c0] sm:$0xff] %v4876_v2  ;;  %4392 = vst [vmem:[%s8533_s30 + $0x240] sm:$0xff] (%p5010_p4), %v4391_v28  ;;  %v4421_v61 = vld [vmem:[%s8372_s17 + $0x198] sm:$0xff] (%p5010_p4)  ;;  %v4423_v19 = vld [vmem:[%s8372_s17 + $0x1a0] sm:$0xff] (%p5010_p4) }
 0x581   : > { %v4878_v13 = vpop.eup %4877  ;;  %4889 = vrcp.f32 %v4151_v38  ;;  %4394 = vst [vmem:[%s8533_s30 + $0x248] sm:$0xff] (%p5010_p4), %v4393_v39  ;;  %4396 = vst [vmem:[%s8533_s30 + $0x250] sm:$0xff] (%p5010_p4), %v4395_v54  ;;  %v4425_v3 = vld [vmem:[%s8372_s17 + $0x1a8] sm:$0xff] (%p5010_p4) }
 0x582   : > { %4562 = vst.msk [vmem:[%s8372_s17 + $0x1c8] sm:$0xff] %vm4217_vm0, %v4878_v13  ;;  %4398 = vst [vmem:[%s8533_s30 + $0x258] sm:$0xff] (%p5010_p4), %v4397_v56 }
 0x583   : > { %4400 = vst [vmem:[%s8533_s30 + $0x280] sm:$0xff] (%p5010_p4), %v4399_v23  ;;  %4402 = vst [vmem:[%s8533_s30 + $0x288] sm:$0xff] (%p5010_p4), %v4401_v11  ;;  %v4427_v63 = vld [vmem:[%s8372_s17 + $0x1b0] sm:$0xff] (%p5010_p4) }
 0x584   : > { %v4880_v8 = vpop.eup %4879  ;;  %4404 = vst [vmem:[%s8533_s30 + $0x290] sm:$0xff] (%p5010_p4), %v4403_v57  ;;  %4406 = vst [vmem:[%s8533_s30 + $0x298] sm:$0xff] (%p5010_p4), %v4405_v60 }
 0x585   : > { %4563 = vst [vmem:[%s8372_s17 + $0x1d0] sm:$0xff] %v4880_v8  ;;  %4408 = vst [vmem:[%s8533_s30 + $0x2c0] sm:$0xff] (%p5010_p4), %v4407_v58  ;;  %v4429_v2 = vld [vmem:[%s8372_s17 + $0x1b8] sm:$0xff] (%p5010_p4) }
 0x586   : > { %v4882_v14 = vpop.eup %4881  ;;  %4410 = vst [vmem:[%s8533_s30 + $0x2c8] sm:$0xff] (%p5010_p4), %v4409_v43  ;;  %4412 = vst [vmem:[%s8533_s30 + $0x2d0] sm:$0xff] (%p5010_p4), %v4411_v26 }
 0x587   : > { %4564 = vst.msk [vmem:[%s8372_s17 + $0x1d8] sm:$0xff] %vm4217_vm0, %v4882_v14  ;;  %4414 = vst [vmem:[%s8533_s30 + $0x2d8] sm:$0xff] (%p5010_p4), %v4413_v4  ;;  %v4431_v38 = vld [vmem:[%s8372_s17 + $0x1c0] sm:$0xff] (%p5010_p4) }
 0x588   : > { %4416 = vst [vmem:[%s8533_s30 + $0x300] sm:$0xff] (%p5010_p4), %v4415_v37  ;;  %4418 = vst [vmem:[%s8533_s30 + $0x308] sm:$0xff] (%p5010_p4), %v4417_v20 }
 0x589   : > { %v4884_v27 = vpop.eup %4883  ;;  %4420 = vst [vmem:[%s8533_s30 + $0x310] sm:$0xff] (%p5010_p4), %v4419_v9  ;;  %4422 = vst [vmem:[%s8533_s30 + $0x318] sm:$0xff] (%p5010_p4), %v4421_v61  ;;  %v4433_v13 = vld [vmem:[%s8372_s17 + $0x1c8] sm:$0xff] (%p5010_p4) }
 0x58a   : > { %v4886_v47 = vpop.eup %4885  ;;  %4565 = vst [vmem:[%s8372_s17 + $0x1e0] sm:$0xff] %v4884_v27  ;;  %4424 = vst [vmem:[%s8533_s30 + $0x340] sm:$0xff] (%p5010_p4), %v4423_v19 }
 0x58b   : > { %4566 = vst.msk [vmem:[%s8372_s17 + $0x1e8] sm:$0xff] %vm4217_vm0, %v4886_v47  ;;  %4302 = sbr.rel (!%p5010_p4) target bundleno = 1432 (0x598), region = 68  ;;  %4426 = vst [vmem:[%s8533_s30 + $0x348] sm:$0xff] (%p5010_p4), %v4425_v3 }
 0x58c   : > { %v4888_v59 = vpop.eup %4887  ;;  %4428 = vst [vmem:[%s8533_s30 + $0x350] sm:$0xff] (%p5010_p4), %v4427_v63  ;;  %4430 = vst [vmem:[%s8533_s30 + $0x358] sm:$0xff] (%p5010_p4), %v4429_v2  ;;  %v4435_v8 = vld [vmem:[%s8372_s17 + $0x1d0] sm:$0xff] (%p5010_p4) }
 0x58d   : > { %4567 = vst [vmem:[%s8372_s17 + $0x1f0] sm:$0xff] %v4888_v59  ;;  %4432 = vst [vmem:[%s8533_s30 + $0x380] sm:$0xff] (%p5010_p4), %v4431_v38 }
 0x58e   : > { %v4890_v55 = vpop.eup %4889  ;;  %v4437_v14 = vld [vmem:[%s8372_s17 + $0x1d8] sm:$0xff] (%p5010_p4)  ;;  %4434 = vst [vmem:[%s8533_s30 + $0x388] sm:$0xff] (%p5010_p4), %v4433_v13  ;;  %4436 = vst [vmem:[%s8533_s30 + $0x390] sm:$0xff] (%p5010_p4), %v4435_v8 }
 0x58f   : > { %4568 = vst.msk [vmem:[%s8372_s17 + $0x1f8] sm:$0xff] %vm4217_vm0, %v4890_v55  ;;  %4438 = vst [vmem:[%s8533_s30 + $0x398] sm:$0xff] (%p5010_p4), %v4437_v14 }
 0x591   : > { %v4439_v27 = vld [vmem:[%s8372_s17 + $0x1e0] sm:$0xff] }
 0x592   : > { %v4441_v47 = vld [vmem:[%s8372_s17 + $0x1e8] sm:$0xff]  ;;  %4440 = vst [vmem:[%s8533_s30 + $0x3c0] sm:$0xff] %v4439_v27 }
 0x593   : > { %4442 = vst [vmem:[%s8533_s30 + $0x3c8] sm:$0xff] %v4441_v47 }
 0x594   : > { %v4443_v59 = vld [vmem:[%s8372_s17 + $0x1f0] sm:$0xff] }
 0x595   : > { %4444 = vst [vmem:[%s8533_s30 + $0x3d0] sm:$0xff] %v4443_v59 }
 0x596   : > { %v4445_v55 = vld [vmem:[%s8372_s17 + $0x1f8] sm:$0xff] }
 0x597   : > { %4446 = vst [vmem:[%s8533_s30 + $0x3d8] sm:$0xff] %v4445_v55 }
 0x598 PF: > { %p18_p8 = scmp.ge.s32.totalorder %s5000_s21, 4   ;;  %s8684_s17 = smov %s4918_s18 }
 0x599   : > { %s8685_s18 = smov %s5008_s24  ;;  %s8686_s19 = smov %s5000_s21 }
 0x59a   :  { %20 = sbr.rel (!%p18_p8) target bundleno = 2 (0x2), region = 132 }

</bundles_post_ra>
